<compile_context>
chip_gen: v7x
topology: tpu7x:2x2x1
jax: 0.10.0
libtpu: 0.0.40
codegen_flags: <defaults>
</compile_context>

<pallas_src>
import functools

import jax
import jax.numpy as jnp
from jax.experimental import pallas as pl
from jax.experimental.pallas import tpu as pltpu


# ----------------------------------------------------------------------------
# Pallas kernels
# ----------------------------------------------------------------------------
def _mm_bias_relu_kernel(p_ref, w_ref, b_ref, o_ref):
    """(bf16 patches @ bf16 weights) -> f32 accum, + bias, ReLU, cast on store."""
    acc = jnp.dot(p_ref[...], w_ref[...], preferred_element_type=jnp.float32)
    o_ref[...] = jnp.maximum(acc + b_ref[...], 0.0).astype(o_ref.dtype)


def _tap_conv_kernel(x_ref, w_ref, b_ref, o_ref, *, ntaps, minor, out_rows):
    """All taps of a (ntaps, 1) conv along the leading spatial axis, in one shot.

    x_ref : (1, rows_pad, C) bf16 -- whole padded, spatially-flattened image,
            resident in VMEM for every tap.
    w_ref : (ntaps, C, OC) bf16   -- all tap weights resident.
    Tap t's receptive window is the contiguous, sublane-aligned row slice
    starting at t*minor (minor is a multiple of 8).  Accumulate in an f32
    value; single bias+ReLU+store at the end (bf16 out).
    """
    oc = o_ref.shape[-1]
    acc = jnp.zeros((out_rows, oc), jnp.float32)
    for t in range(ntaps):                      # static unroll: back-to-back MXU pushes
        xt = x_ref[0, pl.ds(t * minor, out_rows), :]      # (out_rows, C) bf16
        acc = acc + jnp.dot(xt, w_ref[t], preferred_element_type=jnp.float32)
    o_ref[0] = jnp.maximum(acc + b_ref[...], 0.0).astype(o_ref.dtype)


def _pool_rows_kernel(x_ref, o_ref, *, oh):
    """H-direction of the 3x3/stride-2 max pool.

    x_ref : (1, H, OW, C) -- already column-maxed (W direction done outside).
    For output row i, take the 3 contiguous input rows 2i..2i+2 and max them.
    Whole image per grid step -> no tiny tiles, input read from HBM once.
    """
    for i in range(oh):
        v = x_ref[0, pl.ds(2 * i, 3)]           # (3, OW, C) contiguous rows
        o_ref[0, i] = jnp.max(v, axis=0)


# ----------------------------------------------------------------------------
# Small helpers (glue, plain JAX data movement)
# ----------------------------------------------------------------------------
def _round_up(x, m):
    return (x + m - 1) // m * m


def _pick_tiling(m, cap=512):
    """Pick the M tile first (cap by default, raiseable to 1024-2048 on v6e for
    big batches), then pad M up to a multiple of it.  Prefer >=4 grid steps
    (2 per v7x TensorCore) as long as that keeps the tile >= 256 rows."""
    m128 = _round_up(m, 128)
    if m128 <= cap:
        return m128, m128                       # single full-size step
    tm = cap
    while tm > 256 and pl.cdiv(m128, tm) < 4:
        tm //= 2
    return _round_up(m, tm), tm


def _im2col(x, kh, kw, stride, ph, pw):
    """x: (N, H, W, C) bf16 -> patches (N*OH*OW, kh*kw*C), plus OH, OW."""
    n, h, w, c = x.shape
    xp = jnp.pad(x, ((0, 0), (ph, ph), (pw, pw), (0, 0)))
    oh = (h + 2 * ph - kh) // stride + 1
    ow = (w + 2 * pw - kw) // stride + 1
    cols = []
    for di in range(kh):
        for dj in range(kw):
            cols.append(xp[:, di:di + stride * (oh - 1) + 1:stride,
                              dj:dj + stride * (ow - 1) + 1:stride, :])
    patches = jnp.concatenate(cols, axis=-1)          # (N, OH, OW, kh*kw*C)
    return patches.reshape(n * oh * ow, kh * kw * c), oh, ow


# ----------------------------------------------------------------------------
# Pallas-backed ops
# ----------------------------------------------------------------------------
def matmul_bias_relu(patches_bf16, w_bf16, bias_f32, out_dtype=jnp.float32):
    """(M, K) bf16 @ (K, OC) bf16 -> +bias, ReLU.  Tiled over M only."""
    m, k = patches_bf16.shape
    oc = w_bf16.shape[1]
    m_pad, tm = _pick_tiling(m)
    if m_pad != m:
        patches_bf16 = jnp.pad(patches_bf16, ((0, m_pad - m), (0, 0)))

    out = pl.pallas_call(
        _mm_bias_relu_kernel,
        out_shape=jax.ShapeDtypeStruct((m_pad, oc), out_dtype),
        grid=(m_pad // tm,),
        in_specs=[
            pl.BlockSpec((tm, k), lambda i: (i, 0)),
            pl.BlockSpec((k, oc), lambda i: (0, 0)),
            pl.BlockSpec((1, oc), lambda i: (0, 0)),
        ],
        out_specs=pl.BlockSpec((tm, oc), lambda i: (i, 0)),
        compiler_params=pltpu.CompilerParams(
            dimension_semantics=("parallel",),
            vmem_limit_bytes=64 * 1024 * 1024),
    )(patches_bf16, w_bf16, bias_f32[None, :])
    return out[:m]                                    # padded rows dropped


def conv_bn_relu_im2col(x, params, ksize, stride, padding, out_dtype=jnp.float32):
    """Conv via im2col (bf16 patches) + fused matmul (3x3/stride-2 convs)."""
    kh, kw = ksize
    ph, pw = padding
    patches, oh, ow = _im2col(x.astype(jnp.bfloat16), kh, kw, stride, ph, pw)
    oc = params["w_mat"].shape[1]
    out = matmul_bias_relu(patches, params["w_mat"], params["bias"],
                           out_dtype=out_dtype)
    return out.reshape(x.shape[0], oh, ow, oc)


def conv1x1_merged(x, p_cat, oc_a):
    """The two 1x1 convs read identical data: one matmul with their output
    channels concatenated (weights pre-concatenated at build time), then split."""
    n, h, w, c = x.shape
    flat = x.reshape(n * h * w, c).astype(jnp.bfloat16)
    out = matmul_bias_relu(flat, p_cat["w_mat"], p_cat["bias"],
                           out_dtype=jnp.bfloat16)
    out_a = out[:, :oc_a].reshape(n, h, w, oc_a)
    out_b = out[:, oc_a:].reshape(n, h, w, out.shape[1] - oc_a)
    return out_a, out_b


def conv_1d_taps(x, params, ntaps, pad):
    """Conv with kernel (ntaps, 1), stride 1, zero padding `pad` on the leading
    spatial axis of x = (N, S_major, S_minor, C).  Taps are reduced inside the
    kernel (grid = batch only).  The minor dim is padded to a multiple of 8 so
    every tap window start is sublane-aligned.  Emits bf16."""
    n, smaj, smin, c = x.shape
    oc = params["w_mat"].shape[1]
    w = params["w_mat"].reshape(ntaps, c, oc)                 # bf16, tap-major
    smin_pad = _round_up(smin, 8)
    xp = jnp.pad(x.astype(jnp.bfloat16),
                 ((0, 0), (pad, pad), (0, smin_pad - smin), (0, 0)))
    rows_pad = (smaj + 2 * pad) * smin_pad
    out_rows = smaj * smin_pad
    x_flat = xp.reshape(n, rows_pad, c)
    bias = params["bias"][None, :]                            # (1, OC) f32

    kernel = functools.partial(_tap_conv_kernel, ntaps=ntaps,
                               minor=smin_pad, out_rows=out_rows)
    out = pl.pallas_call(
        kernel,
        out_shape=jax.ShapeDtypeStruct((n, out_rows, oc), jnp.bfloat16),
        grid=(n,),
        in_specs=[
            pl.BlockSpec((1, rows_pad, c), lambda b: (b, 0, 0)),   # whole image
            pl.BlockSpec((ntaps, c, oc), lambda b: (0, 0, 0)),     # all taps resident
            pl.BlockSpec((1, oc), lambda b: (0, 0)),
        ],
        out_specs=pl.BlockSpec((1, out_rows, oc), lambda b: (b, 0, 0)),
        compiler_params=pltpu.CompilerParams(
            dimension_semantics=("parallel",),
            vmem_limit_bytes=64 * 1024 * 1024),
    )(x_flat, w, bias)
    # Drop the minor-dim padding columns.
    return out.reshape(n, smaj, smin_pad, oc)[:, :, :smin, :]


def max_pool_3x3_s2(x):
    """F.max_pool2d(kernel_size=3, stride=2), NHWC, no padding.

    W-direction 3-tap max is a fused XLA maximum tree over stride-2 views
    (single pass over x, no (9, L) stack in HBM).  H-direction runs in a
    Pallas kernel with one whole image per grid step."""
    n, h, w, c = x.shape
    oh = (h - 3) // 2 + 1
    ow = (w - 3) // 2 + 1
    cols = [x[:, :, dj:dj + 2 * (ow - 1) + 1:2, :] for dj in range(3)]
    xw = jnp.maximum(jnp.maximum(cols[0], cols[1]), cols[2])   # (N, H, OW, C)

    out = pl.pallas_call(
        functools.partial(_pool_rows_kernel, oh=oh),
        out_shape=jax.ShapeDtypeStruct((n, oh, ow, c), x.dtype),
        grid=(n,),
        in_specs=[pl.BlockSpec((1, h, ow, c), lambda b: (b, 0, 0, 0))],
        out_specs=pl.BlockSpec((1, oh, ow, c), lambda b: (b, 0, 0, 0)),
        compiler_params=pltpu.CompilerParams(
            dimension_semantics=("parallel",)),
    )(xw)
    return out


# ----------------------------------------------------------------------------
# Parameters (deterministic, synthetic; shapes match the PyTorch module)
# ----------------------------------------------------------------------------
def make_basic_conv2d_params(key, in_c, out_c, kh, kw):
    k1, k2, k3, k4, k5 = jax.random.split(key, 5)
    w = jax.random.normal(k1, (out_c, in_c, kh, kw), jnp.float32) * 0.05
    gamma = 1.0 + 0.1 * jax.random.normal(k2, (out_c,), jnp.float32)
    beta = 0.1 * jax.random.normal(k3, (out_c,), jnp.float32)
    mean = 0.1 * jax.random.normal(k4, (out_c,), jnp.float32)
    var = 0.5 + 0.5 * jnp.abs(jax.random.normal(k5, (out_c,), jnp.float32))
    eps = 1e-3
    scale = gamma / jnp.sqrt(var + eps)
    bias = beta - mean * scale
    # (OC, IC, KH, KW) -> (KH*KW*IC, OC) matching the (kh, kw, c) tap order.
    w_mat = jnp.transpose(w, (2, 3, 1, 0)).reshape(kh * kw * in_c, out_c)
    # Fold BN scale into the weights; store bf16 for the MXU.
    w_mat = (w_mat * scale[None, :]).astype(jnp.bfloat16)
    return {"w_mat": w_mat, "bias": bias}


def make_inception_d_params(key, in_channels):
    keys = jax.random.split(key, 6)
    p = {
        "branch3x3_1":   make_basic_conv2d_params(keys[0], in_channels, 192, 1, 1),
        "branch3x3_2":   make_basic_conv2d_params(keys[1], 192, 320, 3, 3),
        "branch7x7x3_1": make_basic_conv2d_params(keys[2], in_channels, 192, 1, 1),
        "branch7x7x3_2": make_basic_conv2d_params(keys[3], 192, 192, 1, 7),
        "branch7x7x3_3": make_basic_conv2d_params(keys[4], 192, 192, 7, 1),
        "branch7x7x3_4": make_basic_conv2d_params(keys[5], 192, 192, 3, 3),
    }
    # Pre-concatenate the two 1x1 convs' weights/bias (they share the same
    # input) so the merged matmul needs no per-forward jnp.concatenate.
    p["branch1x1_cat"] = {
        "w_mat": jnp.concatenate([p["branch3x3_1"]["w_mat"],
                                  p["branch7x7x3_1"]["w_mat"]], axis=1),
        "bias": jnp.concatenate([p["branch3x3_1"]["bias"],
                                 p["branch7x7x3_1"]["bias"]], axis=0),
    }
    return p


# ----------------------------------------------------------------------------
# InceptionD forward
# ----------------------------------------------------------------------------
@jax.jit
def inception_d(x_nchw, params):
    x = jnp.transpose(x_nchw, (0, 2, 3, 1))                 # NCHW -> NHWC

    # Merged 1x1 convs (both branches read the same input); bf16 outputs.
    oc_a = params["branch3x3_1"]["w_mat"].shape[1]
    b3, b7 = conv1x1_merged(x, params["branch1x1_cat"], oc_a)

    # branch3x3: 3x3 stride-2 (final conv of the branch -> f32).
    b3 = conv_bn_relu_im2col(b3, params["branch3x3_2"], (3, 3), 2, (0, 0),
                             out_dtype=jnp.float32)

    # branch7x7x3: 1x7 -> 7x1 -> 3x3 stride-2.
    # 1x7: run in W-major layout so the 7 taps are contiguous row shifts.
    b7 = jnp.transpose(b7, (0, 2, 1, 3))                    # (N, W, H, 192) bf16
    b7 = conv_1d_taps(b7, params["branch7x7x3_2"], 7, 3)
    b7 = jnp.transpose(b7, (0, 2, 1, 3))                    # (N, H, W, 192) bf16
    # 7x1: native H-major layout.
    b7 = conv_1d_taps(b7, params["branch7x7x3_3"], 7, 3)
    b7 = conv_bn_relu_im2col(b7, params["branch7x7x3_4"], (3, 3), 2, (0, 0),
                             out_dtype=jnp.float32)

    # Pool branch (f32, matches input dtype).
    bp = max_pool_3x3_s2(x)

    # TODO(synk): if the downstream consumer accepts NHWC, the concat+transpose
    #             tail (two extra HBM passes) could be dropped.
    out = jnp.concatenate([b3, b7, bp], axis=-1)            # 320, 192, C_in
    return jnp.transpose(out, (0, 3, 1, 2))                 # NHWC -> NCHW


if __name__ == "__main__":
    key = jax.random.PRNGKey(0)
    k_in, k_par = jax.random.split(key)

    N, C_IN, H, W = 2, 8, 16, 16
    x = jax.random.normal(k_in, (N, C_IN, H, W), jnp.float32)
    params = make_inception_d_params(k_par, C_IN)

    out = inception_d(x, params)
    out = jax.block_until_ready(out)

    # Output spatial: (16-3)//2+1 = 7; channels: 320 + 192 + C_IN
    expected = (N, 320 + 192 + C_IN, 7, 7)
    assert out.shape == expected, (out.shape, expected)
    print("KERNEL_OK")
</pallas_src>

<mosaic_0001>
module attributes {stable_mosaic.version = 11 : i64} {
  func.func @_pool_rows_kernel(%arg0: i32, %arg1: memref<1x16x7x8xf32, #tpu.memory_space<vmem>>, %arg2: memref<1x7x7x8xf32, #tpu.memory_space<vmem>>) attributes {dimension_semantics = [#tpu.dimension_semantics<parallel>], iteration_bounds = array<i64: 2>, scalar_prefetch = 0 : i64, scratch_operands = 0 : i64, tpu.core_type = #tpu.core_type<tc>, window_params = [{transform_indices = @transform_0, window_bounds = array<i64: 1, 16, 7, 8>}, {transform_indices = @transform_1, window_bounds = array<i64: 1, 7, 7, 8>}]} {
    %c0 = arith.constant 0 : index
    %c0_0 = arith.constant 0 : index
    %c0_1 = arith.constant 0 : index
    %c0_2 = arith.constant 0 : index
    %0 = vector.load %arg1[%c0, %c0_0, %c0_1, %c0_2] : memref<1x16x7x8xf32, #tpu.memory_space<vmem>>, vector<1x3x7x8xf32>
    %1 = vector.shape_cast %0 : vector<1x3x7x8xf32> to vector<3x7x8xf32>
    %cst = arith.constant dense<0xFF800000> : vector<7x8xf32>
    %2 = vector.multi_reduction <maximumf>, %1, %cst [0] : vector<3x7x8xf32> to vector<7x8xf32>
    %c0_3 = arith.constant 0 : index
    %c0_4 = arith.constant 0 : index
    %c0_5 = arith.constant 0 : index
    %c0_6 = arith.constant 0 : index
    %3 = vector.load %arg2[%c0_3, %c0_4, %c0_5, %c0_6] : memref<1x7x7x8xf32, #tpu.memory_space<vmem>>, vector<1x1x7x8xf32>
    %4 = vector.shape_cast %3 : vector<1x1x7x8xf32> to vector<7x8xf32>
    %5 = vector.shape_cast %2 : vector<7x8xf32> to vector<1x1x7x8xf32>
    tpu.vector_store %arg2[%c0_3, %c0_4, %c0_5, %c0_6], %5 {strides = array<i32>} : memref<1x7x7x8xf32, #tpu.memory_space<vmem>>, vector<1x1x7x8xf32>,
    %c0_7 = arith.constant 0 : index
    %c2 = arith.constant 2 : index
    %c0_8 = arith.constant 0 : index
    %c0_9 = arith.constant 0 : index
    %6 = vector.load %arg1[%c0_7, %c2, %c0_8, %c0_9] : memref<1x16x7x8xf32, #tpu.memory_space<vmem>>, vector<1x3x7x8xf32>
    %7 = vector.shape_cast %6 : vector<1x3x7x8xf32> to vector<3x7x8xf32>
    %cst_10 = arith.constant dense<0xFF800000> : vector<7x8xf32>
    %8 = vector.multi_reduction <maximumf>, %7, %cst_10 [0] : vector<3x7x8xf32> to vector<7x8xf32>
    %c0_11 = arith.constant 0 : index
    %c1 = arith.constant 1 : index
    %c0_12 = arith.constant 0 : index
    %c0_13 = arith.constant 0 : index
    %9 = vector.load %arg2[%c0_11, %c1, %c0_12, %c0_13] : memref<1x7x7x8xf32, #tpu.memory_space<vmem>>, vector<1x1x7x8xf32>
    %10 = vector.shape_cast %9 : vector<1x1x7x8xf32> to vector<7x8xf32>
    %11 = vector.shape_cast %8 : vector<7x8xf32> to vector<1x1x7x8xf32>
    tpu.vector_store %arg2[%c0_11, %c1, %c0_12, %c0_13], %11 {strides = array<i32>} : memref<1x7x7x8xf32, #tpu.memory_space<vmem>>, vector<1x1x7x8xf32>,
    %c0_14 = arith.constant 0 : index
    %c4 = arith.constant 4 : index
    %c0_15 = arith.constant 0 : index
    %c0_16 = arith.constant 0 : index
    %12 = vector.load %arg1[%c0_14, %c4, %c0_15, %c0_16] : memref<1x16x7x8xf32, #tpu.memory_space<vmem>>, vector<1x3x7x8xf32>
    %13 = vector.shape_cast %12 : vector<1x3x7x8xf32> to vector<3x7x8xf32>
    %cst_17 = arith.constant dense<0xFF800000> : vector<7x8xf32>
    %14 = vector.multi_reduction <maximumf>, %13, %cst_17 [0] : vector<3x7x8xf32> to vector<7x8xf32>
    %c0_18 = arith.constant 0 : index
    %c2_19 = arith.constant 2 : index
    %c0_20 = arith.constant 0 : index
    %c0_21 = arith.constant 0 : index
    %15 = vector.load %arg2[%c0_18, %c2_19, %c0_20, %c0_21] : memref<1x7x7x8xf32, #tpu.memory_space<vmem>>, vector<1x1x7x8xf32>
    %16 = vector.shape_cast %15 : vector<1x1x7x8xf32> to vector<7x8xf32>
    %17 = vector.shape_cast %14 : vector<7x8xf32> to vector<1x1x7x8xf32>
    tpu.vector_store %arg2[%c0_18, %c2_19, %c0_20, %c0_21], %17 {strides = array<i32>} : memref<1x7x7x8xf32, #tpu.memory_space<vmem>>, vector<1x1x7x8xf32>,
    %c0_22 = arith.constant 0 : index
    %c6 = arith.constant 6 : index
    %c0_23 = arith.constant 0 : index
    %c0_24 = arith.constant 0 : index
    %18 = vector.load %arg1[%c0_22, %c6, %c0_23, %c0_24] : memref<1x16x7x8xf32, #tpu.memory_space<vmem>>, vector<1x3x7x8xf32>
    %19 = vector.shape_cast %18 : vector<1x3x7x8xf32> to vector<3x7x8xf32>
    %cst_25 = arith.constant dense<0xFF800000> : vector<7x8xf32>
    %20 = vector.multi_reduction <maximumf>, %19, %cst_25 [0] : vector<3x7x8xf32> to vector<7x8xf32>
    %c0_26 = arith.constant 0 : index
    %c3 = arith.constant 3 : index
    %c0_27 = arith.constant 0 : index
    %c0_28 = arith.constant 0 : index
    %21 = vector.load %arg2[%c0_26, %c3, %c0_27, %c0_28] : memref<1x7x7x8xf32, #tpu.memory_space<vmem>>, vector<1x1x7x8xf32>
    %22 = vector.shape_cast %21 : vector<1x1x7x8xf32> to vector<7x8xf32>
    %23 = vector.shape_cast %20 : vector<7x8xf32> to vector<1x1x7x8xf32>
    tpu.vector_store %arg2[%c0_26, %c3, %c0_27, %c0_28], %23 {strides = array<i32>} : memref<1x7x7x8xf32, #tpu.memory_space<vmem>>, vector<1x1x7x8xf32>,
    %c0_29 = arith.constant 0 : index
    %c8 = arith.constant 8 : index
    %c0_30 = arith.constant 0 : index
    %c0_31 = arith.constant 0 : index
    %24 = vector.load %arg1[%c0_29, %c8, %c0_30, %c0_31] : memref<1x16x7x8xf32, #tpu.memory_space<vmem>>, vector<1x3x7x8xf32>
    %25 = vector.shape_cast %24 : vector<1x3x7x8xf32> to vector<3x7x8xf32>
    %cst_32 = arith.constant dense<0xFF800000> : vector<7x8xf32>
    %26 = vector.multi_reduction <maximumf>, %25, %cst_32 [0] : vector<3x7x8xf32> to vector<7x8xf32>
    %c0_33 = arith.constant 0 : index
    %c4_34 = arith.constant 4 : index
    %c0_35 = arith.constant 0 : index
    %c0_36 = arith.constant 0 : index
    %27 = vector.load %arg2[%c0_33, %c4_34, %c0_35, %c0_36] : memref<1x7x7x8xf32, #tpu.memory_space<vmem>>, vector<1x1x7x8xf32>
    %28 = vector.shape_cast %27 : vector<1x1x7x8xf32> to vector<7x8xf32>
    %29 = vector.shape_cast %26 : vector<7x8xf32> to vector<1x1x7x8xf32>
    tpu.vector_store %arg2[%c0_33, %c4_34, %c0_35, %c0_36], %29 {strides = array<i32>} : memref<1x7x7x8xf32, #tpu.memory_space<vmem>>, vector<1x1x7x8xf32>,
    %c0_37 = arith.constant 0 : index
    %c10 = arith.constant 10 : index
    %c0_38 = arith.constant 0 : index
    %c0_39 = arith.constant 0 : index
    %30 = vector.load %arg1[%c0_37, %c10, %c0_38, %c0_39] : memref<1x16x7x8xf32, #tpu.memory_space<vmem>>, vector<1x3x7x8xf32>
    %31 = vector.shape_cast %30 : vector<1x3x7x8xf32> to vector<3x7x8xf32>
    %cst_40 = arith.constant dense<0xFF800000> : vector<7x8xf32>
    %32 = vector.multi_reduction <maximumf>, %31, %cst_40 [0] : vector<3x7x8xf32> to vector<7x8xf32>
    %c0_41 = arith.constant 0 : index
    %c5 = arith.constant 5 : index
    %c0_42 = arith.constant 0 : index
    %c0_43 = arith.constant 0 : index
    %33 = vector.load %arg2[%c0_41, %c5, %c0_42, %c0_43] : memref<1x7x7x8xf32, #tpu.memory_space<vmem>>, vector<1x1x7x8xf32>
    %34 = vector.shape_cast %33 : vector<1x1x7x8xf32> to vector<7x8xf32>
    %35 = vector.shape_cast %32 : vector<7x8xf32> to vector<1x1x7x8xf32>
    tpu.vector_store %arg2[%c0_41, %c5, %c0_42, %c0_43], %35 {strides = array<i32>} : memref<1x7x7x8xf32, #tpu.memory_space<vmem>>, vector<1x1x7x8xf32>,
    %c0_44 = arith.constant 0 : index
    %c12 = arith.constant 12 : index
    %c0_45 = arith.constant 0 : index
    %c0_46 = arith.constant 0 : index
    %36 = vector.load %arg1[%c0_44, %c12, %c0_45, %c0_46] : memref<1x16x7x8xf32, #tpu.memory_space<vmem>>, vector<1x3x7x8xf32>
    %37 = vector.shape_cast %36 : vector<1x3x7x8xf32> to vector<3x7x8xf32>
    %cst_47 = arith.constant dense<0xFF800000> : vector<7x8xf32>
    %38 = vector.multi_reduction <maximumf>, %37, %cst_47 [0] : vector<3x7x8xf32> to vector<7x8xf32>
    %c0_48 = arith.constant 0 : index
    %c6_49 = arith.constant 6 : index
    %c0_50 = arith.constant 0 : index
    %c0_51 = arith.constant 0 : index
    %39 = vector.load %arg2[%c0_48, %c6_49, %c0_50, %c0_51] : memref<1x7x7x8xf32, #tpu.memory_space<vmem>>, vector<1x1x7x8xf32>
    %40 = vector.shape_cast %39 : vector<1x1x7x8xf32> to vector<7x8xf32>
    %41 = vector.shape_cast %38 : vector<7x8xf32> to vector<1x1x7x8xf32>
    tpu.vector_store %arg2[%c0_48, %c6_49, %c0_50, %c0_51], %41 {strides = array<i32>} : memref<1x7x7x8xf32, #tpu.memory_space<vmem>>, vector<1x1x7x8xf32>,
    return
  }
  func.func @transform_0(%arg0: i32) -> (i32, i32, i32, i32) {
    %c0_i32 = arith.constant 0 : i32
    %c0_i32_0 = arith.constant 0 : i32
    %c0_i32_1 = arith.constant 0 : i32
    %c0_i32_2 = arith.constant 0 : i32
    return %arg0, %c0_i32, %c0_i32_0, %c0_i32_1 : i32, i32, i32, i32
  }
  func.func @transform_1(%arg0: i32) -> (i32, i32, i32, i32) {
    %c0_i32 = arith.constant 0 : i32
    %c0_i32_0 = arith.constant 0 : i32
    %c0_i32_1 = arith.constant 0 : i32
    %c0_i32_2 = arith.constant 0 : i32
    return %arg0, %c0_i32, %c0_i32_0, %c0_i32_1 : i32, i32, i32, i32
  }
}

module attributes {stable_mosaic.version = 11 : i64} {
  func.func @_mm_bias_relu_kernel(%arg0: i32, %arg1: memref<512x8xbf16, #tpu.memory_space<vmem>>, %arg2: memref<8x384xbf16, #tpu.memory_space<vmem>>, %arg3: memref<1x384xf32, #tpu.memory_space<vmem>>, %arg4: memref<512x384xbf16, #tpu.memory_space<vmem>>) attributes {dimension_semantics = [#tpu.dimension_semantics<parallel>], iteration_bounds = array<i64: 1>, scalar_prefetch = 0 : i64, scratch_operands = 0 : i64, tpu.core_type = #tpu.core_type<tc>, window_params = [{transform_indices = @transform_0, window_bounds = array<i64: 512, 8>}, {pipeline_mode = #tpu.pipeline_mode<synchronous>, transform_indices = @transform_1, window_bounds = array<i64: 8, 384>}, {pipeline_mode = #tpu.pipeline_mode<synchronous>, transform_indices = @transform_2, window_bounds = array<i64: 1, 384>}, {transform_indices = @transform_3, window_bounds = array<i64: 512, 384>}]} {
    %c0 = arith.constant 0 : index
    %c0_0 = arith.constant 0 : index
    %0 = vector.load %arg1[%c0, %c0_0] : memref<512x8xbf16, #tpu.memory_space<vmem>>, vector<512x8xbf16>
    %c0_1 = arith.constant 0 : index
    %c0_2 = arith.constant 0 : index
    %1 = vector.load %arg2[%c0_1, %c0_2] : memref<8x384xbf16, #tpu.memory_space<vmem>>, vector<8x384xbf16>
    %cst = arith.constant dense<0.000000e+00> : vector<512x384xf32>
    %2 = tpu.matmul %0, %1, %cst {dimension_numbers = #tpu.dot_dimension_numbers<[1], [0], [0], [1], [0, 0, 1, 1], [], []>} : vector<512x8xbf16>, vector<8x384xbf16>, vector<512x384xf32> -> vector<512x384xf32>
    %c0_3 = arith.constant 0 : index
    %c0_4 = arith.constant 0 : index
    %3 = vector.load %arg3[%c0_3, %c0_4] : memref<1x384xf32, #tpu.memory_space<vmem>>, vector<1x384xf32>
    %4 = vector.broadcast %3 : vector<1x384xf32> to vector<512x384xf32>
    %5 = arith.addf %2, %4 : vector<512x384xf32>
    %cst_5 = arith.constant 0.000000e+00 : f32
    %6 = vector.broadcast %cst_5 : f32 to vector<512x384xf32>
    %7 = arith.maximumf %5, %6 : vector<512x384xf32>
    %8 = arith.truncf %7 : vector<512x384xf32> to vector<512x384xbf16>
    %c0_6 = arith.constant 0 : index
    %c0_7 = arith.constant 0 : index
    %9 = vector.load %arg4[%c0_6, %c0_7] : memref<512x384xbf16, #tpu.memory_space<vmem>>, vector<512x384xbf16>
    tpu.vector_store %arg4[%c0_6, %c0_7], %8 {strides = array<i32>} : memref<512x384xbf16, #tpu.memory_space<vmem>>, vector<512x384xbf16>,
    return
  }
  func.func @transform_0(%arg0: i32) -> (i32, i32) {
    %c0_i32 = arith.constant 0 : i32
    %c0_i32_0 = arith.constant 0 : i32
    return %arg0, %c0_i32 : i32, i32
  }
  func.func @transform_1(%arg0: i32) -> (i32, i32) {
    %c0_i32 = arith.constant 0 : i32
    %c0_i32_0 = arith.constant 0 : i32
    %c0_i32_1 = arith.constant 0 : i32
    return %c0_i32, %c0_i32_0 : i32, i32
  }
  func.func @transform_2(%arg0: i32) -> (i32, i32) {
    %c0_i32 = arith.constant 0 : i32
    %c0_i32_0 = arith.constant 0 : i32
    %c0_i32_1 = arith.constant 0 : i32
    return %c0_i32, %c0_i32_0 : i32, i32
  }
  func.func @transform_3(%arg0: i32) -> (i32, i32) {
    %c0_i32 = arith.constant 0 : i32
    %c0_i32_0 = arith.constant 0 : i32
    return %arg0, %c0_i32 : i32, i32
  }
}

module attributes {stable_mosaic.version = 11 : i64} {
  func.func @_tap_conv_kernel(%arg0: i32, %arg1: memref<1x352x192xbf16, #tpu.memory_space<vmem>>, %arg2: memref<7x192x192xbf16, #tpu.memory_space<vmem>>, %arg3: memref<1x192xf32, #tpu.memory_space<vmem>>, %arg4: memref<1x256x192xbf16, #tpu.memory_space<vmem>>) attributes {dimension_semantics = [#tpu.dimension_semantics<parallel>], iteration_bounds = array<i64: 2>, scalar_prefetch = 0 : i64, scratch_operands = 0 : i64, tpu.core_type = #tpu.core_type<tc>, window_params = [{transform_indices = @transform_0, window_bounds = array<i64: 1, 352, 192>}, {pipeline_mode = #tpu.pipeline_mode<synchronous>, transform_indices = @transform_1, window_bounds = array<i64: 7, 192, 192>}, {pipeline_mode = #tpu.pipeline_mode<synchronous>, transform_indices = @transform_2, window_bounds = array<i64: 1, 192>}, {transform_indices = @transform_3, window_bounds = array<i64: 1, 256, 192>}]} {
    %cst = arith.constant 0.000000e+00 : f32
    %0 = vector.broadcast %cst : f32 to vector<256x192xf32>
    %c0 = arith.constant 0 : index
    %c0_0 = arith.constant 0 : index
    %c0_1 = arith.constant 0 : index
    %1 = vector.load %arg1[%c0, %c0_0, %c0_1] : memref<1x352x192xbf16, #tpu.memory_space<vmem>>, vector<1x256x192xbf16>
    %2 = vector.shape_cast %1 : vector<1x256x192xbf16> to vector<256x192xbf16>
    %c0_2 = arith.constant 0 : index
    %c0_3 = arith.constant 0 : index
    %c0_4 = arith.constant 0 : index
    %3 = vector.load %arg2[%c0_2, %c0_3, %c0_4] : memref<7x192x192xbf16, #tpu.memory_space<vmem>>, vector<1x192x192xbf16>
    %4 = vector.shape_cast %3 : vector<1x192x192xbf16> to vector<192x192xbf16>
    %cst_5 = arith.constant dense<0.000000e+00> : vector<256x192xf32>
    %5 = tpu.matmul %2, %4, %cst_5 {dimension_numbers = #tpu.dot_dimension_numbers<[1], [0], [0], [1], [0, 0, 1, 1], [], []>} : vector<256x192xbf16>, vector<192x192xbf16>, vector<256x192xf32> -> vector<256x192xf32>
    %6 = arith.addf %0, %5 : vector<256x192xf32>
    %c0_6 = arith.constant 0 : index
    %c16 = arith.constant 16 : index
    %c0_7 = arith.constant 0 : index
    %7 = vector.load %arg1[%c0_6, %c16, %c0_7] : memref<1x352x192xbf16, #tpu.memory_space<vmem>>, vector<1x256x192xbf16>
    %8 = vector.shape_cast %7 : vector<1x256x192xbf16> to vector<256x192xbf16>
    %c1 = arith.constant 1 : index
    %c0_8 = arith.constant 0 : index
    %c0_9 = arith.constant 0 : index
    %9 = vector.load %arg2[%c1, %c0_8, %c0_9] : memref<7x192x192xbf16, #tpu.memory_space<vmem>>, vector<1x192x192xbf16>
    %10 = vector.shape_cast %9 : vector<1x192x192xbf16> to vector<192x192xbf16>
    %cst_10 = arith.constant dense<0.000000e+00> : vector<256x192xf32>
    %11 = tpu.matmul %8, %10, %cst_10 {dimension_numbers = #tpu.dot_dimension_numbers<[1], [0], [0], [1], [0, 0, 1, 1], [], []>} : vector<256x192xbf16>, vector<192x192xbf16>, vector<256x192xf32> -> vector<256x192xf32>
    %12 = arith.addf %6, %11 : vector<256x192xf32>
    %c0_11 = arith.constant 0 : index
    %c32 = arith.constant 32 : index
    %c0_12 = arith.constant 0 : index
    %13 = vector.load %arg1[%c0_11, %c32, %c0_12] : memref<1x352x192xbf16, #tpu.memory_space<vmem>>, vector<1x256x192xbf16>
    %14 = vector.shape_cast %13 : vector<1x256x192xbf16> to vector<256x192xbf16>
    %c2 = arith.constant 2 : index
    %c0_13 = arith.constant 0 : index
    %c0_14 = arith.constant 0 : index
    %15 = vector.load %arg2[%c2, %c0_13, %c0_14] : memref<7x192x192xbf16, #tpu.memory_space<vmem>>, vector<1x192x192xbf16>
    %16 = vector.shape_cast %15 : vector<1x192x192xbf16> to vector<192x192xbf16>
    %cst_15 = arith.constant dense<0.000000e+00> : vector<256x192xf32>
    %17 = tpu.matmul %14, %16, %cst_15 {dimension_numbers = #tpu.dot_dimension_numbers<[1], [0], [0], [1], [0, 0, 1, 1], [], []>} : vector<256x192xbf16>, vector<192x192xbf16>, vector<256x192xf32> -> vector<256x192xf32>
    %18 = arith.addf %12, %17 : vector<256x192xf32>
    %c0_16 = arith.constant 0 : index
    %c48 = arith.constant 48 : index
    %c0_17 = arith.constant 0 : index
    %19 = vector.load %arg1[%c0_16, %c48, %c0_17] : memref<1x352x192xbf16, #tpu.memory_space<vmem>>, vector<1x256x192xbf16>
    %20 = vector.shape_cast %19 : vector<1x256x192xbf16> to vector<256x192xbf16>
    %c3 = arith.constant 3 : index
    %c0_18 = arith.constant 0 : index
    %c0_19 = arith.constant 0 : index
    %21 = vector.load %arg2[%c3, %c0_18, %c0_19] : memref<7x192x192xbf16, #tpu.memory_space<vmem>>, vector<1x192x192xbf16>
    %22 = vector.shape_cast %21 : vector<1x192x192xbf16> to vector<192x192xbf16>
    %cst_20 = arith.constant dense<0.000000e+00> : vector<256x192xf32>
    %23 = tpu.matmul %20, %22, %cst_20 {dimension_numbers = #tpu.dot_dimension_numbers<[1], [0], [0], [1], [0, 0, 1, 1], [], []>} : vector<256x192xbf16>, vector<192x192xbf16>, vector<256x192xf32> -> vector<256x192xf32>
    %24 = arith.addf %18, %23 : vector<256x192xf32>
    %c0_21 = arith.constant 0 : index
    %c64 = arith.constant 64 : index
    %c0_22 = arith.constant 0 : index
    %25 = vector.load %arg1[%c0_21, %c64, %c0_22] : memref<1x352x192xbf16, #tpu.memory_space<vmem>>, vector<1x256x192xbf16>
    %26 = vector.shape_cast %25 : vector<1x256x192xbf16> to vector<256x192xbf16>
    %c4 = arith.constant 4 : index
    %c0_23 = arith.constant 0 : index
    %c0_24 = arith.constant 0 : index
    %27 = vector.load %arg2[%c4, %c0_23, %c0_24] : memref<7x192x192xbf16, #tpu.memory_space<vmem>>, vector<1x192x192xbf16>
    %28 = vector.shape_cast %27 : vector<1x192x192xbf16> to vector<192x192xbf16>
    %cst_25 = arith.constant dense<0.000000e+00> : vector<256x192xf32>
    %29 = tpu.matmul %26, %28, %cst_25 {dimension_numbers = #tpu.dot_dimension_numbers<[1], [0], [0], [1], [0, 0, 1, 1], [], []>} : vector<256x192xbf16>, vector<192x192xbf16>, vector<256x192xf32> -> vector<256x192xf32>
    %30 = arith.addf %24, %29 : vector<256x192xf32>
    %c0_26 = arith.constant 0 : index
    %c80 = arith.constant 80 : index
    %c0_27 = arith.constant 0 : index
    %31 = vector.load %arg1[%c0_26, %c80, %c0_27] : memref<1x352x192xbf16, #tpu.memory_space<vmem>>, vector<1x256x192xbf16>
    %32 = vector.shape_cast %31 : vector<1x256x192xbf16> to vector<256x192xbf16>
    %c5 = arith.constant 5 : index
    %c0_28 = arith.constant 0 : index
    %c0_29 = arith.constant 0 : index
    %33 = vector.load %arg2[%c5, %c0_28, %c0_29] : memref<7x192x192xbf16, #tpu.memory_space<vmem>>, vector<1x192x192xbf16>
    %34 = vector.shape_cast %33 : vector<1x192x192xbf16> to vector<192x192xbf16>
    %cst_30 = arith.constant dense<0.000000e+00> : vector<256x192xf32>
    %35 = tpu.matmul %32, %34, %cst_30 {dimension_numbers = #tpu.dot_dimension_numbers<[1], [0], [0], [1], [0, 0, 1, 1], [], []>} : vector<256x192xbf16>, vector<192x192xbf16>, vector<256x192xf32> -> vector<256x192xf32>
    %36 = arith.addf %30, %35 : vector<256x192xf32>
    %c0_31 = arith.constant 0 : index
    %c96 = arith.constant 96 : index
    %c0_32 = arith.constant 0 : index
    %37 = vector.load %arg1[%c0_31, %c96, %c0_32] : memref<1x352x192xbf16, #tpu.memory_space<vmem>>, vector<1x256x192xbf16>
    %38 = vector.shape_cast %37 : vector<1x256x192xbf16> to vector<256x192xbf16>
    %c6 = arith.constant 6 : index
    %c0_33 = arith.constant 0 : index
    %c0_34 = arith.constant 0 : index
    %39 = vector.load %arg2[%c6, %c0_33, %c0_34] : memref<7x192x192xbf16, #tpu.memory_space<vmem>>, vector<1x192x192xbf16>
    %40 = vector.shape_cast %39 : vector<1x192x192xbf16> to vector<192x192xbf16>
    %cst_35 = arith.constant dense<0.000000e+00> : vector<256x192xf32>
    %41 = tpu.matmul %38, %40, %cst_35 {dimension_numbers = #tpu.dot_dimension_numbers<[1], [0], [0], [1], [0, 0, 1, 1], [], []>} : vector<256x192xbf16>, vector<192x192xbf16>, vector<256x192xf32> -> vector<256x192xf32>
    %42 = arith.addf %36, %41 : vector<256x192xf32>
    %c0_36 = arith.constant 0 : index
    %c0_37 = arith.constant 0 : index
    %43 = vector.load %arg3[%c0_36, %c0_37] : memref<1x192xf32, #tpu.memory_space<vmem>>, vector<1x192xf32>
    %44 = vector.broadcast %43 : vector<1x192xf32> to vector<256x192xf32>
    %45 = arith.addf %42, %44 : vector<256x192xf32>
    %cst_38 = arith.constant 0.000000e+00 : f32
    %46 = vector.broadcast %cst_38 : f32 to vector<256x192xf32>
    %47 = arith.maximumf %45, %46 : vector<256x192xf32>
    %48 = arith.truncf %47 : vector<256x192xf32> to vector<256x192xbf16>
    %c0_39 = arith.constant 0 : index
    %c0_40 = arith.constant 0 : index
    %c0_41 = arith.constant 0 : index
    %49 = vector.load %arg4[%c0_39, %c0_40, %c0_41] : memref<1x256x192xbf16, #tpu.memory_space<vmem>>, vector<1x256x192xbf16>
    %50 = vector.shape_cast %49 : vector<1x256x192xbf16> to vector<256x192xbf16>
    %51 = vector.shape_cast %48 : vector<256x192xbf16> to vector<1x256x192xbf16>
    tpu.vector_store %arg4[%c0_39, %c0_40, %c0_41], %51 {strides = array<i32>} : memref<1x256x192xbf16, #tpu.memory_space<vmem>>, vector<1x256x192xbf16>,
    return
  }
  func.func @transform_0(%arg0: i32) -> (i32, i32, i32) {
    %c0_i32 = arith.constant 0 : i32
    %c0_i32_0 = arith.constant 0 : i32
    %c0_i32_1 = arith.constant 0 : i32
    return %arg0, %c0_i32, %c0_i32_0 : i32, i32, i32
  }
  func.func @transform_1(%arg0: i32) -> (i32, i32, i32) {
    %c0_i32 = arith.constant 0 : i32
    %c0_i32_0 = arith.constant 0 : i32
    %c0_i32_1 = arith.constant 0 : i32
    %c0_i32_2 = arith.constant 0 : i32
    return %c0_i32, %c0_i32_0, %c0_i32_1 : i32, i32, i32
  }
  func.func @transform_2(%arg0: i32) -> (i32, i32) {
    %c0_i32 = arith.constant 0 : i32
    %c0_i32_0 = arith.constant 0 : i32
    %c0_i32_1 = arith.constant 0 : i32
    return %c0_i32, %c0_i32_0 : i32, i32
  }
  func.func @transform_3(%arg0: i32) -> (i32, i32, i32) {
    %c0_i32 = arith.constant 0 : i32
    %c0_i32_0 = arith.constant 0 : i32
    %c0_i32_1 = arith.constant 0 : i32
    return %arg0, %c0_i32, %c0_i32_0 : i32, i32, i32
  }
}

module attributes {stable_mosaic.version = 11 : i64} {
  func.func @_mm_bias_relu_kernel(%arg0: i32, %arg1: memref<128x1728xbf16, #tpu.memory_space<vmem>>, %arg2: memref<1728x192xbf16, #tpu.memory_space<vmem>>, %arg3: memref<1x192xf32, #tpu.memory_space<vmem>>, %arg4: memref<128x192xf32, #tpu.memory_space<vmem>>) attributes {dimension_semantics = [#tpu.dimension_semantics<parallel>], iteration_bounds = array<i64: 1>, scalar_prefetch = 0 : i64, scratch_operands = 0 : i64, tpu.core_type = #tpu.core_type<tc>, window_params = [{transform_indices = @transform_0, window_bounds = array<i64: 128, 1728>}, {pipeline_mode = #tpu.pipeline_mode<synchronous>, transform_indices = @transform_1, window_bounds = array<i64: 1728, 192>}, {pipeline_mode = #tpu.pipeline_mode<synchronous>, transform_indices = @transform_2, window_bounds = array<i64: 1, 192>}, {transform_indices = @transform_3, window_bounds = array<i64: 128, 192>}]} {
    %c0 = arith.constant 0 : index
    %c0_0 = arith.constant 0 : index
    %0 = vector.load %arg1[%c0, %c0_0] : memref<128x1728xbf16, #tpu.memory_space<vmem>>, vector<128x1728xbf16>
    %c0_1 = arith.constant 0 : index
    %c0_2 = arith.constant 0 : index
    %1 = vector.load %arg2[%c0_1, %c0_2] : memref<1728x192xbf16, #tpu.memory_space<vmem>>, vector<1728x192xbf16>
    %cst = arith.constant dense<0.000000e+00> : vector<128x192xf32>
    %2 = tpu.matmul %0, %1, %cst {dimension_numbers = #tpu.dot_dimension_numbers<[1], [0], [0], [1], [0, 0, 1, 1], [], []>} : vector<128x1728xbf16>, vector<1728x192xbf16>, vector<128x192xf32> -> vector<128x192xf32>
    %c0_3 = arith.constant 0 : index
    %c0_4 = arith.constant 0 : index
    %3 = vector.load %arg3[%c0_3, %c0_4] : memref<1x192xf32, #tpu.memory_space<vmem>>, vector<1x192xf32>
    %4 = vector.broadcast %3 : vector<1x192xf32> to vector<128x192xf32>
    %5 = arith.addf %2, %4 : vector<128x192xf32>
    %cst_5 = arith.constant 0.000000e+00 : f32
    %6 = vector.broadcast %cst_5 : f32 to vector<128x192xf32>
    %7 = arith.maximumf %5, %6 : vector<128x192xf32>
    %c0_6 = arith.constant 0 : index
    %c0_7 = arith.constant 0 : index
    %8 = vector.load %arg4[%c0_6, %c0_7] : memref<128x192xf32, #tpu.memory_space<vmem>>, vector<128x192xf32>
    tpu.vector_store %arg4[%c0_6, %c0_7], %7 {strides = array<i32>} : memref<128x192xf32, #tpu.memory_space<vmem>>, vector<128x192xf32>,
    return
  }
  func.func @transform_0(%arg0: i32) -> (i32, i32) {
    %c0_i32 = arith.constant 0 : i32
    %c0_i32_0 = arith.constant 0 : i32
    return %arg0, %c0_i32 : i32, i32
  }
  func.func @transform_1(%arg0: i32) -> (i32, i32) {
    %c0_i32 = arith.constant 0 : i32
    %c0_i32_0 = arith.constant 0 : i32
    %c0_i32_1 = arith.constant 0 : i32
    return %c0_i32, %c0_i32_0 : i32, i32
  }
  func.func @transform_2(%arg0: i32) -> (i32, i32) {
    %c0_i32 = arith.constant 0 : i32
    %c0_i32_0 = arith.constant 0 : i32
    %c0_i32_1 = arith.constant 0 : i32
    return %c0_i32, %c0_i32_0 : i32, i32
  }
  func.func @transform_3(%arg0: i32) -> (i32, i32) {
    %c0_i32 = arith.constant 0 : i32
    %c0_i32_0 = arith.constant 0 : i32
    return %arg0, %c0_i32 : i32, i32
  }
}

module attributes {stable_mosaic.version = 11 : i64} {
  func.func @_mm_bias_relu_kernel(%arg0: i32, %arg1: memref<128x1728xbf16, #tpu.memory_space<vmem>>, %arg2: memref<1728x320xbf16, #tpu.memory_space<vmem>>, %arg3: memref<1x320xf32, #tpu.memory_space<vmem>>, %arg4: memref<128x320xf32, #tpu.memory_space<vmem>>) attributes {dimension_semantics = [#tpu.dimension_semantics<parallel>], iteration_bounds = array<i64: 1>, scalar_prefetch = 0 : i64, scratch_operands = 0 : i64, tpu.core_type = #tpu.core_type<tc>, window_params = [{transform_indices = @transform_0, window_bounds = array<i64: 128, 1728>}, {pipeline_mode = #tpu.pipeline_mode<synchronous>, transform_indices = @transform_1, window_bounds = array<i64: 1728, 320>}, {pipeline_mode = #tpu.pipeline_mode<synchronous>, transform_indices = @transform_2, window_bounds = array<i64: 1, 320>}, {transform_indices = @transform_3, window_bounds = array<i64: 128, 320>}]} {
    %c0 = arith.constant 0 : index
    %c0_0 = arith.constant 0 : index
    %0 = vector.load %arg1[%c0, %c0_0] : memref<128x1728xbf16, #tpu.memory_space<vmem>>, vector<128x1728xbf16>
    %c0_1 = arith.constant 0 : index
    %c0_2 = arith.constant 0 : index
    %1 = vector.load %arg2[%c0_1, %c0_2] : memref<1728x320xbf16, #tpu.memory_space<vmem>>, vector<1728x320xbf16>
    %cst = arith.constant dense<0.000000e+00> : vector<128x320xf32>
    %2 = tpu.matmul %0, %1, %cst {dimension_numbers = #tpu.dot_dimension_numbers<[1], [0], [0], [1], [0, 0, 1, 1], [], []>} : vector<128x1728xbf16>, vector<1728x320xbf16>, vector<128x320xf32> -> vector<128x320xf32>
    %c0_3 = arith.constant 0 : index
    %c0_4 = arith.constant 0 : index
    %3 = vector.load %arg3[%c0_3, %c0_4] : memref<1x320xf32, #tpu.memory_space<vmem>>, vector<1x320xf32>
    %4 = vector.broadcast %3 : vector<1x320xf32> to vector<128x320xf32>
    %5 = arith.addf %2, %4 : vector<128x320xf32>
    %cst_5 = arith.constant 0.000000e+00 : f32
    %6 = vector.broadcast %cst_5 : f32 to vector<128x320xf32>
    %7 = arith.maximumf %5, %6 : vector<128x320xf32>
    %c0_6 = arith.constant 0 : index
    %c0_7 = arith.constant 0 : index
    %8 = vector.load %arg4[%c0_6, %c0_7] : memref<128x320xf32, #tpu.memory_space<vmem>>, vector<128x320xf32>
    tpu.vector_store %arg4[%c0_6, %c0_7], %7 {strides = array<i32>} : memref<128x320xf32, #tpu.memory_space<vmem>>, vector<128x320xf32>,
    return
  }
  func.func @transform_0(%arg0: i32) -> (i32, i32) {
    %c0_i32 = arith.constant 0 : i32
    %c0_i32_0 = arith.constant 0 : i32
    return %arg0, %c0_i32 : i32, i32
  }
  func.func @transform_1(%arg0: i32) -> (i32, i32) {
    %c0_i32 = arith.constant 0 : i32
    %c0_i32_0 = arith.constant 0 : i32
    %c0_i32_1 = arith.constant 0 : i32
    return %c0_i32, %c0_i32_0 : i32, i32
  }
  func.func @transform_2(%arg0: i32) -> (i32, i32) {
    %c0_i32 = arith.constant 0 : i32
    %c0_i32_0 = arith.constant 0 : i32
    %c0_i32_1 = arith.constant 0 : i32
    return %c0_i32, %c0_i32_0 : i32, i32
  }
  func.func @transform_3(%arg0: i32) -> (i32, i32) {
    %c0_i32 = arith.constant 0 : i32
    %c0_i32_0 = arith.constant 0 : i32
    return %arg0, %c0_i32 : i32, i32
  }
}

</mosaic_0001>

<bundles_post_ra>
// kernel: inception_d.11
= control target key start
LH: loop header
LB: loop body
LE: loop exit
PB: predicated region body
PF: predicated region fallthrough
CT: control target
= control target key end

     0   :  { %6 = vsyncpa [#allocation3], 0  ;;  %s593_s0 = inlined_call_operand.vmem [shape: f32[2,16,7,8], index: 0, kind: input, shape index: {}]   ;;  %s594_s1 = inlined_call_operand.hbm [shape: f32[2,7,7,8], index: 1, kind: output, shape index: {}]  }
   0x1   :  { %8 = vsyncpa [#allocation3 + $0x1], 0  ;;  %s421_s6 = smov 0   ;;  %s423_s7 = smov 0  }
   0x2   :  { %s425_s8 = smov 0   ;;  %s427_s9 = smov 0  }
   0x3 LB: > { %s442_s10 = sadd.s32 4294967295, %s406_s9   ;;  %s267_s11 = sadd.s32 4294967294, %s406_s9   ;;  %s406_s9 = sphi %s427_s9, %s600_s9   ;;  %s402_s8 = sphi %s425_s8, %s599_s8   ;;  %s398_s7 = sphi %s423_s7, %s598_s7   ;;  %s394_s6 = sphi %s421_s6, %s597_s6  }
   0x4   : > { %s446_s12 = sadd.s32 1, %s406_s9   ;;  %s47_s13 = sadd.s32 1, %s402_s8 }
   0x5   : > { %s44_s14 = ssub.s32 %s406_s9, %s446_s12  ;;  %p57_p0 = scmp.ne.s32.totalorder %s402_s8, %s398_s7 }
   0x6   : > { %p45_p1 = scmp.eq.s32.totalorder %s44_s14, 0  ;;  %p58_p2 = scmp.eq.s32.totalorder %s442_s10, 1 }
   0x7   : > { %p63_p3 = scmp.ne.s32.totalorder %s398_s7, %s394_s6  ;;  %p64_p4 = scmp.eq.s32.totalorder %s267_s11, 1 }
   0x8   : > { %s457_s15 = scalar_select %p45_p1, %s402_s8, %s47_s13  }
   0x9   : > { %p459_p5 = por %p58_p2, %p57_p0  ;;  %p463_p6 = por %p64_p4, %p63_p3 }
   0xa   : > { %p270_p7 = scmp.ge.s32.totalorder %s406_s9, 1  ;;  %p90_p8 = scmp.lt.s32.totalorder %s406_s9, 3 }
   0xc   : > { %p91_p9 = pnand %p270_p7, %p90_p8 }
   0xd   : > { %s107_s18 = sand.u32 (!%p91_p9), 1, %s398_s7   ;;  %p110_p10 = scmp.lt.s32.totalorder (!%p91_p9), %s442_s10, 1  ;;  %vm118_vm0 = vcmask (!%p91_p9), 63488  }
   0xe   : > { %94 = sbr.rel (%p91_p9) target bundleno = 57 (0x39), region = 24  ;;  %s552_s2 = scalar_lea.sflag (!%p91_p9), [#allocation3], %s107_s18 }
   0xf   : > { %s301_s19 = smul.u32 (!%p91_p9), 56, %s107_s18  ;;  %s408_s4 = smov (!%p91_p9), [#allocation2]  }
  0x10   : > { %s302_s25 = smul.u32 (!%p91_p9), 896, %s442_s10  ;;  %s348_s5 = sshll.u32 (!%p91_p9), %s408_s4, 4  ;;  %s349_s5 = int_to_ptr.vmem [resolvable:$false] %s348_s5 }
  0x11   : > { %s487_s26 = scalar_lea.vmem (!%p91_p9), [#allocation2], %s301_s19 }
  0x12   : > { %s205_s27 = sshll.u32 (!%p91_p9), %s487_s26, 4  ;;  %s544_s30 = scalar_lea.hbm (!%p91_p9), %s594_s1, %s302_s25  ;;  %s535_s27 = int_to_ptr.vmem [resolvable:$true] %s205_s27 }
  0x13   : > { %s344_s3 = scalar_lea.vmem (!%p91_p9), %s535_s27, 896  ;;  %p351_p0 = scmp.lt.s32.totalorder (!%p91_p9), %s535_s27, %s349_s5 }
  0x14   : > { %p345_p11 = scmp.ne.s32.totalorder (!%p91_p9), %s535_s27, %s344_s3 }
  0x15   : > { %s111_s20 = scalar_select %p110_p10, %s442_s10, 1 }
  0x16   : > { %p346_p12 = pnand %p345_p11, %p459_p5  ;;  %s350_s10 = scalar_lea.vmem %s349_s5, 1792 }
  0x17   : > { %s300_s21 = sshll.u32 %s111_s20, 7  ;;  %p352_p1 = scmp.lt.s32.totalorder %s350_s10, %s344_s3 }
  0x18   : > { %s477_s24 = scalar_lea.vmem %s593_s0, %s300_s21  ;;  %p347_p13 = pneg %p346_p12 }
  0x19   : > { %v115_v0 = vld [vmem:[%s477_s24] sm:$0x7f]  ;;  %v116_v1 = vld [vmem:[%s477_s24 + $0x8] sm:$0x7f]  ;;  %v117_v2 = vld [vmem:[%s477_s24 + $0x10] sm:$0x7f]  ;;  %p353_p2 = por %p352_p1, %p351_p0 }
  0x1a   : > { %v119_v3 = vsel %vm118_vm0, %v115_v0, -inf  ;;  %v120_v4 = vsel %vm118_vm0, %v116_v1, -inf  ;;  %v121_v5 = vsel %vm118_vm0, %v117_v2, -inf  ;;  %v273_v6 = vld [vmem:[%s477_s24 + $0x10] sm:$0x7f] }
  0x1b   : > { %v122_v7 = vmax.f32 %v119_v3, %v120_v4  ;;  %v274_v8 = vld [vmem:[%s477_s24 + $0x18] sm:$0x7f]  ;;  %v275_v9 = vld [vmem:[%s477_s24 + $0x20] sm:$0x7f]  ;;  %v129_v10 = vsel %vm118_vm0, %v273_v6, -inf  ;;  %p354_p3 = pnand %p353_p2, %p347_p13 }
  0x1c   : > { %v130_v11 = vsel %vm118_vm0, %v274_v8, -inf  ;;  %v131_v12 = vsel %vm118_vm0, %v275_v9, -inf  ;;  %v277_v13 = vld [vmem:[%s477_s24 + $0x20] sm:$0x7f]  ;;  %v278_v14 = vld [vmem:[%s477_s24 + $0x28] sm:$0x7f] }
  0x1d   : > { %v123_v15 = vmax.f32 %v122_v7, %v121_v5  ;;  %v132_v16 = vmax.f32 %v129_v10, %v130_v11  ;;  %v279_v17 = vld [vmem:[%s477_s24 + $0x30] sm:$0x7f]  ;;  %v140_v18 = vsel %vm118_vm0, %v277_v13, -inf  ;;  %v141_v19 = vsel %vm118_vm0, %v278_v14, -inf  ;;  %v282_v23 = vld [vmem:[%s477_s24 + $0x38] sm:$0x7f] }
  0x1e   : > { %v281_v20 = vld [vmem:[%s477_s24 + $0x30] sm:$0x7f]  ;;  %v142_v21 = vsel %vm118_vm0, %v279_v17, -inf  ;;  %v143_v22 = vmax.f32 %v140_v18, %v141_v19  ;;  %v283_v24 = vld [vmem:[%s477_s24 + $0x40] sm:$0x7f]  ;;  %v152_v27 = vsel %vm118_vm0, %v282_v23, -inf }
  0x1f   : > { %v151_v25 = vsel %vm118_vm0, %v281_v20, -inf  ;;  %124 = vst.msk [vmem:[%s487_s26] sm:$0x7f] %vm118_vm0, %v123_v15  ;;  %v133_v26 = vmax.f32 %v132_v16, %v131_v12  ;;  %v153_v28 = vsel %vm118_vm0, %v283_v24, -inf  ;;  %v285_v29 = vld [vmem:[%s477_s24 + $0x40] sm:$0x7f] }
  0x20   : > { %v286_v30 = vld [vmem:[%s477_s24 + $0x48] sm:$0x7f]  ;;  %v144_v31 = vmax.f32 %v143_v22, %v142_v21  ;;  %v154_v32 = vmax.f32 %v151_v25, %v152_v27  ;;  %v287_v33 = vld [vmem:[%s477_s24 + $0x50] sm:$0x7f]  ;;  %v162_v34 = vsel %vm118_vm0, %v285_v29, -inf }
  0x21   : > { %v163_v35 = vsel %vm118_vm0, %v286_v30, -inf  ;;  %v289_v36 = vld [vmem:[%s477_s24 + $0x50] sm:$0x7f]  ;;  %276 = vst.msk [vmem:[%s487_s26 + $0x8] sm:$0x7f] %vm118_vm0, %v133_v26  ;;  %v164_v37 = vsel %vm118_vm0, %v287_v33, -inf }
  0x22   : > { %v165_v38 = vmax.f32 %v162_v34, %v163_v35  ;;  %v290_v39 = vld [vmem:[%s477_s24 + $0x58] sm:$0x7f]  ;;  %v291_v40 = vld [vmem:[%s477_s24 + $0x60] sm:$0x7f]  ;;  %v173_v41 = vsel %vm118_vm0, %v289_v36, -inf  ;;  %v155_v42 = vmax.f32 %v154_v32, %v153_v28 }
  0x23   : > { %280 = vst.msk [vmem:[%s487_s26 + $0x10] sm:$0x7f] %vm118_vm0, %v144_v31  ;;  %v174_v43 = vsel %vm118_vm0, %v290_v39, -inf  ;;  %v175_v44 = vsel %vm118_vm0, %v291_v40, -inf  ;;  %v293_v45 = vld [vmem:[%s477_s24 + $0x60] sm:$0x7f] }
  0x24   : > { %v294_v46 = vld [vmem:[%s477_s24 + $0x68] sm:$0x7f]  ;;  %v166_v47 = vmax.f32 %v165_v38, %v164_v37  ;;  %v176_v48 = vmax.f32 %v173_v41, %v174_v43  ;;  %v295_v49 = vld [vmem:[%s477_s24 + $0x70] sm:$0x7f]  ;;  %v184_v50 = vsel %vm118_vm0, %v293_v45, -inf }
  0x25   : > { %v185_v51 = vsel %vm118_vm0, %v294_v46, -inf  ;;  %284 = vst.msk [vmem:[%s487_s26 + $0x18] sm:$0x7f] %vm118_vm0, %v155_v42  ;;  %v186_v52 = vsel %vm118_vm0, %v295_v49, -inf }
  0x26   : > { %v187_v53 = vmax.f32 %v184_v50, %v185_v51  ;;  %288 = vst.msk [vmem:[%s487_s26 + $0x20] sm:$0x7f] %vm118_vm0, %v166_v47  ;;  %v177_v54 = vmax.f32 %v176_v48, %v175_v44 }
  0x28   : > { %v188_v55 = vmax.f32 %v187_v53, %v186_v52  ;;  %292 = vst.msk [vmem:[%s487_s26 + $0x28] sm:$0x7f] %vm118_vm0, %v177_v54 }
  0x2a   : > { %296 = vst.msk [vmem:[%s487_s26 + $0x30] sm:$0x7f] %vm118_vm0, %v188_v55 }
  0x2b   : > { %357 = shalt.err (!%p354_p3)
}
  0x2c   : > { %s358_s11 = scalar_lea.hbm %s544_s30, 896  ;;  %s362_s18 = scalar_lea.hbm %s594_s1, 1792 }
  0x2d   : > { %p359_p4 = scmp.ne.s32.totalorder %s544_s30, %s358_s11  ;;  %p363_p9 = scmp.lt.u32.totalorder %s544_s30, %s594_s1 }
  0x2e   : > { %p364_p10 = scmp.lt.u32.totalorder %s362_s18, %s358_s11  ;;  %p366_p12 = scmp.lt.u32.totalorder %s358_s11, %s544_s30 }
  0x2f   : > { %p360_p7 = pnand %p359_p4, %p459_p5 }
  0x30   : > { %p365_p11 = por %p364_p10, %p363_p9 }
  0x31   : > { %p361_p8 = pneg %p360_p7 }
  0x32   : > { %p367_p13 = por %p366_p12, %p365_p11 }
  0x34   : > { %p368_p0 = pnand %p367_p13, %p361_p8 }
  0x36   : > { %371 = shalt.err (!%p368_p0)
}
  0x37   : > { %s409_s21 = smov 128   ;;  %s410_s22 = smov 8  }
  0x38   : > { %303 = dma.vmem_to_hbm [thread:$0]  (%p459_p5), %s535_s27, 896, %s544_s30, %s552_s2, %s409_s21, %s409_s21, %s410_s22  }
  0x39 PF: > { %p309_p1 = scmp.ge.s32.totalorder %s406_s9, 2  ;;  %s220_s23 = sand.u32 1, %s394_s6  }
  0x3a   : > { %s221_s24 = scalar_lea.sflag [#allocation3], %s220_s23 }
  0x3b   : > { %p306_p2 = pnand %p309_p1, %p463_p6 }
  0x3d   : > { %389 = dma.done.wait (!%p306_p2), %s221_s24, 896  }
  0x3e   : > { %391 = vsyncadd (!%p306_p2), %s221_s24, 4294966400  ;;  %p11_p3 = scmp.ge.s32.totalorder %s446_s12, 4   ;;  %s597_s6 = smov %s398_s7 }
  0x3f   : > { %s598_s7 = smov %s402_s8  ;;  %s599_s8 = smov %s457_s15 }
  0x40   : > { %s600_s9 = smov %s446_s12  ;;  %13 = sbr.rel (!%p11_p3) target bundleno = 3 (0x3), region = 71 }
  0x47   :  { %226 = vsyncpa [#allocation3], 1 }
  0x48   :  { %228 = vsyncpa [#allocation3 + $0x1], 1 }

// kernel: inception_d.6
= control target key start
LH: loop header
LB: loop body
LE: loop exit
PB: predicated region body
PF: predicated region fallthrough
CT: control target
= control target key end

     0   :  { %8 = vsyncpa [#allocation3], 0  ;;  %s3047_s0 = inlined_call_operand.hbm [shape: bf16[512,8], index: 0, kind: input, shape index: {}]   ;;  %s3048_s1 = inlined_call_operand.hbm [shape: bf16[8,384], index: 1, kind: input, shape index: {}]   ;;  %s3049_s2 = inlined_call_operand.hbm [shape: f32[1,384], index: 2, kind: input, shape index: {}]   ;;  %s3050_s3 = inlined_call_operand.hbm [shape: bf16[512,384], index: 3, kind: output, shape index: {}]  }
   0x1   :  { %9 = vsyncpa [#allocation6], 0 }
   0x2   :  { %10 = vsyncpa [#allocation4], 0  ;;  %s2627_s12 = smov [#allocation5]   ;;  %s2628_s14 = smov [#allocation2]  }
   0x3   :  { %s29_s13 = sshll.u32 %s2627_s12, 4  ;;  %s16_s15 = sshll.u32 %s2628_s14, 4  ;;  %s30_s13 = int_to_ptr.vmem [resolvable:$true] %s29_s13  ;;  %s2656_s15 = int_to_ptr.vmem [resolvable:$true] %s16_s15 }
   0x4   :  { %s2533_s18 = scalar_lea.hbm %s3048_s1, 192 }
   0x5   :  { %p2534_p0 = scmp.ne.s32.totalorder %s3048_s1, %s2533_s18  ;;  %p2537_p1 = scmp.lt.u32.totalorder %s2533_s18, %s3048_s1 }
   0x7   :  { %p2539_p2 = pnand %p2537_p1, %p2534_p0 }
   0x9   :  { %2542 = shalt.err (!%p2539_p2)
}
   0xa   :  { %s2543_s23 = scalar_lea.vmem %s30_s13, 192  ;;  %p2548_p4 = scmp.lt.s32.totalorder %s30_s13, %s30_s13 }
   0xb   :  { %p2544_p3 = scmp.ne.s32.totalorder %s30_s13, %s2543_s23  ;;  %p2549_p5 = scmp.lt.s32.totalorder %s2543_s23, %s2543_s23 }
   0xd   :  { %p2550_p6 = por %p2549_p5, %p2548_p4 }
   0xf   :  { %p2551_p7 = pnand %p2550_p6, %p2544_p3 }
  0x11   :  { %2554 = shalt.err (!%p2551_p7)
}
  0x12   :  { %32 = dma.hbm_to_vmem [thread:$0]  %s3048_s1, 192, %s30_s13, [#allocation6]  }
  0x13   :  { %s2555_s28 = scalar_lea.hbm %s3047_s0, 4096 }
  0x14   :  { %p2556_p8 = scmp.ne.s32.totalorder %s3047_s0, %s2555_s28  ;;  %p2559_p9 = scmp.lt.u32.totalorder %s2555_s28, %s3047_s0 }
  0x16   :  { %p2561_p10 = pnand %p2559_p9, %p2556_p8 }
  0x18   :  { %2564 = shalt.err (!%p2561_p10)
}
  0x19   :  { %s2565_s6 = scalar_lea.vmem %s2656_s15, 4096  ;;  %p2570_p12 = scmp.lt.s32.totalorder %s2656_s15, %s2656_s15 }
  0x1a   :  { %p2566_p11 = scmp.ne.s32.totalorder %s2656_s15, %s2565_s6  ;;  %p2571_p13 = scmp.lt.s32.totalorder %s2565_s6, %s2565_s6 }
  0x1c   :  { %p2572_p0 = por %p2571_p13, %p2570_p12 }
  0x1e   :  { %p2573_p1 = pnand %p2572_p0, %p2566_p11 }
  0x20   :  { %2576 = shalt.err (!%p2573_p1)
}
  0x21   :  { %s2629_s1 = smov 64   ;;  %s2630_s7 = smov 4  }
  0x22   :  { %22 = dma.hbm_to_vmem [thread:$0]  %s3047_s0, 4096, %s2656_s15, [#allocation3], %s2629_s1, %s2629_s1, %s2630_s7  }
  0x23   :  { %s2631_s10 = smov [#allocation7]   ;;  %s2577_s14 = scalar_lea.hbm %s3049_s2, 48 }
  0x24   :  { %s39_s11 = sshll.u32 %s2631_s10, 4  ;;  %p2578_p2 = scmp.ne.s32.totalorder %s3049_s2, %s2577_s14  ;;  %s40_s11 = int_to_ptr.vmem [resolvable:$true] %s39_s11 }
  0x25   :  { %p2581_p3 = scmp.lt.u32.totalorder %s2577_s14, %s3049_s2 }
  0x27   :  { %p2583_p4 = pnand %p2581_p3, %p2578_p2 }
  0x29   :  { %2586 = shalt.err (!%p2583_p4)
}
  0x2a   :  { %s2587_s20 = scalar_lea.vmem %s40_s11, 48  ;;  %s2591_s0 = scalar_lea.vmem %s40_s11, 64 }
  0x2b   :  { %p2588_p5 = scmp.ne.s32.totalorder %s40_s11, %s2587_s20  ;;  %p2592_p6 = scmp.lt.s32.totalorder %s40_s11, %s40_s11 }
  0x2c   :  { %p2593_p7 = scmp.lt.s32.totalorder %s2591_s0, %s2587_s20 }
  0x2e   :  { %p2594_p8 = por %p2593_p7, %p2592_p6 }
  0x30   :  { %p2595_p9 = pnand %p2594_p8, %p2588_p5 }
  0x32   :  { %2598 = shalt.err (!%p2595_p9)
}
  0x33   :  { %42 = dma.hbm_to_vmem [thread:$0]  %s3049_s2, 48, %s40_s11, [#allocation6]  }
  0x34   :  { %2621 = dma.done.wait [#allocation3], 4096  }
  0x35   :  { %2622 = vsyncadd [#allocation3], 4294963200 }
  0x36   :  { %2623 = dma.done.wait [#allocation6], 240  }
  0x37   :  { %2624 = vsyncadd [#allocation6], 4294967056  ;;  %v2632_v0 = vmov 0   ;;  %v117_v1 = vld [vmem:[#allocation5] sm:$0xff]  ;;  %vm401_vm0 = vcmask 1043456   ;;  %vm304_vm1 = vcmask 64512   ;;  %v121_v39 = vlaneseq }
  0x38   :  { %443 = vmatprep.mubr.bf16.mxu0 %v2632_v0  ;;  %683 = vmatprep.mubr.bf16.mxu1 %v2632_v0  ;;  %v2064_v2 = vcombine.high %v117_v1, %v117_v1  ;;  %v2063_v3 = vcombine.low %v117_v1, %v117_v1  ;;  %v2500_v4 = vld [vmem:[#allocation2] sm:$0xff]   ;;  %v2502_v5 = vld [vmem:[#allocation5 + $0x8] ss:$0 sps:$4 sm:$0xff]   ;;  %v2505_v11 = vld [vmem:[#allocation2 + $0x10] sm:$0xff]   ;;  %s2633_s2 = smov [#allocation8]  }
  0x39   :  { %v2701_v7 = vld [vmem:[#allocation2 + $0xc0] sm:$0xff]   ;;  %v409_v8 = vsel %vm401_vm0, %v2502_v5, 0  ;;  %v2503_v9 = vld [vmem:[#allocation2 + $0x8] sm:$0xff]   ;;  %v2715_v12 = vld [vmem:[#allocation2 + $0xd0] sm:$0xff]   ;;  %v2827_v40 = vshrl.u32 %v121_v39, 7  ;;  %s2018_s22 = sshll.u32 %s2633_s2, 4  ;;  %s2019_s22 = int_to_ptr.vmem [resolvable:$true] %s2018_s22 }
  0x3a   :  { %2066 = vmatprep.subr.msk.bf16.mxu0 %vm401_vm0, %v2064_v2  ;;  %2486 = vmatprep.subr.msk.bf16.mxu1 %vm401_vm0, %v2064_v2  ;;  %v403_v6 = vsel %vm401_vm0, %v2063_v3, 0  ;;  %v2708_v10 = vld [vmem:[#allocation2 + $0xc8] sm:$0xff]   ;;  %v2507_v13 = vld [vmem:[#allocation2 + $0x18] sm:$0xff]   ;;  %v2509_v15 = vld [vmem:[#allocation2 + $0x20] sm:$0xff]   ;;  %s2599_s23 = scalar_lea.vmem %s2019_s22, 12288  ;;  %p2604_p11 = scmp.lt.s32.totalorder %s2019_s22, %s2019_s22 }
  0x3b   :  { %412 = vmatpush1.bf16.msra.mxu0 %v403_v6  ;;  %2487 = vmatpush1.bf16.msra.mxu1 %v403_v6  ;;  %v2722_v14 = vld [vmem:[#allocation2 + $0xd8] sm:$0xff]   ;;  %v2729_v16 = vld [vmem:[#allocation2 + $0xe0] sm:$0xff]   ;;  %v2511_v17 = vld [vmem:[#allocation2 + $0x28] sm:$0xff]   ;;  %v123_v41 = vsub.s32 0, %v2827_v40  ;;  %v127_v43 = vsub.s32 1, %v2827_v40  ;;  %p2600_p10 = scmp.ne.s32.totalorder %s2019_s22, %s2599_s23  ;;  %p2605_p12 = scmp.lt.s32.totalorder %s2599_s23, %s2599_s23 }
  0x3c   :  { %2488 = vmatprep.subr.msk.bf16.mxu1 %vm401_vm0, %v2502_v5  ;;  %v2736_v18 = vld [vmem:[#allocation2 + $0xe8] sm:$0xff]   ;;  %v2513_v19 = vld [vmem:[#allocation2 + $0x30] sm:$0xff]   ;;  %v2515_v21 = vld [vmem:[#allocation2 + $0x38] sm:$0xff]  }
  0x3d   :  { %v2743_v20 = vld [vmem:[#allocation2 + $0xf0] sm:$0xff]   ;;  %v2750_v22 = vld [vmem:[#allocation2 + $0xf8] sm:$0xff]   ;;  %v2517_v23 = vld [vmem:[#allocation2 + $0x40] sm:$0xff]   ;;  %p2606_p13 = por %p2605_p12, %p2604_p11 }
  0x3e   :  { %2067 = vmatmul.mubr.msk.bf16.vlgmr.msra.gmra.mrb[0].mxu0 %vm304_vm1, %v2500_v4  ;;  %2091 = vmatmul.mubr.msk.bf16.vlgmr.msra.gmra.mrb[0].mxu1 %vm304_vm1, %v2701_v7  ;;  %v2518_v24 = vld [vmem:[#allocation2 + $0x48] sm:$0xff]   ;;  %v2519_v25 = vld [vmem:[#allocation2 + $0x50] sm:$0xff]   ;;  %v2520_v26 = vld [vmem:[#allocation2 + $0x58] sm:$0xff]  }
  0x3f   :  { %2421 = vmatpush3.bf16.msra.mxu1 %v409_v8  ;;  %453 = vmatprep.mubr.bf16.mxu0 %v2632_v0  ;;  %v2521_v27 = vld [vmem:[#allocation2 + $0x60] sm:$0xff]   ;;  %v2522_v28 = vld [vmem:[#allocation2 + $0x68] sm:$0xff]   ;;  %v2523_v29 = vld [vmem:[#allocation2 + $0x70] sm:$0xff]   ;;  %p2607_p0 = pnand %p2606_p13, %p2600_p10 }
  0x40   :  { %693 = vmatprep.mubr.bf16.mxu1 %v2632_v0  ;;  %v2524_v30 = vld [vmem:[#allocation2 + $0x78] sm:$0xff]   ;;  %v2525_v31 = vld [vmem:[#allocation2 + $0x80] sm:$0xff]   ;;  %v2526_v32 = vld [vmem:[#allocation2 + $0x88] sm:$0xff]  }
  0x41   :  { %v2527_v33 = vld [vmem:[#allocation2 + $0x90] sm:$0xff]   ;;  %v2528_v34 = vld [vmem:[#allocation2 + $0x98] sm:$0xff]   ;;  %v2529_v35 = vld [vmem:[#allocation2 + $0xa0] sm:$0xff]  }
  0x42   :  { %v2530_v36 = vld [vmem:[#allocation2 + $0xa8] sm:$0xff]   ;;  %v2531_v37 = vld [vmem:[#allocation2 + $0xb0] sm:$0xff]   ;;  %v2532_v38 = vld [vmem:[#allocation2 + $0xb8] sm:$0xff]  }
  0x43   :  { %v2830_v42 = vld [vmem:[#allocation7] sm:$0x7] }
  0x44   :  { %v2834_v44 = vrot.slane %v2830_v42, %v123_v41  ;;  %v2837_v45 = vrot.slane %v2830_v42, %v127_v43 }
  0x46   :  { %2068 = vmatmul.mubr.msk.bf16.gmra.mrb[4].mxu0 %vm304_vm1, %v2503_v9  ;;  %2092 = vmatmul.mubr.msk.bf16.gmra.mrb[4].mxu1 %vm304_vm1, %v2708_v10 }
  0x47   :  { %463 = vmatprep.mubr.bf16.mxu0 %v2632_v0  ;;  %703 = vmatprep.mubr.bf16.mxu1 %v2632_v0 }
  0x4e   :  { %2069 = vmatmul.mubr.msk.bf16.gmra.mrb[8].mxu0 %vm304_vm1, %v2505_v11  ;;  %2093 = vmatmul.mubr.msk.bf16.gmra.mrb[8].mxu1 %vm304_vm1, %v2715_v12 }
  0x4f   :  { %473 = vmatprep.mubr.bf16.mxu0 %v2632_v0  ;;  %713 = vmatprep.mubr.bf16.mxu1 %v2632_v0 }
  0x56   :  { %2070 = vmatmul.mubr.msk.bf16.gmra.mrb[12].mxu0 %vm304_vm1, %v2507_v13  ;;  %2094 = vmatmul.mubr.msk.bf16.gmra.mrb[12].mxu1 %vm304_vm1, %v2722_v14 }
  0x57   :  { %483 = vmatprep.mubr.bf16.mxu0 %v2632_v0  ;;  %723 = vmatprep.mubr.bf16.mxu1 %v2632_v0 }
  0x5e   :  { %2071 = vmatmul.mubr.msk.bf16.gmra.mrb[16].mxu0 %vm304_vm1, %v2509_v15  ;;  %2095 = vmatmul.mubr.msk.bf16.gmra.mrb[16].mxu1 %vm304_vm1, %v2729_v16 }
  0x5f   :  { %493 = vmatprep.mubr.bf16.mxu0 %v2632_v0  ;;  %733 = vmatprep.mubr.bf16.mxu1 %v2632_v0 }
  0x66   :  { %2072 = vmatmul.mubr.msk.bf16.gmra.mrb[20].mxu0 %vm304_vm1, %v2511_v17  ;;  %2096 = vmatmul.mubr.msk.bf16.gmra.mrb[20].mxu1 %vm304_vm1, %v2736_v18 }
  0x67   :  { %503 = vmatprep.mubr.bf16.mxu0 %v2632_v0  ;;  %743 = vmatprep.mubr.bf16.mxu1 %v2632_v0 }
  0x6e   :  { %2073 = vmatmul.mubr.msk.bf16.gmra.mrb[24].mxu0 %vm304_vm1, %v2513_v19  ;;  %2097 = vmatmul.mubr.msk.bf16.gmra.mrb[24].mxu1 %vm304_vm1, %v2743_v20 }
  0x6f   :  { %513 = vmatprep.mubr.bf16.mxu0 %v2632_v0  ;;  %753 = vmatprep.mubr.bf16.mxu1 %v2632_v0 }
  0x76   :  { %2074 = vmatmul.mubr.msk.bf16.gmra.mrb[28].mxu0 %vm304_vm1, %v2515_v21  ;;  %2098 = vmatmul.mubr.msk.bf16.gmra.mrb[28].mxu1 %vm304_vm1, %v2750_v22 }
  0x77   :  { %523 = vmatprep.mubr.bf16.mxu0 %v2632_v0  ;;  %2422 = vmatprep.mubr.msk.bf16.mxu1 %vm304_vm1, %v2500_v4 }
  0x7e   :  { %2075 = vmatmul.mubr.msk.bf16.gmra.mrb[32].mxu0 %vm304_vm1, %v2517_v23  ;;  %2423 = vmatmul.mubr.msk.bf16.vlgmr.msra.gmra.mrb[32].mxu1 %vm304_vm1, %v2503_v9 }
  0x7f   :  { %533 = vmatprep.mubr.bf16.mxu0 %v2632_v0  ;;  %2426 = vmatprep.mubr.msk.bf16.mxu1 %vm304_vm1, %v2505_v11 }
  0x86   :  { %2076 = vmatmul.mubr.msk.bf16.gmra.mrb[36].mxu0 %vm304_vm1, %v2518_v24  ;;  %2427 = vmatmul.mubr.msk.bf16.gmra.mrb[36].mxu1 %vm304_vm1, %v2507_v13 }
  0x87   :  { %543 = vmatprep.mubr.bf16.mxu0 %v2632_v0  ;;  %2430 = vmatprep.mubr.msk.bf16.mxu1 %vm304_vm1, %v2509_v15 }
  0x8e   :  { %2077 = vmatmul.mubr.msk.bf16.gmra.mrb[40].mxu0 %vm304_vm1, %v2519_v25  ;;  %2431 = vmatmul.mubr.msk.bf16.gmra.mrb[40].mxu1 %vm304_vm1, %v2511_v17 }
  0x8f   :  { %553 = vmatprep.mubr.bf16.mxu0 %v2632_v0  ;;  %2434 = vmatprep.mubr.msk.bf16.mxu1 %vm304_vm1, %v2513_v19 }
  0x96   :  { %2078 = vmatmul.mubr.msk.bf16.gmra.mrb[44].mxu0 %vm304_vm1, %v2520_v26  ;;  %2435 = vmatmul.mubr.msk.bf16.gmra.mrb[44].mxu1 %vm304_vm1, %v2515_v21 }
  0x97   :  { %563 = vmatprep.mubr.bf16.mxu0 %v2632_v0  ;;  %2438 = vmatprep.mubr.msk.bf16.mxu1 %vm304_vm1, %v2517_v23 }
  0x9e   :  { %2079 = vmatmul.mubr.msk.bf16.gmra.mrb[48].mxu0 %vm304_vm1, %v2521_v27  ;;  %2439 = vmatmul.mubr.msk.bf16.gmra.mrb[48].mxu1 %vm304_vm1, %v2518_v24 }
  0x9f   :  { %573 = vmatprep.mubr.bf16.mxu0 %v2632_v0  ;;  %2442 = vmatprep.mubr.msk.bf16.mxu1 %vm304_vm1, %v2519_v25 }
  0xa6   :  { %2080 = vmatmul.mubr.msk.bf16.gmra.mrb[52].mxu0 %vm304_vm1, %v2522_v28  ;;  %2443 = vmatmul.mubr.msk.bf16.gmra.mrb[52].mxu1 %vm304_vm1, %v2520_v26 }
  0xa7   :  { %583 = vmatprep.mubr.bf16.mxu0 %v2632_v0  ;;  %2446 = vmatprep.mubr.msk.bf16.mxu1 %vm304_vm1, %v2521_v27 }
  0xae   :  { %2081 = vmatmul.mubr.msk.bf16.gmra.mrb[56].mxu0 %vm304_vm1, %v2523_v29  ;;  %2447 = vmatmul.mubr.msk.bf16.gmra.mrb[56].mxu1 %vm304_vm1, %v2522_v28 }
  0xaf   :  { %593 = vmatprep.mubr.bf16.mxu0 %v2632_v0  ;;  %2450 = vmatprep.mubr.msk.bf16.mxu1 %vm304_vm1, %v2523_v29 }
  0xb6   :  { %2082 = vmatmul.mubr.msk.bf16.gmra.mrb[60].mxu0 %vm304_vm1, %v2524_v30  ;;  %2451 = vmatmul.mubr.msk.bf16.gmra.mrb[60].mxu1 %vm304_vm1, %v2524_v30 }
  0xb7   :  { %603 = vmatprep.mubr.bf16.mxu0 %v2632_v0  ;;  %2454 = vmatprep.mubr.msk.bf16.mxu1 %vm304_vm1, %v2525_v31 }
  0xbe   :  { %2083 = vmatmul.mubr.msk.bf16.gmra.mrb[64].mxu0 %vm304_vm1, %v2525_v31  ;;  %2455 = vmatmul.mubr.msk.bf16.gmra.mrb[64].mxu1 %vm304_vm1, %v2526_v32 }
  0xbf   :  { %613 = vmatprep.mubr.bf16.mxu0 %v2632_v0  ;;  %2458 = vmatprep.mubr.msk.bf16.mxu1 %vm304_vm1, %v2527_v33 }
  0xc6   :  { %2084 = vmatmul.mubr.msk.bf16.gmra.mrb[68].mxu0 %vm304_vm1, %v2526_v32  ;;  %2459 = vmatmul.mubr.msk.bf16.gmra.mrb[68].mxu1 %vm304_vm1, %v2528_v34 }
  0xc7   :  { %623 = vmatprep.mubr.bf16.mxu0 %v2632_v0  ;;  %2462 = vmatprep.mubr.msk.bf16.mxu1 %vm304_vm1, %v2529_v35 }
  0xce   :  { %2085 = vmatmul.mubr.msk.bf16.gmra.mrb[72].mxu0 %vm304_vm1, %v2527_v33  ;;  %2463 = vmatmul.mubr.msk.bf16.gmra.mrb[72].mxu1 %vm304_vm1, %v2530_v36 }
  0xcf   :  { %633 = vmatprep.mubr.bf16.mxu0 %v2632_v0  ;;  %2466 = vmatprep.mubr.msk.bf16.mxu1 %vm304_vm1, %v2531_v37 }
  0xd6   :  { %2086 = vmatmul.mubr.msk.bf16.gmra.mrb[76].mxu0 %vm304_vm1, %v2528_v34  ;;  %2467 = vmatmul.mubr.msk.bf16.gmra.mrb[76].mxu1 %vm304_vm1, %v2532_v38 }
  0xd7   :  { %643 = vmatprep.mubr.bf16.mxu0 %v2632_v0  ;;  %2470 = vmatprep.mubr.msk.bf16.mxu1 %vm304_vm1, %v2701_v7 }
  0xde   :  { %2087 = vmatmul.mubr.msk.bf16.gmra.mrb[80].mxu0 %vm304_vm1, %v2529_v35  ;;  %2471 = vmatmul.mubr.msk.bf16.gmra.mrb[80].mxu1 %vm304_vm1, %v2708_v10 }
  0xdf   :  { %653 = vmatprep.mubr.bf16.mxu0 %v2632_v0  ;;  %2474 = vmatprep.mubr.msk.bf16.mxu1 %vm304_vm1, %v2715_v12 }
  0xe6   :  { %2088 = vmatmul.mubr.msk.bf16.gmra.mrb[84].mxu0 %vm304_vm1, %v2530_v36  ;;  %2475 = vmatmul.mubr.msk.bf16.gmra.mrb[84].mxu1 %vm304_vm1, %v2722_v14 }
  0xe7   :  { %663 = vmatprep.mubr.bf16.mxu0 %v2632_v0  ;;  %2478 = vmatprep.mubr.msk.bf16.mxu1 %vm304_vm1, %v2729_v16 }
  0xee   :  { %2089 = vmatmul.mubr.msk.bf16.gmra.mrb[88].mxu0 %vm304_vm1, %v2531_v37  ;;  %2479 = vmatmul.mubr.msk.bf16.gmra.mrb[88].mxu1 %vm304_vm1, %v2736_v18 }
  0xef   :  { %673 = vmatprep.mubr.bf16.mxu0 %v2632_v0  ;;  %2482 = vmatprep.mubr.msk.bf16.mxu1 %vm304_vm1, %v2743_v20 }
  0xf6   :  { %2090 = vmatmul.mubr.msk.bf16.gmra.mrb[92].mxu0 %vm304_vm1, %v2532_v38  ;;  %2483 = vmatmul.mubr.msk.bf16.gmra.mrb[92].mxu1 %vm304_vm1, %v2750_v22 }
 0x111   :  { %v445_v46 = vpop.f32.mrb[0].mxu0  ;;  %v685_v47 = vpop.f32.mrb[0].mxu1 }
 0x112   :  { %v446_v48 = vadd.f32 %v445_v46, %v2834_v44  ;;  %v686_v49 = vadd.f32 %v685_v47, %v2834_v44  ;;  %v447_v50 = vpop.f32.mrb[1].mxu0  ;;  %v687_v51 = vpop.f32.mrb[1].mxu1 }
 0x113   :  { %v448_v52 = vadd.f32 %v447_v50, %v2837_v45  ;;  %v688_v53 = vadd.f32 %v687_v51, %v2837_v45  ;;  %v449_v54 = vpop.f32.mrb[2].mxu0  ;;  %v689_v55 = vpop.f32.mrb[2].mxu1 }
 0x114   :  { %v1053_v56 = vmax.f32 %v446_v48, 0.0  ;;  %v1197_v57 = vmax.f32 %v686_v49, 0.0  ;;  %v450_v58 = vadd.f32 %v449_v54, %v2834_v44  ;;  %v690_v59 = vadd.f32 %v689_v55, %v2834_v44  ;;  %v451_v60 = vpop.f32.mrb[3].mxu0  ;;  %v691_v61 = vpop.f32.mrb[3].mxu1 }
 0x115   :  { %v1054_v62 = vmax.f32 %v448_v52, 0.0  ;;  %v1198_v63 = vmax.f32 %v688_v53, 0.0  ;;  %v452_v0 = vadd.f32 %v451_v60, %v2837_v45  ;;  %v692_v1 = vadd.f32 %v691_v61, %v2837_v45 }
 0x116   :  { %v1056_v2 = vmax.f32 %v450_v58, 0.0  ;;  %v1200_v3 = vmax.f32 %v690_v59, 0.0 }
 0x117   :  { %v2259_v4 = vpack.c.bf16 %v1054_v62, %v1053_v56  ;;  %v2355_v5 = vpack.c.bf16 %v1198_v63, %v1197_v57  ;;  %v1057_v6 = vmax.f32 %v452_v0, 0.0  ;;  %v1201_v7 = vmax.f32 %v692_v1, 0.0 }
 0x119   :  { %1885 = vst [vmem:[#allocation8] sm:$0xff] %v2259_v4  ;;  %1981 = vst [vmem:[#allocation8 + $0x240] sm:$0xff] %v2355_v5  ;;  %v2261_v8 = vpack.c.bf16 %v1057_v6, %v1056_v2  ;;  %v2357_v9 = vpack.c.bf16 %v1201_v7, %v1200_v3  ;;  %v455_v10 = vpop.f32.mrb[4].mxu0  ;;  %v695_v11 = vpop.f32.mrb[4].mxu1 }
 0x11a   :  { %v456_v12 = vadd.f32 %v455_v10, %v2834_v44  ;;  %v696_v13 = vadd.f32 %v695_v11, %v2834_v44  ;;  %v457_v14 = vpop.f32.mrb[5].mxu0  ;;  %v697_v15 = vpop.f32.mrb[5].mxu1 }
 0x11b   :  { %1887 = vst [vmem:[#allocation8 + $0xc] sm:$0xff] %v2261_v8  ;;  %1983 = vst [vmem:[#allocation8 + $0x24c] sm:$0xff] %v2357_v9  ;;  %v458_v16 = vadd.f32 %v457_v14, %v2837_v45  ;;  %v698_v17 = vadd.f32 %v697_v15, %v2837_v45  ;;  %v459_v18 = vpop.f32.mrb[6].mxu0  ;;  %v699_v19 = vpop.f32.mrb[6].mxu1 }
 0x11c   :  { %v1059_v20 = vmax.f32 %v456_v12, 0.0  ;;  %v1203_v21 = vmax.f32 %v696_v13, 0.0  ;;  %v460_v22 = vadd.f32 %v459_v18, %v2834_v44  ;;  %v700_v23 = vadd.f32 %v699_v19, %v2834_v44  ;;  %v461_v24 = vpop.f32.mrb[7].mxu0  ;;  %v701_v25 = vpop.f32.mrb[7].mxu1 }
 0x11d   :  { %v1060_v26 = vmax.f32 %v458_v16, 0.0  ;;  %v1204_v27 = vmax.f32 %v698_v17, 0.0  ;;  %v462_v28 = vadd.f32 %v461_v24, %v2837_v45  ;;  %v702_v29 = vadd.f32 %v701_v25, %v2837_v45 }
 0x11e   :  { %v1062_v30 = vmax.f32 %v460_v22, 0.0  ;;  %v1206_v31 = vmax.f32 %v700_v23, 0.0 }
 0x11f   :  { %v2263_v32 = vpack.c.bf16 %v1060_v26, %v1059_v20  ;;  %v2359_v33 = vpack.c.bf16 %v1204_v27, %v1203_v21  ;;  %v1063_v34 = vmax.f32 %v462_v28, 0.0  ;;  %v1207_v35 = vmax.f32 %v702_v29, 0.0 }
 0x121   :  { %1889 = vst [vmem:[#allocation8 + $0x18] sm:$0xff] %v2263_v32  ;;  %1985 = vst [vmem:[#allocation8 + $0x258] sm:$0xff] %v2359_v33  ;;  %v2265_v36 = vpack.c.bf16 %v1063_v34, %v1062_v30  ;;  %v2361_v37 = vpack.c.bf16 %v1207_v35, %v1206_v31  ;;  %v465_v38 = vpop.f32.mrb[8].mxu0  ;;  %v705_v39 = vpop.f32.mrb[8].mxu1 }
 0x122   :  { %v466_v41 = vadd.f32 %v465_v38, %v2834_v44  ;;  %v706_v43 = vadd.f32 %v705_v39, %v2834_v44  ;;  %v467_v46 = vpop.f32.mrb[9].mxu0  ;;  %v707_v47 = vpop.f32.mrb[9].mxu1 }
 0x123   :  { %1891 = vst [vmem:[#allocation8 + $0x24] sm:$0xff] %v2265_v36  ;;  %1987 = vst [vmem:[#allocation8 + $0x264] sm:$0xff] %v2361_v37  ;;  %v468_v48 = vadd.f32 %v467_v46, %v2837_v45  ;;  %v708_v49 = vadd.f32 %v707_v47, %v2837_v45  ;;  %v469_v50 = vpop.f32.mrb[10].mxu0  ;;  %v709_v51 = vpop.f32.mrb[10].mxu1 }
 0x124   :  { %v1065_v52 = vmax.f32 %v466_v41, 0.0  ;;  %v1209_v53 = vmax.f32 %v706_v43, 0.0  ;;  %v470_v54 = vadd.f32 %v469_v50, %v2834_v44  ;;  %v710_v55 = vadd.f32 %v709_v51, %v2834_v44  ;;  %v471_v56 = vpop.f32.mrb[11].mxu0  ;;  %v711_v57 = vpop.f32.mrb[11].mxu1 }
 0x125   :  { %v1066_v58 = vmax.f32 %v468_v48, 0.0  ;;  %v1210_v59 = vmax.f32 %v708_v49, 0.0  ;;  %v472_v60 = vadd.f32 %v471_v56, %v2837_v45  ;;  %v712_v61 = vadd.f32 %v711_v57, %v2837_v45 }
 0x126   :  { %v1068_v62 = vmax.f32 %v470_v54, 0.0  ;;  %v1212_v63 = vmax.f32 %v710_v55, 0.0 }
 0x127   :  { %v2267_v0 = vpack.c.bf16 %v1066_v58, %v1065_v52  ;;  %v2363_v1 = vpack.c.bf16 %v1210_v59, %v1209_v53  ;;  %v1069_v2 = vmax.f32 %v472_v60, 0.0  ;;  %v1213_v3 = vmax.f32 %v712_v61, 0.0 }
 0x129   :  { %1893 = vst [vmem:[#allocation8 + $0x30] sm:$0xff] %v2267_v0  ;;  %1989 = vst [vmem:[#allocation8 + $0x270] sm:$0xff] %v2363_v1  ;;  %v2269_v4 = vpack.c.bf16 %v1069_v2, %v1068_v62  ;;  %v2365_v5 = vpack.c.bf16 %v1213_v3, %v1212_v63  ;;  %v475_v6 = vpop.f32.mrb[12].mxu0  ;;  %v715_v7 = vpop.f32.mrb[12].mxu1 }
 0x12a   :  { %v476_v8 = vadd.f32 %v475_v6, %v2834_v44  ;;  %v716_v9 = vadd.f32 %v715_v7, %v2834_v44  ;;  %v477_v10 = vpop.f32.mrb[13].mxu0  ;;  %v717_v11 = vpop.f32.mrb[13].mxu1 }
 0x12b   :  { %1895 = vst [vmem:[#allocation8 + $0x3c] sm:$0xff] %v2269_v4  ;;  %1991 = vst [vmem:[#allocation8 + $0x27c] sm:$0xff] %v2365_v5  ;;  %v478_v12 = vadd.f32 %v477_v10, %v2837_v45  ;;  %v718_v13 = vadd.f32 %v717_v11, %v2837_v45  ;;  %v479_v14 = vpop.f32.mrb[14].mxu0  ;;  %v719_v15 = vpop.f32.mrb[14].mxu1 }
 0x12c   :  { %v1071_v16 = vmax.f32 %v476_v8, 0.0  ;;  %v1215_v17 = vmax.f32 %v716_v9, 0.0  ;;  %v480_v18 = vadd.f32 %v479_v14, %v2834_v44  ;;  %v720_v19 = vadd.f32 %v719_v15, %v2834_v44  ;;  %v481_v20 = vpop.f32.mrb[15].mxu0  ;;  %v721_v21 = vpop.f32.mrb[15].mxu1 }
 0x12d   :  { %v1072_v22 = vmax.f32 %v478_v12, 0.0  ;;  %v1216_v23 = vmax.f32 %v718_v13, 0.0  ;;  %v482_v24 = vadd.f32 %v481_v20, %v2837_v45  ;;  %v722_v25 = vadd.f32 %v721_v21, %v2837_v45 }
 0x12e   :  { %v1074_v26 = vmax.f32 %v480_v18, 0.0  ;;  %v1218_v27 = vmax.f32 %v720_v19, 0.0 }
 0x12f   :  { %v2271_v28 = vpack.c.bf16 %v1072_v22, %v1071_v16  ;;  %v2367_v29 = vpack.c.bf16 %v1216_v23, %v1215_v17  ;;  %v1075_v30 = vmax.f32 %v482_v24, 0.0  ;;  %v1219_v31 = vmax.f32 %v722_v25, 0.0 }
 0x131   :  { %1897 = vst [vmem:[#allocation8 + $0x48] sm:$0xff] %v2271_v28  ;;  %1993 = vst [vmem:[#allocation8 + $0x288] sm:$0xff] %v2367_v29  ;;  %v2273_v32 = vpack.c.bf16 %v1075_v30, %v1074_v26  ;;  %v2369_v33 = vpack.c.bf16 %v1219_v31, %v1218_v27  ;;  %v485_v34 = vpop.f32.mrb[16].mxu0  ;;  %v725_v35 = vpop.f32.mrb[16].mxu1 }
 0x132   :  { %v486_v36 = vadd.f32 %v485_v34, %v2834_v44  ;;  %v726_v37 = vadd.f32 %v725_v35, %v2834_v44  ;;  %v487_v38 = vpop.f32.mrb[17].mxu0  ;;  %v727_v39 = vpop.f32.mrb[17].mxu1 }
 0x133   :  { %1899 = vst [vmem:[#allocation8 + $0x54] sm:$0xff] %v2273_v32  ;;  %1995 = vst [vmem:[#allocation8 + $0x294] sm:$0xff] %v2369_v33  ;;  %v488_v41 = vadd.f32 %v487_v38, %v2837_v45  ;;  %v728_v43 = vadd.f32 %v727_v39, %v2837_v45  ;;  %v489_v46 = vpop.f32.mrb[18].mxu0  ;;  %v729_v47 = vpop.f32.mrb[18].mxu1 }
 0x134   :  { %v1077_v48 = vmax.f32 %v486_v36, 0.0  ;;  %v1221_v49 = vmax.f32 %v726_v37, 0.0  ;;  %v490_v50 = vadd.f32 %v489_v46, %v2834_v44  ;;  %v730_v51 = vadd.f32 %v729_v47, %v2834_v44  ;;  %v491_v52 = vpop.f32.mrb[19].mxu0  ;;  %v731_v53 = vpop.f32.mrb[19].mxu1 }
 0x135   :  { %v1078_v54 = vmax.f32 %v488_v41, 0.0  ;;  %v1222_v55 = vmax.f32 %v728_v43, 0.0  ;;  %v492_v56 = vadd.f32 %v491_v52, %v2837_v45  ;;  %v732_v57 = vadd.f32 %v731_v53, %v2837_v45 }
 0x136   :  { %v1080_v58 = vmax.f32 %v490_v50, 0.0  ;;  %v1224_v59 = vmax.f32 %v730_v51, 0.0 }
 0x137   :  { %v2275_v60 = vpack.c.bf16 %v1078_v54, %v1077_v48  ;;  %v2371_v61 = vpack.c.bf16 %v1222_v55, %v1221_v49  ;;  %v1081_v62 = vmax.f32 %v492_v56, 0.0  ;;  %v1225_v63 = vmax.f32 %v732_v57, 0.0 }
 0x139   :  { %1901 = vst [vmem:[#allocation8 + $0x60] sm:$0xff] %v2275_v60  ;;  %1997 = vst [vmem:[#allocation8 + $0x2a0] sm:$0xff] %v2371_v61  ;;  %v2277_v0 = vpack.c.bf16 %v1081_v62, %v1080_v58  ;;  %v2373_v1 = vpack.c.bf16 %v1225_v63, %v1224_v59  ;;  %v495_v2 = vpop.f32.mrb[20].mxu0  ;;  %v735_v3 = vpop.f32.mrb[20].mxu1 }
 0x13a   :  { %v496_v4 = vadd.f32 %v495_v2, %v2834_v44  ;;  %v736_v5 = vadd.f32 %v735_v3, %v2834_v44  ;;  %v497_v6 = vpop.f32.mrb[21].mxu0  ;;  %v737_v7 = vpop.f32.mrb[21].mxu1 }
 0x13b   :  { %1903 = vst [vmem:[#allocation8 + $0x6c] sm:$0xff] %v2277_v0  ;;  %1999 = vst [vmem:[#allocation8 + $0x2ac] sm:$0xff] %v2373_v1  ;;  %v498_v8 = vadd.f32 %v497_v6, %v2837_v45  ;;  %v738_v9 = vadd.f32 %v737_v7, %v2837_v45  ;;  %v499_v10 = vpop.f32.mrb[22].mxu0  ;;  %v739_v11 = vpop.f32.mrb[22].mxu1 }
 0x13c   :  { %v1083_v12 = vmax.f32 %v496_v4, 0.0  ;;  %v1227_v13 = vmax.f32 %v736_v5, 0.0  ;;  %v500_v14 = vadd.f32 %v499_v10, %v2834_v44  ;;  %v740_v15 = vadd.f32 %v739_v11, %v2834_v44  ;;  %v501_v16 = vpop.f32.mrb[23].mxu0  ;;  %v741_v17 = vpop.f32.mrb[23].mxu1 }
 0x13d   :  { %v1084_v18 = vmax.f32 %v498_v8, 0.0  ;;  %v1228_v19 = vmax.f32 %v738_v9, 0.0  ;;  %v502_v20 = vadd.f32 %v501_v16, %v2837_v45  ;;  %v742_v21 = vadd.f32 %v741_v17, %v2837_v45 }
 0x13e   :  { %v1086_v22 = vmax.f32 %v500_v14, 0.0  ;;  %v1230_v23 = vmax.f32 %v740_v15, 0.0  ;;  %v131_v4 = vsub.s32 2, %v2827_v40 }
 0x13f   :  { %v2279_v24 = vpack.c.bf16 %v1084_v18, %v1083_v12  ;;  %v2375_v25 = vpack.c.bf16 %v1228_v19, %v1227_v13  ;;  %v1087_v26 = vmax.f32 %v502_v20, 0.0  ;;  %v1231_v27 = vmax.f32 %v742_v21, 0.0 }
 0x140   :  { %v2905_v20 = vrot.slane %v2830_v42, %v131_v4 }
 0x141   :  { %1905 = vst [vmem:[#allocation8 + $0x78] sm:$0xff] %v2279_v24  ;;  %2001 = vst [vmem:[#allocation8 + $0x2b8] sm:$0xff] %v2375_v25  ;;  %v2281_v28 = vpack.c.bf16 %v1087_v26, %v1086_v22  ;;  %v2377_v29 = vpack.c.bf16 %v1231_v27, %v1230_v23  ;;  %v505_v30 = vpop.f32.mrb[24].mxu0  ;;  %v745_v31 = vpop.f32.mrb[24].mxu1 }
 0x142   :  { %v506_v32 = vadd.f32 %v505_v30, %v2834_v44  ;;  %v746_v33 = vadd.f32 %v745_v31, %v2834_v44  ;;  %v507_v34 = vpop.f32.mrb[25].mxu0  ;;  %v747_v35 = vpop.f32.mrb[25].mxu1 }
 0x143   :  { %1907 = vst [vmem:[#allocation8 + $0x84] sm:$0xff] %v2281_v28  ;;  %2003 = vst [vmem:[#allocation8 + $0x2c4] sm:$0xff] %v2377_v29  ;;  %v508_v36 = vadd.f32 %v507_v34, %v2837_v45  ;;  %v748_v37 = vadd.f32 %v747_v35, %v2837_v45  ;;  %v509_v38 = vpop.f32.mrb[26].mxu0  ;;  %v749_v39 = vpop.f32.mrb[26].mxu1 }
 0x144   :  { %v1089_v41 = vmax.f32 %v506_v32, 0.0  ;;  %v1233_v43 = vmax.f32 %v746_v33, 0.0  ;;  %v510_v46 = vadd.f32 %v509_v38, %v2834_v44  ;;  %v750_v47 = vadd.f32 %v749_v39, %v2834_v44  ;;  %v511_v48 = vpop.f32.mrb[27].mxu0  ;;  %v751_v49 = vpop.f32.mrb[27].mxu1 }
 0x145   :  { %v1090_v50 = vmax.f32 %v508_v36, 0.0  ;;  %v1234_v51 = vmax.f32 %v748_v37, 0.0  ;;  %v512_v52 = vadd.f32 %v511_v48, %v2837_v45  ;;  %v752_v53 = vadd.f32 %v751_v49, %v2837_v45 }
 0x146   :  { %v1092_v54 = vmax.f32 %v510_v46, 0.0  ;;  %v1236_v55 = vmax.f32 %v750_v47, 0.0 }
 0x147   :  { %v2283_v56 = vpack.c.bf16 %v1090_v50, %v1089_v41  ;;  %v2379_v57 = vpack.c.bf16 %v1234_v51, %v1233_v43  ;;  %v1093_v58 = vmax.f32 %v512_v52, 0.0  ;;  %v1237_v59 = vmax.f32 %v752_v53, 0.0 }
 0x149   :  { %1909 = vst [vmem:[#allocation8 + $0x90] sm:$0xff] %v2283_v56  ;;  %2005 = vst [vmem:[#allocation8 + $0x2d0] sm:$0xff] %v2379_v57  ;;  %v2285_v60 = vpack.c.bf16 %v1093_v58, %v1092_v54  ;;  %v2381_v61 = vpack.c.bf16 %v1237_v59, %v1236_v55  ;;  %v515_v62 = vpop.f32.mrb[28].mxu0  ;;  %v755_v63 = vpop.f32.mrb[28].mxu1 }
 0x14a   :  { %v516_v0 = vadd.f32 %v515_v62, %v2834_v44  ;;  %v756_v1 = vadd.f32 %v755_v63, %v2834_v44  ;;  %v517_v2 = vpop.f32.mrb[29].mxu0  ;;  %v757_v3 = vpop.f32.mrb[29].mxu1 }
 0x14b   :  { %1911 = vst [vmem:[#allocation8 + $0x9c] sm:$0xff] %v2285_v60  ;;  %2007 = vst [vmem:[#allocation8 + $0x2dc] sm:$0xff] %v2381_v61  ;;  %v518_v5 = vadd.f32 %v517_v2, %v2837_v45  ;;  %v758_v6 = vadd.f32 %v757_v3, %v2837_v45  ;;  %v519_v7 = vpop.f32.mrb[30].mxu0  ;;  %v759_v8 = vpop.f32.mrb[30].mxu1 }
 0x14c   :  { %v1095_v9 = vmax.f32 %v516_v0, 0.0  ;;  %v1239_v10 = vmax.f32 %v756_v1, 0.0  ;;  %v520_v11 = vadd.f32 %v519_v7, %v2834_v44  ;;  %v760_v12 = vadd.f32 %v759_v8, %v2834_v44  ;;  %v521_v13 = vpop.f32.mrb[31].mxu0  ;;  %v761_v14 = vpop.f32.mrb[31].mxu1 }
 0x14d   :  { %v1096_v15 = vmax.f32 %v518_v5, 0.0  ;;  %v1240_v16 = vmax.f32 %v758_v6, 0.0  ;;  %v522_v40 = vadd.f32 %v521_v13, %v2837_v45  ;;  %v762_v17 = vadd.f32 %v761_v14, %v2837_v45 }
 0x14e   :  { %v1098_v18 = vmax.f32 %v520_v11, 0.0  ;;  %v1242_v19 = vmax.f32 %v760_v12, 0.0 }
 0x14f   :  { %v2287_v21 = vpack.c.bf16 %v1096_v15, %v1095_v9  ;;  %v2383_v22 = vpack.c.bf16 %v1240_v16, %v1239_v10  ;;  %v1099_v23 = vmax.f32 %v522_v40, 0.0  ;;  %v1243_v24 = vmax.f32 %v762_v17, 0.0 }
 0x151   :  { %1913 = vst [vmem:[#allocation8 + $0xa8] sm:$0xff] %v2287_v21  ;;  %2009 = vst [vmem:[#allocation8 + $0x2e8] sm:$0xff] %v2383_v22  ;;  %v2289_v25 = vpack.c.bf16 %v1099_v23, %v1098_v18  ;;  %v2385_v26 = vpack.c.bf16 %v1243_v24, %v1242_v19  ;;  %v525_v27 = vpop.f32.mrb[32].mxu0  ;;  %v2424_v28 = vpop.f32.mrb[32].mxu1 }
 0x152   :  { %v526_v29 = vadd.f32 %v525_v27, %v2834_v44  ;;  %v807_v30 = vadd.f32 %v2424_v28, %v2905_v20  ;;  %v527_v31 = vpop.f32.mrb[33].mxu0  ;;  %v798_v32 = vpop.f32.mrb[33].mxu1 }
 0x153   :  { %1915 = vst [vmem:[#allocation8 + $0xb4] sm:$0xff] %v2289_v25  ;;  %2011 = vst [vmem:[#allocation8 + $0x2f4] sm:$0xff] %v2385_v26  ;;  %v528_v42 = vadd.f32 %v527_v31, %v2837_v45  ;;  %v799_v33 = vadd.f32 %v798_v32, %v2905_v20  ;;  %v529_v34 = vpop.f32.mrb[34].mxu0  ;;  %v2425_v35 = vpop.f32.mrb[34].mxu1 }
 0x154   :  { %v1101_v36 = vmax.f32 %v526_v29, 0.0  ;;  %v1061_v37 = vmax.f32 %v807_v30, 0.0  ;;  %v530_v38 = vadd.f32 %v529_v34, %v2834_v44  ;;  %v810_v39 = vadd.f32 %v2425_v35, %v2905_v20  ;;  %v531_v41 = vpop.f32.mrb[35].mxu0  ;;  %v801_v43 = vpop.f32.mrb[35].mxu1 }
 0x155   :  { %v1102_v46 = vmax.f32 %v528_v42, 0.0  ;;  %v1055_v47 = vmax.f32 %v799_v33, 0.0  ;;  %v532_v48 = vadd.f32 %v531_v41, %v2837_v45  ;;  %v802_v49 = vadd.f32 %v801_v43, %v2905_v20 }
 0x156   :  { %v2264_v50 = vpack.c.bf16 %v1061_v37, %v1061_v37  ;;  %v1104_v51 = vmax.f32 %v530_v38, 0.0  ;;  %v1064_v52 = vmax.f32 %v810_v39, 0.0 }
 0x157   :  { %v2291_v53 = vpack.c.bf16 %v1102_v46, %v1101_v36  ;;  %v2260_v54 = vpack.c.bf16 %v1055_v47, %v1055_v47  ;;  %v1105_v55 = vmax.f32 %v532_v48, 0.0  ;;  %v1058_v56 = vmax.f32 %v802_v49, 0.0 }
 0x158   :  { %1890 = vst [vmem:[#allocation8 + $0x20] sm:$0xf] %v2264_v50  ;;  %v2266_v57 = vpack.c.bf16 %v1064_v52, %v1064_v52 }
 0x159   :  { %1917 = vst [vmem:[#allocation8 + $0xc0] sm:$0xff] %v2291_v53  ;;  %1886 = vst [vmem:[#allocation8 + $0x8] sm:$0xf] %v2260_v54  ;;  %v2293_v58 = vpack.c.bf16 %v1105_v55, %v1104_v51  ;;  %v2262_v59 = vpack.c.bf16 %v1058_v56, %v1058_v56  ;;  %v535_v60 = vpop.f32.mrb[36].mxu0  ;;  %v2428_v61 = vpop.f32.mrb[36].mxu1 }
 0x15a   :  { %1892 = vst [vmem:[#allocation8 + $0x2c] sm:$0xf] %v2266_v57  ;;  %v536_v62 = vadd.f32 %v535_v60, %v2834_v44  ;;  %v823_v63 = vadd.f32 %v2428_v61, %v2905_v20  ;;  %v537_v0 = vpop.f32.mrb[37].mxu0  ;;  %v814_v1 = vpop.f32.mrb[37].mxu1 }
 0x15b   :  { %1919 = vst [vmem:[#allocation8 + $0xcc] sm:$0xff] %v2293_v58  ;;  %1888 = vst [vmem:[#allocation8 + $0x14] sm:$0xf] %v2262_v59  ;;  %v538_v2 = vadd.f32 %v537_v0, %v2837_v45  ;;  %v815_v3 = vadd.f32 %v814_v1, %v2905_v20  ;;  %v539_v4 = vpop.f32.mrb[38].mxu0  ;;  %v2429_v5 = vpop.f32.mrb[38].mxu1 }
 0x15c   :  { %v1107_v6 = vmax.f32 %v536_v62, 0.0  ;;  %v1073_v7 = vmax.f32 %v823_v63, 0.0  ;;  %v540_v8 = vadd.f32 %v539_v4, %v2834_v44  ;;  %v826_v9 = vadd.f32 %v2429_v5, %v2905_v20  ;;  %v541_v10 = vpop.f32.mrb[39].mxu0  ;;  %v817_v11 = vpop.f32.mrb[39].mxu1 }
 0x15d   :  { %v1108_v12 = vmax.f32 %v538_v2, 0.0  ;;  %v1067_v13 = vmax.f32 %v815_v3, 0.0  ;;  %v542_v14 = vadd.f32 %v541_v10, %v2837_v45  ;;  %v818_v15 = vadd.f32 %v817_v11, %v2905_v20 }
 0x15e   :  { %v2272_v16 = vpack.c.bf16 %v1073_v7, %v1073_v7  ;;  %v1110_v40 = vmax.f32 %v540_v8, 0.0  ;;  %v1076_v17 = vmax.f32 %v826_v9, 0.0 }
 0x15f   :  { %v2295_v18 = vpack.c.bf16 %v1108_v12, %v1107_v6  ;;  %v2268_v19 = vpack.c.bf16 %v1067_v13, %v1067_v13  ;;  %v1111_v21 = vmax.f32 %v542_v14, 0.0  ;;  %v1070_v22 = vmax.f32 %v818_v15, 0.0 }
 0x160   :  { %1898 = vst [vmem:[#allocation8 + $0x50] sm:$0xf] %v2272_v16  ;;  %v2274_v23 = vpack.c.bf16 %v1076_v17, %v1076_v17 }
 0x161   :  { %1921 = vst [vmem:[#allocation8 + $0xd8] sm:$0xff] %v2295_v18  ;;  %1894 = vst [vmem:[#allocation8 + $0x38] sm:$0xf] %v2268_v19  ;;  %v2297_v24 = vpack.c.bf16 %v1111_v21, %v1110_v40  ;;  %v2270_v25 = vpack.c.bf16 %v1070_v22, %v1070_v22  ;;  %v545_v26 = vpop.f32.mrb[40].mxu0  ;;  %v2432_v27 = vpop.f32.mrb[40].mxu1 }
 0x162   :  { %1900 = vst [vmem:[#allocation8 + $0x5c] sm:$0xf] %v2274_v23  ;;  %v546_v28 = vadd.f32 %v545_v26, %v2834_v44  ;;  %v839_v29 = vadd.f32 %v2432_v27, %v2905_v20  ;;  %v547_v30 = vpop.f32.mrb[41].mxu0  ;;  %v830_v31 = vpop.f32.mrb[41].mxu1 }
 0x163   :  { %1923 = vst [vmem:[#allocation8 + $0xe4] sm:$0xff] %v2297_v24  ;;  %1896 = vst [vmem:[#allocation8 + $0x44] sm:$0xf] %v2270_v25  ;;  %v548_v32 = vadd.f32 %v547_v30, %v2837_v45  ;;  %v831_v42 = vadd.f32 %v830_v31, %v2905_v20  ;;  %v549_v33 = vpop.f32.mrb[42].mxu0  ;;  %v2433_v34 = vpop.f32.mrb[42].mxu1 }
 0x164   :  { %v1113_v35 = vmax.f32 %v546_v28, 0.0  ;;  %v1085_v36 = vmax.f32 %v839_v29, 0.0  ;;  %v550_v37 = vadd.f32 %v549_v33, %v2834_v44  ;;  %v842_v38 = vadd.f32 %v2433_v34, %v2905_v20  ;;  %v551_v39 = vpop.f32.mrb[43].mxu0  ;;  %v833_v41 = vpop.f32.mrb[43].mxu1 }
 0x165   :  { %v1114_v43 = vmax.f32 %v548_v32, 0.0  ;;  %v1079_v46 = vmax.f32 %v831_v42, 0.0  ;;  %v552_v47 = vadd.f32 %v551_v39, %v2837_v45  ;;  %v834_v48 = vadd.f32 %v833_v41, %v2905_v20 }
 0x166   :  { %v2280_v49 = vpack.c.bf16 %v1085_v36, %v1085_v36  ;;  %v1116_v50 = vmax.f32 %v550_v37, 0.0  ;;  %v1088_v51 = vmax.f32 %v842_v38, 0.0 }
 0x167   :  { %v2299_v52 = vpack.c.bf16 %v1114_v43, %v1113_v35  ;;  %v2276_v53 = vpack.c.bf16 %v1079_v46, %v1079_v46  ;;  %v1117_v54 = vmax.f32 %v552_v47, 0.0  ;;  %v1082_v55 = vmax.f32 %v834_v48, 0.0 }
 0x168   :  { %1906 = vst [vmem:[#allocation8 + $0x80] sm:$0xf] %v2280_v49  ;;  %v2282_v56 = vpack.c.bf16 %v1088_v51, %v1088_v51 }
 0x169   :  { %1925 = vst [vmem:[#allocation8 + $0xf0] sm:$0xff] %v2299_v52  ;;  %1902 = vst [vmem:[#allocation8 + $0x68] sm:$0xf] %v2276_v53  ;;  %v2301_v57 = vpack.c.bf16 %v1117_v54, %v1116_v50  ;;  %v2278_v58 = vpack.c.bf16 %v1082_v55, %v1082_v55  ;;  %v555_v59 = vpop.f32.mrb[44].mxu0  ;;  %v2436_v60 = vpop.f32.mrb[44].mxu1 }
 0x16a   :  { %1908 = vst [vmem:[#allocation8 + $0x8c] sm:$0xf] %v2282_v56  ;;  %v556_v61 = vadd.f32 %v555_v59, %v2834_v44  ;;  %v855_v62 = vadd.f32 %v2436_v60, %v2905_v20  ;;  %v557_v63 = vpop.f32.mrb[45].mxu0  ;;  %v846_v0 = vpop.f32.mrb[45].mxu1 }
 0x16b   :  { %1927 = vst [vmem:[#allocation8 + $0xfc] sm:$0xff] %v2301_v57  ;;  %1904 = vst [vmem:[#allocation8 + $0x74] sm:$0xf] %v2278_v58  ;;  %v558_v1 = vadd.f32 %v557_v63, %v2837_v45  ;;  %v847_v2 = vadd.f32 %v846_v0, %v2905_v20  ;;  %v559_v3 = vpop.f32.mrb[46].mxu0  ;;  %v2437_v4 = vpop.f32.mrb[46].mxu1 }
 0x16c   :  { %v1119_v5 = vmax.f32 %v556_v61, 0.0  ;;  %v1097_v6 = vmax.f32 %v855_v62, 0.0  ;;  %v560_v7 = vadd.f32 %v559_v3, %v2834_v44  ;;  %v858_v8 = vadd.f32 %v2437_v4, %v2905_v20  ;;  %v561_v9 = vpop.f32.mrb[47].mxu0  ;;  %v849_v10 = vpop.f32.mrb[47].mxu1 }
 0x16d   :  { %v1120_v11 = vmax.f32 %v558_v1, 0.0  ;;  %v1091_v12 = vmax.f32 %v847_v2, 0.0  ;;  %v562_v13 = vadd.f32 %v561_v9, %v2837_v45  ;;  %v850_v14 = vadd.f32 %v849_v10, %v2905_v20 }
 0x16e   :  { %v2288_v15 = vpack.c.bf16 %v1097_v6, %v1097_v6  ;;  %v1122_v16 = vmax.f32 %v560_v7, 0.0  ;;  %v1100_v40 = vmax.f32 %v858_v8, 0.0 }
 0x16f   :  { %v2303_v17 = vpack.c.bf16 %v1120_v11, %v1119_v5  ;;  %v2284_v18 = vpack.c.bf16 %v1091_v12, %v1091_v12  ;;  %v1123_v19 = vmax.f32 %v562_v13, 0.0  ;;  %v1094_v21 = vmax.f32 %v850_v14, 0.0 }
 0x170   :  { %1914 = vst [vmem:[#allocation8 + $0xb0] sm:$0xf] %v2288_v15  ;;  %v2290_v22 = vpack.c.bf16 %v1100_v40, %v1100_v40 }
 0x171   :  { %1929 = vst [vmem:[#allocation8 + $0x108] sm:$0xff] %v2303_v17  ;;  %1910 = vst [vmem:[#allocation8 + $0x98] sm:$0xf] %v2284_v18  ;;  %v2305_v23 = vpack.c.bf16 %v1123_v19, %v1122_v16  ;;  %v2286_v24 = vpack.c.bf16 %v1094_v21, %v1094_v21  ;;  %v565_v25 = vpop.f32.mrb[48].mxu0  ;;  %v2440_v26 = vpop.f32.mrb[48].mxu1 }
 0x172   :  { %1916 = vst [vmem:[#allocation8 + $0xbc] sm:$0xf] %v2290_v22  ;;  %v566_v27 = vadd.f32 %v565_v25, %v2834_v44  ;;  %v871_v28 = vadd.f32 %v2440_v26, %v2905_v20  ;;  %v567_v29 = vpop.f32.mrb[49].mxu0  ;;  %v862_v30 = vpop.f32.mrb[49].mxu1 }
 0x173   :  { %1931 = vst [vmem:[#allocation8 + $0x114] sm:$0xff] %v2305_v23  ;;  %1912 = vst [vmem:[#allocation8 + $0xa4] sm:$0xf] %v2286_v24  ;;  %v568_v31 = vadd.f32 %v567_v29, %v2837_v45  ;;  %v863_v32 = vadd.f32 %v862_v30, %v2905_v20  ;;  %v569_v42 = vpop.f32.mrb[50].mxu0  ;;  %v2441_v33 = vpop.f32.mrb[50].mxu1 }
 0x174   :  { %v1125_v34 = vmax.f32 %v566_v27, 0.0  ;;  %v1109_v35 = vmax.f32 %v871_v28, 0.0  ;;  %v570_v36 = vadd.f32 %v569_v42, %v2834_v44  ;;  %v874_v37 = vadd.f32 %v2441_v33, %v2905_v20  ;;  %v571_v38 = vpop.f32.mrb[51].mxu0  ;;  %v865_v39 = vpop.f32.mrb[51].mxu1 }
 0x175   :  { %v1126_v41 = vmax.f32 %v568_v31, 0.0  ;;  %v1103_v43 = vmax.f32 %v863_v32, 0.0  ;;  %v572_v46 = vadd.f32 %v571_v38, %v2837_v45  ;;  %v866_v47 = vadd.f32 %v865_v39, %v2905_v20 }
 0x176   :  { %v2296_v48 = vpack.c.bf16 %v1109_v35, %v1109_v35  ;;  %v1128_v49 = vmax.f32 %v570_v36, 0.0  ;;  %v1112_v50 = vmax.f32 %v874_v37, 0.0 }
 0x177   :  { %v2307_v51 = vpack.c.bf16 %v1126_v41, %v1125_v34  ;;  %v2292_v52 = vpack.c.bf16 %v1103_v43, %v1103_v43  ;;  %v1129_v53 = vmax.f32 %v572_v46, 0.0  ;;  %v1106_v54 = vmax.f32 %v866_v47, 0.0 }
 0x178   :  { %1922 = vst [vmem:[#allocation8 + $0xe0] sm:$0xf] %v2296_v48  ;;  %v2298_v55 = vpack.c.bf16 %v1112_v50, %v1112_v50 }
 0x179   :  { %1933 = vst [vmem:[#allocation8 + $0x120] sm:$0xff] %v2307_v51  ;;  %1918 = vst [vmem:[#allocation8 + $0xc8] sm:$0xf] %v2292_v52  ;;  %v2309_v56 = vpack.c.bf16 %v1129_v53, %v1128_v49  ;;  %v2294_v57 = vpack.c.bf16 %v1106_v54, %v1106_v54  ;;  %v575_v58 = vpop.f32.mrb[52].mxu0  ;;  %v2444_v59 = vpop.f32.mrb[52].mxu1 }
 0x17a   :  { %1924 = vst [vmem:[#allocation8 + $0xec] sm:$0xf] %v2298_v55  ;;  %v576_v60 = vadd.f32 %v575_v58, %v2834_v44  ;;  %v887_v61 = vadd.f32 %v2444_v59, %v2905_v20  ;;  %v577_v62 = vpop.f32.mrb[53].mxu0  ;;  %v878_v63 = vpop.f32.mrb[53].mxu1 }
 0x17b   :  { %1935 = vst [vmem:[#allocation8 + $0x12c] sm:$0xff] %v2309_v56  ;;  %1920 = vst [vmem:[#allocation8 + $0xd4] sm:$0xf] %v2294_v57  ;;  %v578_v0 = vadd.f32 %v577_v62, %v2837_v45  ;;  %v879_v1 = vadd.f32 %v878_v63, %v2905_v20  ;;  %v579_v2 = vpop.f32.mrb[54].mxu0  ;;  %v2445_v3 = vpop.f32.mrb[54].mxu1 }
 0x17c   :  { %v1131_v4 = vmax.f32 %v576_v60, 0.0  ;;  %v1121_v5 = vmax.f32 %v887_v61, 0.0  ;;  %v580_v6 = vadd.f32 %v579_v2, %v2834_v44  ;;  %v890_v7 = vadd.f32 %v2445_v3, %v2905_v20  ;;  %v581_v8 = vpop.f32.mrb[55].mxu0  ;;  %v881_v9 = vpop.f32.mrb[55].mxu1 }
 0x17d   :  { %v1132_v10 = vmax.f32 %v578_v0, 0.0  ;;  %v1115_v11 = vmax.f32 %v879_v1, 0.0  ;;  %v582_v12 = vadd.f32 %v581_v8, %v2837_v45  ;;  %v882_v13 = vadd.f32 %v881_v9, %v2905_v20 }
 0x17e   :  { %v2304_v14 = vpack.c.bf16 %v1121_v5, %v1121_v5  ;;  %v1134_v15 = vmax.f32 %v580_v6, 0.0  ;;  %v1124_v16 = vmax.f32 %v890_v7, 0.0 }
 0x17f   :  { %v2311_v40 = vpack.c.bf16 %v1132_v10, %v1131_v4  ;;  %v2300_v17 = vpack.c.bf16 %v1115_v11, %v1115_v11  ;;  %v1135_v18 = vmax.f32 %v582_v12, 0.0  ;;  %v1118_v19 = vmax.f32 %v882_v13, 0.0 }
 0x180   :  { %1930 = vst [vmem:[#allocation8 + $0x110] sm:$0xf] %v2304_v14  ;;  %v2306_v21 = vpack.c.bf16 %v1124_v16, %v1124_v16 }
 0x181   :  { %1937 = vst [vmem:[#allocation8 + $0x138] sm:$0xff] %v2311_v40  ;;  %1926 = vst [vmem:[#allocation8 + $0xf8] sm:$0xf] %v2300_v17  ;;  %v2313_v22 = vpack.c.bf16 %v1135_v18, %v1134_v15  ;;  %v2302_v23 = vpack.c.bf16 %v1118_v19, %v1118_v19  ;;  %v585_v24 = vpop.f32.mrb[56].mxu0  ;;  %v2448_v25 = vpop.f32.mrb[56].mxu1 }
 0x182   :  { %1932 = vst [vmem:[#allocation8 + $0x11c] sm:$0xf] %v2306_v21  ;;  %v586_v26 = vadd.f32 %v585_v24, %v2834_v44  ;;  %v903_v27 = vadd.f32 %v2448_v25, %v2905_v20  ;;  %v587_v28 = vpop.f32.mrb[57].mxu0  ;;  %v894_v29 = vpop.f32.mrb[57].mxu1 }
 0x183   :  { %1939 = vst [vmem:[#allocation8 + $0x144] sm:$0xff] %v2313_v22  ;;  %1928 = vst [vmem:[#allocation8 + $0x104] sm:$0xf] %v2302_v23  ;;  %v588_v30 = vadd.f32 %v587_v28, %v2837_v45  ;;  %v895_v31 = vadd.f32 %v894_v29, %v2905_v20  ;;  %v589_v32 = vpop.f32.mrb[58].mxu0  ;;  %v2449_v42 = vpop.f32.mrb[58].mxu1 }
 0x184   :  { %v1137_v33 = vmax.f32 %v586_v26, 0.0  ;;  %v1133_v34 = vmax.f32 %v903_v27, 0.0  ;;  %v590_v35 = vadd.f32 %v589_v32, %v2834_v44  ;;  %v906_v36 = vadd.f32 %v2449_v42, %v2905_v20  ;;  %v591_v37 = vpop.f32.mrb[59].mxu0  ;;  %v897_v38 = vpop.f32.mrb[59].mxu1 }
 0x185   :  { %v1138_v39 = vmax.f32 %v588_v30, 0.0  ;;  %v1127_v41 = vmax.f32 %v895_v31, 0.0  ;;  %v592_v43 = vadd.f32 %v591_v37, %v2837_v45  ;;  %v898_v46 = vadd.f32 %v897_v38, %v2905_v20 }
 0x186   :  { %v2312_v47 = vpack.c.bf16 %v1133_v34, %v1133_v34  ;;  %v1140_v48 = vmax.f32 %v590_v35, 0.0  ;;  %v1136_v49 = vmax.f32 %v906_v36, 0.0 }
 0x187   :  { %v2315_v50 = vpack.c.bf16 %v1138_v39, %v1137_v33  ;;  %v2308_v51 = vpack.c.bf16 %v1127_v41, %v1127_v41  ;;  %v1141_v52 = vmax.f32 %v592_v43, 0.0  ;;  %v1130_v53 = vmax.f32 %v898_v46, 0.0 }
 0x188   :  { %1938 = vst [vmem:[#allocation8 + $0x140] sm:$0xf] %v2312_v47  ;;  %v2314_v54 = vpack.c.bf16 %v1136_v49, %v1136_v49 }
 0x189   :  { %1941 = vst [vmem:[#allocation8 + $0x150] sm:$0xff] %v2315_v50  ;;  %1934 = vst [vmem:[#allocation8 + $0x128] sm:$0xf] %v2308_v51  ;;  %v2317_v55 = vpack.c.bf16 %v1141_v52, %v1140_v48  ;;  %v2310_v56 = vpack.c.bf16 %v1130_v53, %v1130_v53  ;;  %v595_v57 = vpop.f32.mrb[60].mxu0  ;;  %v2452_v58 = vpop.f32.mrb[60].mxu1 }
 0x18a   :  { %1940 = vst [vmem:[#allocation8 + $0x14c] sm:$0xf] %v2314_v54  ;;  %v596_v59 = vadd.f32 %v595_v57, %v2834_v44  ;;  %v919_v60 = vadd.f32 %v2452_v58, %v2905_v20  ;;  %v597_v61 = vpop.f32.mrb[61].mxu0  ;;  %v910_v62 = vpop.f32.mrb[61].mxu1 }
 0x18b   :  { %1943 = vst [vmem:[#allocation8 + $0x15c] sm:$0xff] %v2317_v55  ;;  %1936 = vst [vmem:[#allocation8 + $0x134] sm:$0xf] %v2310_v56  ;;  %v598_v63 = vadd.f32 %v597_v61, %v2837_v45  ;;  %v911_v0 = vadd.f32 %v910_v62, %v2905_v20  ;;  %v599_v1 = vpop.f32.mrb[62].mxu0  ;;  %v2453_v2 = vpop.f32.mrb[62].mxu1 }
 0x18c   :  { %v1143_v3 = vmax.f32 %v596_v59, 0.0  ;;  %v1145_v4 = vmax.f32 %v919_v60, 0.0  ;;  %v600_v5 = vadd.f32 %v599_v1, %v2834_v44  ;;  %v922_v6 = vadd.f32 %v2453_v2, %v2905_v20  ;;  %v601_v7 = vpop.f32.mrb[63].mxu0  ;;  %v913_v8 = vpop.f32.mrb[63].mxu1 }
 0x18d   :  { %v1144_v9 = vmax.f32 %v598_v63, 0.0  ;;  %v1139_v10 = vmax.f32 %v911_v0, 0.0  ;;  %v602_v11 = vadd.f32 %v601_v7, %v2837_v45  ;;  %v914_v12 = vadd.f32 %v913_v8, %v2905_v20 }
 0x18e   :  { %v2320_v13 = vpack.c.bf16 %v1145_v4, %v1145_v4  ;;  %v1146_v14 = vmax.f32 %v600_v5, 0.0  ;;  %v1148_v15 = vmax.f32 %v922_v6, 0.0 }
 0x18f   :  { %v2319_v16 = vpack.c.bf16 %v1144_v9, %v1143_v3  ;;  %v2316_v40 = vpack.c.bf16 %v1139_v10, %v1139_v10  ;;  %v1147_v17 = vmax.f32 %v602_v11, 0.0  ;;  %v1142_v18 = vmax.f32 %v914_v12, 0.0 }
 0x190   :  { %1946 = vst [vmem:[#allocation8 + $0x170] sm:$0xf] %v2320_v13  ;;  %v2322_v19 = vpack.c.bf16 %v1148_v15, %v1148_v15 }
 0x191   :  { %1945 = vst [vmem:[#allocation8 + $0x168] sm:$0xff] %v2319_v16  ;;  %1942 = vst [vmem:[#allocation8 + $0x158] sm:$0xf] %v2316_v40  ;;  %v2321_v21 = vpack.c.bf16 %v1147_v17, %v1146_v14  ;;  %v2318_v22 = vpack.c.bf16 %v1142_v18, %v1142_v18  ;;  %v605_v23 = vpop.f32.mrb[64].mxu0  ;;  %v2456_v24 = vpop.f32.mrb[64].mxu1 }
 0x192   :  { %1948 = vst [vmem:[#allocation8 + $0x17c] sm:$0xf] %v2322_v19  ;;  %v606_v25 = vadd.f32 %v605_v23, %v2834_v44  ;;  %v935_v26 = vadd.f32 %v2456_v24, %v2905_v20  ;;  %v607_v27 = vpop.f32.mrb[65].mxu0  ;;  %v926_v28 = vpop.f32.mrb[65].mxu1 }
 0x193   :  { %1947 = vst [vmem:[#allocation8 + $0x174] sm:$0xff] %v2321_v21  ;;  %1944 = vst [vmem:[#allocation8 + $0x164] sm:$0xf] %v2318_v22  ;;  %v608_v29 = vadd.f32 %v607_v27, %v2837_v45  ;;  %v927_v30 = vadd.f32 %v926_v28, %v2905_v20  ;;  %v609_v31 = vpop.f32.mrb[66].mxu0  ;;  %v2457_v32 = vpop.f32.mrb[66].mxu1 }
 0x194   :  { %v1149_v42 = vmax.f32 %v606_v25, 0.0  ;;  %v1157_v33 = vmax.f32 %v935_v26, 0.0  ;;  %v610_v34 = vadd.f32 %v609_v31, %v2834_v44  ;;  %v938_v35 = vadd.f32 %v2457_v32, %v2905_v20  ;;  %v611_v36 = vpop.f32.mrb[67].mxu0  ;;  %v929_v37 = vpop.f32.mrb[67].mxu1 }
 0x195   :  { %v1150_v38 = vmax.f32 %v608_v29, 0.0  ;;  %v1151_v39 = vmax.f32 %v927_v30, 0.0  ;;  %v612_v41 = vadd.f32 %v611_v36, %v2837_v45  ;;  %v930_v43 = vadd.f32 %v929_v37, %v2905_v20 }
 0x196   :  { %v2328_v46 = vpack.c.bf16 %v1157_v33, %v1157_v33  ;;  %v1152_v47 = vmax.f32 %v610_v34, 0.0  ;;  %v1160_v48 = vmax.f32 %v938_v35, 0.0 }
 0x197   :  { %v2323_v49 = vpack.c.bf16 %v1150_v38, %v1149_v42  ;;  %v2324_v50 = vpack.c.bf16 %v1151_v39, %v1151_v39  ;;  %v1153_v51 = vmax.f32 %v612_v41, 0.0  ;;  %v1154_v52 = vmax.f32 %v930_v43, 0.0 }
 0x198   :  { %1954 = vst [vmem:[#allocation8 + $0x1a0] sm:$0xf] %v2328_v46  ;;  %v2330_v53 = vpack.c.bf16 %v1160_v48, %v1160_v48 }
 0x199   :  { %1949 = vst [vmem:[#allocation8 + $0x180] sm:$0xff] %v2323_v49  ;;  %1950 = vst [vmem:[#allocation8 + $0x188] sm:$0xf] %v2324_v50  ;;  %v2325_v54 = vpack.c.bf16 %v1153_v51, %v1152_v47  ;;  %v2326_v55 = vpack.c.bf16 %v1154_v52, %v1154_v52  ;;  %v615_v56 = vpop.f32.mrb[68].mxu0  ;;  %v2460_v57 = vpop.f32.mrb[68].mxu1 }
 0x19a   :  { %1956 = vst [vmem:[#allocation8 + $0x1ac] sm:$0xf] %v2330_v53  ;;  %v616_v58 = vadd.f32 %v615_v56, %v2834_v44  ;;  %v951_v59 = vadd.f32 %v2460_v57, %v2905_v20  ;;  %v617_v60 = vpop.f32.mrb[69].mxu0  ;;  %v942_v61 = vpop.f32.mrb[69].mxu1 }
 0x19b   :  { %1951 = vst [vmem:[#allocation8 + $0x18c] sm:$0xff] %v2325_v54  ;;  %1952 = vst [vmem:[#allocation8 + $0x194] sm:$0xf] %v2326_v55  ;;  %v618_v62 = vadd.f32 %v617_v60, %v2837_v45  ;;  %v943_v63 = vadd.f32 %v942_v61, %v2905_v20  ;;  %v619_v0 = vpop.f32.mrb[70].mxu0  ;;  %v2461_v1 = vpop.f32.mrb[70].mxu1 }
 0x19c   :  { %v1155_v2 = vmax.f32 %v616_v58, 0.0  ;;  %v1169_v3 = vmax.f32 %v951_v59, 0.0  ;;  %v620_v4 = vadd.f32 %v619_v0, %v2834_v44  ;;  %v954_v5 = vadd.f32 %v2461_v1, %v2905_v20  ;;  %v621_v6 = vpop.f32.mrb[71].mxu0  ;;  %v945_v7 = vpop.f32.mrb[71].mxu1 }
 0x19d   :  { %v1156_v8 = vmax.f32 %v618_v62, 0.0  ;;  %v1163_v9 = vmax.f32 %v943_v63, 0.0  ;;  %v622_v10 = vadd.f32 %v621_v6, %v2837_v45  ;;  %v946_v11 = vadd.f32 %v945_v7, %v2905_v20 }
 0x19e   :  { %v2336_v12 = vpack.c.bf16 %v1169_v3, %v1169_v3  ;;  %v1158_v13 = vmax.f32 %v620_v4, 0.0  ;;  %v1172_v14 = vmax.f32 %v954_v5, 0.0 }
 0x19f   :  { %v2327_v15 = vpack.c.bf16 %v1156_v8, %v1155_v2  ;;  %v2332_v16 = vpack.c.bf16 %v1163_v9, %v1163_v9  ;;  %v1159_v40 = vmax.f32 %v622_v10, 0.0  ;;  %v1166_v17 = vmax.f32 %v946_v11, 0.0 }
 0x1a0   :  { %1962 = vst [vmem:[#allocation8 + $0x1d0] sm:$0xf] %v2336_v12  ;;  %v2338_v18 = vpack.c.bf16 %v1172_v14, %v1172_v14 }
 0x1a1   :  { %1953 = vst [vmem:[#allocation8 + $0x198] sm:$0xff] %v2327_v15  ;;  %1958 = vst [vmem:[#allocation8 + $0x1b8] sm:$0xf] %v2332_v16  ;;  %v2329_v19 = vpack.c.bf16 %v1159_v40, %v1158_v13  ;;  %v2334_v21 = vpack.c.bf16 %v1166_v17, %v1166_v17  ;;  %v625_v22 = vpop.f32.mrb[72].mxu0  ;;  %v2464_v23 = vpop.f32.mrb[72].mxu1 }
 0x1a2   :  { %1964 = vst [vmem:[#allocation8 + $0x1dc] sm:$0xf] %v2338_v18  ;;  %v626_v24 = vadd.f32 %v625_v22, %v2834_v44  ;;  %v967_v25 = vadd.f32 %v2464_v23, %v2905_v20  ;;  %v627_v26 = vpop.f32.mrb[73].mxu0  ;;  %v958_v27 = vpop.f32.mrb[73].mxu1 }
 0x1a3   :  { %1955 = vst [vmem:[#allocation8 + $0x1a4] sm:$0xff] %v2329_v19  ;;  %1960 = vst [vmem:[#allocation8 + $0x1c4] sm:$0xf] %v2334_v21  ;;  %v628_v28 = vadd.f32 %v627_v26, %v2837_v45  ;;  %v959_v29 = vadd.f32 %v958_v27, %v2905_v20  ;;  %v629_v30 = vpop.f32.mrb[74].mxu0  ;;  %v2465_v31 = vpop.f32.mrb[74].mxu1 }
 0x1a4   :  { %v1161_v32 = vmax.f32 %v626_v24, 0.0  ;;  %v1181_v42 = vmax.f32 %v967_v25, 0.0  ;;  %v630_v33 = vadd.f32 %v629_v30, %v2834_v44  ;;  %v970_v34 = vadd.f32 %v2465_v31, %v2905_v20  ;;  %v631_v35 = vpop.f32.mrb[75].mxu0  ;;  %v961_v36 = vpop.f32.mrb[75].mxu1 }
 0x1a5   :  { %v1162_v37 = vmax.f32 %v628_v28, 0.0  ;;  %v1175_v38 = vmax.f32 %v959_v29, 0.0  ;;  %v632_v39 = vadd.f32 %v631_v35, %v2837_v45  ;;  %v962_v41 = vadd.f32 %v961_v36, %v2905_v20 }
 0x1a6   :  { %v2344_v43 = vpack.c.bf16 %v1181_v42, %v1181_v42  ;;  %v1164_v46 = vmax.f32 %v630_v33, 0.0  ;;  %v1184_v47 = vmax.f32 %v970_v34, 0.0 }
 0x1a7   :  { %v2331_v48 = vpack.c.bf16 %v1162_v37, %v1161_v32  ;;  %v2340_v49 = vpack.c.bf16 %v1175_v38, %v1175_v38  ;;  %v1165_v50 = vmax.f32 %v632_v39, 0.0  ;;  %v1178_v51 = vmax.f32 %v962_v41, 0.0 }
 0x1a8   :  { %1970 = vst [vmem:[#allocation8 + $0x200] sm:$0xf] %v2344_v43  ;;  %v2346_v52 = vpack.c.bf16 %v1184_v47, %v1184_v47 }
 0x1a9   :  { %1957 = vst [vmem:[#allocation8 + $0x1b0] sm:$0xff] %v2331_v48  ;;  %1966 = vst [vmem:[#allocation8 + $0x1e8] sm:$0xf] %v2340_v49  ;;  %v2333_v53 = vpack.c.bf16 %v1165_v50, %v1164_v46  ;;  %v2342_v54 = vpack.c.bf16 %v1178_v51, %v1178_v51  ;;  %v635_v55 = vpop.f32.mrb[76].mxu0  ;;  %v2468_v56 = vpop.f32.mrb[76].mxu1 }
 0x1aa   :  { %1972 = vst [vmem:[#allocation8 + $0x20c] sm:$0xf] %v2346_v52  ;;  %v636_v57 = vadd.f32 %v635_v55, %v2834_v44  ;;  %v983_v58 = vadd.f32 %v2468_v56, %v2905_v20  ;;  %v637_v59 = vpop.f32.mrb[77].mxu0  ;;  %v974_v60 = vpop.f32.mrb[77].mxu1 }
 0x1ab   :  { %1959 = vst [vmem:[#allocation8 + $0x1bc] sm:$0xff] %v2333_v53  ;;  %1968 = vst [vmem:[#allocation8 + $0x1f4] sm:$0xf] %v2342_v54  ;;  %v638_v61 = vadd.f32 %v637_v59, %v2837_v45  ;;  %v975_v62 = vadd.f32 %v974_v60, %v2905_v20  ;;  %v639_v63 = vpop.f32.mrb[78].mxu0  ;;  %v2469_v0 = vpop.f32.mrb[78].mxu1 }
 0x1ac   :  { %v1167_v1 = vmax.f32 %v636_v57, 0.0  ;;  %v1193_v2 = vmax.f32 %v983_v58, 0.0  ;;  %v640_v3 = vadd.f32 %v639_v63, %v2834_v44  ;;  %v986_v4 = vadd.f32 %v2469_v0, %v2905_v20  ;;  %v641_v5 = vpop.f32.mrb[79].mxu0  ;;  %v977_v6 = vpop.f32.mrb[79].mxu1 }
 0x1ad   :  { %v1168_v7 = vmax.f32 %v638_v61, 0.0  ;;  %v1187_v8 = vmax.f32 %v975_v62, 0.0  ;;  %v642_v9 = vadd.f32 %v641_v5, %v2837_v45  ;;  %v978_v10 = vadd.f32 %v977_v6, %v2905_v20 }
 0x1ae   :  { %v2352_v11 = vpack.c.bf16 %v1193_v2, %v1193_v2  ;;  %v1170_v12 = vmax.f32 %v640_v3, 0.0  ;;  %v1196_v13 = vmax.f32 %v986_v4, 0.0 }
 0x1af   :  { %v2335_v14 = vpack.c.bf16 %v1168_v7, %v1167_v1  ;;  %v2348_v15 = vpack.c.bf16 %v1187_v8, %v1187_v8  ;;  %v1171_v16 = vmax.f32 %v642_v9, 0.0  ;;  %v1190_v40 = vmax.f32 %v978_v10, 0.0 }
 0x1b0   :  { %1978 = vst [vmem:[#allocation8 + $0x230] sm:$0xf] %v2352_v11  ;;  %v2354_v17 = vpack.c.bf16 %v1196_v13, %v1196_v13 }
 0x1b1   :  { %1961 = vst [vmem:[#allocation8 + $0x1c8] sm:$0xff] %v2335_v14  ;;  %1974 = vst [vmem:[#allocation8 + $0x218] sm:$0xf] %v2348_v15  ;;  %v2337_v18 = vpack.c.bf16 %v1171_v16, %v1170_v12  ;;  %v2350_v19 = vpack.c.bf16 %v1190_v40, %v1190_v40  ;;  %v645_v21 = vpop.f32.mrb[80].mxu0  ;;  %v2472_v22 = vpop.f32.mrb[80].mxu1 }
 0x1b2   :  { %1980 = vst [vmem:[#allocation8 + $0x23c] sm:$0xf] %v2354_v17  ;;  %v646_v23 = vadd.f32 %v645_v21, %v2834_v44  ;;  %v999_v24 = vadd.f32 %v2472_v22, %v2905_v20  ;;  %v647_v25 = vpop.f32.mrb[81].mxu0  ;;  %v990_v26 = vpop.f32.mrb[81].mxu1 }
 0x1b3   :  { %1963 = vst [vmem:[#allocation8 + $0x1d4] sm:$0xff] %v2337_v18  ;;  %1976 = vst [vmem:[#allocation8 + $0x224] sm:$0xf] %v2350_v19  ;;  %v648_v27 = vadd.f32 %v647_v25, %v2837_v45  ;;  %v991_v28 = vadd.f32 %v990_v26, %v2905_v20  ;;  %v649_v29 = vpop.f32.mrb[82].mxu0  ;;  %v2473_v30 = vpop.f32.mrb[82].mxu1 }
 0x1b4   :  { %v1173_v31 = vmax.f32 %v646_v23, 0.0  ;;  %v1205_v32 = vmax.f32 %v999_v24, 0.0  ;;  %v650_v42 = vadd.f32 %v649_v29, %v2834_v44  ;;  %v1002_v33 = vadd.f32 %v2473_v30, %v2905_v20  ;;  %v651_v34 = vpop.f32.mrb[83].mxu0  ;;  %v993_v35 = vpop.f32.mrb[83].mxu1 }
 0x1b5   :  { %v1174_v36 = vmax.f32 %v648_v27, 0.0  ;;  %v1199_v37 = vmax.f32 %v991_v28, 0.0  ;;  %v652_v38 = vadd.f32 %v651_v34, %v2837_v45  ;;  %v994_v39 = vadd.f32 %v993_v35, %v2905_v20 }
 0x1b6   :  { %v2360_v41 = vpack.c.bf16 %v1205_v32, %v1205_v32  ;;  %v1176_v43 = vmax.f32 %v650_v42, 0.0  ;;  %v1208_v46 = vmax.f32 %v1002_v33, 0.0 }
 0x1b7   :  { %v2339_v47 = vpack.c.bf16 %v1174_v36, %v1173_v31  ;;  %v2356_v48 = vpack.c.bf16 %v1199_v37, %v1199_v37  ;;  %v1177_v49 = vmax.f32 %v652_v38, 0.0  ;;  %v1202_v50 = vmax.f32 %v994_v39, 0.0 }
 0x1b8   :  { %1986 = vst [vmem:[#allocation8 + $0x260] sm:$0xf] %v2360_v41  ;;  %v2362_v51 = vpack.c.bf16 %v1208_v46, %v1208_v46 }
 0x1b9   :  { %1965 = vst [vmem:[#allocation8 + $0x1e0] sm:$0xff] %v2339_v47  ;;  %1982 = vst [vmem:[#allocation8 + $0x248] sm:$0xf] %v2356_v48  ;;  %v2341_v52 = vpack.c.bf16 %v1177_v49, %v1176_v43  ;;  %v2358_v53 = vpack.c.bf16 %v1202_v50, %v1202_v50  ;;  %v655_v54 = vpop.f32.mrb[84].mxu0  ;;  %v2476_v55 = vpop.f32.mrb[84].mxu1 }
 0x1ba   :  { %1988 = vst [vmem:[#allocation8 + $0x26c] sm:$0xf] %v2362_v51  ;;  %v656_v56 = vadd.f32 %v655_v54, %v2834_v44  ;;  %v1015_v57 = vadd.f32 %v2476_v55, %v2905_v20  ;;  %v657_v58 = vpop.f32.mrb[85].mxu0  ;;  %v1006_v59 = vpop.f32.mrb[85].mxu1 }
 0x1bb   :  { %1967 = vst [vmem:[#allocation8 + $0x1ec] sm:$0xff] %v2341_v52  ;;  %1984 = vst [vmem:[#allocation8 + $0x254] sm:$0xf] %v2358_v53  ;;  %v658_v60 = vadd.f32 %v657_v58, %v2837_v45  ;;  %v1007_v61 = vadd.f32 %v1006_v59, %v2905_v20  ;;  %v659_v62 = vpop.f32.mrb[86].mxu0  ;;  %v2477_v63 = vpop.f32.mrb[86].mxu1 }
 0x1bc   :  { %v1179_v0 = vmax.f32 %v656_v56, 0.0  ;;  %v1217_v1 = vmax.f32 %v1015_v57, 0.0  ;;  %v660_v2 = vadd.f32 %v659_v62, %v2834_v44  ;;  %v1018_v3 = vadd.f32 %v2477_v63, %v2905_v20  ;;  %v661_v4 = vpop.f32.mrb[87].mxu0  ;;  %v1009_v5 = vpop.f32.mrb[87].mxu1 }
 0x1bd   :  { %v1180_v6 = vmax.f32 %v658_v60, 0.0  ;;  %v1211_v7 = vmax.f32 %v1007_v61, 0.0  ;;  %v662_v8 = vadd.f32 %v661_v4, %v2837_v45  ;;  %v1010_v9 = vadd.f32 %v1009_v5, %v2905_v20 }
 0x1be   :  { %v2368_v10 = vpack.c.bf16 %v1217_v1, %v1217_v1  ;;  %v1182_v11 = vmax.f32 %v660_v2, 0.0  ;;  %v1220_v12 = vmax.f32 %v1018_v3, 0.0 }
 0x1bf   :  { %v2343_v13 = vpack.c.bf16 %v1180_v6, %v1179_v0  ;;  %v2364_v14 = vpack.c.bf16 %v1211_v7, %v1211_v7  ;;  %v1183_v15 = vmax.f32 %v662_v8, 0.0  ;;  %v1214_v16 = vmax.f32 %v1010_v9, 0.0 }
 0x1c0   :  { %1994 = vst [vmem:[#allocation8 + $0x290] sm:$0xf] %v2368_v10  ;;  %v2370_v40 = vpack.c.bf16 %v1220_v12, %v1220_v12 }
 0x1c1   :  { %1969 = vst [vmem:[#allocation8 + $0x1f8] sm:$0xff] %v2343_v13  ;;  %1990 = vst [vmem:[#allocation8 + $0x278] sm:$0xf] %v2364_v14  ;;  %v2345_v17 = vpack.c.bf16 %v1183_v15, %v1182_v11  ;;  %v2366_v18 = vpack.c.bf16 %v1214_v16, %v1214_v16  ;;  %v665_v19 = vpop.f32.mrb[88].mxu0  ;;  %v2480_v21 = vpop.f32.mrb[88].mxu1 }
 0x1c2   :  { %1996 = vst [vmem:[#allocation8 + $0x29c] sm:$0xf] %v2370_v40  ;;  %v666_v22 = vadd.f32 %v665_v19, %v2834_v44  ;;  %v1031_v23 = vadd.f32 %v2480_v21, %v2905_v20  ;;  %v667_v24 = vpop.f32.mrb[89].mxu0  ;;  %v1022_v25 = vpop.f32.mrb[89].mxu1 }
 0x1c3   :  { %1971 = vst [vmem:[#allocation8 + $0x204] sm:$0xff] %v2345_v17  ;;  %1992 = vst [vmem:[#allocation8 + $0x284] sm:$0xf] %v2366_v18  ;;  %v668_v26 = vadd.f32 %v667_v24, %v2837_v45  ;;  %v1023_v27 = vadd.f32 %v1022_v25, %v2905_v20  ;;  %v669_v28 = vpop.f32.mrb[90].mxu0  ;;  %v2481_v29 = vpop.f32.mrb[90].mxu1 }
 0x1c4   :  { %v1185_v30 = vmax.f32 %v666_v22, 0.0  ;;  %v1229_v31 = vmax.f32 %v1031_v23, 0.0  ;;  %v670_v32 = vadd.f32 %v669_v28, %v2834_v44  ;;  %v1034_v42 = vadd.f32 %v2481_v29, %v2905_v20  ;;  %v671_v33 = vpop.f32.mrb[91].mxu0  ;;  %v1025_v34 = vpop.f32.mrb[91].mxu1 }
 0x1c5   :  { %v1186_v35 = vmax.f32 %v668_v26, 0.0  ;;  %v1223_v36 = vmax.f32 %v1023_v27, 0.0  ;;  %v672_v37 = vadd.f32 %v671_v33, %v2837_v45  ;;  %v1026_v38 = vadd.f32 %v1025_v34, %v2905_v20 }
 0x1c6   :  { %v2376_v39 = vpack.c.bf16 %v1229_v31, %v1229_v31  ;;  %v1188_v41 = vmax.f32 %v670_v32, 0.0  ;;  %v1232_v43 = vmax.f32 %v1034_v42, 0.0 }
 0x1c7   :  { %v2347_v46 = vpack.c.bf16 %v1186_v35, %v1185_v30  ;;  %v2372_v47 = vpack.c.bf16 %v1223_v36, %v1223_v36  ;;  %v1189_v48 = vmax.f32 %v672_v37, 0.0  ;;  %v1226_v49 = vmax.f32 %v1026_v38, 0.0 }
 0x1c8   :  { %2002 = vst [vmem:[#allocation8 + $0x2c0] sm:$0xf] %v2376_v39  ;;  %v2378_v50 = vpack.c.bf16 %v1232_v43, %v1232_v43 }
 0x1c9   :  { %1973 = vst [vmem:[#allocation8 + $0x210] sm:$0xff] %v2347_v46  ;;  %1998 = vst [vmem:[#allocation8 + $0x2a8] sm:$0xf] %v2372_v47  ;;  %v2349_v51 = vpack.c.bf16 %v1189_v48, %v1188_v41  ;;  %v2374_v52 = vpack.c.bf16 %v1226_v49, %v1226_v49  ;;  %v675_v53 = vpop.f32.mrb[92].mxu0  ;;  %v2484_v54 = vpop.f32.mrb[92].mxu1 }
 0x1ca   :  { %2004 = vst [vmem:[#allocation8 + $0x2cc] sm:$0xf] %v2378_v50  ;;  %v676_v55 = vadd.f32 %v675_v53, %v2834_v44  ;;  %v1047_v56 = vadd.f32 %v2484_v54, %v2905_v20  ;;  %v677_v57 = vpop.f32.mrb[93].mxu0  ;;  %v1038_v58 = vpop.f32.mrb[93].mxu1 }
 0x1cb   :  { %1975 = vst [vmem:[#allocation8 + $0x21c] sm:$0xff] %v2349_v51  ;;  %2000 = vst [vmem:[#allocation8 + $0x2b4] sm:$0xf] %v2374_v52  ;;  %v678_v59 = vadd.f32 %v677_v57, %v2837_v45  ;;  %v1039_v60 = vadd.f32 %v1038_v58, %v2905_v20  ;;  %v679_v61 = vpop.f32.mrb[94].mxu0  ;;  %v2485_v62 = vpop.f32.mrb[94].mxu1 }
 0x1cc   :  { %v1191_v63 = vmax.f32 %v676_v55, 0.0  ;;  %v1241_v0 = vmax.f32 %v1047_v56, 0.0  ;;  %v680_v1 = vadd.f32 %v679_v61, %v2834_v44  ;;  %v1050_v2 = vadd.f32 %v2485_v62, %v2905_v20  ;;  %v681_v3 = vpop.f32.mrb[95].mxu0  ;;  %v1041_v4 = vpop.f32.mrb[95].mxu1 }
 0x1cd   :  { %v1192_v5 = vmax.f32 %v678_v59, 0.0  ;;  %v1235_v6 = vmax.f32 %v1039_v60, 0.0  ;;  %v682_v7 = vadd.f32 %v681_v3, %v2837_v45  ;;  %v1042_v8 = vadd.f32 %v1041_v4, %v2905_v20 }
 0x1ce   :  { %v2384_v9 = vpack.c.bf16 %v1241_v0, %v1241_v0  ;;  %v1194_v10 = vmax.f32 %v680_v1, 0.0  ;;  %v1244_v11 = vmax.f32 %v1050_v2, 0.0 }
 0x1cf   :  { %v2351_v12 = vpack.c.bf16 %v1192_v5, %v1191_v63  ;;  %v2380_v13 = vpack.c.bf16 %v1235_v6, %v1235_v6  ;;  %v1195_v14 = vmax.f32 %v682_v7, 0.0  ;;  %v1238_v15 = vmax.f32 %v1042_v8, 0.0 }
 0x1d0   :  { %2010 = vst [vmem:[#allocation8 + $0x2f0] sm:$0xf] %v2384_v9  ;;  %v2386_v44 = vpack.c.bf16 %v1244_v11, %v1244_v11 }
 0x1d1   :  { %1977 = vst [vmem:[#allocation8 + $0x228] sm:$0xff] %v2351_v12  ;;  %2006 = vst [vmem:[#allocation8 + $0x2d8] sm:$0xf] %v2380_v13  ;;  %v2353_v16 = vpack.c.bf16 %v1195_v14, %v1194_v10  ;;  %v2382_v40 = vpack.c.bf16 %v1238_v15, %v1238_v15 }
 0x1d2   :  { %2012 = vst [vmem:[#allocation8 + $0x2fc] sm:$0xf] %v2386_v44 }
 0x1d3   :  { %1979 = vst [vmem:[#allocation8 + $0x234] sm:$0xff] %v2353_v16  ;;  %2008 = vst [vmem:[#allocation8 + $0x2e4] sm:$0xf] %v2382_v40 }
 0x1d4   :  { %2610 = shalt.err (!%p2607_p0)
}
 0x1d5   :  { %s2611_s26 = scalar_lea.hbm %s3050_s3, 12288 }
 0x1d6   :  { %p2612_p1 = scmp.ne.s32.totalorder %s3050_s3, %s2611_s26  ;;  %p2615_p2 = scmp.lt.u32.totalorder %s2611_s26, %s3050_s3 }
 0x1d8   :  { %p2617_p3 = pnand %p2615_p2, %p2612_p1 }
 0x1da   :  { %2620 = shalt.err (!%p2617_p3)
}
 0x1db   :  { %s2634_s4 = smov 192   ;;  %s2635_s5 = smov 12  }
 0x1dc   :  { %2024 = dma.vmem_to_hbm [thread:$0]  %s2019_s22, 12288, %s3050_s3, [#allocation4], %s2634_s4, %s2634_s4, %s2635_s5  }
 0x1dd   :  { %2625 = dma.done.wait [#allocation4], 12288  }
 0x1de   :  { %2626 = vsyncadd [#allocation4], 4294955008 }
 0x1df   :  { %2028 = vsyncpa [#allocation3], 1 }
 0x1e0   :  { %2029 = vsyncpa [#allocation6], 1 }
 0x1e1   :  { %2030 = vsyncpa [#allocation4], 1 }

// kernel: inception_d.8
= control target key start
LH: loop header
LB: loop body
LE: loop exit
PB: predicated region body
PF: predicated region fallthrough
CT: control target
= control target key end

     0   :  { %8 = vsyncpa [#allocation3], 0  ;;  %s7257_s0 = inlined_call_operand.hbm [shape: bf16[2,352,192], index: 0, kind: input, shape index: {}]   ;;  %s7258_s1 = inlined_call_operand.hbm [shape: bf16[7,192,192], index: 1, kind: input, shape index: {}]   ;;  %s7259_s2 = inlined_call_operand.hbm [shape: f32[1,192], index: 2, kind: input, shape index: {}]   ;;  %s7260_s3 = inlined_call_operand.hbm [shape: bf16[2,256,192], index: 3, kind: output, shape index: {}]  }
   0x1   :  { %10 = vsyncpa [#allocation3 + $0x1], 0 }
   0x2   :  { %11 = vsyncpa [#allocation6], 0 }
   0x3   :  { %12 = vsyncpa [#allocation4], 0 }
   0x4   :  { %14 = vsyncpa [#allocation4 + $0x1], 0  ;;  %s6343_s12 = smov 0   ;;  %s6345_s13 = smov 0  }
   0x5   :  { %s6347_s14 = smov 0   ;;  %s6349_s15 = smov 0  }
   0x6 LB: > { %s6364_s16 = sadd.s32 4294967295, %s6313_s15   ;;  %s4734_s17 = sadd.s32 4294967294, %s6313_s15   ;;  %s6313_s15 = sphi %s6349_s15, %s7282_s15   ;;  %s6309_s14 = sphi %s6347_s14, %s7281_s14   ;;  %s6305_s13 = sphi %s6345_s13, %s7280_s13   ;;  %s6301_s12 = sphi %s6343_s12, %s7279_s12  }
   0x7   : > { %p40_p0 = scmp.ne.s32.totalorder %s6305_s13, %s6301_s12  ;;  %p7261_p1 = scmp.eq.s32.totalorder %s6364_s16, 0 }
   0x8   : > { %p112_p3 = scmp.eq.s32.totalorder %s4734_s17, 1  ;;  %p4735_p5 = scmp.ge.s32.totalorder %s6313_s15, 1 }
   0x9   : > { %p6373_p4 = por %p7261_p1, %p40_p0  ;;  %p119_p7 = scmp.lt.s32.totalorder %s6313_s15, 3 }
   0xa   : > { %p6378_p6 = por %p112_p3, %p40_p0  ;;  %s6315_s21 = smov [#allocation5]  }
   0xb   : > { %s7264_s18 = scalar_select %p6373_p4, 1, 0 }
   0xc   : > { %s7265_s19 = scalar_select %p6378_p6, 1, 0 }
   0xd   : > { %p6383_p8 = pnand %p4735_p5, %p119_p7  ;;  %s131_s22 = sshll.u32 %s6315_s21, 4  ;;  %s6387_s22 = int_to_ptr.vmem [resolvable:$true] %s131_s22 }
   0xe   : > { %s6316_s24 = smov [#allocation7]   ;;  %s6157_s28 = scalar_lea.hbm %s7258_s1, 21504 }
   0xf   : > { %p5711_p9 = pneg %p6383_p8  ;;  %s145_s25 = sshll.u32 %s6316_s24, 4  ;;  %s6398_s25 = int_to_ptr.vmem [resolvable:$true] %s145_s25 }
  0x10   : > { %p6158_p12 = scmp.ne.s32.totalorder %s7258_s1, %s6157_s28  ;;  %p6164_p5 = scmp.lt.u32.totalorder %s6157_s28, %s7258_s1 }
  0x11   : > { %p6394_p11 = pnand %p5711_p9, %p7261_p1 }
  0x13   : > { %p6159_p13 = pneg %p6394_p11 }
  0x15   : > { %p6160_p0 = pnand %p6159_p13, %p6158_p12 }
  0x17   : > { %p6161_p3 = pneg %p6160_p0 }
  0x19   : > { %p6166_p7 = pnand %p6164_p5, %p6161_p3 }
  0x1b   : > { %6169 = shalt.err (!%p6166_p7)
}
  0x1c   : > { %s6170_s6 = scalar_lea.vmem %s6387_s22, 21504  ;;  %p6178_p2 = scmp.lt.s32.totalorder %s6387_s22, %s6387_s22 }
  0x1d   : > { %p6171_p9 = scmp.ne.s32.totalorder %s6387_s22, %s6170_s6  ;;  %p6179_p12 = scmp.lt.s32.totalorder %s6170_s6, %s6170_s6 }
  0x1f   : > { %p6173_p10 = pnand %p6171_p9, %p6159_p13  ;;  %p6180_p0 = por %p6179_p12, %p6178_p2 }
  0x21   : > { %p6174_p1 = pneg %p6173_p10 }
  0x23   : > { %p6181_p6 = pnand %p6180_p0, %p6174_p1 }
  0x25   : > { %6184 = shalt.err (!%p6181_p6)
}
  0x26   : > { %s6317_s7 = smov 128   ;;  %s6318_s8 = smov 8  }
  0x27   : > { %5714 = dma.hbm_to_vmem [thread:$0]  (!%p6394_p11), %s7258_s1, 21504, %s6387_s22, [#allocation6], %s6317_s7, %s6317_s7, %s6318_s8  }
  0x28   : > { %s6185_s21 = scalar_lea.hbm %s7259_s2, 32 }
  0x29   : > { %p6186_p1 = scmp.ne.s32.totalorder %s7259_s2, %s6185_s21  ;;  %p6192_p10 = scmp.lt.u32.totalorder %s6185_s21, %s7259_s2 }
  0x2b   : > { %p6188_p2 = pnand %p6186_p1, %p6159_p13 }
  0x2d   : > { %p6189_p6 = pneg %p6188_p2 }
  0x2f   : > { %p6194_p3 = pnand %p6192_p10, %p6189_p6 }
  0x31   : > { %6197 = shalt.err (!%p6194_p3)
}
  0x32   : > { %s6198_s22 = scalar_lea.vmem %s6398_s25, 32  ;;  %p6206_p12 = scmp.lt.s32.totalorder %s6398_s25, %s6398_s25 }
  0x33   : > { %p6199_p5 = scmp.ne.s32.totalorder %s6398_s25, %s6198_s22  ;;  %p6207_p0 = scmp.lt.s32.totalorder %s6198_s22, %s6198_s22 }
  0x35   : > { %p6201_p7 = pnand %p6199_p5, %p6159_p13  ;;  %p6208_p1 = por %p6207_p0, %p6206_p12 }
  0x37   : > { %p6202_p9 = pneg %p6201_p7 }
  0x39   : > { %p6209_p2 = pnand %p6208_p1, %p6202_p9 }
  0x3b   : > { %6212 = shalt.err (!%p6209_p2)
}
  0x3c   : > { %5717 = dma.hbm_to_vmem [thread:$0]  (!%p6394_p11), %s7259_s2, 32, %s6398_s25, [#allocation6]  }
  0x3d   : > { %s6456_s4 = sadd.s32 1, %s6313_s15   ;;  %s27_s23 = sadd.s32 1, %s6309_s14 }
  0x3e   : > { %s24_s5 = ssub.s32 %s6313_s15, %s6456_s4  ;;  %p34_p13 = scmp.ne.s32.totalorder %s6309_s14, %s6305_s13 }
  0x3f   : > { %p25_p6 = scmp.eq.s32.totalorder %s24_s5, 0  ;;  %p35_p10 = scmp.eq.s32.totalorder %s6313_s15, 0 }
  0x40   : > { %p7268_p3 = scmp.eq.s32.totalorder %s6364_s16, 1  ;;  %p5728_p7 = scmp.lt.s32.totalorder %s6313_s15, 2 }
  0x41   : > { %s6472_s9 = scalar_select %p25_p6, %s6309_s14, %s27_s23  }
  0x42   : > { %p6466_p5 = por %p7268_p3, %p34_p13  ;;  %p36_p9 = por %p35_p10, %p34_p13 }
  0x43   : > { %s156_s10 = sand.u32 1, %s6309_s14   ;;  %s5697_s25 = smul.u32 5632, %s6313_s15 }
  0x44   : > { %s7269_s6 = scalar_select %p6466_p5, 1, 0 }
  0x45   : > { %s5696_s11 = smul.u32 352, %s156_s10  ;;  %p6476_p11 = pnand %p5728_p7, %p36_p9 }
  0x46   : > { %s6483_s26 = scalar_lea.hbm %s7257_s0, %s5697_s25  ;;  %s6487_s22 = scalar_lea.sflag [#allocation3], %s156_s10 }
  0x47   : > { %s160_s27 = scalar_lea.vmem [#allocation2], %s5696_s11  ;;  %s6213_s29 = scalar_lea.hbm %s6483_s26, 5632 }
  0x48   : > { %s167_s28 = sshll.u32 %s160_s27, 4  ;;  %p6214_p12 = scmp.ne.s32.totalorder %s6483_s26, %s6213_s29  ;;  %s6485_s28 = int_to_ptr.vmem [resolvable:$true] %s167_s28 }
  0x49   : > { %p6215_p0 = pneg %p6476_p11  ;;  %s6218_s5 = scalar_lea.hbm %s7257_s0, 11264 }
  0x4a   : > { %p6219_p13 = scmp.lt.u32.totalorder %s6483_s26, %s7257_s0  ;;  %p6220_p6 = scmp.lt.u32.totalorder %s6218_s5, %s6213_s29 }
  0x4b   : > { %p6216_p1 = pnand %p6215_p0, %p6214_p12  ;;  %p6222_p3 = scmp.lt.u32.totalorder %s6213_s29, %s6483_s26 }
  0x4c   : > { %p6221_p10 = por %p6220_p6, %p6219_p13 }
  0x4d   : > { %p6217_p2 = pneg %p6216_p1 }
  0x4e   : > { %p6223_p7 = por %p6222_p3, %p6221_p10 }
  0x50   : > { %p6224_p9 = pnand %p6223_p7, %p6217_p2 }
  0x52   : > { %6227 = shalt.err (!%p6224_p9)
}
  0x53   : > { %s6228_s10 = scalar_lea.vmem %s6485_s28, 5632  ;;  %s6319_s11 = smov [#allocation2]  }
  0x54   : > { %p6229_p12 = scmp.ne.s32.totalorder %s6485_s28, %s6228_s10  ;;  %s6233_s24 = sshll.u32 %s6319_s11, 4  ;;  %s6234_s24 = int_to_ptr.vmem [resolvable:$false] %s6233_s24 }
  0x55   : > { %s6235_s27 = scalar_lea.vmem %s6234_s24, 11264  ;;  %p6236_p4 = scmp.lt.s32.totalorder %s6485_s28, %s6234_s24 }
  0x56   : > { %p6231_p1 = pnand %p6229_p12, %p6215_p0  ;;  %p6237_p13 = scmp.lt.s32.totalorder %s6235_s27, %s6228_s10 }
  0x58   : > { %p6232_p5 = pneg %p6231_p1  ;;  %p6238_p6 = por %p6237_p13, %p6236_p4 }
  0x5a   : > { %p6239_p10 = pnand %p6238_p6, %p6232_p5 }
  0x5c   : > { %6242 = shalt.err (!%p6239_p10)
}
  0x5d   : > { %5721 = dma.hbm_to_vmem [thread:$0]  (!%p6476_p11), %s6483_s26, 5632, %s6485_s28, %s6487_s22, %s6317_s7, %s6317_s7, %s6318_s8  }
  0x5e   : > { %179 = sbr.rel (%p6383_p8) target bundleno = 833 (0x341), region = 32  ;;  %s6521_s29 = sand.u32 (!%p6383_p8), 1, %s6305_s13  }
  0x5f   : > { %s5698_s30 = smul.u32 (!%p6383_p8), 352, %s6521_s29  ;;  %s182_s23 = scalar_lea.sflag (!%p6383_p8), [#allocation3], %s6521_s29 }
  0x60   : > { %p7271_p4 = scmp.ne.s32.totalorder (!%p6383_p8), %s7264_s18, 0 }
  0x61   : > { %s6525_s5 = scalar_lea.vmem (!%p6383_p8), [#allocation2], %s5698_s30 }
  0x65   : > { %6288 = dma.done.wait (%p7271_p4), %s182_s23, 5632  }
  0x66   : > { %6290 = vsyncadd (%p7271_p4), %s182_s23, 4294961664  ;;  %p7272_p5 = scmp.eq.s32.totalorder %s6364_s16, 0 }
  0x68   : > { %6292 = dma.done.wait (%p7272_p5), [#allocation6], 21536   ;;  %p7273_p8 = pmov %p7272_p5 }
  0x69   : > { %v5770_v0 = vld [vmem:[#allocation5 + $0xc4] ss:$8 sps:$4 sm:$0xff]   ;;  %v5774_v2 = vld [vmem:[#allocation5 + $0xc0] ss:$8 sps:$4 sm:$0xff]   ;;  %v5776_v4 = vld [vmem:[#allocation5 + $0xd4] ss:$8 sps:$4 sm:$0xff]  }
  0x6a   : > { %6294 = vsyncadd (%p7273_p8), [#allocation6], 4294945760  ;;  %v5772_v1 = vld [vmem:[#allocation5 + $0x244] ss:$8 sps:$4 sm:$0xff]   ;;  %613 = vmatprep.subr.bf16.mxu1 %v5770_v0  ;;  %v5775_v3 = vld [vmem:[#allocation5 + $0x240] ss:$8 sps:$4 sm:$0xff]  }
  0x6b   : > { %2126 = vmatprep.subr.bf16.mxu0 %v5772_v1  ;;  %614 = vmatpush1.bf16.msra.mxu1 %v5774_v2  ;;  %v5778_v5 = vld [vmem:[#allocation5 + $0x254] ss:$8 sps:$4 sm:$0xff]   ;;  %v5780_v6 = vld [vmem:[#allocation5 + $0xd0] ss:$8 sps:$4 sm:$0xff]   ;;  %v5782_v8 = vld [vmem:[#allocation5 + $0xe4] ss:$8 sps:$4 sm:$0xff]  }
  0x6c   : > { %2127 = vmatpush1.bf16.msra.mxu0 %v5775_v3  ;;  %615 = vmatprep.subr.bf16.mxu1 %v5776_v4  ;;  %v5781_v7 = vld [vmem:[#allocation5 + $0x250] ss:$8 sps:$4 sm:$0xff]   ;;  %v5784_v9 = vld [vmem:[#allocation5 + $0x264] ss:$8 sps:$4 sm:$0xff]   ;;  %v5786_v10 = vld [vmem:[#allocation5 + $0xe0] ss:$8 sps:$4 sm:$0xff]  }
  0x6d   : > { %2128 = vmatprep.subr.bf16.mxu0 %v5778_v5  ;;  %v5787_v11 = vld [vmem:[#allocation5 + $0x260] ss:$8 sps:$4 sm:$0xff]   ;;  %v5788_v12 = vld [vmem:[#allocation5 + $0xf4] ss:$8 sps:$4 sm:$0xff]   ;;  %v5792_v14 = vld [vmem:[#allocation5 + $0xf0] ss:$8 sps:$4 sm:$0xff]  }
  0x6e   : > { %v5790_v13 = vld [vmem:[#allocation5 + $0x274] ss:$8 sps:$4 sm:$0xff]   ;;  %v5793_v15 = vld [vmem:[#allocation5 + $0x270] ss:$8 sps:$4 sm:$0xff]   ;;  %v5794_v16 = vld [vmem:[#allocation5 + $0x104] ss:$8 sps:$4 sm:$0xff]  }
  0x6f   : > { %616 = vmatpush1.bf16.msra.mxu1 %v5780_v6  ;;  %v5796_v17 = vld [vmem:[#allocation5 + $0x284] ss:$8 sps:$4 sm:$0xff]   ;;  %v5798_v18 = vld [vmem:[#allocation5 + $0x100] ss:$8 sps:$4 sm:$0xff]   ;;  %v5800_v20 = vld [vmem:[#allocation5 + $0x114] ss:$8 sps:$4 sm:$0xff]  }
  0x70   : > { %2129 = vmatpush1.bf16.msra.mxu0 %v5781_v7  ;;  %617 = vmatprep.subr.bf16.mxu1 %v5782_v8  ;;  %v5799_v19 = vld [vmem:[#allocation5 + $0x280] ss:$8 sps:$4 sm:$0xff]   ;;  %v5802_v21 = vld [vmem:[#allocation5 + $0x294] ss:$8 sps:$4 sm:$0xff]   ;;  %v5804_v22 = vld [vmem:[#allocation5 + $0x110] ss:$8 sps:$4 sm:$0xff]  }
  0x71   : > { %2130 = vmatprep.subr.bf16.mxu0 %v5784_v9  ;;  %v5805_v23 = vld [vmem:[#allocation5 + $0x290] ss:$8 sps:$4 sm:$0xff]   ;;  %v5806_v24 = vld [vmem:[#allocation5 + $0x124] ss:$8 sps:$4 sm:$0xff]   ;;  %v5810_v26 = vld [vmem:[#allocation5 + $0x120] ss:$8 sps:$4 sm:$0xff]  }
  0x72   : > { %v5808_v25 = vld [vmem:[#allocation5 + $0x2a4] ss:$8 sps:$4 sm:$0xff]   ;;  %v5811_v27 = vld [vmem:[#allocation5 + $0x2a0] ss:$8 sps:$4 sm:$0xff]   ;;  %v5812_v28 = vld [vmem:[#allocation5 + $0x134] ss:$8 sps:$4 sm:$0xff]  }
  0x73   : > { %618 = vmatpush1.bf16.msra.mxu1 %v5786_v10  ;;  %v5814_v29 = vld [vmem:[#allocation5 + $0x2b4] ss:$8 sps:$4 sm:$0xff]   ;;  %v5816_v30 = vld [vmem:[#allocation5 + $0x130] ss:$8 sps:$4 sm:$0xff]   ;;  %v5818_v32 = vld [vmem:[#allocation5 + $0x144] ss:$8 sps:$4 sm:$0xff]  }
  0x74   : > { %2131 = vmatpush1.bf16.msra.mxu0 %v5787_v11  ;;  %619 = vmatprep.subr.bf16.mxu1 %v5788_v12  ;;  %v5817_v31 = vld [vmem:[#allocation5 + $0x2b0] ss:$8 sps:$4 sm:$0xff]   ;;  %v5820_v33 = vld [vmem:[#allocation5 + $0x2c4] ss:$8 sps:$4 sm:$0xff]   ;;  %v5822_v34 = vld [vmem:[#allocation5 + $0x140] ss:$8 sps:$4 sm:$0xff]  }
  0x75   : > { %2132 = vmatprep.subr.bf16.mxu0 %v5790_v13  ;;  %v5823_v35 = vld [vmem:[#allocation5 + $0x2c0] ss:$8 sps:$4 sm:$0xff]   ;;  %v5824_v36 = vld [vmem:[#allocation5 + $0x154] ss:$8 sps:$4 sm:$0xff]   ;;  %vm564_vm0 = vcmask 523264   ;;  %s4743_s18 = sshll.u32 %s6521_s29, 8 }
  0x76   : > { %v5826_v37 = vld [vmem:[#allocation5 + $0x2d4] ss:$8 sps:$4 sm:$0xff]   ;;  %v5828_v40 = vld [vmem:[#allocation5 + $0x150] ss:$8 sps:$4 sm:$0xff]   ;;  %v5830_v42 = vld [vmem:[#allocation5 + $0x164] ss:$8 sps:$4 sm:$0xff]  }
  0x77   : > { %620 = vmatpush1.bf16.msra.mxu1 %v5792_v14  ;;  %v6536_v38 = vld [vmem:[%s6525_s5 + $0x14] ss:$8 sps:$4 sm:$0xff]   ;;  %v5829_v41 = vld [vmem:[#allocation5 + $0x2d0] ss:$8 sps:$4 sm:$0xff]   ;;  %v5832_v43 = vld [vmem:[#allocation5 + $0x2e4] ss:$8 sps:$4 sm:$0xff]  }
  0x78   : > { %2133 = vmatpush1.bf16.msra.mxu0 %v5793_v15  ;;  %621 = vmatprep.subr.bf16.mxu1 %v5794_v16  ;;  %v6539_v39 = vld [vmem:[%s6525_s5 + $0x34] ss:$8 sps:$4 sm:$0xff]   ;;  %v5834_v44 = vld [vmem:[#allocation5 + $0x160] ss:$8 sps:$4 sm:$0xff]   ;;  %v5840_v48 = vld [vmem:[#allocation5 + $0x170] ss:$8 sps:$4 sm:$0xff]  }
  0x79   : > { %2134 = vmatprep.subr.bf16.mxu0 %v5796_v17  ;;  %4800 = vmatprep.mubr.msk.bf16.mxu1 %vm564_vm0, %v6536_v38  ;;  %v5835_v45 = vld [vmem:[#allocation5 + $0x2e0] ss:$8 sps:$4 sm:$0xff]   ;;  %v5836_v46 = vld [vmem:[#allocation5 + $0x174] ss:$8 sps:$4 sm:$0xff]   ;;  %v5841_v49 = vld [vmem:[#allocation5 + $0x2f0] ss:$8 sps:$4 sm:$0xff]  }
  0x7a   : > { %4986 = vmatprep.mubr.msk.bf16.mxu0 %vm564_vm0, %v6539_v39  ;;  %v5838_v47 = vld [vmem:[#allocation5 + $0x2f4] ss:$8 sps:$4 sm:$0xff]   ;;  %v5850_v50 = vld [vmem:[#allocation5 + $0x4] ss:$8 sps:$4 sm:$0xff]   ;;  %v6546_v52 = vld [vmem:[%s6525_s5 + $0x10] ss:$8 sps:$4 sm:$0xff]  }
  0x7b   : > { %622 = vmatpush1.bf16.msra.mxu1 %v5798_v18  ;;  %v5853_v51 = vld [vmem:[#allocation5 + $0x304] ss:$8 sps:$4 sm:$0xff]   ;;  %v6549_v53 = vld [vmem:[%s6525_s5 + $0x30] ss:$8 sps:$4 sm:$0xff]   ;;  %v5848_v54 = vld [vmem:[#allocation5] ss:$8 sps:$4 sm:$0xff]  }
  0x7c   : > { %2135 = vmatpush1.bf16.msra.mxu0 %v5799_v19  ;;  %623 = vmatprep.subr.bf16.mxu1 %v5800_v20  ;;  %v5851_v55 = vld [vmem:[#allocation5 + $0x300] ss:$8 sps:$4 sm:$0xff]   ;;  %v5856_v56 = vld [vmem:[#allocation5 + $0x314] ss:$8 sps:$4 sm:$0xff]   ;;  %v6552_v57 = vld [vmem:[%s6525_s5 + $0x24] ss:$8 sps:$4 sm:$0xff]  }
  0x7d   : > { %2136 = vmatprep.subr.bf16.mxu0 %v5802_v21  ;;  %v6555_v58 = vld [vmem:[%s6525_s5 + $0x44] ss:$8 sps:$4 sm:$0xff]   ;;  %v5865_v59 = vld [vmem:[#allocation5 + $0x14] ss:$8 sps:$4 sm:$0xff]   ;;  %v5854_v60 = vld [vmem:[#allocation5 + $0x310] ss:$8 sps:$4 sm:$0xff]  }
  0x7e   : > { %v5863_v61 = vld [vmem:[#allocation5 + $0x10] ss:$8 sps:$4 sm:$0xff]   ;;  %v5868_v62 = vld [vmem:[#allocation5 + $0x324] ss:$8 sps:$4 sm:$0xff]   ;;  %v6564_v0 = vld [vmem:[%s6525_s5 + $0x20] ss:$8 sps:$4 sm:$0xff]  }
  0x7f   : > { %624 = vmatpush1.bf16.msra.mxu1 %v5804_v22  ;;  %v5877_v63 = vld [vmem:[#allocation5 + $0x24] ss:$8 sps:$4 sm:$0xff]   ;;  %v6567_v1 = vld [vmem:[%s6525_s5 + $0x40] ss:$8 sps:$4 sm:$0xff]   ;;  %v6570_v3 = vld [vmem:[%s6525_s5 + $0x54] ss:$8 sps:$4 sm:$0xff]  }
  0x80   : > { %2137 = vmatpush1.bf16.msra.mxu0 %v5805_v23  ;;  %625 = vmatprep.subr.bf16.mxu1 %v5806_v24  ;;  %v5866_v2 = vld [vmem:[#allocation5 + $0x320] ss:$8 sps:$4 sm:$0xff]   ;;  %v5874_v4 = vld [vmem:[#allocation5 + $0x334] ss:$8 sps:$4 sm:$0xff]   ;;  %v5872_v7 = vld [vmem:[#allocation5 + $0x330] ss:$8 sps:$4 sm:$0xff]  }
  0x81   : > { %2138 = vmatprep.subr.bf16.mxu0 %v5808_v25  ;;  %v5875_v5 = vld [vmem:[#allocation5 + $0x20] ss:$8 sps:$4 sm:$0xff]   ;;  %v5891_v6 = vld [vmem:[#allocation5 + $0x34] ss:$8 sps:$4 sm:$0xff]   ;;  %v5880_v8 = vld [vmem:[#allocation5 + $0x344] ss:$8 sps:$4 sm:$0xff]  }
  0x82   : > { %v5889_v9 = vld [vmem:[#allocation5 + $0x30] ss:$8 sps:$4 sm:$0xff]   ;;  %v5878_v11 = vld [vmem:[#allocation5 + $0x340] ss:$8 sps:$4 sm:$0xff]   ;;  %v6582_v12 = vld [vmem:[%s6525_s5 + $0x64] ss:$8 sps:$4 sm:$0xff]  }
  0x83   : > { %626 = vmatpush1.bf16.msra.mxu1 %v5810_v26  ;;  %v6579_v10 = vld [vmem:[%s6525_s5 + $0x50] ss:$8 sps:$4 sm:$0xff]   ;;  %v5904_v13 = vld [vmem:[#allocation5 + $0x44] ss:$8 sps:$4 sm:$0xff]   ;;  %v5886_v14 = vld [vmem:[#allocation5 + $0x354] ss:$8 sps:$4 sm:$0xff]  }
  0x84   : > { %2139 = vmatpush1.bf16.msra.mxu0 %v5811_v27  ;;  %627 = vmatprep.subr.bf16.mxu1 %v5812_v28  ;;  %v5902_v15 = vld [vmem:[#allocation5 + $0x40] ss:$8 sps:$4 sm:$0xff]   ;;  %v5916_v16 = vld [vmem:[#allocation5 + $0x54] ss:$8 sps:$4 sm:$0xff]   ;;  %v5884_v17 = vld [vmem:[#allocation5 + $0x350] ss:$8 sps:$4 sm:$0xff]  }
  0x85   : > { %2140 = vmatprep.subr.bf16.mxu0 %v5814_v29  ;;  %v5895_v18 = vld [vmem:[#allocation5 + $0x364] ss:$8 sps:$4 sm:$0xff]   ;;  %v5914_v19 = vld [vmem:[#allocation5 + $0x50] ss:$8 sps:$4 sm:$0xff]   ;;  %v6591_v20 = vld [vmem:[%s6525_s5 + $0x60] ss:$8 sps:$4 sm:$0xff]  }
  0x86   : > { %v6594_v21 = vld [vmem:[%s6525_s5 + $0x74] ss:$8 sps:$4 sm:$0xff]   ;;  %v5893_v22 = vld [vmem:[#allocation5 + $0x360] ss:$8 sps:$4 sm:$0xff]   ;;  %v5928_v23 = vld [vmem:[#allocation5 + $0x64] ss:$8 sps:$4 sm:$0xff]  }
  0x87   : > { %628 = vmatpush1.bf16.msra.mxu1 %v5816_v30  ;;  %v5898_v24 = vld [vmem:[#allocation5 + $0x374] ss:$8 sps:$4 sm:$0xff]   ;;  %v5926_v25 = vld [vmem:[#allocation5 + $0x60] ss:$8 sps:$4 sm:$0xff]   ;;  %v5896_v27 = vld [vmem:[#allocation5 + $0x370] ss:$8 sps:$4 sm:$0xff]  }
  0x88   : > { %2141 = vmatpush1.bf16.msra.mxu0 %v5817_v31  ;;  %629 = vmatprep.subr.bf16.mxu1 %v5818_v32  ;;  %v5934_v26 = vld [vmem:[#allocation5 + $0x74] ss:$8 sps:$4 sm:$0xff]   ;;  %v5907_v28 = vld [vmem:[#allocation5 + $0x384] ss:$8 sps:$4 sm:$0xff]   ;;  %v5932_v29 = vld [vmem:[#allocation5 + $0x70] ss:$8 sps:$4 sm:$0xff]  }
  0x89   : > { %2142 = vmatprep.subr.bf16.mxu0 %v5820_v33  ;;  %v6603_v30 = vld [vmem:[%s6525_s5 + $0x70] ss:$8 sps:$4 sm:$0xff]   ;;  %v6606_v31 = vld [vmem:[%s6525_s5 + $0x84] ss:$8 sps:$4 sm:$0xff]   ;;  %v5905_v32 = vld [vmem:[#allocation5 + $0x380] ss:$8 sps:$4 sm:$0xff]  }
  0x8a   : > { %v5943_v33 = vld [vmem:[#allocation5 + $0x84] ss:$8 sps:$4 sm:$0xff]   ;;  %vm4593_vm1 = vcmask 1043456   ;;  %vm4594_vm2 = vcmask 523268   ;;  %s7022_s20 = scalar_lea.vmem [#allocation8], %s4743_s18  ;;  %s5287_s7 = sshll.u32 %s6364_s16, 12 }
  0x8b   : > { %630 = vmatpush1.bf16.msra.mxu1 %v5822_v34  ;;  %v5913_v34 = vld [vmem:[#allocation5 + $0x394] ss:$8 sps:$4 sm:$0xff]   ;;  %vm7018_vm3 = vmor %vm4594_vm2, %vm4593_vm1  ;;  %s4642_s8 = sshll.u32 %s7022_s20, 4  ;;  %s7205_s28 = scalar_lea.hbm %s7260_s3, %s5287_s7  ;;  %s7207_s8 = int_to_ptr.vmem [resolvable:$true] %s4642_s8 }
  0x8c   : > { %2143 = vmatpush1.bf16.msra.mxu0 %v5823_v35  ;;  %631 = vmatprep.subr.bf16.mxu1 %v5824_v36  ;;  %v5941_v35 = vld [vmem:[#allocation5 + $0x80] ss:$8 sps:$4 sm:$0xff]   ;;  %v5955_v36 = vld [vmem:[#allocation5 + $0x94] ss:$8 sps:$4 sm:$0xff]   ;;  %s4629_s16 = scalar_lea.sflag [#allocation4], %s6521_s29  ;;  %s6243_s22 = scalar_lea.vmem %s7207_s8, 4096 }
  0x8d   : > { %2144 = vmatprep.subr.bf16.mxu0 %v5826_v37  ;;  %v5911_v37 = vld [vmem:[#allocation5 + $0x390] ss:$8 sps:$4 sm:$0xff]   ;;  %p6244_p11 = scmp.ne.s32.totalorder %s7207_s8, %s6243_s22  ;;  %p7276_p0 = scmp.ne.s32.totalorder %s7269_s6, 0 }
  0x8e   : > { %s6320_s25 = smov [#allocation8]  }
  0x8f   : > { %632 = vmatpush1.bf16.msra.mxu1 %v5828_v40  ;;  %v5919_v40 = vld [vmem:[#allocation5 + $0x3a4] ss:$8 sps:$4 sm:$0xff]   ;;  %p6245_p2 = pnand %p6244_p11, %p7276_p0  ;;  %s6247_s21 = sshll.u32 %s6320_s25, 4  ;;  %s6248_s21 = int_to_ptr.vmem [resolvable:$false] %s6247_s21 }
  0x90   : > { %2145 = vmatpush1.bf16.msra.mxu0 %v5829_v41  ;;  %633 = vmatprep.subr.bf16.mxu1 %v5830_v42  ;;  %v5953_v41 = vld [vmem:[#allocation5 + $0x90] ss:$8 sps:$4 sm:$0xff]   ;;  %v6615_v42 = vld [vmem:[%s6525_s5 + $0x80] ss:$8 sps:$4 sm:$0xff]   ;;  %s6249_s10 = scalar_lea.vmem %s6248_s21, 8192  ;;  %p6250_p7 = scmp.lt.s32.totalorder %s7207_s8, %s6248_s21 }
  0x91   : > { %2146 = vmatprep.subr.bf16.mxu0 %v5832_v43  ;;  %v6618_v43 = vld [vmem:[%s6525_s5 + $0x94] ss:$8 sps:$4 sm:$0xff]   ;;  %p6246_p3 = pneg %p6245_p2  ;;  %p6251_p9 = scmp.lt.s32.totalorder %s6249_s10, %s6243_s22 }
  0x93   : > { %634 = vmatpush1.bf16.msra.mxu1 %v5834_v44  ;;  %v5917_v44 = vld [vmem:[#allocation5 + $0x3a0] ss:$8 sps:$4 sm:$0xff]   ;;  %p6252_p12 = por %p6251_p9, %p6250_p7 }
  0x94   : > { %2147 = vmatpush1.bf16.msra.mxu0 %v5835_v45  ;;  %635 = vmatprep.subr.bf16.mxu1 %v5836_v46  ;;  %v5964_v45 = vld [vmem:[#allocation5 + $0xa4] ss:$8 sps:$4 sm:$0xff]   ;;  %v5925_v46 = vld [vmem:[#allocation5 + $0x3b4] ss:$8 sps:$4 sm:$0xff]  }
  0x95   : > { %2148 = vmatprep.subr.bf16.mxu0 %v5838_v47  ;;  %v5962_v47 = vld [vmem:[#allocation5 + $0xa0] ss:$8 sps:$4 sm:$0xff]   ;;  %p6253_p1 = pnand %p6252_p12, %p6246_p3 }
  0x97   : > { %636 = vmatpush1.bf16.msra.mxu1 %v5840_v48  ;;  %v5973_v48 = vld [vmem:[#allocation5 + $0xb4] ss:$8 sps:$4 sm:$0xff]  }
  0x98   : > { %2149 = vmatpush1.bf16.msra.mxu0 %v5841_v49  ;;  %938 = vmatprep.subr.bf16.mxu1 %v5850_v50  ;;  %v5923_v49 = vld [vmem:[#allocation5 + $0x3b0] ss:$8 sps:$4 sm:$0xff]   ;;  %v5931_v50 = vld [vmem:[#allocation5 + $0x3c4] ss:$8 sps:$4 sm:$0xff]  }
  0x99   : > { %2752 = vmatprep.subr.bf16.mxu0 %v5853_v51  ;;  %v5971_v51 = vld [vmem:[#allocation5 + $0xb0] ss:$8 sps:$4 sm:$0xff]  }
  0x9a   : > { %646 = vmatmul.mubr.bf16.vlgmr.msra.gmra.mrb[0].mxu1 %v6546_v52 }
  0x9b   : > { %2159 = vmatmul.mubr.bf16.vlgmr.msra.gmra.mrb[0].mxu0 %v6549_v53  ;;  %939 = vmatpush1.bf16.msra.mxu1 %v5848_v54  ;;  %v6627_v54 = vld [vmem:[%s6525_s5 + $0x90] ss:$8 sps:$4 sm:$0xff]  }
  0x9c   : > { %2753 = vmatpush1.bf16.msra.mxu0 %v5851_v55  ;;  %4801 = vmatprep.mubr.msk.bf16.mxu1 %vm564_vm0, %v6552_v57  ;;  %v6630_v55 = vld [vmem:[%s6525_s5 + $0xa4] ss:$8 sps:$4 sm:$0xff]  }
  0x9d   : > { %2754 = vmatprep.subr.bf16.mxu0 %v5856_v56  ;;  %4987 = vmatprep.mubr.msk.bf16.mxu0 %vm564_vm0, %v6555_v58  ;;  %v5985_v56 = vld [vmem:[#allocation5 + $0x184] ss:$8 sps:$4 sm:$0xff]  }
  0x9e   : > { %940 = vmatprep.subr.bf16.mxu1 %v5865_v59  ;;  %v6639_v59 = vld [vmem:[%s6525_s5 + $0xa0] ss:$8 sps:$4 sm:$0xff]  }
  0x9f   : > { %941 = vmatpush1.bf16.msra.mxu1 %v5863_v61  ;;  %v5937_v61 = vld [vmem:[#allocation5 + $0x3d4] ss:$8 sps:$4 sm:$0xff]  }
  0xa0   : > { %2755 = vmatpush1.bf16.msra.mxu0 %v5854_v60  ;;  %942 = vmatprep.subr.bf16.mxu1 %v5877_v63  ;;  %v5929_v60 = vld [vmem:[#allocation5 + $0x3c0] ss:$8 sps:$4 sm:$0xff]   ;;  %v5946_v63 = vld [vmem:[#allocation5 + $0x3e4] ss:$8 sps:$4 sm:$0xff]  }
  0xa1   : > { %2756 = vmatprep.subr.bf16.mxu0 %v5868_v62  ;;  %v5935_v62 = vld [vmem:[#allocation5 + $0x3d0] ss:$8 sps:$4 sm:$0xff]  }
  0xa2   : > { %656 = vmatmul.mubr.bf16.gmra.mrb[4].mxu1 %v6564_v0 }
  0xa3   : > { %2169 = vmatmul.mubr.bf16.gmra.mrb[4].mxu0 %v6567_v1  ;;  %4802 = vmatprep.mubr.msk.bf16.mxu1 %vm564_vm0, %v6539_v39 }
  0xa4   : > { %2757 = vmatpush1.bf16.msra.mxu0 %v5866_v2  ;;  %4988 = vmatprep.mubr.msk.bf16.mxu0 %vm564_vm0, %v6570_v3  ;;  %v6654_v2 = vld [vmem:[%s6525_s5 + $0xb4] ss:$8 sps:$4 sm:$0xff]  }
  0xa5   : > { %2758 = vmatprep.subr.bf16.mxu0 %v5874_v4  ;;  %943 = vmatpush1.bf16.msra.mxu1 %v5875_v5  ;;  %v5944_v4 = vld [vmem:[#allocation5 + $0x3e0] ss:$8 sps:$4 sm:$0xff]   ;;  %v5958_v5 = vld [vmem:[#allocation5 + $0x3f4] ss:$8 sps:$4 sm:$0xff]  }
  0xa6   : > { %944 = vmatprep.subr.bf16.mxu1 %v5891_v6  ;;  %v5956_v6 = vld [vmem:[#allocation5 + $0x3f0] ss:$8 sps:$4 sm:$0xff]  }
  0xa8   : > { %2759 = vmatpush1.bf16.msra.mxu0 %v5872_v7  ;;  %v5967_v7 = vld [vmem:[#allocation5 + $0x404] ss:$8 sps:$4 sm:$0xff]  }
  0xa9   : > { %2760 = vmatprep.subr.bf16.mxu0 %v5880_v8  ;;  %945 = vmatpush1.bf16.msra.mxu1 %v5889_v9  ;;  %v6663_v8 = vld [vmem:[%s6525_s5 + $0xb0] ss:$8 sps:$4 sm:$0xff]   ;;  %v6666_v9 = vld [vmem:[%s6525_s5 + $0xc4] ss:$8 sps:$4 sm:$0xff]  }
  0xaa   : > { %666 = vmatmul.mubr.bf16.gmra.mrb[8].mxu1 %v6549_v53  ;;  %946 = vmatprep.subr.bf16.mxu1 %v5904_v13  ;;  %v5976_v13 = vld [vmem:[#allocation5 + $0x414] ss:$8 sps:$4 sm:$0xff]  }
  0xab   : > { %2179 = vmatmul.mubr.bf16.gmra.mrb[8].mxu0 %v6579_v10  ;;  %4803 = vmatprep.mubr.msk.bf16.mxu1 %vm564_vm0, %v6555_v58 }
  0xac   : > { %4989 = vmatprep.mubr.msk.bf16.mxu0 %vm564_vm0, %v6582_v12  ;;  %2761 = vmatpush1.bf16.msra.mxu0 %v5878_v11  ;;  %v5965_v11 = vld [vmem:[#allocation5 + $0x400] ss:$8 sps:$4 sm:$0xff]  }
  0xad   : > { %2762 = vmatprep.subr.bf16.mxu0 %v5886_v14  ;;  %947 = vmatpush1.bf16.msra.mxu1 %v5902_v15  ;;  %v5974_v14 = vld [vmem:[#allocation5 + $0x410] ss:$8 sps:$4 sm:$0xff]   ;;  %v5988_v15 = vld [vmem:[#allocation5 + $0x424] ss:$8 sps:$4 sm:$0xff]  }
  0xae   : > { %948 = vmatprep.subr.bf16.mxu1 %v5916_v16  ;;  %v6675_v16 = vld [vmem:[%s6525_s5 + $0xc0] ss:$8 sps:$4 sm:$0xff]  }
  0xb0   : > { %2763 = vmatpush1.bf16.msra.mxu0 %v5884_v17  ;;  %v6678_v17 = vld [vmem:[%s6525_s5 + $0xd4] ss:$8 sps:$4 sm:$0xff]  }
  0xb1   : > { %2764 = vmatprep.subr.bf16.mxu0 %v5895_v18  ;;  %949 = vmatpush1.bf16.msra.mxu1 %v5914_v19  ;;  %v5986_v18 = vld [vmem:[#allocation5 + $0x420] ss:$8 sps:$4 sm:$0xff]   ;;  %v5994_v19 = vld [vmem:[#allocation5 + $0x434] ss:$8 sps:$4 sm:$0xff]  }
  0xb2   : > { %676 = vmatmul.mubr.bf16.gmra.mrb[12].mxu1 %v6567_v1  ;;  %950 = vmatprep.subr.bf16.mxu1 %v5928_v23  ;;  %v6000_v23 = vld [vmem:[#allocation5 + $0x444] ss:$8 sps:$4 sm:$0xff]  }
  0xb3   : > { %2189 = vmatmul.mubr.bf16.gmra.mrb[12].mxu0 %v6591_v20  ;;  %4804 = vmatprep.mubr.msk.bf16.mxu1 %vm564_vm0, %v6570_v3 }
  0xb4   : > { %4990 = vmatprep.mubr.msk.bf16.mxu0 %vm564_vm0, %v6594_v21  ;;  %2765 = vmatpush1.bf16.msra.mxu0 %v5893_v22  ;;  %v5992_v22 = vld [vmem:[#allocation5 + $0x430] ss:$8 sps:$4 sm:$0xff]  }
  0xb5   : > { %2766 = vmatprep.subr.bf16.mxu0 %v5898_v24  ;;  %951 = vmatpush1.bf16.msra.mxu1 %v5926_v25  ;;  %v6687_v24 = vld [vmem:[%s6525_s5 + $0xd0] ss:$8 sps:$4 sm:$0xff]   ;;  %v6690_v25 = vld [vmem:[%s6525_s5 + $0xe4] ss:$8 sps:$4 sm:$0xff]  }
  0xb6   : > { %952 = vmatprep.subr.bf16.mxu1 %v5934_v26  ;;  %v5998_v26 = vld [vmem:[#allocation5 + $0x440] ss:$8 sps:$4 sm:$0xff]  }
  0xb8   : > { %2767 = vmatpush1.bf16.msra.mxu0 %v5896_v27  ;;  %v6006_v27 = vld [vmem:[#allocation5 + $0x454] ss:$8 sps:$4 sm:$0xff]  }
  0xb9   : > { %2768 = vmatprep.subr.bf16.mxu0 %v5907_v28  ;;  %953 = vmatpush1.bf16.msra.mxu1 %v5932_v29  ;;  %v6004_v28 = vld [vmem:[#allocation5 + $0x450] ss:$8 sps:$4 sm:$0xff]   ;;  %v6015_v29 = vld [vmem:[#allocation5 + $0x464] ss:$8 sps:$4 sm:$0xff]  }
  0xba   : > { %686 = vmatmul.mubr.bf16.gmra.mrb[16].mxu1 %v6579_v10  ;;  %954 = vmatprep.subr.bf16.mxu1 %v5943_v33  ;;  %v6702_v33 = vld [vmem:[%s6525_s5 + $0xf4] ss:$8 sps:$4 sm:$0xff]  }
  0xbb   : > { %2199 = vmatmul.mubr.bf16.gmra.mrb[16].mxu0 %v6603_v30  ;;  %4805 = vmatprep.mubr.msk.bf16.mxu1 %vm564_vm0, %v6582_v12 }
  0xbc   : > { %4991 = vmatprep.mubr.msk.bf16.mxu0 %vm564_vm0, %v6606_v31  ;;  %2769 = vmatpush1.bf16.msra.mxu0 %v5905_v32  ;;  %v6699_v32 = vld [vmem:[%s6525_s5 + $0xe0] ss:$8 sps:$4 sm:$0xff]  }
  0xbd   : > { %2770 = vmatprep.subr.bf16.mxu0 %v5913_v34  ;;  %955 = vmatpush1.bf16.msra.mxu1 %v5941_v35  ;;  %v6013_v34 = vld [vmem:[#allocation5 + $0x460] ss:$8 sps:$4 sm:$0xff]   ;;  %v6024_v35 = vld [vmem:[#allocation5 + $0x474] ss:$8 sps:$4 sm:$0xff]  }
  0xbe   : > { %956 = vmatprep.subr.bf16.mxu1 %v5955_v36  ;;  %v6022_v36 = vld [vmem:[#allocation5 + $0x470] ss:$8 sps:$4 sm:$0xff]  }
  0xc0   : > { %2771 = vmatpush1.bf16.msra.mxu0 %v5911_v37  ;;  %v6033_v37 = vld [vmem:[#allocation5 + $0x484] ss:$8 sps:$4 sm:$0xff]  }
  0xc1   : > { %2772 = vmatprep.subr.bf16.mxu0 %v5919_v40  ;;  %957 = vmatpush1.bf16.msra.mxu1 %v5953_v41  ;;  %v6711_v40 = vld [vmem:[%s6525_s5 + $0xf0] ss:$8 sps:$4 sm:$0xff]   ;;  %v6714_v41 = vld [vmem:[%s6525_s5 + $0x104] ss:$8 sps:$4 sm:$0xff]  }
  0xc2   : > { %696 = vmatmul.mubr.bf16.gmra.mrb[20].mxu1 %v6591_v20  ;;  %958 = vmatprep.subr.bf16.mxu1 %v5964_v45  ;;  %v5982_v45 = vld [vmem:[%s6525_s5 + $0x4] ss:$8 sps:$4 sm:$0xff]  }
  0xc3   : > { %2209 = vmatmul.mubr.bf16.gmra.mrb[20].mxu0 %v6615_v42  ;;  %4806 = vmatprep.mubr.msk.bf16.mxu1 %vm564_vm0, %v6594_v21 }
  0xc4   : > { %4992 = vmatprep.mubr.msk.bf16.mxu0 %vm564_vm0, %v6618_v43  ;;  %2773 = vmatpush1.bf16.msra.mxu0 %v5917_v44  ;;  %v6723_v44 = vld [vmem:[%s6525_s5 + $0x100] ss:$8 sps:$4 sm:$0xff]  }
  0xc5   : > { %2774 = vmatprep.subr.bf16.mxu0 %v5925_v46  ;;  %959 = vmatpush1.bf16.msra.mxu1 %v5962_v47  ;;  %v5980_v46 = vld [vmem:[%s6525_s5] ss:$8 sps:$4 sm:$0xff]  }
  0xc6   : > { %960 = vmatprep.subr.bf16.mxu1 %v5973_v48  ;;  %v5983_v47 = vld [vmem:[#allocation5 + $0x180] ss:$8 sps:$4 sm:$0xff]   ;;  %v5991_v48 = vld [vmem:[#allocation5 + $0x194] ss:$8 sps:$4 sm:$0xff]  }
  0xc8   : > { %2775 = vmatpush1.bf16.msra.mxu0 %v5923_v49  ;;  %v5989_v49 = vld [vmem:[#allocation5 + $0x190] ss:$8 sps:$4 sm:$0xff]  }
  0xc9   : > { %3378 = vmatprep.subr.bf16.mxu0 %v5931_v50  ;;  %961 = vmatpush1.bf16.msra.mxu1 %v5971_v51  ;;  %v5997_v50 = vld [vmem:[#allocation5 + $0x1a4] ss:$8 sps:$4 sm:$0xff]   ;;  %v5995_v51 = vld [vmem:[#allocation5 + $0x1a0] ss:$8 sps:$4 sm:$0xff]  }
  0xca   : > { %706 = vmatmul.mubr.bf16.gmra.mrb[24].mxu1 %v6603_v30  ;;  %1500 = vmatprep.subr.bf16.mxu1 %v5985_v56  ;;  %v6003_v56 = vld [vmem:[#allocation5 + $0x1b4] ss:$8 sps:$4 sm:$0xff]  }
  0xcb   : > { %2219 = vmatmul.mubr.bf16.gmra.mrb[24].mxu0 %v6627_v54  ;;  %4807 = vmatprep.mubr.msk.bf16.mxu1 %vm564_vm0, %v6606_v31 }
  0xcc   : > { %4993 = vmatprep.mubr.msk.bf16.mxu0 %vm564_vm0, %v6630_v55 }
  0xd2   : > { %716 = vmatmul.mubr.bf16.gmra.mrb[28].mxu1 %v6615_v42 }
  0xd3   : > { %2229 = vmatmul.mubr.bf16.gmra.mrb[28].mxu0 %v6639_v59  ;;  %4808 = vmatprep.mubr.msk.bf16.mxu1 %vm564_vm0, %v6618_v43 }
  0xd4   : > { %5058 = vmatprep.mubr.msk.bf16.mxu0 %vm564_vm0, %v6555_v58 }
  0xda   : > { %726 = vmatmul.mubr.bf16.gmra.mrb[32].mxu1 %v6627_v54 }
  0xdb   : > { %2785 = vmatmul.mubr.bf16.vlgmr.msra.gmra.mrb[0].mxu0 %v6567_v1  ;;  %4809 = vmatprep.mubr.msk.bf16.mxu1 %vm564_vm0, %v6630_v55 }
  0xdc   : > { %3379 = vmatpush1.bf16.msra.mxu0 %v5929_v60  ;;  %5059 = vmatprep.mubr.msk.bf16.mxu0 %vm564_vm0, %v6570_v3  ;;  %v6012_v60 = vld [vmem:[#allocation5 + $0x1c4] ss:$8 sps:$4 sm:$0xff]  }
  0xdd   : > { %3380 = vmatprep.subr.bf16.mxu0 %v5937_v61  ;;  %v6010_v61 = vld [vmem:[#allocation5 + $0x1c0] ss:$8 sps:$4 sm:$0xff]  }
  0xe0   : > { %3381 = vmatpush1.bf16.msra.mxu0 %v5935_v62  ;;  %v6021_v62 = vld [vmem:[#allocation5 + $0x1d4] ss:$8 sps:$4 sm:$0xff]  }
  0xe1   : > { %3382 = vmatprep.subr.bf16.mxu0 %v5946_v63  ;;  %v6028_v63 = vld [vmem:[#allocation5 + $0x1e0] ss:$8 sps:$4 sm:$0xff]  }
  0xe2   : > { %736 = vmatmul.mubr.bf16.gmra.mrb[36].mxu1 %v6639_v59 }
  0xe3   : > { %2795 = vmatmul.mubr.bf16.gmra.mrb[4].mxu0 %v6579_v10  ;;  %4810 = vmatprep.mubr.msk.bf16.mxu1 %vm564_vm0, %v6654_v2 }
  0xe4   : > { %5060 = vmatprep.mubr.msk.bf16.mxu0 %vm564_vm0, %v6582_v12  ;;  %3383 = vmatpush1.bf16.msra.mxu0 %v5944_v4  ;;  %v6036_v4 = vld [vmem:[#allocation5 + $0x1f4] ss:$8 sps:$4 sm:$0xff]  }
  0xe5   : > { %3384 = vmatprep.subr.bf16.mxu0 %v5958_v5  ;;  %v6756_v5 = vld [vmem:[%s6525_s5 + $0x114] ss:$8 sps:$4 sm:$0xff]  }
  0xe8   : > { %3385 = vmatpush1.bf16.msra.mxu0 %v5956_v6  ;;  %v6040_v6 = vld [vmem:[#allocation5 + $0x200] ss:$8 sps:$4 sm:$0xff]  }
  0xe9   : > { %3386 = vmatprep.subr.bf16.mxu0 %v5967_v7  ;;  %v6054_v7 = vld [vmem:[#allocation5 + $0x224] ss:$8 sps:$4 sm:$0xff]  }
  0xea   : > { %746 = vmatmul.mubr.bf16.gmra.mrb[40].mxu1 %v6663_v8 }
  0xeb   : > { %2805 = vmatmul.mubr.bf16.gmra.mrb[8].mxu0 %v6591_v20  ;;  %4811 = vmatprep.mubr.msk.bf16.mxu1 %vm564_vm0, %v6666_v9 }
  0xec   : > { %5061 = vmatprep.mubr.msk.bf16.mxu0 %vm564_vm0, %v6594_v21  ;;  %3387 = vmatpush1.bf16.msra.mxu0 %v5965_v11  ;;  %v6765_v11 = vld [vmem:[%s6525_s5 + $0x110] ss:$8 sps:$4 sm:$0xff]  }
  0xed   : > { %3388 = vmatprep.subr.bf16.mxu0 %v5976_v13  ;;  %v6768_v13 = vld [vmem:[%s6525_s5 + $0x124] ss:$8 sps:$4 sm:$0xff]  }
  0xf0   : > { %3389 = vmatpush1.bf16.msra.mxu0 %v5974_v14  ;;  %v6060_v14 = vld [vmem:[#allocation5 + $0x234] ss:$8 sps:$4 sm:$0xff]  }
  0xf1   : > { %3390 = vmatprep.subr.bf16.mxu0 %v5988_v15  ;;  %v6058_v15 = vld [vmem:[#allocation5 + $0x230] ss:$8 sps:$4 sm:$0xff]  }
  0xf2   : > { %756 = vmatmul.mubr.bf16.gmra.mrb[44].mxu1 %v6675_v16 }
  0xf3   : > { %2815 = vmatmul.mubr.bf16.gmra.mrb[12].mxu0 %v6603_v30  ;;  %4812 = vmatprep.mubr.msk.bf16.mxu1 %vm564_vm0, %v6678_v17 }
  0xf4   : > { %5062 = vmatprep.mubr.msk.bf16.mxu0 %vm564_vm0, %v6606_v31  ;;  %3391 = vmatpush1.bf16.msra.mxu0 %v5986_v18  ;;  %v6777_v18 = vld [vmem:[%s6525_s5 + $0x120] ss:$8 sps:$4 sm:$0xff]  }
  0xf5   : > { %3392 = vmatprep.subr.bf16.mxu0 %v5994_v19  ;;  %v6780_v19 = vld [vmem:[%s6525_s5 + $0x134] ss:$8 sps:$4 sm:$0xff]  }
  0xf8   : > { %3393 = vmatpush1.bf16.msra.mxu0 %v5992_v22  ;;  %v6133_v22 = vld [vmem:[#allocation5 + $0x244] ss:$8 sps:$4 sm:$0xff]  }
  0xf9   : > { %3394 = vmatprep.subr.bf16.mxu0 %v6000_v23  ;;  %v6789_v23 = vld [vmem:[%s6525_s5 + $0x130] ss:$8 sps:$4 sm:$0xff]  }
  0xfa   : > { %766 = vmatmul.mubr.bf16.gmra.mrb[48].mxu1 %v6687_v24 }
  0xfb   : > { %2825 = vmatmul.mubr.bf16.gmra.mrb[16].mxu0 %v6615_v42  ;;  %4813 = vmatprep.mubr.msk.bf16.mxu1 %vm564_vm0, %v6690_v25 }
  0xfc   : > { %5063 = vmatprep.mubr.msk.bf16.mxu0 %vm564_vm0, %v6618_v43  ;;  %3395 = vmatpush1.bf16.msra.mxu0 %v5998_v26  ;;  %v6031_v26 = vld [vmem:[#allocation5 + $0x480] ss:$8 sps:$4 sm:$0xff]  }
  0xfd   : > { %3396 = vmatprep.subr.bf16.mxu0 %v6006_v27  ;;  %v6039_v27 = vld [vmem:[#allocation5 + $0x494] ss:$8 sps:$4 sm:$0xff]  }
 0x100   : > { %3397 = vmatpush1.bf16.msra.mxu0 %v6004_v28  ;;  %v6037_v28 = vld [vmem:[#allocation5 + $0x490] ss:$8 sps:$4 sm:$0xff]  }
 0x101   : > { %3398 = vmatprep.subr.bf16.mxu0 %v6015_v29  ;;  %v6045_v29 = vld [vmem:[#allocation5 + $0x4a4] ss:$8 sps:$4 sm:$0xff]  }
 0x102   : > { %776 = vmatmul.mubr.bf16.gmra.mrb[52].mxu1 %v6699_v32 }
 0x103   : > { %2835 = vmatmul.mubr.bf16.gmra.mrb[20].mxu0 %v6627_v54  ;;  %4814 = vmatprep.mubr.msk.bf16.mxu1 %vm564_vm0, %v6702_v33 }
 0x104   : > { %5064 = vmatprep.mubr.msk.bf16.mxu0 %vm564_vm0, %v6630_v55  ;;  %3399 = vmatpush1.bf16.msra.mxu0 %v6013_v34  ;;  %v6043_v34 = vld [vmem:[#allocation5 + $0x4a0] ss:$8 sps:$4 sm:$0xff]  }
 0x105   : > { %3400 = vmatprep.subr.bf16.mxu0 %v6024_v35  ;;  %v6055_v35 = vld [vmem:[#allocation5 + $0x4c0] ss:$8 sps:$4 sm:$0xff]  }
 0x108   : > { %3401 = vmatpush1.bf16.msra.mxu0 %v6022_v36  ;;  %v6063_v36 = vld [vmem:[#allocation5 + $0x4d4] ss:$8 sps:$4 sm:$0xff]  }
 0x109   : > { %4004 = vmatprep.subr.bf16.mxu0 %v6033_v37  ;;  %v6067_v37 = vld [vmem:[#allocation5 + $0x4e0] ss:$8 sps:$4 sm:$0xff]  }
 0x10a   : > { %786 = vmatmul.mubr.bf16.gmra.mrb[56].mxu1 %v6711_v40 }
 0x10b   : > { %2845 = vmatmul.mubr.bf16.gmra.mrb[24].mxu0 %v6639_v59  ;;  %4815 = vmatprep.mubr.msk.bf16.mxu1 %vm564_vm0, %v6714_v41 }
 0x10c   : > { %5065 = vmatprep.mubr.msk.bf16.mxu0 %vm564_vm0, %v6654_v2 }
 0x112   : > { %796 = vmatmul.mubr.bf16.gmra.mrb[60].mxu1 %v6723_v44 }
 0x113   : > { %2855 = vmatmul.mubr.bf16.gmra.mrb[28].mxu0 %v6663_v8  ;;  %4842 = vmatprep.mubr.msk.bf16.mxu1 %vm564_vm0, %v5982_v45  ;;  %v6075_v45 = vld [vmem:[#allocation5 + $0x4f4] ss:$8 sps:$4 sm:$0xff]  }
 0x114   : > { %5066 = vmatprep.mubr.msk.bf16.mxu0 %vm564_vm0, %v6666_v9 }
 0x11a   : > { %971 = vmatmul.mubr.bf16.vlgmr.msra.gmra.mrb[0].mxu1 %v5980_v46  ;;  %v6079_v46 = vld [vmem:[#allocation5 + $0x500] ss:$8 sps:$4 sm:$0xff]  }
 0x11b   : > { %2865 = vmatmul.mubr.bf16.gmra.mrb[32].mxu0 %v6675_v16  ;;  %1501 = vmatpush1.bf16.msra.mxu1 %v5983_v47  ;;  %v6090_v47 = vld [vmem:[#allocation5 + $0x514] ss:$8 sps:$4 sm:$0xff]  }
 0x11c   : > { %4843 = vmatprep.mubr.msk.bf16.mxu1 %vm564_vm0, %v6536_v38  ;;  %5067 = vmatprep.mubr.msk.bf16.mxu0 %vm564_vm0, %v6678_v17  ;;  %v6001_v38 = vld [vmem:[#allocation5 + $0x1b0] ss:$8 sps:$4 sm:$0xff]  }
 0x11d   : > { %1502 = vmatprep.subr.bf16.mxu1 %v5991_v48  ;;  %v6094_v48 = vld [vmem:[#allocation5 + $0x520] ss:$8 sps:$4 sm:$0xff]  }
 0x11f   : > { %1503 = vmatpush1.bf16.msra.mxu1 %v5989_v49  ;;  %v6102_v49 = vld [vmem:[#allocation5 + $0x534] ss:$8 sps:$4 sm:$0xff]  }
 0x120   : > { %1504 = vmatprep.subr.bf16.mxu1 %v5997_v50  ;;  %v6136_v50 = vld [vmem:[#allocation5 + $0x250] ss:$8 sps:$4 sm:$0xff]  }
 0x122   : > { %981 = vmatmul.mubr.bf16.gmra.mrb[4].mxu1 %v6546_v52  ;;  %v6019_v52 = vld [vmem:[#allocation5 + $0x1d0] ss:$8 sps:$4 sm:$0xff]  }
 0x123   : > { %2875 = vmatmul.mubr.bf16.gmra.mrb[36].mxu0 %v6687_v24  ;;  %4844 = vmatprep.mubr.msk.bf16.mxu1 %vm564_vm0, %v6552_v57  ;;  %v6030_v57 = vld [vmem:[#allocation5 + $0x1e4] ss:$8 sps:$4 sm:$0xff]  }
 0x124   : > { %5068 = vmatprep.mubr.msk.bf16.mxu0 %vm564_vm0, %v6690_v25  ;;  %1505 = vmatpush1.bf16.msra.mxu1 %v5995_v51  ;;  %v6137_v51 = vld [vmem:[#allocation5 + $0x264] ss:$8 sps:$4 sm:$0xff]  }
 0x125   : > { %1506 = vmatprep.subr.bf16.mxu1 %v6003_v56  ;;  %v6078_v56 = vld [vmem:[%s6525_s5 + $0x40] ss:$8 sps:$4 sm:$0xff]  }
 0x128   : > { %1507 = vmatpush1.bf16.msra.mxu1 %v6001_v38  ;;  %v6082_v38 = vld [vmem:[%s6525_s5 + $0x54] ss:$8 sps:$4 sm:$0xff]  }
 0x129   : > { %1508 = vmatprep.subr.bf16.mxu1 %v6012_v60  ;;  %v6140_v60 = vld [vmem:[#allocation5 + $0x270] ss:$8 sps:$4 sm:$0xff]  }
 0x12a   : > { %991 = vmatmul.mubr.bf16.gmra.mrb[8].mxu1 %v6564_v0  ;;  %v6042_v0 = vld [vmem:[#allocation5 + $0x204] ss:$8 sps:$4 sm:$0xff]  }
 0x12b   : > { %2885 = vmatmul.mubr.bf16.gmra.mrb[40].mxu0 %v6699_v32  ;;  %4845 = vmatprep.mubr.msk.bf16.mxu1 %vm564_vm0, %v6539_v39  ;;  %v6034_v39 = vld [vmem:[#allocation5 + $0x1f0] ss:$8 sps:$4 sm:$0xff]  }
 0x12c   : > { %5069 = vmatprep.mubr.msk.bf16.mxu0 %vm564_vm0, %v6702_v33  ;;  %1509 = vmatpush1.bf16.msra.mxu1 %v6010_v61  ;;  %v6141_v61 = vld [vmem:[#allocation5 + $0x284] ss:$8 sps:$4 sm:$0xff]  }
 0x12d   : > { %1510 = vmatprep.subr.bf16.mxu1 %v6021_v62  ;;  %v6084_v62 = vld [vmem:[%s6525_s5 + $0x50] ss:$8 sps:$4 sm:$0xff]  }
 0x130   : > { %1511 = vmatpush1.bf16.msra.mxu1 %v6019_v52  ;;  %v6085_v52 = vld [vmem:[%s6525_s5 + $0x64] ss:$8 sps:$4 sm:$0xff]  }
 0x131   : > { %1512 = vmatprep.subr.bf16.mxu1 %v6030_v57  ;;  %v6144_v57 = vld [vmem:[#allocation5 + $0x290] ss:$8 sps:$4 sm:$0xff]  }
 0x132   : > { %1001 = vmatmul.mubr.bf16.gmra.mrb[12].mxu1 %v6549_v53  ;;  %v6048_v53 = vld [vmem:[#allocation5 + $0x214] ss:$8 sps:$4 sm:$0xff]  }
 0x133   : > { %2895 = vmatmul.mubr.bf16.gmra.mrb[44].mxu0 %v6711_v40  ;;  %4846 = vmatprep.mubr.msk.bf16.mxu1 %vm564_vm0, %v6555_v58  ;;  %v6046_v58 = vld [vmem:[#allocation5 + $0x210] ss:$8 sps:$4 sm:$0xff]  }
 0x134   : > { %5070 = vmatprep.mubr.msk.bf16.mxu0 %vm564_vm0, %v6714_v41  ;;  %1513 = vmatpush1.bf16.msra.mxu1 %v6028_v63  ;;  %v6145_v63 = vld [vmem:[#allocation5 + $0x2a4] ss:$8 sps:$4 sm:$0xff]  }
 0x135   : > { %1514 = vmatprep.subr.bf16.mxu1 %v6036_v4  ;;  %v6087_v4 = vld [vmem:[%s6525_s5 + $0x60] ss:$8 sps:$4 sm:$0xff]  }
 0x138   : > { %1515 = vmatpush1.bf16.msra.mxu1 %v6034_v39  ;;  %v6091_v39 = vld [vmem:[%s6525_s5 + $0x74] ss:$8 sps:$4 sm:$0xff]  }
 0x139   : > { %1516 = vmatprep.subr.bf16.mxu1 %v6042_v0  ;;  %v6148_v0 = vld [vmem:[#allocation5 + $0x2b0] ss:$8 sps:$4 sm:$0xff]  }
 0x13a   : > { %1011 = vmatmul.mubr.bf16.gmra.mrb[16].mxu1 %v6567_v1  ;;  %v6052_v1 = vld [vmem:[#allocation5 + $0x220] ss:$8 sps:$4 sm:$0xff]  }
 0x13b   : > { %2905 = vmatmul.mubr.bf16.gmra.mrb[48].mxu0 %v6723_v44  ;;  %4847 = vmatprep.mubr.msk.bf16.mxu1 %vm564_vm0, %v6570_v3 }
 0x13c   : > { %5071 = vmatprep.mubr.msk.bf16.mxu0 %vm564_vm0, %v6756_v5  ;;  %1517 = vmatpush1.bf16.msra.mxu1 %v6040_v6  ;;  %v6149_v6 = vld [vmem:[#allocation5 + $0x2c4] ss:$8 sps:$4 sm:$0xff]  }
 0x13d   : > { %1518 = vmatprep.subr.bf16.mxu1 %v6048_v53  ;;  %v6151_v53 = vld [vmem:[#allocation5 + $0x2d4] ss:$8 sps:$4 sm:$0xff]  }
 0x140   : > { %1519 = vmatpush1.bf16.msra.mxu1 %v6046_v58  ;;  %v6093_v58 = vld [vmem:[%s6525_s5 + $0x70] ss:$8 sps:$4 sm:$0xff]  }
 0x141   : > { %1520 = vmatprep.subr.bf16.mxu1 %v6054_v7  ;;  %v6097_v7 = vld [vmem:[%s6525_s5 + $0x84] ss:$8 sps:$4 sm:$0xff]  }
 0x142   : > { %1021 = vmatmul.mubr.bf16.gmra.mrb[20].mxu1 %v6579_v10 }
 0x143   : > { %2915 = vmatmul.mubr.bf16.gmra.mrb[52].mxu0 %v6765_v11  ;;  %4848 = vmatprep.mubr.msk.bf16.mxu1 %vm564_vm0, %v6582_v12 }
 0x144   : > { %5072 = vmatprep.mubr.msk.bf16.mxu0 %vm564_vm0, %v6768_v13  ;;  %1521 = vmatpush1.bf16.msra.mxu1 %v6052_v1  ;;  %v6152_v1 = vld [vmem:[#allocation5 + $0x2d0] ss:$8 sps:$4 sm:$0xff]  }
 0x145   : > { %1522 = vmatprep.subr.bf16.mxu1 %v6060_v14  ;;  %v6153_v14 = vld [vmem:[#allocation5 + $0x2e4] ss:$8 sps:$4 sm:$0xff]  }
 0x148   : > { %1523 = vmatpush1.bf16.msra.mxu1 %v6058_v15  ;;  %v6154_v15 = vld [vmem:[#allocation5 + $0x2e0] ss:$8 sps:$4 sm:$0xff]  }
 0x149   : > { %5288 = vmatprep.subr.bf16.mxu1 %v6133_v22  ;;  %v6155_v22 = vld [vmem:[#allocation5 + $0x2f4] ss:$8 sps:$4 sm:$0xff]  }
 0x14a   : > { %1031 = vmatmul.mubr.bf16.gmra.mrb[24].mxu1 %v6591_v20 }
 0x14b   : > { %2925 = vmatmul.mubr.bf16.gmra.mrb[56].mxu0 %v6777_v18  ;;  %4849 = vmatprep.mubr.msk.bf16.mxu1 %vm564_vm0, %v6594_v21 }
 0x14c   : > { %5073 = vmatprep.mubr.msk.bf16.mxu0 %vm564_vm0, %v6780_v19 }
 0x152   : > { %1041 = vmatmul.mubr.bf16.gmra.mrb[28].mxu1 %v6603_v30 }
 0x153   : > { %2935 = vmatmul.mubr.bf16.gmra.mrb[60].mxu0 %v6789_v23  ;;  %4850 = vmatprep.mubr.msk.bf16.mxu1 %vm564_vm0, %v6606_v31 }
 0x154   : > { %5130 = vmatprep.mubr.msk.bf16.mxu0 %vm564_vm0, %v6570_v3  ;;  %v6051_v3 = vld [vmem:[#allocation5 + $0x4b4] ss:$8 sps:$4 sm:$0xff]  }
 0x15a   : > { %1051 = vmatmul.mubr.bf16.gmra.mrb[32].mxu1 %v6615_v42 }
 0x15b   : > { %3411 = vmatmul.mubr.bf16.vlgmr.msra.gmra.mrb[0].mxu0 %v6579_v10  ;;  %4851 = vmatprep.mubr.msk.bf16.mxu1 %vm564_vm0, %v6618_v43  ;;  %v6049_v10 = vld [vmem:[#allocation5 + $0x4b0] ss:$8 sps:$4 sm:$0xff]  }
 0x15c   : > { %4005 = vmatpush1.bf16.msra.mxu0 %v6031_v26  ;;  %5131 = vmatprep.mubr.msk.bf16.mxu0 %vm564_vm0, %v6582_v12  ;;  %v6057_v12 = vld [vmem:[#allocation5 + $0x4c4] ss:$8 sps:$4 sm:$0xff]   ;;  %v6099_v26 = vld [vmem:[%s6525_s5 + $0x80] ss:$8 sps:$4 sm:$0xff]  }
 0x15d   : > { %4006 = vmatprep.subr.bf16.mxu0 %v6039_v27  ;;  %v6103_v27 = vld [vmem:[%s6525_s5 + $0x94] ss:$8 sps:$4 sm:$0xff]  }
 0x160   : > { %4007 = vmatpush1.bf16.msra.mxu0 %v6037_v28  ;;  %v6884_v28 = vld [vmem:[%s6525_s5 + $0x144] ss:$8 sps:$4 sm:$0xff]  }
 0x161   : > { %4008 = vmatprep.subr.bf16.mxu0 %v6045_v29  ;;  %v6156_v29 = vld [vmem:[#allocation5 + $0x2f0] ss:$8 sps:$4 sm:$0xff]  }
 0x162   : > { %1061 = vmatmul.mubr.bf16.gmra.mrb[36].mxu1 %v6627_v54 }
 0x163   : > { %3421 = vmatmul.mubr.bf16.gmra.mrb[4].mxu0 %v6591_v20  ;;  %4852 = vmatprep.mubr.msk.bf16.mxu1 %vm564_vm0, %v6630_v55  ;;  %v6061_v20 = vld [vmem:[#allocation5 + $0x4d0] ss:$8 sps:$4 sm:$0xff]  }
 0x164   : > { %5132 = vmatprep.mubr.msk.bf16.mxu0 %vm564_vm0, %v6594_v21  ;;  %4009 = vmatpush1.bf16.msra.mxu0 %v6043_v34  ;;  %v6069_v21 = vld [vmem:[#allocation5 + $0x4e4] ss:$8 sps:$4 sm:$0xff]   ;;  %v6107_v34 = vld [vmem:[%s6525_s5 + $0x90] ss:$8 sps:$4 sm:$0xff]  }
 0x165   : > { %4010 = vmatprep.subr.bf16.mxu0 %v6051_v3  ;;  %v6892_v3 = vld [vmem:[%s6525_s5 + $0x140] ss:$8 sps:$4 sm:$0xff]  }
 0x168   : > { %4011 = vmatpush1.bf16.msra.mxu0 %v6049_v10  ;;  %v6109_v10 = vld [vmem:[%s6525_s5 + $0xa4] ss:$8 sps:$4 sm:$0xff]  }
 0x169   : > { %4012 = vmatprep.subr.bf16.mxu0 %v6057_v12  ;;  %v6111_v12 = vld [vmem:[%s6525_s5 + $0xa0] ss:$8 sps:$4 sm:$0xff]  }
 0x16a   : > { %1071 = vmatmul.mubr.bf16.gmra.mrb[40].mxu1 %v6639_v59 }
 0x16b   : > { %3431 = vmatmul.mubr.bf16.gmra.mrb[8].mxu0 %v6603_v30  ;;  %4853 = vmatprep.mubr.msk.bf16.mxu1 %vm564_vm0, %v6654_v2  ;;  %v6073_v30 = vld [vmem:[#allocation5 + $0x4f0] ss:$8 sps:$4 sm:$0xff]  }
 0x16c   : > { %5133 = vmatprep.mubr.msk.bf16.mxu0 %vm564_vm0, %v6606_v31  ;;  %4013 = vmatpush1.bf16.msra.mxu0 %v6055_v35  ;;  %v6081_v31 = vld [vmem:[#allocation5 + $0x504] ss:$8 sps:$4 sm:$0xff]   ;;  %v6112_v35 = vld [vmem:[%s6525_s5 + $0xb4] ss:$8 sps:$4 sm:$0xff]  }
 0x16d   : > { %4014 = vmatprep.subr.bf16.mxu0 %v6063_v36  ;;  %v6114_v36 = vld [vmem:[%s6525_s5 + $0xb0] ss:$8 sps:$4 sm:$0xff]  }
 0x170   : > { %4015 = vmatpush1.bf16.msra.mxu0 %v6061_v20  ;;  %v6115_v20 = vld [vmem:[%s6525_s5 + $0xc4] ss:$8 sps:$4 sm:$0xff]  }
 0x171   : > { %4016 = vmatprep.subr.bf16.mxu0 %v6069_v21  ;;  %v6117_v21 = vld [vmem:[%s6525_s5 + $0xc0] ss:$8 sps:$4 sm:$0xff]  }
 0x172   : > { %1081 = vmatmul.mubr.bf16.gmra.mrb[44].mxu1 %v6663_v8 }
 0x173   : > { %3441 = vmatmul.mubr.bf16.gmra.mrb[12].mxu0 %v6615_v42  ;;  %4854 = vmatprep.mubr.msk.bf16.mxu1 %vm564_vm0, %v6666_v9  ;;  %v6088_v42 = vld [vmem:[#allocation5 + $0x510] ss:$8 sps:$4 sm:$0xff]  }
 0x174   : > { %5134 = vmatprep.mubr.msk.bf16.mxu0 %vm564_vm0, %v6618_v43  ;;  %4017 = vmatpush1.bf16.msra.mxu0 %v6067_v37  ;;  %v6096_v43 = vld [vmem:[#allocation5 + $0x524] ss:$8 sps:$4 sm:$0xff]   ;;  %v6118_v37 = vld [vmem:[%s6525_s5 + $0xd4] ss:$8 sps:$4 sm:$0xff]  }
 0x175   : > { %4018 = vmatprep.subr.bf16.mxu0 %v6075_v45  ;;  %v6120_v45 = vld [vmem:[%s6525_s5 + $0xd0] ss:$8 sps:$4 sm:$0xff]  }
 0x178   : > { %4019 = vmatpush1.bf16.msra.mxu0 %v6073_v30  ;;  %v6121_v30 = vld [vmem:[%s6525_s5 + $0xe4] ss:$8 sps:$4 sm:$0xff]  }
 0x179   : > { %4020 = vmatprep.subr.bf16.mxu0 %v6081_v31  ;;  %v6123_v31 = vld [vmem:[%s6525_s5 + $0xe0] ss:$8 sps:$4 sm:$0xff]  }
 0x17a   : > { %1091 = vmatmul.mubr.bf16.gmra.mrb[48].mxu1 %v6675_v16 }
 0x17b   : > { %3451 = vmatmul.mubr.bf16.gmra.mrb[16].mxu0 %v6627_v54  ;;  %4855 = vmatprep.mubr.msk.bf16.mxu1 %vm564_vm0, %v6678_v17  ;;  %v6100_v54 = vld [vmem:[#allocation5 + $0x530] ss:$8 sps:$4 sm:$0xff]  }
 0x17c   : > { %5135 = vmatprep.mubr.msk.bf16.mxu0 %vm564_vm0, %v6630_v55  ;;  %4021 = vmatpush1.bf16.msra.mxu0 %v6079_v46  ;;  %v6066_v55 = vld [vmem:[%s6525_s5 + $0x24] ss:$8 sps:$4 sm:$0xff]   ;;  %v6124_v46 = vld [vmem:[%s6525_s5 + $0xf4] ss:$8 sps:$4 sm:$0xff]  }
 0x17d   : > { %4022 = vmatprep.subr.bf16.mxu0 %v6090_v47  ;;  %v6126_v47 = vld [vmem:[%s6525_s5 + $0xf0] ss:$8 sps:$4 sm:$0xff]  }
 0x180   : > { %4023 = vmatpush1.bf16.msra.mxu0 %v6088_v42  ;;  %v6127_v42 = vld [vmem:[%s6525_s5 + $0x104] ss:$8 sps:$4 sm:$0xff]  }
 0x181   : > { %4024 = vmatprep.subr.bf16.mxu0 %v6096_v43  ;;  %v6129_v43 = vld [vmem:[%s6525_s5 + $0x100] ss:$8 sps:$4 sm:$0xff]  }
 0x182   : > { %1101 = vmatmul.mubr.bf16.gmra.mrb[52].mxu1 %v6687_v24 }
 0x183   : > { %3461 = vmatmul.mubr.bf16.gmra.mrb[20].mxu0 %v6639_v59  ;;  %4856 = vmatprep.mubr.msk.bf16.mxu1 %vm564_vm0, %v6690_v25  ;;  %v6064_v59 = vld [vmem:[%s6525_s5 + $0x20] ss:$8 sps:$4 sm:$0xff]  }
 0x184   : > { %5136 = vmatprep.mubr.msk.bf16.mxu0 %vm564_vm0, %v6654_v2  ;;  %4025 = vmatpush1.bf16.msra.mxu0 %v6094_v48  ;;  %v6070_v2 = vld [vmem:[%s6525_s5 + $0x34] ss:$8 sps:$4 sm:$0xff]  }
 0x185   : > { %4026 = vmatprep.subr.bf16.mxu0 %v6102_v49  ;;  %v6130_v48 = vld [vmem:[%s6525_s5 + $0x154] ss:$8 sps:$4 sm:$0xff]  }
 0x188   : > { %4027 = vmatpush1.bf16.msra.mxu0 %v6100_v54 }
 0x18a   : > { %1111 = vmatmul.mubr.bf16.gmra.mrb[56].mxu1 %v6699_v32 }
 0x18b   : > { %3471 = vmatmul.mubr.bf16.gmra.mrb[24].mxu0 %v6663_v8  ;;  %4857 = vmatprep.mubr.msk.bf16.mxu1 %vm564_vm0, %v6702_v33  ;;  %v6134_v8 = vld [vmem:[#allocation5 + $0x240] ss:$8 sps:$4 sm:$0xff]  }
 0x18c   : > { %5137 = vmatprep.mubr.msk.bf16.mxu0 %vm564_vm0, %v6666_v9  ;;  %v6135_v9 = vld [vmem:[#allocation5 + $0x254] ss:$8 sps:$4 sm:$0xff]  }
 0x192   : > { %1121 = vmatmul.mubr.bf16.gmra.mrb[60].mxu1 %v6711_v40 }
 0x193   : > { %3481 = vmatmul.mubr.bf16.gmra.mrb[28].mxu0 %v6675_v16  ;;  %4914 = vmatprep.mubr.msk.bf16.mxu1 %vm564_vm0, %v6066_v55  ;;  %v6072_v16 = vld [vmem:[%s6525_s5 + $0x30] ss:$8 sps:$4 sm:$0xff]  }
 0x194   : > { %5138 = vmatprep.mubr.msk.bf16.mxu0 %vm564_vm0, %v6678_v17  ;;  %v6076_v17 = vld [vmem:[%s6525_s5 + $0x44] ss:$8 sps:$4 sm:$0xff]  }
 0x19a   : > { %1533 = vmatmul.mubr.bf16.vlgmr.msra.gmra.mrb[0].mxu1 %v6064_v59 }
 0x19b   : > { %3491 = vmatmul.mubr.bf16.gmra.mrb[32].mxu0 %v6687_v24  ;;  %5300 = vmatpush1.bf16.msra.mxu1 %v6134_v8  ;;  %v6138_v24 = vld [vmem:[#allocation5 + $0x260] ss:$8 sps:$4 sm:$0xff]  }
 0x19c   : > { %4915 = vmatprep.mubr.msk.bf16.mxu1 %vm564_vm0, %v6070_v2  ;;  %5139 = vmatprep.mubr.msk.bf16.mxu0 %vm564_vm0, %v6690_v25  ;;  %v6139_v25 = vld [vmem:[#allocation5 + $0x274] ss:$8 sps:$4 sm:$0xff]  }
 0x19d   : > { %5289 = vmatprep.subr.bf16.mxu1 %v6135_v9 }
 0x19f   : > { %5301 = vmatpush1.bf16.msra.mxu1 %v6136_v50 }
 0x1a0   : > { %5290 = vmatprep.subr.bf16.mxu1 %v6137_v51 }
 0x1a2   : > { %1543 = vmatmul.mubr.bf16.gmra.mrb[4].mxu1 %v6072_v16 }
 0x1a3   : > { %3501 = vmatmul.mubr.bf16.gmra.mrb[36].mxu0 %v6699_v32  ;;  %4916 = vmatprep.mubr.msk.bf16.mxu1 %vm564_vm0, %v6076_v17  ;;  %v6142_v32 = vld [vmem:[#allocation5 + $0x280] ss:$8 sps:$4 sm:$0xff]  }
 0x1a4   : > { %5140 = vmatprep.mubr.msk.bf16.mxu0 %vm564_vm0, %v6702_v33  ;;  %5302 = vmatpush1.bf16.msra.mxu1 %v6138_v24  ;;  %v6143_v33 = vld [vmem:[#allocation5 + $0x294] ss:$8 sps:$4 sm:$0xff]  }
 0x1a5   : > { %5291 = vmatprep.subr.bf16.mxu1 %v6139_v25 }
 0x1a8   : > { %5303 = vmatpush1.bf16.msra.mxu1 %v6140_v60 }
 0x1a9   : > { %5292 = vmatprep.subr.bf16.mxu1 %v6141_v61 }
 0x1aa   : > { %1553 = vmatmul.mubr.bf16.gmra.mrb[8].mxu1 %v6078_v56 }
 0x1ab   : > { %3511 = vmatmul.mubr.bf16.gmra.mrb[40].mxu0 %v6711_v40  ;;  %4917 = vmatprep.mubr.msk.bf16.mxu1 %vm564_vm0, %v6082_v38  ;;  %v6146_v40 = vld [vmem:[#allocation5 + $0x2a0] ss:$8 sps:$4 sm:$0xff]  }
 0x1ac   : > { %5141 = vmatprep.mubr.msk.bf16.mxu0 %vm564_vm0, %v6714_v41  ;;  %5304 = vmatpush1.bf16.msra.mxu1 %v6142_v32  ;;  %v6147_v41 = vld [vmem:[#allocation5 + $0x2b4] ss:$8 sps:$4 sm:$0xff]  }
 0x1ad   : > { %5293 = vmatprep.subr.bf16.mxu1 %v6143_v33 }
 0x1b0   : > { %5305 = vmatpush1.bf16.msra.mxu1 %v6144_v57 }
 0x1b1   : > { %5294 = vmatprep.subr.bf16.mxu1 %v6145_v63 }
 0x1b2   : > { %1563 = vmatmul.mubr.bf16.gmra.mrb[12].mxu1 %v6084_v62 }
 0x1b3   : > { %3521 = vmatmul.mubr.bf16.gmra.mrb[44].mxu0 %v6723_v44  ;;  %4918 = vmatprep.mubr.msk.bf16.mxu1 %vm564_vm0, %v6085_v52  ;;  %v6150_v44 = vld [vmem:[#allocation5 + $0x2c0] ss:$8 sps:$4 sm:$0xff]  }
 0x1b4   : > { %5142 = vmatprep.mubr.msk.bf16.mxu0 %vm564_vm0, %v6756_v5  ;;  %5306 = vmatpush1.bf16.msra.mxu1 %v6146_v40  ;;  %v4263_v40 = vlaneseq }
 0x1b5   : > { %5295 = vmatprep.subr.bf16.mxu1 %v6147_v41 }
 0x1b6   : > { %v4264_v41 = vshrl.u32 %v4263_v40, 7 }
 0x1b8   : > { %5307 = vmatpush1.bf16.msra.mxu1 %v6148_v0 }
 0x1b9   : > { %5296 = vmatprep.subr.bf16.mxu1 %v6149_v6 }
 0x1ba   : > { %1573 = vmatmul.mubr.bf16.gmra.mrb[16].mxu1 %v6087_v4 }
 0x1bb   : > { %3531 = vmatmul.mubr.bf16.gmra.mrb[48].mxu0 %v6765_v11  ;;  %4919 = vmatprep.mubr.msk.bf16.mxu1 %vm564_vm0, %v6091_v39 }
 0x1bc   : > { %5143 = vmatprep.mubr.msk.bf16.mxu0 %vm564_vm0, %v6768_v13  ;;  %5308 = vmatpush1.bf16.msra.mxu1 %v6150_v44  ;;  %v4265_v44 = vsub.s32 0, %v4264_v41 }
 0x1bd   : > { %5297 = vmatprep.subr.bf16.mxu1 %v6151_v53  ;;  %v4261_v53 = vld [vmem:[#allocation7] sm:$0x3] }
 0x1c0   : > { %5309 = vmatpush1.bf16.msra.mxu1 %v6152_v1 }
 0x1c1   : > { %5298 = vmatprep.subr.bf16.mxu1 %v6153_v14 }
 0x1c2   : > { %1583 = vmatmul.mubr.bf16.gmra.mrb[20].mxu1 %v6093_v58 }
 0x1c3   : > { %3541 = vmatmul.mubr.bf16.gmra.mrb[52].mxu0 %v6777_v18  ;;  %4920 = vmatprep.mubr.msk.bf16.mxu1 %vm564_vm0, %v6097_v7 }
 0x1c4   : > { %5144 = vmatprep.mubr.msk.bf16.mxu0 %vm564_vm0, %v6780_v19  ;;  %5310 = vmatpush1.bf16.msra.mxu1 %v6154_v15 }
 0x1c5   : > { %5299 = vmatprep.subr.bf16.mxu1 %v6155_v22 }
 0x1c8   : > { %5311 = vmatpush1.bf16.msra.mxu1 %v6156_v29 }
 0x1ca   : > { %1593 = vmatmul.mubr.bf16.gmra.mrb[24].mxu1 %v6099_v26 }
 0x1cb   : > { %3551 = vmatmul.mubr.bf16.gmra.mrb[56].mxu0 %v6789_v23  ;;  %4921 = vmatprep.mubr.msk.bf16.mxu1 %vm564_vm0, %v6103_v27 }
 0x1cc   : > { %5145 = vmatprep.mubr.msk.bf16.mxu0 %vm564_vm0, %v6884_v28 }
 0x1d2   : > { %1603 = vmatmul.mubr.bf16.gmra.mrb[28].mxu1 %v6107_v34 }
 0x1d3   : > { %3561 = vmatmul.mubr.bf16.gmra.mrb[60].mxu0 %v6892_v3  ;;  %4922 = vmatprep.mubr.msk.bf16.mxu1 %vm564_vm0, %v6109_v10 }
 0x1d4   : > { %5202 = vmatprep.mubr.msk.bf16.mxu0 %vm564_vm0, %v6085_v52 }
 0x1da   : > { %1613 = vmatmul.mubr.bf16.gmra.mrb[32].mxu1 %v6111_v12 }
 0x1db   : > { %4037 = vmatmul.mubr.bf16.vlgmr.msra.gmra.mrb[0].mxu0 %v6087_v4  ;;  %4923 = vmatprep.mubr.msk.bf16.mxu1 %vm564_vm0, %v6112_v35 }
 0x1dc   : > { %5203 = vmatprep.mubr.msk.bf16.mxu0 %vm564_vm0, %v6091_v39 }
 0x1e2   : > { %1623 = vmatmul.mubr.bf16.gmra.mrb[36].mxu1 %v6114_v36 }
 0x1e3   : > { %4047 = vmatmul.mubr.bf16.gmra.mrb[4].mxu0 %v6093_v58  ;;  %4924 = vmatprep.mubr.msk.bf16.mxu1 %vm564_vm0, %v6115_v20  ;;  %v4269_v58 = vsub.s32 1, %v4264_v41 }
 0x1e4   : > { %5204 = vmatprep.mubr.msk.bf16.mxu0 %vm564_vm0, %v6097_v7  ;;  %v7009_v7 = vrot.slane %v4261_v53, %v4265_v44 }
 0x1e5   : > { %v7011_v14 = vrot.slane %v4261_v53, %v4269_v58 }
 0x1ea   : > { %1633 = vmatmul.mubr.bf16.gmra.mrb[40].mxu1 %v6117_v21 }
 0x1eb   : > { %4057 = vmatmul.mubr.bf16.gmra.mrb[8].mxu0 %v6099_v26  ;;  %4925 = vmatprep.mubr.msk.bf16.mxu1 %vm564_vm0, %v6118_v37 }
 0x1ec   : > { %5205 = vmatprep.mubr.msk.bf16.mxu0 %vm564_vm0, %v6103_v27 }
 0x1f2   : > { %1643 = vmatmul.mubr.bf16.gmra.mrb[44].mxu1 %v6120_v45 }
 0x1f3   : > { %4067 = vmatmul.mubr.bf16.gmra.mrb[12].mxu0 %v6107_v34  ;;  %4926 = vmatprep.mubr.msk.bf16.mxu1 %vm564_vm0, %v6121_v30 }
 0x1f4   : > { %5206 = vmatprep.mubr.msk.bf16.mxu0 %vm564_vm0, %v6109_v10 }
 0x1fa   : > { %1653 = vmatmul.mubr.bf16.gmra.mrb[48].mxu1 %v6123_v31 }
 0x1fb   : > { %4077 = vmatmul.mubr.bf16.gmra.mrb[16].mxu0 %v6111_v12  ;;  %4927 = vmatprep.mubr.msk.bf16.mxu1 %vm564_vm0, %v6124_v46 }
 0x1fc   : > { %5207 = vmatprep.mubr.msk.bf16.mxu0 %vm564_vm0, %v6112_v35 }
 0x202   : > { %1663 = vmatmul.mubr.bf16.gmra.mrb[52].mxu1 %v6126_v47 }
 0x203   : > { %4087 = vmatmul.mubr.bf16.gmra.mrb[20].mxu0 %v6114_v36  ;;  %4928 = vmatprep.mubr.msk.bf16.mxu1 %vm564_vm0, %v6127_v42 }
 0x204   : > { %5208 = vmatprep.mubr.msk.bf16.mxu0 %vm564_vm0, %v6115_v20 }
 0x20a   : > { %1673 = vmatmul.mubr.bf16.gmra.mrb[56].mxu1 %v6129_v43 }
 0x20b   : > { %4097 = vmatmul.mubr.bf16.gmra.mrb[24].mxu0 %v6117_v21  ;;  %4929 = vmatprep.mubr.msk.bf16.mxu1 %vm564_vm0, %v6756_v5 }
 0x20c   : > { %5209 = vmatprep.mubr.msk.bf16.mxu0 %vm564_vm0, %v6118_v37 }
 0x212   : > { %1683 = vmatmul.mubr.bf16.gmra.mrb[60].mxu1 %v6765_v11 }
 0x213   : > { %4107 = vmatmul.mubr.bf16.gmra.mrb[28].mxu0 %v6120_v45  ;;  %4994 = vmatprep.mubr.msk.bf16.mxu1 %vm564_vm0, %v6112_v35 }
 0x214   : > { %5210 = vmatprep.mubr.msk.bf16.mxu0 %vm564_vm0, %v6121_v30 }
 0x21a   : > { %2239 = vmatmul.mubr.bf16.vlgmr.msra.gmra.mrb[32].mxu1 %v6114_v36 }
 0x21b   : > { %4117 = vmatmul.mubr.bf16.gmra.mrb[32].mxu0 %v6123_v31  ;;  %4995 = vmatprep.mubr.msk.bf16.mxu1 %vm564_vm0, %v6115_v20 }
 0x21c   : > { %5211 = vmatprep.mubr.msk.bf16.mxu0 %vm564_vm0, %v6124_v46 }
 0x222   : > { %2249 = vmatmul.mubr.bf16.gmra.mrb[36].mxu1 %v6117_v21 }
 0x223   : > { %4127 = vmatmul.mubr.bf16.gmra.mrb[36].mxu0 %v6126_v47  ;;  %4996 = vmatprep.mubr.msk.bf16.mxu1 %vm564_vm0, %v6118_v37 }
 0x224   : > { %5212 = vmatprep.mubr.msk.bf16.mxu0 %vm564_vm0, %v6127_v42 }
 0x22a   : > { %2259 = vmatmul.mubr.bf16.gmra.mrb[40].mxu1 %v6120_v45 }
 0x22b   : > { %4137 = vmatmul.mubr.bf16.gmra.mrb[40].mxu0 %v6129_v43  ;;  %4997 = vmatprep.mubr.msk.bf16.mxu1 %vm564_vm0, %v6121_v30 }
 0x22c   : > { %5213 = vmatprep.mubr.msk.bf16.mxu0 %vm564_vm0, %v6756_v5 }
 0x232   : > { %2269 = vmatmul.mubr.bf16.gmra.mrb[44].mxu1 %v6123_v31 }
 0x233   : > { %4147 = vmatmul.mubr.bf16.gmra.mrb[44].mxu0 %v6765_v11  ;;  %4998 = vmatprep.mubr.msk.bf16.mxu1 %vm564_vm0, %v6124_v46 }
 0x234   : > { %5214 = vmatprep.mubr.msk.bf16.mxu0 %vm564_vm0, %v6768_v13 }
 0x23a   : > { %2279 = vmatmul.mubr.bf16.gmra.mrb[48].mxu1 %v6126_v47 }
 0x23b   : > { %4157 = vmatmul.mubr.bf16.gmra.mrb[48].mxu0 %v6777_v18  ;;  %4999 = vmatprep.mubr.msk.bf16.mxu1 %vm564_vm0, %v6127_v42 }
 0x23c   : > { %5215 = vmatprep.mubr.msk.bf16.mxu0 %vm564_vm0, %v6780_v19  ;;  %v6132_v19 = vld [vmem:[%s6525_s5 + $0x150] ss:$8 sps:$4 sm:$0xff]  }
 0x242   : > { %2289 = vmatmul.mubr.bf16.gmra.mrb[52].mxu1 %v6129_v43 }
 0x243   : > { %4167 = vmatmul.mubr.bf16.gmra.mrb[52].mxu0 %v6789_v23  ;;  %5000 = vmatprep.mubr.msk.bf16.mxu1 %vm564_vm0, %v6756_v5 }
 0x244   : > { %5216 = vmatprep.mubr.msk.bf16.mxu0 %vm564_vm0, %v6884_v28 }
 0x24a   : > { %2299 = vmatmul.mubr.bf16.gmra.mrb[56].mxu1 %v6765_v11 }
 0x24b   : > { %4177 = vmatmul.mubr.bf16.gmra.mrb[56].mxu0 %v6892_v3  ;;  %5001 = vmatprep.mubr.msk.bf16.mxu1 %vm564_vm0, %v6768_v13 }
 0x24c   : > { %5217 = vmatprep.mubr.msk.bf16.mxu0 %vm564_vm0, %v6130_v48 }
 0x252   : > { %2309 = vmatmul.mubr.bf16.gmra.mrb[60].mxu1 %v6777_v18 }
 0x253   : > { %4187 = vmatmul.mubr.bf16.gmra.mrb[60].mxu0 %v6132_v19 }
 0x26d   : > { %v1534_v23 = vpop.f32.mrb[0].mxu1 }
 0x26e   : > { %v1536_v49 = vpop.f32.mrb[1].mxu1 }
 0x26f   : > { %v1538_v5 = vpop.f32.mrb[2].mxu1 }
 0x270   : > { %v1540_v54 = vpop.f32.mrb[3].mxu1 }
 0x275   : > { %v1544_v55 = vpop.f32.mrb[4].mxu1 }
 0x276   : > { %v1546_v59 = vpop.f32.mrb[5].mxu1 }
 0x277   : > { %v6957_v2 = vpop.f32.mrb[6].mxu1 }
 0x278   : > { %v6959_v11 = vpop.f32.mrb[7].mxu1 }
 0x27d   : > { %v6961_v8 = vpop.f32.mrb[8].mxu1 }
 0x27e   : > { %v6963_v9 = vpop.f32.mrb[9].mxu1 }
 0x27f   : > { %v6965_v13 = vpop.f32.mrb[10].mxu1 }
 0x280   : > { %v6967_v16 = vpop.f32.mrb[11].mxu1 }
 0x285   : > { %v6969_v18 = vpop.f32.mrb[12].mxu1 }
 0x286   : > { %v6971_v50 = vpop.f32.mrb[13].mxu1 }
 0x287   : > { %v6973_v17 = vpop.f32.mrb[14].mxu1 }
 0x288   : > { %v6975_v51 = vpop.f32.mrb[15].mxu1 }
 0x28d   : > { %v6977_v24 = vpop.f32.mrb[16].mxu1 }
 0x28e   : > { %v6979_v25 = vpop.f32.mrb[17].mxu1 }
 0x28f   : > { %v6981_v56 = vpop.f32.mrb[18].mxu1 }
 0x290   : > { %v6983_v38 = vpop.f32.mrb[19].mxu1 }
 0x295   : > { %v6985_v60 = vpop.f32.mrb[20].mxu1 }
 0x296   : > { %v6987_v61 = vpop.f32.mrb[21].mxu1 }
 0x297   : > { %v6989_v32 = vpop.f32.mrb[22].mxu1 }
 0x298   : > { %v6991_v33 = vpop.f32.mrb[23].mxu1 }
 0x29d   : > { %v6993_v62 = vpop.f32.mrb[24].mxu1 }
 0x29e   : > { %v6995_v52 = vpop.f32.mrb[25].mxu1 }
 0x29f   : > { %v6997_v57 = vpop.f32.mrb[26].mxu1 }
 0x2a0   : > { %v6999_v63 = vpop.f32.mrb[27].mxu1 }
 0x2a5   : > { %v7001_v4 = vpop.f32.mrb[28].mxu1 }
 0x2a6   : > { %v7003_v39 = vpop.f32.mrb[29].mxu1 }
 0x2a7   : > { %v7005_v0 = vpop.f32.mrb[30].mxu1 }
 0x2a8   : > { %v7007_v6 = vpop.f32.mrb[31].mxu1 }
 0x2ae   : > { %v4038_v1 = vpop.f32.mrb[0].mxu0 }
 0x2af   : > { %v5312_v15 = vadd.f32 %v4038_v1, %v1534_v23  ;;  %v4040_v22 = vpop.f32.mrb[1].mxu0 }
 0x2b0   : > { %v5313_v26 = vadd.f32 %v4040_v22, %v1536_v49  ;;  %v4042_v27 = vpop.f32.mrb[2].mxu0 }
 0x2b1   : > { %v4273_v28 = vadd.f32 %v5312_v15, %v7009_v7  ;;  %v5314_v29 = vadd.f32 %v4042_v27, %v1538_v5  ;;  %v4044_v34 = vpop.f32.mrb[3].mxu0 }
 0x2b2   : > { %v4274_v3 = vadd.f32 %v5313_v26, %v7011_v14  ;;  %v5315_v10 = vadd.f32 %v4044_v34, %v1540_v54 }
 0x2b3   : > { %v4337_v12 = vmax.f32 %v4273_v28, 0.0  ;;  %v4275_v35 = vadd.f32 %v5314_v29, %v7009_v7 }
 0x2b4   : > { %v4338_v36 = vmax.f32 %v4274_v3, 0.0  ;;  %v4276_v20 = vadd.f32 %v5315_v10, %v7011_v14 }
 0x2b5   : > { %v4339_v37 = vmax.f32 %v4275_v35, 0.0 }
 0x2b6   : > { %v5255_v45 = vpack.c.bf16 %v4338_v36, %v4337_v12  ;;  %v4340_v30 = vmax.f32 %v4276_v20, 0.0  ;;  %v4048_v31 = vpop.f32.mrb[4].mxu0 }
 0x2b7   : > { %v5316_v46 = vadd.f32 %v4048_v31, %v1544_v55  ;;  %v4050_v47 = vpop.f32.mrb[5].mxu0 }
 0x2b8   : > { %4596 = vst.msk [vmem:[%s7022_s20] sm:$0xff] %vm7018_vm3, %v5255_v45  ;;  %v5256_v42 = vpack.c.bf16 %v4340_v30, %v4339_v37  ;;  %v5317_v43 = vadd.f32 %v4050_v47, %v1546_v59  ;;  %v4052_v48 = vpop.f32.mrb[6].mxu0 }
 0x2b9   : > { %v4277_v19 = vadd.f32 %v5316_v46, %v7009_v7  ;;  %v5318_v23 = vadd.f32 %v4052_v48, %v6957_v2  ;;  %v4054_v49 = vpop.f32.mrb[7].mxu0 }
 0x2ba   : > { %4597 = vst.msk [vmem:[%s7022_s20 + $0x8] sm:$0xff] %vm7018_vm3, %v5256_v42  ;;  %v4278_v5 = vadd.f32 %v5317_v43, %v7011_v14  ;;  %v5319_v54 = vadd.f32 %v4054_v49, %v6959_v11 }
 0x2bb   : > { %v4341_v55 = vmax.f32 %v4277_v19, 0.0  ;;  %v4279_v40 = vadd.f32 %v5318_v23, %v7009_v7 }
 0x2bc   : > { %v4342_v41 = vmax.f32 %v4278_v5, 0.0  ;;  %v4280_v59 = vadd.f32 %v5319_v54, %v7011_v14 }
 0x2bd   : > { %v4343_v44 = vmax.f32 %v4279_v40, 0.0 }
 0x2be   : > { %v5257_v53 = vpack.c.bf16 %v4342_v41, %v4341_v55  ;;  %v4344_v58 = vmax.f32 %v4280_v59, 0.0  ;;  %v4058_v1 = vpop.f32.mrb[8].mxu0 }
 0x2bf   : > { %v5320_v2 = vadd.f32 %v4058_v1, %v6961_v8  ;;  %v4060_v15 = vpop.f32.mrb[9].mxu0 }
 0x2c0   : > { %4598 = vst.msk [vmem:[%s7022_s20 + $0x10] sm:$0xff] %vm7018_vm3, %v5257_v53  ;;  %v5258_v22 = vpack.c.bf16 %v4344_v58, %v4343_v44  ;;  %v5321_v11 = vadd.f32 %v4060_v15, %v6963_v9  ;;  %v4062_v26 = vpop.f32.mrb[10].mxu0 }
 0x2c1   : > { %v4281_v27 = vadd.f32 %v5320_v2, %v7009_v7  ;;  %v5322_v28 = vadd.f32 %v4062_v26, %v6965_v13  ;;  %v4064_v29 = vpop.f32.mrb[11].mxu0 }
 0x2c2   : > { %4599 = vst.msk [vmem:[%s7022_s20 + $0x18] sm:$0xff] %vm7018_vm3, %v5258_v22  ;;  %v4282_v34 = vadd.f32 %v5321_v11, %v7011_v14  ;;  %v5323_v8 = vadd.f32 %v4064_v29, %v6967_v16 }
 0x2c3   : > { %v4345_v3 = vmax.f32 %v4281_v27, 0.0  ;;  %v4283_v10 = vadd.f32 %v5322_v28, %v7009_v7 }
 0x2c4   : > { %v4346_v12 = vmax.f32 %v4282_v34, 0.0  ;;  %v4284_v9 = vadd.f32 %v5323_v8, %v7011_v14 }
 0x2c5   : > { %v4347_v35 = vmax.f32 %v4283_v10, 0.0 }
 0x2c6   : > { %v5259_v36 = vpack.c.bf16 %v4346_v12, %v4345_v3  ;;  %v4348_v20 = vmax.f32 %v4284_v9, 0.0  ;;  %v4068_v37 = vpop.f32.mrb[12].mxu0 }
 0x2c7   : > { %v5324_v13 = vadd.f32 %v4068_v37, %v6969_v18  ;;  %v4070_v45 = vpop.f32.mrb[13].mxu0 }
 0x2c8   : > { %4600 = vst.msk [vmem:[%s7022_s20 + $0x20] sm:$0xff] %vm7018_vm3, %v5259_v36  ;;  %v5260_v30 = vpack.c.bf16 %v4348_v20, %v4347_v35  ;;  %v5325_v16 = vadd.f32 %v4070_v45, %v6971_v50  ;;  %v4072_v31 = vpop.f32.mrb[14].mxu0 }
 0x2c9   : > { %v4285_v46 = vadd.f32 %v5324_v13, %v7009_v7  ;;  %v5326_v47 = vadd.f32 %v4072_v31, %v6973_v17  ;;  %v4074_v42 = vpop.f32.mrb[15].mxu0 }
 0x2ca   : > { %4601 = vst.msk [vmem:[%s7022_s20 + $0x28] sm:$0xff] %vm7018_vm3, %v5260_v30  ;;  %v4286_v43 = vadd.f32 %v5325_v16, %v7011_v14  ;;  %v5327_v18 = vadd.f32 %v4074_v42, %v6975_v51 }
 0x2cb   : > { %v4349_v48 = vmax.f32 %v4285_v46, 0.0  ;;  %v4287_v19 = vadd.f32 %v5326_v47, %v7009_v7 }
 0x2cc   : > { %v4350_v23 = vmax.f32 %v4286_v43, 0.0  ;;  %v4288_v50 = vadd.f32 %v5327_v18, %v7011_v14 }
 0x2cd   : > { %v4351_v49 = vmax.f32 %v4287_v19, 0.0 }
 0x2ce   : > { %v5261_v5 = vpack.c.bf16 %v4350_v23, %v4349_v48  ;;  %v4352_v54 = vmax.f32 %v4288_v50, 0.0  ;;  %v4078_v55 = vpop.f32.mrb[16].mxu0 }
 0x2cf   : > { %v5328_v17 = vadd.f32 %v4078_v55, %v6977_v24  ;;  %v4080_v40 = vpop.f32.mrb[17].mxu0 }
 0x2d0   : > { %4602 = vst.msk [vmem:[%s7022_s20 + $0x30] sm:$0xff] %vm7018_vm3, %v5261_v5  ;;  %v5262_v41 = vpack.c.bf16 %v4352_v54, %v4351_v49  ;;  %v5329_v51 = vadd.f32 %v4080_v40, %v6979_v25  ;;  %v4082_v59 = vpop.f32.mrb[18].mxu0 }
 0x2d1   : > { %v4289_v44 = vadd.f32 %v5328_v17, %v7009_v7  ;;  %v5330_v53 = vadd.f32 %v4082_v59, %v6981_v56  ;;  %v4084_v58 = vpop.f32.mrb[19].mxu0 }
 0x2d2   : > { %4603 = vst.msk [vmem:[%s7022_s20 + $0x38] sm:$0xff] %vm7018_vm3, %v5262_v41  ;;  %v4290_v1 = vadd.f32 %v5329_v51, %v7011_v14  ;;  %v5331_v24 = vadd.f32 %v4084_v58, %v6983_v38 }
 0x2d3   : > { %v4353_v2 = vmax.f32 %v4289_v44, 0.0  ;;  %v4291_v15 = vadd.f32 %v5330_v53, %v7009_v7 }
 0x2d4   : > { %v4354_v22 = vmax.f32 %v4290_v1, 0.0  ;;  %v4292_v25 = vadd.f32 %v5331_v24, %v7011_v14 }
 0x2d5   : > { %v4355_v11 = vmax.f32 %v4291_v15, 0.0 }
 0x2d6   : > { %v5263_v26 = vpack.c.bf16 %v4354_v22, %v4353_v2  ;;  %v4356_v27 = vmax.f32 %v4292_v25, 0.0  ;;  %v4088_v28 = vpop.f32.mrb[20].mxu0 }
 0x2d7   : > { %v5332_v56 = vadd.f32 %v4088_v28, %v6985_v60  ;;  %v4090_v29 = vpop.f32.mrb[21].mxu0 }
 0x2d8   : > { %4604 = vst.msk [vmem:[%s7022_s20 + $0x40] sm:$0xff] %vm7018_vm3, %v5263_v26  ;;  %v5264_v34 = vpack.c.bf16 %v4356_v27, %v4355_v11  ;;  %v5333_v38 = vadd.f32 %v4090_v29, %v6987_v61  ;;  %v4092_v8 = vpop.f32.mrb[22].mxu0 }
 0x2d9   : > { %v4293_v3 = vadd.f32 %v5332_v56, %v7009_v7  ;;  %v5334_v10 = vadd.f32 %v4092_v8, %v6989_v32  ;;  %v4094_v12 = vpop.f32.mrb[23].mxu0 }
 0x2da   : > { %4605 = vst.msk [vmem:[%s7022_s20 + $0x48] sm:$0xff] %vm7018_vm3, %v5264_v34  ;;  %v4294_v9 = vadd.f32 %v5333_v38, %v7011_v14  ;;  %v5335_v60 = vadd.f32 %v4094_v12, %v6991_v33 }
 0x2db   : > { %v4357_v35 = vmax.f32 %v4293_v3, 0.0  ;;  %v4295_v36 = vadd.f32 %v5334_v10, %v7009_v7 }
 0x2dc   : > { %v4358_v20 = vmax.f32 %v4294_v9, 0.0  ;;  %v4296_v61 = vadd.f32 %v5335_v60, %v7011_v14 }
 0x2dd   : > { %v4359_v37 = vmax.f32 %v4295_v36, 0.0 }
 0x2de   : > { %v5265_v13 = vpack.c.bf16 %v4358_v20, %v4357_v35  ;;  %v4360_v45 = vmax.f32 %v4296_v61, 0.0  ;;  %v4098_v30 = vpop.f32.mrb[24].mxu0 }
 0x2df   : > { %v5336_v32 = vadd.f32 %v4098_v30, %v6993_v62  ;;  %v4100_v16 = vpop.f32.mrb[25].mxu0 }
 0x2e0   : > { %4606 = vst.msk [vmem:[%s7022_s20 + $0x50] sm:$0xff] %vm7018_vm3, %v5265_v13  ;;  %v5266_v31 = vpack.c.bf16 %v4360_v45, %v4359_v37  ;;  %v5337_v33 = vadd.f32 %v4100_v16, %v6995_v52  ;;  %v4102_v46 = vpop.f32.mrb[26].mxu0 }
 0x2e1   : > { %v4297_v47 = vadd.f32 %v5336_v32, %v7009_v7  ;;  %v5338_v42 = vadd.f32 %v4102_v46, %v6997_v57  ;;  %v4104_v43 = vpop.f32.mrb[27].mxu0 }
 0x2e2   : > { %4607 = vst.msk [vmem:[%s7022_s20 + $0x58] sm:$0xff] %vm7018_vm3, %v5266_v31  ;;  %v4298_v18 = vadd.f32 %v5337_v33, %v7011_v14  ;;  %v5339_v62 = vadd.f32 %v4104_v43, %v6999_v63 }
 0x2e3   : > { %v4361_v48 = vmax.f32 %v4297_v47, 0.0  ;;  %v4299_v19 = vadd.f32 %v5338_v42, %v7009_v7 }
 0x2e4   : > { %v4362_v23 = vmax.f32 %v4298_v18, 0.0  ;;  %v4300_v52 = vadd.f32 %v5339_v62, %v7011_v14 }
 0x2e5   : > { %v4363_v50 = vmax.f32 %v4299_v19, 0.0 }
 0x2e6   : > { %v5267_v49 = vpack.c.bf16 %v4362_v23, %v4361_v48  ;;  %v4364_v5 = vmax.f32 %v4300_v52, 0.0  ;;  %v4108_v54 = vpop.f32.mrb[28].mxu0 }
 0x2e7   : > { %v5340_v57 = vadd.f32 %v4108_v54, %v7001_v4  ;;  %v4110_v55 = vpop.f32.mrb[29].mxu0 }
 0x2e8   : > { %4608 = vst.msk [vmem:[%s7022_s20 + $0x60] sm:$0xff] %vm7018_vm3, %v5267_v49  ;;  %v5268_v17 = vpack.c.bf16 %v4364_v5, %v4363_v50  ;;  %v5341_v63 = vadd.f32 %v4110_v55, %v7003_v39  ;;  %v4112_v40 = vpop.f32.mrb[30].mxu0 }
 0x2e9   : > { %v4301_v41 = vadd.f32 %v5340_v57, %v7009_v7  ;;  %v5342_v51 = vadd.f32 %v4112_v40, %v7005_v0  ;;  %v4114_v59 = vpop.f32.mrb[31].mxu0 }
 0x2ea   : > { %4609 = vst.msk [vmem:[%s7022_s20 + $0x68] sm:$0xff] %vm7018_vm3, %v5268_v17  ;;  %v4302_v44 = vadd.f32 %v5341_v63, %v7011_v14  ;;  %v5343_v4 = vadd.f32 %v4114_v59, %v7007_v6 }
 0x2eb   : > { %v4365_v53 = vmax.f32 %v4301_v41, 0.0  ;;  %v4303_v58 = vadd.f32 %v5342_v51, %v7009_v7 }
 0x2ec   : > { %v4366_v1 = vmax.f32 %v4302_v44, 0.0  ;;  %v4304_v39 = vadd.f32 %v5343_v4, %v7011_v14 }
 0x2ed   : > { %v4367_v24 = vmax.f32 %v4303_v58, 0.0  ;;  %v2240_v0 = vpop.f32.mrb[32].mxu1 }
 0x2ee   : > { %v5269_v2 = vpack.c.bf16 %v4366_v1, %v4365_v53  ;;  %v4368_v15 = vmax.f32 %v4304_v39, 0.0  ;;  %v4118_v22 = vpop.f32.mrb[32].mxu0  ;;  %v2242_v11 = vpop.f32.mrb[33].mxu1 }
 0x2ef   : > { %v5344_v25 = vadd.f32 %v4118_v22, %v2240_v0  ;;  %v4120_v26 = vpop.f32.mrb[33].mxu0  ;;  %v2244_v28 = vpop.f32.mrb[34].mxu1 }
 0x2f0   : > { %4610 = vst.msk [vmem:[%s7022_s20 + $0x70] sm:$0xff] %vm7018_vm3, %v5269_v2  ;;  %v5270_v27 = vpack.c.bf16 %v4368_v15, %v4367_v24  ;;  %v5345_v6 = vadd.f32 %v4120_v26, %v2242_v11  ;;  %v4122_v56 = vpop.f32.mrb[34].mxu0  ;;  %v2246_v38 = vpop.f32.mrb[35].mxu1 }
 0x2f1   : > { %v4305_v29 = vadd.f32 %v5344_v25, %v7009_v7  ;;  %v5346_v34 = vadd.f32 %v4122_v56, %v2244_v28  ;;  %v4124_v8 = vpop.f32.mrb[35].mxu0 }
 0x2f2   : > { %4611 = vst.msk [vmem:[%s7022_s20 + $0x78] sm:$0xff] %vm7018_vm3, %v5270_v27  ;;  %v4306_v3 = vadd.f32 %v5345_v6, %v7011_v14  ;;  %v5347_v10 = vadd.f32 %v4124_v8, %v2246_v38 }
 0x2f3   : > { %v4369_v12 = vmax.f32 %v4305_v29, 0.0  ;;  %v4307_v9 = vadd.f32 %v5346_v34, %v7009_v7 }
 0x2f4   : > { %v4370_v60 = vmax.f32 %v4306_v3, 0.0  ;;  %v4308_v35 = vadd.f32 %v5347_v10, %v7011_v14 }
 0x2f5   : > { %v4371_v36 = vmax.f32 %v4307_v9, 0.0  ;;  %v2250_v37 = vpop.f32.mrb[36].mxu1 }
 0x2f6   : > { %v5271_v20 = vpack.c.bf16 %v4370_v60, %v4369_v12  ;;  %v4372_v61 = vmax.f32 %v4308_v35, 0.0  ;;  %v4128_v13 = vpop.f32.mrb[36].mxu0  ;;  %v2252_v30 = vpop.f32.mrb[37].mxu1 }
 0x2f7   : > { %v5348_v45 = vadd.f32 %v4128_v13, %v2250_v37  ;;  %v4130_v32 = vpop.f32.mrb[37].mxu0  ;;  %v2254_v33 = vpop.f32.mrb[38].mxu1 }
 0x2f8   : > { %4612 = vst.msk [vmem:[%s7022_s20 + $0x80] sm:$0xff] %vm7018_vm3, %v5271_v20  ;;  %v5272_v16 = vpack.c.bf16 %v4372_v61, %v4371_v36  ;;  %v5349_v31 = vadd.f32 %v4130_v32, %v2252_v30  ;;  %v4132_v46 = vpop.f32.mrb[38].mxu0  ;;  %v2256_v43 = vpop.f32.mrb[39].mxu1 }
 0x2f9   : > { %v4309_v47 = vadd.f32 %v5348_v45, %v7009_v7  ;;  %v5350_v42 = vadd.f32 %v4132_v46, %v2254_v33  ;;  %v4134_v18 = vpop.f32.mrb[39].mxu0 }
 0x2fa   : > { %4613 = vst.msk [vmem:[%s7022_s20 + $0x88] sm:$0xff] %vm7018_vm3, %v5272_v16  ;;  %v4310_v62 = vadd.f32 %v5349_v31, %v7011_v14  ;;  %v5351_v48 = vadd.f32 %v4134_v18, %v2256_v43 }
 0x2fb   : > { %v4373_v19 = vmax.f32 %v4309_v47, 0.0  ;;  %v4311_v23 = vadd.f32 %v5350_v42, %v7009_v7 }
 0x2fc   : > { %v4374_v52 = vmax.f32 %v4310_v62, 0.0  ;;  %v4312_v50 = vadd.f32 %v5351_v48, %v7011_v14 }
 0x2fd   : > { %v4375_v49 = vmax.f32 %v4311_v23, 0.0  ;;  %v2260_v57 = vpop.f32.mrb[40].mxu1 }
 0x2fe   : > { %v5273_v5 = vpack.c.bf16 %v4374_v52, %v4373_v19  ;;  %v4376_v54 = vmax.f32 %v4312_v50, 0.0  ;;  %v4138_v55 = vpop.f32.mrb[40].mxu0  ;;  %v2262_v63 = vpop.f32.mrb[41].mxu1 }
 0x2ff   : > { %v5352_v17 = vadd.f32 %v4138_v55, %v2260_v57  ;;  %v4140_v40 = vpop.f32.mrb[41].mxu0  ;;  %v2264_v59 = vpop.f32.mrb[42].mxu1 }
 0x300   : > { %4614 = vst.msk [vmem:[%s7022_s20 + $0x90] sm:$0xff] %vm7018_vm3, %v5273_v5  ;;  %v5274_v41 = vpack.c.bf16 %v4376_v54, %v4375_v49  ;;  %v5353_v51 = vadd.f32 %v4140_v40, %v2262_v63  ;;  %v4142_v44 = vpop.f32.mrb[42].mxu0  ;;  %v2266_v58 = vpop.f32.mrb[43].mxu1 }
 0x301   : > { %v4313_v4 = vadd.f32 %v5352_v17, %v7009_v7  ;;  %v5354_v53 = vadd.f32 %v4142_v44, %v2264_v59  ;;  %v4144_v1 = vpop.f32.mrb[43].mxu0 }
 0x302   : > { %4615 = vst.msk [vmem:[%s7022_s20 + $0x98] sm:$0xff] %vm7018_vm3, %v5274_v41  ;;  %v4314_v39 = vadd.f32 %v5353_v51, %v7011_v14  ;;  %v5355_v24 = vadd.f32 %v4144_v1, %v2266_v58 }
 0x303   : > { %v4377_v2 = vmax.f32 %v4313_v4, 0.0  ;;  %v4315_v15 = vadd.f32 %v5354_v53, %v7009_v7 }
 0x304   : > { %v4378_v0 = vmax.f32 %v4314_v39, 0.0  ;;  %v4316_v22 = vadd.f32 %v5355_v24, %v7011_v14 }
 0x305   : > { %v4379_v25 = vmax.f32 %v4315_v15, 0.0  ;;  %v2270_v27 = vpop.f32.mrb[44].mxu1 }
 0x306   : > { %v5275_v11 = vpack.c.bf16 %v4378_v0, %v4377_v2  ;;  %v4380_v26 = vmax.f32 %v4316_v22, 0.0  ;;  %v4148_v6 = vpop.f32.mrb[44].mxu0  ;;  %v2272_v56 = vpop.f32.mrb[45].mxu1 }
 0x307   : > { %v5356_v28 = vadd.f32 %v4148_v6, %v2270_v27  ;;  %v4150_v29 = vpop.f32.mrb[45].mxu0  ;;  %v2274_v8 = vpop.f32.mrb[46].mxu1 }
 0x308   : > { %4616 = vst.msk [vmem:[%s7022_s20 + $0xa0] sm:$0xff] %vm7018_vm3, %v5275_v11  ;;  %v5276_v34 = vpack.c.bf16 %v4380_v26, %v4379_v25  ;;  %v5357_v38 = vadd.f32 %v4150_v29, %v2272_v56  ;;  %v4152_v3 = vpop.f32.mrb[46].mxu0  ;;  %v2276_v9 = vpop.f32.mrb[47].mxu1 }
 0x309   : > { %v4317_v10 = vadd.f32 %v5356_v28, %v7009_v7  ;;  %v5358_v12 = vadd.f32 %v4152_v3, %v2274_v8  ;;  %v4154_v60 = vpop.f32.mrb[47].mxu0 }
 0x30a   : > { %4617 = vst.msk [vmem:[%s7022_s20 + $0xa8] sm:$0xff] %vm7018_vm3, %v5276_v34  ;;  %v4318_v35 = vadd.f32 %v5357_v38, %v7011_v14  ;;  %v5359_v36 = vadd.f32 %v4154_v60, %v2276_v9 }
 0x30b   : > { %v4381_v20 = vmax.f32 %v4317_v10, 0.0  ;;  %v4319_v61 = vadd.f32 %v5358_v12, %v7009_v7 }
 0x30c   : > { %v4382_v37 = vmax.f32 %v4318_v35, 0.0  ;;  %v4320_v13 = vadd.f32 %v5359_v36, %v7011_v14 }
 0x30d   : > { %v4383_v45 = vmax.f32 %v4319_v61, 0.0  ;;  %v2280_v16 = vpop.f32.mrb[48].mxu1 }
 0x30e   : > { %v5277_v30 = vpack.c.bf16 %v4382_v37, %v4381_v20  ;;  %v4384_v32 = vmax.f32 %v4320_v13, 0.0  ;;  %v4158_v31 = vpop.f32.mrb[48].mxu0  ;;  %v2282_v46 = vpop.f32.mrb[49].mxu1 }
 0x30f   : > { %v5360_v33 = vadd.f32 %v4158_v31, %v2280_v16  ;;  %v4160_v47 = vpop.f32.mrb[49].mxu0  ;;  %v2284_v18 = vpop.f32.mrb[50].mxu1 }
 0x310   : > { %4618 = vst.msk [vmem:[%s7022_s20 + $0xb0] sm:$0xff] %vm7018_vm3, %v5277_v30  ;;  %v5278_v42 = vpack.c.bf16 %v4384_v32, %v4383_v45  ;;  %v5361_v43 = vadd.f32 %v4160_v47, %v2282_v46  ;;  %v4162_v62 = vpop.f32.mrb[50].mxu0  ;;  %v2286_v23 = vpop.f32.mrb[51].mxu1 }
 0x311   : > { %v4321_v48 = vadd.f32 %v5360_v33, %v7009_v7  ;;  %v5362_v19 = vadd.f32 %v4162_v62, %v2284_v18  ;;  %v4164_v52 = vpop.f32.mrb[51].mxu0 }
 0x312   : > { %4619 = vst.msk [vmem:[%s7022_s20 + $0xb8] sm:$0xff] %vm7018_vm3, %v5278_v42  ;;  %v4322_v50 = vadd.f32 %v5361_v43, %v7011_v14  ;;  %v5363_v49 = vadd.f32 %v4164_v52, %v2286_v23 }
 0x313   : > { %v4385_v5 = vmax.f32 %v4321_v48, 0.0  ;;  %v4323_v54 = vadd.f32 %v5362_v19, %v7009_v7 }
 0x314   : > { %v4386_v57 = vmax.f32 %v4322_v50, 0.0  ;;  %v4324_v55 = vadd.f32 %v5363_v49, %v7011_v14 }
 0x315   : > { %v4387_v17 = vmax.f32 %v4323_v54, 0.0  ;;  %v2290_v41 = vpop.f32.mrb[52].mxu1 }
 0x316   : > { %v5279_v63 = vpack.c.bf16 %v4386_v57, %v4385_v5  ;;  %v4388_v40 = vmax.f32 %v4324_v55, 0.0  ;;  %v4168_v51 = vpop.f32.mrb[52].mxu0  ;;  %v2292_v44 = vpop.f32.mrb[53].mxu1 }
 0x317   : > { %v5364_v59 = vadd.f32 %v4168_v51, %v2290_v41  ;;  %v4170_v4 = vpop.f32.mrb[53].mxu0  ;;  %v2294_v1 = vpop.f32.mrb[54].mxu1 }
 0x318   : > { %4620 = vst.msk [vmem:[%s7022_s20 + $0xc0] sm:$0xff] %vm7018_vm3, %v5279_v63  ;;  %v5280_v53 = vpack.c.bf16 %v4388_v40, %v4387_v17  ;;  %v5365_v58 = vadd.f32 %v4170_v4, %v2292_v44  ;;  %v4172_v39 = vpop.f32.mrb[54].mxu0  ;;  %v2296_v15 = vpop.f32.mrb[55].mxu1 }
 0x319   : > { %v4325_v24 = vadd.f32 %v5364_v59, %v7009_v7  ;;  %v5366_v2 = vadd.f32 %v4172_v39, %v2294_v1  ;;  %v4174_v0 = vpop.f32.mrb[55].mxu0 }
 0x31a   : > { %4621 = vst.msk [vmem:[%s7022_s20 + $0xc8] sm:$0xff] %vm7018_vm3, %v5280_v53  ;;  %v4326_v22 = vadd.f32 %v5365_v58, %v7011_v14  ;;  %v5367_v25 = vadd.f32 %v4174_v0, %v2296_v15 }
 0x31b   : > { %v4389_v11 = vmax.f32 %v4325_v24, 0.0  ;;  %v4327_v26 = vadd.f32 %v5366_v2, %v7009_v7 }
 0x31c   : > { %v4390_v27 = vmax.f32 %v4326_v22, 0.0  ;;  %v4328_v6 = vadd.f32 %v5367_v25, %v7011_v14 }
 0x31d   : > { %v4391_v28 = vmax.f32 %v4327_v26, 0.0  ;;  %v2300_v34 = vpop.f32.mrb[56].mxu1 }
 0x31e   : > { %v5281_v56 = vpack.c.bf16 %v4390_v27, %v4389_v11  ;;  %v4392_v29 = vmax.f32 %v4328_v6, 0.0  ;;  %v4178_v38 = vpop.f32.mrb[56].mxu0  ;;  %v2302_v3 = vpop.f32.mrb[57].mxu1 }
 0x31f   : > { %v5368_v8 = vadd.f32 %v4178_v38, %v2300_v34  ;;  %v4180_v10 = vpop.f32.mrb[57].mxu0  ;;  %v2304_v60 = vpop.f32.mrb[58].mxu1 }
 0x320   : > { %4622 = vst.msk [vmem:[%s7022_s20 + $0xd0] sm:$0xff] %vm7018_vm3, %v5281_v56  ;;  %v5282_v12 = vpack.c.bf16 %v4392_v29, %v4391_v28  ;;  %v5369_v9 = vadd.f32 %v4180_v10, %v2302_v3  ;;  %v4182_v35 = vpop.f32.mrb[58].mxu0  ;;  %v2306_v61 = vpop.f32.mrb[59].mxu1 }
 0x321   : > { %v4329_v36 = vadd.f32 %v5368_v8, %v7009_v7  ;;  %v5370_v20 = vadd.f32 %v4182_v35, %v2304_v60  ;;  %v4184_v37 = vpop.f32.mrb[59].mxu0 }
 0x322   : > { %4623 = vst.msk [vmem:[%s7022_s20 + $0xd8] sm:$0xff] %vm7018_vm3, %v5282_v12  ;;  %v4330_v13 = vadd.f32 %v5369_v9, %v7011_v14  ;;  %v5371_v45 = vadd.f32 %v4184_v37, %v2306_v61 }
 0x323   : > { %v4393_v30 = vmax.f32 %v4329_v36, 0.0  ;;  %v4331_v32 = vadd.f32 %v5370_v20, %v7009_v7 }
 0x324   : > { %v4394_v16 = vmax.f32 %v4330_v13, 0.0  ;;  %v4332_v31 = vadd.f32 %v5371_v45, %v7011_v14 }
 0x325   : > { %v4395_v33 = vmax.f32 %v4331_v32, 0.0  ;;  %v2310_v42 = vpop.f32.mrb[60].mxu1 }
 0x326   : > { %v5283_v46 = vpack.c.bf16 %v4394_v16, %v4393_v30  ;;  %v4396_v47 = vmax.f32 %v4332_v31, 0.0  ;;  %v4188_v43 = vpop.f32.mrb[60].mxu0  ;;  %v2312_v62 = vpop.f32.mrb[61].mxu1 }
 0x327   : > { %v5372_v18 = vadd.f32 %v4188_v43, %v2310_v42  ;;  %v4190_v48 = vpop.f32.mrb[61].mxu0  ;;  %v2314_v52 = vpop.f32.mrb[62].mxu1 }
 0x328   : > { %4624 = vst.msk [vmem:[%s7022_s20 + $0xe0] sm:$0xff] %vm7018_vm3, %v5283_v46  ;;  %v5284_v19 = vpack.c.bf16 %v4396_v47, %v4395_v33  ;;  %v5373_v23 = vadd.f32 %v4190_v48, %v2312_v62  ;;  %v4192_v50 = vpop.f32.mrb[62].mxu0  ;;  %v2316_v54 = vpop.f32.mrb[63].mxu1 }
 0x329   : > { %v4333_v49 = vadd.f32 %v5372_v18, %v7009_v7  ;;  %v5374_v5 = vadd.f32 %v4192_v50, %v2314_v52  ;;  %v4194_v57 = vpop.f32.mrb[63].mxu0 }
 0x32a   : > { %4625 = vst.msk [vmem:[%s7022_s20 + $0xe8] sm:$0xff] %vm7018_vm3, %v5284_v19  ;;  %v4334_v55 = vadd.f32 %v5373_v23, %v7011_v14  ;;  %v5375_v17 = vadd.f32 %v4194_v57, %v2316_v54 }
 0x32b   : > { %v4397_v63 = vmax.f32 %v4333_v49, 0.0  ;;  %v4335_v40 = vadd.f32 %v5374_v5, %v7009_v7 }
 0x32c   : > { %v4398_v41 = vmax.f32 %v4334_v55, 0.0  ;;  %v4336_v51 = vadd.f32 %v5375_v17, %v7011_v14 }
 0x32d   : > { %v4399_v59 = vmax.f32 %v4335_v40, 0.0 }
 0x32e   : > { %v5285_v44 = vpack.c.bf16 %v4398_v41, %v4397_v63  ;;  %v4400_v4 = vmax.f32 %v4336_v51, 0.0 }
 0x330   : > { %4626 = vst.msk [vmem:[%s7022_s20 + $0xf0] sm:$0xff] %vm7018_vm3, %v5285_v44  ;;  %v5286_v7 = vpack.c.bf16 %v4400_v4, %v4399_v59 }
 0x332   : > { %4627 = vst.msk [vmem:[%s7022_s20 + $0xf8] sm:$0xff] %vm7018_vm3, %v5286_v7 }
 0x333   : > { %6256 = shalt.err (!%p6253_p1)
}
 0x334   : > { %s6257_s11 = scalar_lea.hbm %s7205_s28, 4096  ;;  %s6261_s30 = scalar_lea.hbm %s7260_s3, 8192 }
 0x335   : > { %p6258_p13 = scmp.ne.s32.totalorder %s7205_s28, %s6257_s11  ;;  %p6262_p4 = scmp.lt.u32.totalorder %s7205_s28, %s7260_s3 }
 0x336   : > { %p6263_p5 = scmp.lt.u32.totalorder %s6261_s30, %s6257_s11  ;;  %p6265_p11 = scmp.lt.u32.totalorder %s6257_s11, %s7205_s28 }
 0x337   : > { %p6259_p6 = pnand %p6258_p13, %p7276_p0 }
 0x338   : > { %p6264_p8 = por %p6263_p5, %p6262_p4 }
 0x339   : > { %p6260_p10 = pneg %p6259_p6 }
 0x33a   : > { %p6266_p2 = por %p6265_p11, %p6264_p8 }
 0x33c   : > { %p6267_p3 = pnand %p6266_p2, %p6260_p10 }
 0x33e   : > { %6270 = shalt.err (!%p6267_p3)
}
 0x33f   : > { %s6321_s18 = smov 128   ;;  %s6322_s20 = smov 8  }
 0x340   : > { %5709 = dma.vmem_to_hbm [thread:$0]  (%p7276_p0), %s7207_s8, 4096, %s7205_s28, %s4629_s16, %s6321_s18, %s6321_s18, %s6322_s20  }
 0x341 PF: > { %s4657_s7 = sand.u32 1, %s6301_s12   ;;  %p7277_p7 = scmp.ne.s32.totalorder %s7265_s19, 0 }
 0x342   : > { %p7278_p9 = scmp.ge.s32.totalorder %s6313_s15, 2  ;;  %s4658_s17 = scalar_lea.sflag [#allocation4], %s4657_s7 }
 0x344   : > { %p5723_p12 = pnand %p7278_p9, %p7277_p7 }
 0x346   : > { %6296 = dma.done.wait (!%p5723_p12), %s4658_s17, 4096  }
 0x347   : > { %6298 = vsyncadd (!%p5723_p12), %s4658_s17, 4294963200  ;;  %p17_p1 = scmp.ge.s32.totalorder %s6456_s4, 4   ;;  %s7279_s12 = smov %s6305_s13 }
 0x348   : > { %s7280_s13 = smov %s6309_s14  ;;  %s7281_s14 = smov %s6472_s9 }
 0x349   : > { %s7282_s15 = smov %s6456_s4  ;;  %19 = sbr.rel (!%p17_p1) target bundleno = 6 (0x6), region = 91 }
 0x350   :  { %4663 = vsyncpa [#allocation3], 1 }
 0x351   :  { %4665 = vsyncpa [#allocation3 + $0x1], 1 }
 0x352   :  { %4666 = vsyncpa [#allocation6], 1 }
 0x353   :  { %4667 = vsyncpa [#allocation4], 1 }
 0x354   :  { %4669 = vsyncpa [#allocation4 + $0x1], 1 }

// kernel: inception_d.10
= control target key start
LH: loop header
LB: loop body
LE: loop exit
PB: predicated region body
PF: predicated region fallthrough
CT: control target
= control target key end

     0   :  { %8 = vsyncpa [#allocation3], 0  ;;  %s4336_s0 = inlined_call_operand.hbm [shape: bf16[128,1728], index: 0, kind: input, shape index: {}]   ;;  %s4337_s1 = inlined_call_operand.hbm [shape: bf16[1728,192], index: 1, kind: input, shape index: {}]   ;;  %s4338_s2 = inlined_call_operand.hbm [shape: f32[1,192], index: 2, kind: input, shape index: {}]   ;;  %s4339_s3 = inlined_call_operand.hbm [shape: f32[128,192], index: 3, kind: output, shape index: {}]  }
   0x1   :  { %9 = vsyncpa [#allocation6], 0 }
   0x2   :  { %10 = vsyncpa [#allocation4], 0  ;;  %s4105_s12 = smov [#allocation5]   ;;  %s4011_s16 = scalar_lea.hbm %s4337_s1, 27648 }
   0x3   :  { %s28_s13 = sshll.u32 %s4105_s12, 4  ;;  %p4012_p0 = scmp.ne.s32.totalorder %s4337_s1, %s4011_s16  ;;  %s29_s13 = int_to_ptr.vmem [resolvable:$true] %s28_s13 }
   0x4   :  { %p4015_p1 = scmp.lt.u32.totalorder %s4011_s16, %s4337_s1 }
   0x6   :  { %p4017_p2 = pnand %p4015_p1, %p4012_p0 }
   0x8   :  { %4020 = shalt.err (!%p4017_p2)
}
   0x9   :  { %s4021_s21 = scalar_lea.vmem %s29_s13, 27648  ;;  %p4026_p4 = scmp.lt.s32.totalorder %s29_s13, %s29_s13 }
   0xa   :  { %p4022_p3 = scmp.ne.s32.totalorder %s29_s13, %s4021_s21  ;;  %p4027_p5 = scmp.lt.s32.totalorder %s4021_s21, %s4021_s21 }
   0xc   :  { %p4028_p6 = por %p4027_p5, %p4026_p4 }
   0xe   :  { %p4029_p7 = pnand %p4028_p6, %p4022_p3 }
  0x10   :  { %4032 = shalt.err (!%p4029_p7)
}
  0x11   :  { %s4106_s22 = smov 128   ;;  %s4107_s23 = smov 8  }
  0x12   :  { %34 = dma.hbm_to_vmem [thread:$0]  %s4337_s1, 27648, %s29_s13, [#allocation6], %s4106_s22, %s4106_s22, %s4107_s23  }
  0x13   :  { %s4108_s26 = smov [#allocation2]   ;;  %s4033_s30 = scalar_lea.hbm %s4336_s0, 14336 }
  0x14   :  { %s16_s27 = sshll.u32 %s4108_s26, 4  ;;  %p4034_p8 = scmp.ne.s32.totalorder %s4336_s0, %s4033_s30  ;;  %s17_s27 = int_to_ptr.vmem [resolvable:$true] %s16_s27 }
  0x15   :  { %p4037_p9 = scmp.lt.u32.totalorder %s4033_s30, %s4336_s0 }
  0x17   :  { %p4039_p10 = pnand %p4037_p9, %p4034_p8 }
  0x19   :  { %4042 = shalt.err (!%p4039_p10)
}
  0x1a   :  { %s4043_s8 = scalar_lea.vmem %s17_s27, 14336  ;;  %p4048_p12 = scmp.lt.s32.totalorder %s17_s27, %s17_s27 }
  0x1b   :  { %p4044_p11 = scmp.ne.s32.totalorder %s17_s27, %s4043_s8  ;;  %p4049_p13 = scmp.lt.s32.totalorder %s4043_s8, %s4043_s8 }
  0x1d   :  { %p4050_p0 = por %p4049_p13, %p4048_p12 }
  0x1f   :  { %p4051_p1 = pnand %p4050_p0, %p4044_p11 }
  0x21   :  { %4054 = shalt.err (!%p4051_p1)
}
  0x22   :  { %s4109_s1 = smov 896   ;;  %s4110_s9 = smov 56  }
  0x23   :  { %22 = dma.hbm_to_vmem [thread:$0]  %s4336_s0, 14336, %s17_s27, [#allocation3], %s4109_s1, %s4109_s1, %s4110_s9  }
  0x24   :  { %s4111_s12 = smov [#allocation7]   ;;  %s4055_s16 = scalar_lea.hbm %s4338_s2, 32 }
  0x25   :  { %s41_s13 = sshll.u32 %s4111_s12, 4  ;;  %p4056_p2 = scmp.ne.s32.totalorder %s4338_s2, %s4055_s16  ;;  %s42_s13 = int_to_ptr.vmem [resolvable:$true] %s41_s13 }
  0x26   :  { %p4059_p3 = scmp.lt.u32.totalorder %s4055_s16, %s4338_s2 }
  0x28   :  { %p4061_p4 = pnand %p4059_p3, %p4056_p2 }
  0x2a   :  { %4064 = shalt.err (!%p4061_p4)
}
  0x2b   :  { %s4065_s21 = scalar_lea.vmem %s42_s13, 32  ;;  %p4070_p6 = scmp.lt.s32.totalorder %s42_s13, %s42_s13 }
  0x2c   :  { %p4066_p5 = scmp.ne.s32.totalorder %s42_s13, %s4065_s21  ;;  %p4071_p7 = scmp.lt.s32.totalorder %s4065_s21, %s4065_s21 }
  0x2e   :  { %p4072_p8 = por %p4071_p7, %p4070_p6 }
  0x30   :  { %p4073_p9 = pnand %p4072_p8, %p4066_p5 }
  0x32   :  { %4076 = shalt.err (!%p4073_p9)
}
  0x33   :  { %44 = dma.hbm_to_vmem [thread:$0]  %s4338_s2, 32, %s42_s13, [#allocation6]  }
  0x34   :  { %4099 = dma.done.wait [#allocation3], 14336  }
  0x35   :  { %4100 = vsyncadd [#allocation3], 4294952960 }
  0x36   :  { %4101 = dma.done.wait [#allocation6], 27680  }
  0x37   :  { %4102 = vsyncadd [#allocation6], 4294939616  ;;  %v3519_v0 = vld [vmem:[#allocation5 + $0x4] ss:$8 sps:$4 sm:$0xff]   ;;  %v3523_v2 = vld [vmem:[#allocation5] ss:$8 sps:$4 sm:$0xff]  }
  0x38   :  { %v3521_v1 = vld [vmem:[#allocation5 + $0x304] ss:$8 sps:$4 sm:$0xff]   ;;  %2052 = vmatprep.subr.bf16.mxu1 %v3519_v0  ;;  %v3524_v3 = vld [vmem:[#allocation5 + $0x300] ss:$8 sps:$4 sm:$0xff]   ;;  %v3525_v4 = vld [vmem:[#allocation5 + $0x14] ss:$8 sps:$4 sm:$0xff]  }
  0x39   :  { %2391 = vmatprep.subr.bf16.mxu0 %v3521_v1  ;;  %2053 = vmatpush1.bf16.msra.mxu1 %v3523_v2  ;;  %v3527_v5 = vld [vmem:[#allocation5 + $0x314] ss:$8 sps:$4 sm:$0xff]   ;;  %v3529_v6 = vld [vmem:[#allocation5 + $0x10] ss:$8 sps:$4 sm:$0xff]   ;;  %v3531_v8 = vld [vmem:[#allocation5 + $0x24] ss:$8 sps:$4 sm:$0xff]  }
  0x3a   :  { %2392 = vmatpush1.bf16.msra.mxu0 %v3524_v3  ;;  %2054 = vmatprep.subr.bf16.mxu1 %v3525_v4  ;;  %v3530_v7 = vld [vmem:[#allocation5 + $0x310] ss:$8 sps:$4 sm:$0xff]   ;;  %v3533_v9 = vld [vmem:[#allocation5 + $0x324] ss:$8 sps:$4 sm:$0xff]   ;;  %v3535_v10 = vld [vmem:[#allocation5 + $0x20] ss:$8 sps:$4 sm:$0xff]  }
  0x3b   :  { %2393 = vmatprep.subr.bf16.mxu0 %v3527_v5  ;;  %v3536_v11 = vld [vmem:[#allocation5 + $0x320] ss:$8 sps:$4 sm:$0xff]   ;;  %v3537_v12 = vld [vmem:[#allocation5 + $0x34] ss:$8 sps:$4 sm:$0xff]   ;;  %v3541_v14 = vld [vmem:[#allocation5 + $0x30] ss:$8 sps:$4 sm:$0xff]  }
  0x3c   :  { %v3539_v13 = vld [vmem:[#allocation5 + $0x334] ss:$8 sps:$4 sm:$0xff]   ;;  %v3542_v15 = vld [vmem:[#allocation5 + $0x330] ss:$8 sps:$4 sm:$0xff]   ;;  %v3543_v16 = vld [vmem:[#allocation5 + $0x44] ss:$8 sps:$4 sm:$0xff]  }
  0x3d   :  { %2055 = vmatpush1.bf16.msra.mxu1 %v3529_v6  ;;  %v3545_v17 = vld [vmem:[#allocation5 + $0x344] ss:$8 sps:$4 sm:$0xff]   ;;  %v3547_v18 = vld [vmem:[#allocation5 + $0x40] ss:$8 sps:$4 sm:$0xff]   ;;  %v3549_v20 = vld [vmem:[#allocation5 + $0x54] ss:$8 sps:$4 sm:$0xff]  }
  0x3e   :  { %2394 = vmatpush1.bf16.msra.mxu0 %v3530_v7  ;;  %2056 = vmatprep.subr.bf16.mxu1 %v3531_v8  ;;  %v3548_v19 = vld [vmem:[#allocation5 + $0x340] ss:$8 sps:$4 sm:$0xff]   ;;  %v3551_v21 = vld [vmem:[#allocation5 + $0x354] ss:$8 sps:$4 sm:$0xff]   ;;  %v3553_v22 = vld [vmem:[#allocation5 + $0x50] ss:$8 sps:$4 sm:$0xff]  }
  0x3f   :  { %2395 = vmatprep.subr.bf16.mxu0 %v3533_v9  ;;  %v3554_v23 = vld [vmem:[#allocation5 + $0x350] ss:$8 sps:$4 sm:$0xff]   ;;  %v3555_v24 = vld [vmem:[#allocation5 + $0x64] ss:$8 sps:$4 sm:$0xff]   ;;  %v3559_v26 = vld [vmem:[#allocation5 + $0x60] ss:$8 sps:$4 sm:$0xff]  }
  0x40   :  { %v3557_v25 = vld [vmem:[#allocation5 + $0x364] ss:$8 sps:$4 sm:$0xff]   ;;  %v3560_v27 = vld [vmem:[#allocation5 + $0x360] ss:$8 sps:$4 sm:$0xff]   ;;  %v3561_v28 = vld [vmem:[#allocation5 + $0x74] ss:$8 sps:$4 sm:$0xff]  }
  0x41   :  { %2057 = vmatpush1.bf16.msra.mxu1 %v3535_v10  ;;  %v3563_v29 = vld [vmem:[#allocation5 + $0x374] ss:$8 sps:$4 sm:$0xff]   ;;  %v3565_v30 = vld [vmem:[#allocation5 + $0x70] ss:$8 sps:$4 sm:$0xff]   ;;  %v3567_v32 = vld [vmem:[#allocation5 + $0x84] ss:$8 sps:$4 sm:$0xff]  }
  0x42   :  { %2396 = vmatpush1.bf16.msra.mxu0 %v3536_v11  ;;  %2058 = vmatprep.subr.bf16.mxu1 %v3537_v12  ;;  %v3566_v31 = vld [vmem:[#allocation5 + $0x370] ss:$8 sps:$4 sm:$0xff]   ;;  %v3569_v33 = vld [vmem:[#allocation5 + $0x384] ss:$8 sps:$4 sm:$0xff]   ;;  %v3571_v34 = vld [vmem:[#allocation5 + $0x80] ss:$8 sps:$4 sm:$0xff]  }
  0x43   :  { %2397 = vmatprep.subr.bf16.mxu0 %v3539_v13  ;;  %v3572_v35 = vld [vmem:[#allocation5 + $0x380] ss:$8 sps:$4 sm:$0xff]   ;;  %v3573_v36 = vld [vmem:[#allocation5 + $0x94] ss:$8 sps:$4 sm:$0xff]   ;;  %v3577_v38 = vld [vmem:[#allocation5 + $0x90] ss:$8 sps:$4 sm:$0xff]  }
  0x44   :  { %v3575_v37 = vld [vmem:[#allocation5 + $0x394] ss:$8 sps:$4 sm:$0xff]   ;;  %v3578_v39 = vld [vmem:[#allocation5 + $0x390] ss:$8 sps:$4 sm:$0xff]   ;;  %v3579_v40 = vld [vmem:[#allocation5 + $0xa4] ss:$8 sps:$4 sm:$0xff]  }
  0x45   :  { %2059 = vmatpush1.bf16.msra.mxu1 %v3541_v14  ;;  %v3581_v41 = vld [vmem:[#allocation5 + $0x3a4] ss:$8 sps:$4 sm:$0xff]   ;;  %v3583_v42 = vld [vmem:[#allocation5 + $0xa0] ss:$8 sps:$4 sm:$0xff]   ;;  %v3585_v44 = vld [vmem:[#allocation5 + $0xb4] ss:$8 sps:$4 sm:$0xff]  }
  0x46   :  { %2398 = vmatpush1.bf16.msra.mxu0 %v3542_v15  ;;  %2060 = vmatprep.subr.bf16.mxu1 %v3543_v16  ;;  %v3584_v43 = vld [vmem:[#allocation5 + $0x3a0] ss:$8 sps:$4 sm:$0xff]   ;;  %v3587_v45 = vld [vmem:[#allocation5 + $0x3b4] ss:$8 sps:$4 sm:$0xff]   ;;  %v3589_v46 = vld [vmem:[#allocation5 + $0xb0] ss:$8 sps:$4 sm:$0xff]  }
  0x47   :  { %2399 = vmatprep.subr.bf16.mxu0 %v3545_v17  ;;  %v3590_v47 = vld [vmem:[#allocation5 + $0x3b0] ss:$8 sps:$4 sm:$0xff]   ;;  %v3591_v48 = vld [vmem:[#allocation5 + $0xc4] ss:$8 sps:$4 sm:$0xff]   ;;  %v3620_v51 = vld [vmem:[#allocation2 + $0x1c] ss:$56 sps:$4 sm:$0xff]  }
  0x48   :  { %v3617_v49 = vld [vmem:[#allocation2 + $0x4] ss:$56 sps:$4 sm:$0xff]   ;;  %v3595_v52 = vld [vmem:[#allocation5 + $0xc0] ss:$8 sps:$4 sm:$0xff]   ;;  %2423 = vmatprep.mubr.bf16.mxu0 %v3620_v51  ;;  %v3601_v56 = vld [vmem:[#allocation5 + $0xd0] ss:$8 sps:$4 sm:$0xff]  }
  0x49   :  { %2061 = vmatpush1.bf16.msra.mxu1 %v3547_v18  ;;  %v3593_v50 = vld [vmem:[#allocation5 + $0x3c4] ss:$8 sps:$4 sm:$0xff]   ;;  %2084 = vmatprep.mubr.bf16.mxu1 %v3617_v49  ;;  %v3596_v53 = vld [vmem:[#allocation5 + $0x3c0] ss:$8 sps:$4 sm:$0xff]   ;;  %v3597_v54 = vld [vmem:[#allocation5 + $0xd4] ss:$8 sps:$4 sm:$0xff]  }
  0x4a   :  { %2400 = vmatpush1.bf16.msra.mxu0 %v3548_v19  ;;  %2062 = vmatprep.subr.bf16.mxu1 %v3549_v20  ;;  %v3599_v55 = vld [vmem:[#allocation5 + $0x3d4] ss:$8 sps:$4 sm:$0xff]   ;;  %v3602_v57 = vld [vmem:[#allocation5 + $0x3d0] ss:$8 sps:$4 sm:$0xff]   ;;  %v3603_v58 = vld [vmem:[#allocation5 + $0xe4] ss:$8 sps:$4 sm:$0xff]  }
  0x4b   :  { %2401 = vmatprep.subr.bf16.mxu0 %v3551_v21  ;;  %v3605_v59 = vld [vmem:[#allocation5 + $0x3e4] ss:$8 sps:$4 sm:$0xff]   ;;  %v3607_v60 = vld [vmem:[#allocation5 + $0xe0] ss:$8 sps:$4 sm:$0xff]   ;;  %v3609_v62 = vld [vmem:[#allocation5 + $0xf4] ss:$8 sps:$4 sm:$0xff]  }
  0x4c   :  { %v3608_v61 = vld [vmem:[#allocation5 + $0x3e0] ss:$8 sps:$4 sm:$0xff]   ;;  %v3611_v63 = vld [vmem:[#allocation5 + $0x3f4] ss:$8 sps:$4 sm:$0xff]   ;;  %v3613_v0 = vld [vmem:[#allocation5 + $0xf0] ss:$8 sps:$4 sm:$0xff]  }
  0x4d   :  { %2063 = vmatpush1.bf16.msra.mxu1 %v3553_v22  ;;  %v3614_v1 = vld [vmem:[#allocation5 + $0x3f0] ss:$8 sps:$4 sm:$0xff]   ;;  %v3623_v2 = vld [vmem:[#allocation5 + $0x104] ss:$8 sps:$4 sm:$0xff]   ;;  %v3621_v6 = vld [vmem:[#allocation5 + $0x100] ss:$8 sps:$4 sm:$0xff]  }
  0x4e   :  { %2402 = vmatpush1.bf16.msra.mxu0 %v3554_v23  ;;  %2064 = vmatprep.subr.bf16.mxu1 %v3555_v24  ;;  %v3626_v3 = vld [vmem:[#allocation5 + $0x404] ss:$8 sps:$4 sm:$0xff]   ;;  %v3615_v4 = vld [vmem:[#allocation2] ss:$56 sps:$4 sm:$0xff]   ;;  %v3629_v8 = vld [vmem:[#allocation5 + $0x114] ss:$8 sps:$4 sm:$0xff]  }
  0x4f   :  { %2403 = vmatprep.subr.bf16.mxu0 %v3557_v25  ;;  %v3618_v5 = vld [vmem:[#allocation2 + $0x18] ss:$56 sps:$4 sm:$0xff]   ;;  %v3624_v7 = vld [vmem:[#allocation5 + $0x400] ss:$8 sps:$4 sm:$0xff]   ;;  %v3632_v9 = vld [vmem:[#allocation5 + $0x414] ss:$8 sps:$4 sm:$0xff]  }
  0x50   :  { %v3633_v10 = vld [vmem:[#allocation2 + $0x74] ss:$56 sps:$4 sm:$0xff]   ;;  %v3627_v12 = vld [vmem:[#allocation5 + $0x110] ss:$8 sps:$4 sm:$0xff]   ;;  %v3638_v17 = vld [vmem:[#allocation5 + $0x120] ss:$8 sps:$4 sm:$0xff]  }
  0x51   :  { %2065 = vmatpush1.bf16.msra.mxu1 %v3559_v26  ;;  %v3635_v11 = vld [vmem:[#allocation2 + $0x8c] ss:$56 sps:$4 sm:$0xff]   ;;  %v3630_v13 = vld [vmem:[#allocation5 + $0x410] ss:$8 sps:$4 sm:$0xff]   ;;  %v3641_v18 = vld [vmem:[#allocation2 + $0x88] ss:$56 sps:$4 sm:$0xff]  }
  0x52   :  { %2404 = vmatpush1.bf16.msra.mxu0 %v3560_v27  ;;  %2066 = vmatprep.subr.bf16.mxu1 %v3561_v28  ;;  %v3640_v14 = vld [vmem:[#allocation5 + $0x124] ss:$8 sps:$4 sm:$0xff]   ;;  %v3637_v16 = vld [vmem:[#allocation2 + $0x70] ss:$56 sps:$4 sm:$0xff]   ;;  %v3647_v20 = vld [vmem:[#allocation5 + $0x134] ss:$8 sps:$4 sm:$0xff]  }
  0x53   :  { %2405 = vmatprep.subr.bf16.mxu0 %v3563_v29  ;;  %v3644_v15 = vld [vmem:[#allocation5 + $0x424] ss:$8 sps:$4 sm:$0xff]   ;;  %v3642_v19 = vld [vmem:[#allocation5 + $0x420] ss:$8 sps:$4 sm:$0xff]   ;;  %v3650_v21 = vld [vmem:[#allocation5 + $0x434] ss:$8 sps:$4 sm:$0xff]  }
  0x54   :  { %v3651_v22 = vld [vmem:[#allocation2 + $0xe4] ss:$56 sps:$4 sm:$0xff]   ;;  %v3645_v24 = vld [vmem:[#allocation5 + $0x130] ss:$8 sps:$4 sm:$0xff]   ;;  %v3656_v29 = vld [vmem:[#allocation5 + $0x140] ss:$8 sps:$4 sm:$0xff]  }
  0x55   :  { %2067 = vmatpush1.bf16.msra.mxu1 %v3565_v30  ;;  %v3653_v23 = vld [vmem:[#allocation2 + $0xfc] ss:$56 sps:$4 sm:$0xff]   ;;  %v3648_v25 = vld [vmem:[#allocation5 + $0x430] ss:$8 sps:$4 sm:$0xff]   ;;  %v3658_v26 = vld [vmem:[#allocation5 + $0x144] ss:$8 sps:$4 sm:$0xff]  }
  0x56   :  { %2406 = vmatpush1.bf16.msra.mxu0 %v3566_v31  ;;  %2068 = vmatprep.subr.bf16.mxu1 %v3567_v32  ;;  %v3662_v27 = vld [vmem:[#allocation5 + $0x444] ss:$8 sps:$4 sm:$0xff]   ;;  %v3655_v28 = vld [vmem:[#allocation2 + $0xe0] ss:$56 sps:$4 sm:$0xff]   ;;  %v3665_v32 = vld [vmem:[#allocation5 + $0x154] ss:$8 sps:$4 sm:$0xff]  }
  0x57   :  { %2407 = vmatprep.subr.bf16.mxu0 %v3569_v33  ;;  %v3659_v30 = vld [vmem:[#allocation2 + $0xf8] ss:$56 sps:$4 sm:$0xff]   ;;  %v3660_v31 = vld [vmem:[#allocation5 + $0x440] ss:$8 sps:$4 sm:$0xff]   ;;  %v3668_v33 = vld [vmem:[#allocation5 + $0x454] ss:$8 sps:$4 sm:$0xff]  }
  0x58   :  { %v3684_v49 = vld [vmem:[#allocation5 + $0x470] ss:$8 sps:$4 sm:$0xff]   ;;  %v3698_v51 = vld [vmem:[#allocation5 + $0x484] ss:$8 sps:$4 sm:$0xff]   ;;  %vm2027_vm0 = vcmask 523264   ;;  %s4112_s2 = smov [#allocation8]  }
  0x59   :  { %2069 = vmatpush1.bf16.msra.mxu1 %v3571_v34  ;;  %v3669_v34 = vld [vmem:[#allocation2 + $0x154] ss:$56 sps:$4 sm:$0xff]   ;;  %s2912_s23 = sshll.u32 %s4112_s2, 4  ;;  %s2913_s23 = int_to_ptr.vmem [resolvable:$true] %s2912_s23 }
  0x5a   :  { %2408 = vmatpush1.bf16.msra.mxu0 %v3572_v35  ;;  %2070 = vmatprep.subr.bf16.mxu1 %v3573_v36  ;;  %v3671_v35 = vld [vmem:[#allocation2 + $0x16c] ss:$56 sps:$4 sm:$0xff]   ;;  %v3663_v36 = vld [vmem:[#allocation5 + $0x150] ss:$8 sps:$4 sm:$0xff]   ;;  %s4077_s24 = scalar_lea.vmem %s2913_s23, 4096  ;;  %p4082_p11 = scmp.lt.s32.totalorder %s2913_s23, %s2913_s23 }
  0x5b   :  { %2409 = vmatprep.subr.bf16.mxu0 %v3575_v37  ;;  %v3666_v37 = vld [vmem:[#allocation5 + $0x450] ss:$8 sps:$4 sm:$0xff]   ;;  %p4078_p10 = scmp.ne.s32.totalorder %s2913_s23, %s4077_s24  ;;  %p4083_p12 = scmp.lt.s32.totalorder %s4077_s24, %s4077_s24 }
  0x5d   :  { %2071 = vmatpush1.bf16.msra.mxu1 %v3577_v38  ;;  %v3676_v38 = vld [vmem:[#allocation5 + $0x164] ss:$8 sps:$4 sm:$0xff]   ;;  %p4084_p13 = por %p4083_p12, %p4082_p11 }
  0x5e   :  { %2410 = vmatpush1.bf16.msra.mxu0 %v3578_v39  ;;  %2072 = vmatprep.subr.bf16.mxu1 %v3579_v40  ;;  %v3680_v39 = vld [vmem:[#allocation5 + $0x464] ss:$8 sps:$4 sm:$0xff]   ;;  %v3673_v40 = vld [vmem:[#allocation2 + $0x150] ss:$56 sps:$4 sm:$0xff]  }
  0x5f   :  { %2411 = vmatprep.subr.bf16.mxu0 %v3581_v41  ;;  %v3674_v41 = vld [vmem:[#allocation5 + $0x160] ss:$8 sps:$4 sm:$0xff]   ;;  %p4085_p0 = pnand %p4084_p13, %p4078_p10 }
  0x61   :  { %2073 = vmatpush1.bf16.msra.mxu1 %v3583_v42  ;;  %v3677_v42 = vld [vmem:[#allocation2 + $0x168] ss:$56 sps:$4 sm:$0xff]  }
  0x62   :  { %2412 = vmatpush1.bf16.msra.mxu0 %v3584_v43  ;;  %2074 = vmatprep.subr.bf16.mxu1 %v3585_v44  ;;  %v3678_v43 = vld [vmem:[#allocation5 + $0x460] ss:$8 sps:$4 sm:$0xff]   ;;  %v3683_v44 = vld [vmem:[#allocation5 + $0x174] ss:$8 sps:$4 sm:$0xff]  }
  0x63   :  { %2413 = vmatprep.subr.bf16.mxu0 %v3587_v45  ;;  %v3686_v45 = vld [vmem:[#allocation5 + $0x474] ss:$8 sps:$4 sm:$0xff]  }
  0x65   :  { %2075 = vmatpush1.bf16.msra.mxu1 %v3589_v46  ;;  %v3687_v46 = vld [vmem:[#allocation2 + $0x1c4] ss:$56 sps:$4 sm:$0xff]  }
  0x66   :  { %2414 = vmatpush1.bf16.msra.mxu0 %v3590_v47  ;;  %2076 = vmatprep.subr.bf16.mxu1 %v3591_v48  ;;  %v3689_v47 = vld [vmem:[#allocation2 + $0x1dc] ss:$56 sps:$4 sm:$0xff]   ;;  %v3681_v48 = vld [vmem:[#allocation5 + $0x170] ss:$8 sps:$4 sm:$0xff]  }
  0x67   :  { %2415 = vmatprep.subr.bf16.mxu0 %v3593_v50  ;;  %v3694_v50 = vld [vmem:[#allocation5 + $0x184] ss:$8 sps:$4 sm:$0xff]  }
  0x69   :  { %2077 = vmatpush1.bf16.msra.mxu1 %v3595_v52  ;;  %v3691_v52 = vld [vmem:[#allocation2 + $0x1c0] ss:$56 sps:$4 sm:$0xff]  }
  0x6a   :  { %2416 = vmatpush1.bf16.msra.mxu0 %v3596_v53  ;;  %2078 = vmatprep.subr.bf16.mxu1 %v3597_v54  ;;  %v3692_v53 = vld [vmem:[#allocation5 + $0x180] ss:$8 sps:$4 sm:$0xff]   ;;  %v3695_v54 = vld [vmem:[#allocation2 + $0x1d8] ss:$56 sps:$4 sm:$0xff]  }
  0x6b   :  { %2417 = vmatprep.subr.bf16.mxu0 %v3599_v55  ;;  %v3696_v55 = vld [vmem:[#allocation5 + $0x480] ss:$8 sps:$4 sm:$0xff]  }
  0x6d   :  { %2079 = vmatpush1.bf16.msra.mxu1 %v3601_v56  ;;  %v3701_v56 = vld [vmem:[#allocation5 + $0x194] ss:$8 sps:$4 sm:$0xff]  }
  0x6e   :  { %2418 = vmatpush1.bf16.msra.mxu0 %v3602_v57  ;;  %2080 = vmatprep.subr.bf16.mxu1 %v3603_v58  ;;  %v3704_v57 = vld [vmem:[#allocation5 + $0x494] ss:$8 sps:$4 sm:$0xff]  }
  0x6f   :  { %2419 = vmatprep.subr.bf16.mxu0 %v3605_v59  ;;  %v3705_v58 = vld [vmem:[#allocation2 + $0x234] ss:$56 sps:$4 sm:$0xff]  }
  0x70   :  { %v3707_v59 = vld [vmem:[#allocation2 + $0x24c] ss:$56 sps:$4 sm:$0xff]  }
  0x71   :  { %2081 = vmatpush1.bf16.msra.mxu1 %v3607_v60  ;;  %v3699_v60 = vld [vmem:[#allocation5 + $0x190] ss:$8 sps:$4 sm:$0xff]  }
  0x72   :  { %2420 = vmatpush1.bf16.msra.mxu0 %v3608_v61  ;;  %2082 = vmatprep.subr.bf16.mxu1 %v3609_v62  ;;  %v3702_v61 = vld [vmem:[#allocation5 + $0x490] ss:$8 sps:$4 sm:$0xff]   ;;  %v3712_v62 = vld [vmem:[#allocation5 + $0x1a4] ss:$8 sps:$4 sm:$0xff]  }
  0x73   :  { %2421 = vmatprep.subr.bf16.mxu0 %v3611_v63  ;;  %v3716_v63 = vld [vmem:[#allocation5 + $0x4a4] ss:$8 sps:$4 sm:$0xff]  }
  0x75   :  { %2083 = vmatpush1.bf16.msra.mxu1 %v3613_v0  ;;  %v3709_v0 = vld [vmem:[#allocation2 + $0x230] ss:$56 sps:$4 sm:$0xff]  }
  0x76   :  { %2422 = vmatpush1.bf16.msra.mxu0 %v3614_v1  ;;  %2165 = vmatprep.subr.bf16.mxu1 %v3623_v2  ;;  %v3710_v1 = vld [vmem:[#allocation5 + $0x1a0] ss:$8 sps:$4 sm:$0xff]  }
  0x77   :  { %2504 = vmatprep.subr.bf16.mxu0 %v3626_v3  ;;  %v3713_v2 = vld [vmem:[#allocation2 + $0x248] ss:$56 sps:$4 sm:$0xff]  }
  0x78   :  { %2085 = vmatmul.mubr.bf16.vlgmr.msra.gmra.mrb[0].mxu1 %v3615_v4  ;;  %v3714_v3 = vld [vmem:[#allocation5 + $0x4a0] ss:$8 sps:$4 sm:$0xff]   ;;  %v3719_v4 = vld [vmem:[#allocation5 + $0x1b4] ss:$8 sps:$4 sm:$0xff]  }
  0x79   :  { %2424 = vmatmul.mubr.bf16.vlgmr.msra.gmra.mrb[0].mxu0 %v3618_v5  ;;  %2166 = vmatpush1.bf16.msra.mxu1 %v3621_v6  ;;  %v3722_v5 = vld [vmem:[#allocation5 + $0x4b4] ss:$8 sps:$4 sm:$0xff]  }
  0x7a   :  { %2505 = vmatpush1.bf16.msra.mxu0 %v3624_v7  ;;  %2167 = vmatprep.subr.bf16.mxu1 %v3629_v8  ;;  %v3723_v6 = vld [vmem:[#allocation2 + $0x2a4] ss:$56 sps:$4 sm:$0xff]   ;;  %v3717_v8 = vld [vmem:[#allocation5 + $0x1b0] ss:$8 sps:$4 sm:$0xff]  }
  0x7b   :  { %2506 = vmatprep.subr.bf16.mxu0 %v3632_v9  ;;  %2094 = vmatprep.mubr.bf16.mxu1 %v3633_v10  ;;  %v3725_v7 = vld [vmem:[#allocation2 + $0x2bc] ss:$56 sps:$4 sm:$0xff]   ;;  %v3720_v9 = vld [vmem:[#allocation5 + $0x4b0] ss:$8 sps:$4 sm:$0xff]   ;;  %v3730_v10 = vld [vmem:[#allocation5 + $0x1c4] ss:$8 sps:$4 sm:$0xff]  }
  0x7c   :  { %2433 = vmatprep.mubr.bf16.mxu0 %v3635_v11  ;;  %v3734_v11 = vld [vmem:[#allocation5 + $0x4c4] ss:$8 sps:$4 sm:$0xff]  }
  0x7d   :  { %2168 = vmatpush1.bf16.msra.mxu1 %v3627_v12  ;;  %v3727_v12 = vld [vmem:[#allocation2 + $0x2a0] ss:$56 sps:$4 sm:$0xff]  }
  0x7e   :  { %2507 = vmatpush1.bf16.msra.mxu0 %v3630_v13  ;;  %2169 = vmatprep.subr.bf16.mxu1 %v3640_v14  ;;  %v3728_v13 = vld [vmem:[#allocation5 + $0x1c0] ss:$8 sps:$4 sm:$0xff]   ;;  %v3731_v14 = vld [vmem:[#allocation2 + $0x2b8] ss:$56 sps:$4 sm:$0xff]  }
  0x7f   :  { %2508 = vmatprep.subr.bf16.mxu0 %v3644_v15  ;;  %v3732_v15 = vld [vmem:[#allocation5 + $0x4c0] ss:$8 sps:$4 sm:$0xff]  }
  0x80   :  { %2095 = vmatmul.mubr.bf16.gmra.mrb[4].mxu1 %v3637_v16  ;;  %v3737_v16 = vld [vmem:[#allocation5 + $0x1d4] ss:$8 sps:$4 sm:$0xff]  }
  0x81   :  { %2434 = vmatmul.mubr.bf16.gmra.mrb[4].mxu0 %v3641_v18  ;;  %2170 = vmatpush1.bf16.msra.mxu1 %v3638_v17  ;;  %v3740_v17 = vld [vmem:[#allocation5 + $0x4d4] ss:$8 sps:$4 sm:$0xff]  }
  0x82   :  { %2509 = vmatpush1.bf16.msra.mxu0 %v3642_v19  ;;  %2171 = vmatprep.subr.bf16.mxu1 %v3647_v20  ;;  %v3741_v18 = vld [vmem:[#allocation2 + $0x314] ss:$56 sps:$4 sm:$0xff]   ;;  %v3735_v20 = vld [vmem:[#allocation5 + $0x1d0] ss:$8 sps:$4 sm:$0xff]  }
  0x83   :  { %2510 = vmatprep.subr.bf16.mxu0 %v3650_v21  ;;  %2104 = vmatprep.mubr.bf16.mxu1 %v3651_v22  ;;  %v3743_v19 = vld [vmem:[#allocation2 + $0x32c] ss:$56 sps:$4 sm:$0xff]   ;;  %v3738_v21 = vld [vmem:[#allocation5 + $0x4d0] ss:$8 sps:$4 sm:$0xff]  }
  0x84   :  { %2443 = vmatprep.mubr.bf16.mxu0 %v3653_v23  ;;  %v3748_v22 = vld [vmem:[#allocation5 + $0x1e4] ss:$8 sps:$4 sm:$0xff]  }
  0x85   :  { %2172 = vmatpush1.bf16.msra.mxu1 %v3645_v24  ;;  %v3752_v23 = vld [vmem:[#allocation5 + $0x4e4] ss:$8 sps:$4 sm:$0xff]   ;;  %v3745_v24 = vld [vmem:[#allocation2 + $0x310] ss:$56 sps:$4 sm:$0xff]  }
  0x86   :  { %2511 = vmatpush1.bf16.msra.mxu0 %v3648_v25  ;;  %2173 = vmatprep.subr.bf16.mxu1 %v3658_v26  ;;  %v3746_v25 = vld [vmem:[#allocation5 + $0x1e0] ss:$8 sps:$4 sm:$0xff]  }
  0x87   :  { %2512 = vmatprep.subr.bf16.mxu0 %v3662_v27  ;;  %v3749_v26 = vld [vmem:[#allocation2 + $0x328] ss:$56 sps:$4 sm:$0xff]  }
  0x88   :  { %2105 = vmatmul.mubr.bf16.gmra.mrb[8].mxu1 %v3655_v28  ;;  %v3750_v27 = vld [vmem:[#allocation5 + $0x4e0] ss:$8 sps:$4 sm:$0xff]   ;;  %v3755_v28 = vld [vmem:[#allocation5 + $0x1f4] ss:$8 sps:$4 sm:$0xff]  }
  0x89   :  { %2444 = vmatmul.mubr.bf16.gmra.mrb[8].mxu0 %v3659_v30  ;;  %2174 = vmatpush1.bf16.msra.mxu1 %v3656_v29  ;;  %v3758_v29 = vld [vmem:[#allocation5 + $0x4f4] ss:$8 sps:$4 sm:$0xff]   ;;  %v3761_v30 = vld [vmem:[#allocation2 + $0xc] ss:$56 sps:$4 sm:$0xff]  }
  0x8a   :  { %2513 = vmatpush1.bf16.msra.mxu0 %v3660_v31  ;;  %2175 = vmatprep.subr.bf16.mxu1 %v3665_v32  ;;  %v3764_v31 = vld [vmem:[#allocation2 + $0x24] ss:$56 sps:$4 sm:$0xff]   ;;  %v3753_v32 = vld [vmem:[#allocation5 + $0x1f0] ss:$8 sps:$4 sm:$0xff]  }
  0x8b   :  { %2514 = vmatprep.subr.bf16.mxu0 %v3668_v33  ;;  %2114 = vmatprep.mubr.bf16.mxu1 %v3669_v34  ;;  %v3756_v33 = vld [vmem:[#allocation5 + $0x4f0] ss:$8 sps:$4 sm:$0xff]   ;;  %v3767_v34 = vld [vmem:[#allocation5 + $0x204] ss:$8 sps:$4 sm:$0xff]  }
  0x8c   :  { %2453 = vmatprep.mubr.bf16.mxu0 %v3671_v35  ;;  %v3770_v35 = vld [vmem:[#allocation5 + $0x504] ss:$8 sps:$4 sm:$0xff]  }
  0x8d   :  { %2176 = vmatpush1.bf16.msra.mxu1 %v3663_v36  ;;  %v3759_v36 = vld [vmem:[#allocation2 + $0x8] ss:$56 sps:$4 sm:$0xff]  }
  0x8e   :  { %2515 = vmatpush1.bf16.msra.mxu0 %v3666_v37  ;;  %2177 = vmatprep.subr.bf16.mxu1 %v3676_v38  ;;  %v3762_v37 = vld [vmem:[#allocation2 + $0x20] ss:$56 sps:$4 sm:$0xff]  }
  0x8f   :  { %2516 = vmatprep.subr.bf16.mxu0 %v3680_v39  ;;  %v3765_v38 = vld [vmem:[#allocation5 + $0x200] ss:$8 sps:$4 sm:$0xff]  }
  0x90   :  { %2115 = vmatmul.mubr.bf16.gmra.mrb[12].mxu1 %v3673_v40  ;;  %v3768_v39 = vld [vmem:[#allocation5 + $0x500] ss:$8 sps:$4 sm:$0xff]   ;;  %v3773_v40 = vld [vmem:[#allocation5 + $0x214] ss:$8 sps:$4 sm:$0xff]  }
  0x91   :  { %2454 = vmatmul.mubr.bf16.gmra.mrb[12].mxu0 %v3677_v42  ;;  %2178 = vmatpush1.bf16.msra.mxu1 %v3674_v41  ;;  %v3776_v41 = vld [vmem:[#allocation5 + $0x514] ss:$8 sps:$4 sm:$0xff]  }
  0x92   :  { %2517 = vmatpush1.bf16.msra.mxu0 %v3678_v43  ;;  %2179 = vmatprep.subr.bf16.mxu1 %v3683_v44  ;;  %v3777_v42 = vld [vmem:[#allocation2 + $0x7c] ss:$56 sps:$4 sm:$0xff]   ;;  %v3771_v44 = vld [vmem:[#allocation5 + $0x210] ss:$8 sps:$4 sm:$0xff]  }
  0x93   :  { %2518 = vmatprep.subr.bf16.mxu0 %v3686_v45  ;;  %2124 = vmatprep.mubr.bf16.mxu1 %v3687_v46  ;;  %v3779_v43 = vld [vmem:[#allocation2 + $0x94] ss:$56 sps:$4 sm:$0xff]   ;;  %v3774_v45 = vld [vmem:[#allocation5 + $0x510] ss:$8 sps:$4 sm:$0xff]  }
  0x94   :  { %2463 = vmatprep.mubr.bf16.mxu0 %v3689_v47  ;;  %v3784_v46 = vld [vmem:[#allocation5 + $0x224] ss:$8 sps:$4 sm:$0xff]  }
  0x95   :  { %2180 = vmatpush1.bf16.msra.mxu1 %v3681_v48  ;;  %v3788_v47 = vld [vmem:[#allocation5 + $0x524] ss:$8 sps:$4 sm:$0xff]   ;;  %v3781_v48 = vld [vmem:[#allocation2 + $0x78] ss:$56 sps:$4 sm:$0xff]  }
  0x96   :  { %2519 = vmatpush1.bf16.msra.mxu0 %v3684_v49  ;;  %2181 = vmatprep.subr.bf16.mxu1 %v3694_v50  ;;  %v3782_v49 = vld [vmem:[#allocation5 + $0x220] ss:$8 sps:$4 sm:$0xff]  }
  0x97   :  { %2520 = vmatprep.subr.bf16.mxu0 %v3698_v51  ;;  %v3785_v50 = vld [vmem:[#allocation2 + $0x90] ss:$56 sps:$4 sm:$0xff]  }
  0x98   :  { %2125 = vmatmul.mubr.bf16.gmra.mrb[16].mxu1 %v3691_v52  ;;  %v3786_v51 = vld [vmem:[#allocation5 + $0x520] ss:$8 sps:$4 sm:$0xff]   ;;  %v3791_v52 = vld [vmem:[#allocation5 + $0x234] ss:$8 sps:$4 sm:$0xff]  }
  0x99   :  { %2464 = vmatmul.mubr.bf16.gmra.mrb[16].mxu0 %v3695_v54  ;;  %2182 = vmatpush1.bf16.msra.mxu1 %v3692_v53  ;;  %v3794_v53 = vld [vmem:[#allocation5 + $0x534] ss:$8 sps:$4 sm:$0xff]   ;;  %v3795_v54 = vld [vmem:[#allocation2 + $0xec] ss:$56 sps:$4 sm:$0xff]  }
  0x9a   :  { %2521 = vmatpush1.bf16.msra.mxu0 %v3696_v55  ;;  %2183 = vmatprep.subr.bf16.mxu1 %v3701_v56  ;;  %v3797_v55 = vld [vmem:[#allocation2 + $0x104] ss:$56 sps:$4 sm:$0xff]   ;;  %v3789_v56 = vld [vmem:[#allocation5 + $0x230] ss:$8 sps:$4 sm:$0xff]  }
  0x9b   :  { %2522 = vmatprep.subr.bf16.mxu0 %v3704_v57  ;;  %2134 = vmatprep.mubr.bf16.mxu1 %v3705_v58  ;;  %v3792_v57 = vld [vmem:[#allocation5 + $0x530] ss:$8 sps:$4 sm:$0xff]   ;;  %v3802_v58 = vld [vmem:[#allocation5 + $0x244] ss:$8 sps:$4 sm:$0xff]  }
  0x9c   :  { %2473 = vmatprep.mubr.bf16.mxu0 %v3707_v59  ;;  %v3806_v59 = vld [vmem:[#allocation5 + $0x544] ss:$8 sps:$4 sm:$0xff]  }
  0x9d   :  { %2184 = vmatpush1.bf16.msra.mxu1 %v3699_v60  ;;  %v3799_v60 = vld [vmem:[#allocation2 + $0xe8] ss:$56 sps:$4 sm:$0xff]  }
  0x9e   :  { %2523 = vmatpush1.bf16.msra.mxu0 %v3702_v61  ;;  %2185 = vmatprep.subr.bf16.mxu1 %v3712_v62  ;;  %v3800_v61 = vld [vmem:[#allocation5 + $0x240] ss:$8 sps:$4 sm:$0xff]  }
  0x9f   :  { %2524 = vmatprep.subr.bf16.mxu0 %v3716_v63  ;;  %v3803_v62 = vld [vmem:[#allocation2 + $0x100] ss:$56 sps:$4 sm:$0xff]  }
  0xa0   :  { %2135 = vmatmul.mubr.bf16.gmra.mrb[20].mxu1 %v3709_v0  ;;  %v3804_v63 = vld [vmem:[#allocation5 + $0x540] ss:$8 sps:$4 sm:$0xff]   ;;  %v3809_v0 = vld [vmem:[#allocation5 + $0x254] ss:$8 sps:$4 sm:$0xff]  }
  0xa1   :  { %2474 = vmatmul.mubr.bf16.gmra.mrb[20].mxu0 %v3713_v2  ;;  %2186 = vmatpush1.bf16.msra.mxu1 %v3710_v1  ;;  %v3812_v1 = vld [vmem:[#allocation5 + $0x554] ss:$8 sps:$4 sm:$0xff]  }
  0xa2   :  { %2525 = vmatpush1.bf16.msra.mxu0 %v3714_v3  ;;  %2187 = vmatprep.subr.bf16.mxu1 %v3719_v4  ;;  %v3813_v2 = vld [vmem:[#allocation2 + $0x15c] ss:$56 sps:$4 sm:$0xff]   ;;  %v3807_v4 = vld [vmem:[#allocation5 + $0x250] ss:$8 sps:$4 sm:$0xff]  }
  0xa3   :  { %2526 = vmatprep.subr.bf16.mxu0 %v3722_v5  ;;  %2144 = vmatprep.mubr.bf16.mxu1 %v3723_v6  ;;  %v3815_v3 = vld [vmem:[#allocation2 + $0x174] ss:$56 sps:$4 sm:$0xff]   ;;  %v3810_v5 = vld [vmem:[#allocation5 + $0x550] ss:$8 sps:$4 sm:$0xff]  }
  0xa4   :  { %2483 = vmatprep.mubr.bf16.mxu0 %v3725_v7  ;;  %v3820_v6 = vld [vmem:[#allocation5 + $0x264] ss:$8 sps:$4 sm:$0xff]  }
  0xa5   :  { %2188 = vmatpush1.bf16.msra.mxu1 %v3717_v8  ;;  %v3824_v7 = vld [vmem:[#allocation5 + $0x564] ss:$8 sps:$4 sm:$0xff]   ;;  %v3817_v8 = vld [vmem:[#allocation2 + $0x158] ss:$56 sps:$4 sm:$0xff]  }
  0xa6   :  { %2527 = vmatpush1.bf16.msra.mxu0 %v3720_v9  ;;  %2189 = vmatprep.subr.bf16.mxu1 %v3730_v10  ;;  %v3818_v9 = vld [vmem:[#allocation5 + $0x260] ss:$8 sps:$4 sm:$0xff]  }
  0xa7   :  { %2528 = vmatprep.subr.bf16.mxu0 %v3734_v11  ;;  %v3821_v10 = vld [vmem:[#allocation2 + $0x170] ss:$56 sps:$4 sm:$0xff]  }
  0xa8   :  { %2145 = vmatmul.mubr.bf16.gmra.mrb[24].mxu1 %v3727_v12  ;;  %v3822_v11 = vld [vmem:[#allocation5 + $0x560] ss:$8 sps:$4 sm:$0xff]   ;;  %v3827_v12 = vld [vmem:[#allocation5 + $0x274] ss:$8 sps:$4 sm:$0xff]  }
  0xa9   :  { %2484 = vmatmul.mubr.bf16.gmra.mrb[24].mxu0 %v3731_v14  ;;  %2190 = vmatpush1.bf16.msra.mxu1 %v3728_v13  ;;  %v3830_v13 = vld [vmem:[#allocation5 + $0x574] ss:$8 sps:$4 sm:$0xff]   ;;  %v3831_v14 = vld [vmem:[#allocation2 + $0x1cc] ss:$56 sps:$4 sm:$0xff]  }
  0xaa   :  { %2529 = vmatpush1.bf16.msra.mxu0 %v3732_v15  ;;  %2191 = vmatprep.subr.bf16.mxu1 %v3737_v16  ;;  %v3833_v15 = vld [vmem:[#allocation2 + $0x1e4] ss:$56 sps:$4 sm:$0xff]   ;;  %v3825_v16 = vld [vmem:[#allocation5 + $0x270] ss:$8 sps:$4 sm:$0xff]  }
  0xab   :  { %2530 = vmatprep.subr.bf16.mxu0 %v3740_v17  ;;  %2154 = vmatprep.mubr.bf16.mxu1 %v3741_v18  ;;  %v3828_v17 = vld [vmem:[#allocation5 + $0x570] ss:$8 sps:$4 sm:$0xff]   ;;  %v3838_v18 = vld [vmem:[#allocation5 + $0x284] ss:$8 sps:$4 sm:$0xff]  }
  0xac   :  { %2493 = vmatprep.mubr.bf16.mxu0 %v3743_v19  ;;  %v3842_v19 = vld [vmem:[#allocation5 + $0x584] ss:$8 sps:$4 sm:$0xff]  }
  0xad   :  { %2192 = vmatpush1.bf16.msra.mxu1 %v3735_v20  ;;  %v3835_v20 = vld [vmem:[#allocation2 + $0x1c8] ss:$56 sps:$4 sm:$0xff]  }
  0xae   :  { %2531 = vmatpush1.bf16.msra.mxu0 %v3738_v21  ;;  %2193 = vmatprep.subr.bf16.mxu1 %v3748_v22  ;;  %v3836_v21 = vld [vmem:[#allocation5 + $0x280] ss:$8 sps:$4 sm:$0xff]  }
  0xaf   :  { %2532 = vmatprep.subr.bf16.mxu0 %v3752_v23  ;;  %v3839_v22 = vld [vmem:[#allocation2 + $0x1e0] ss:$56 sps:$4 sm:$0xff]  }
  0xb0   :  { %2155 = vmatmul.mubr.bf16.gmra.mrb[28].mxu1 %v3745_v24  ;;  %v3840_v23 = vld [vmem:[#allocation5 + $0x580] ss:$8 sps:$4 sm:$0xff]   ;;  %v3845_v24 = vld [vmem:[#allocation5 + $0x294] ss:$8 sps:$4 sm:$0xff]  }
  0xb1   :  { %2494 = vmatmul.mubr.bf16.gmra.mrb[28].mxu0 %v3749_v26  ;;  %2194 = vmatpush1.bf16.msra.mxu1 %v3746_v25  ;;  %v3848_v25 = vld [vmem:[#allocation5 + $0x594] ss:$8 sps:$4 sm:$0xff]  }
  0xb2   :  { %2533 = vmatpush1.bf16.msra.mxu0 %v3750_v27  ;;  %2195 = vmatprep.subr.bf16.mxu1 %v3755_v28  ;;  %v3849_v26 = vld [vmem:[#allocation2 + $0x23c] ss:$56 sps:$4 sm:$0xff]   ;;  %v3843_v28 = vld [vmem:[#allocation5 + $0x290] ss:$8 sps:$4 sm:$0xff]  }
  0xb3   :  { %2534 = vmatprep.subr.bf16.mxu0 %v3758_v29  ;;  %2197 = vmatprep.mubr.bf16.mxu1 %v3761_v30  ;;  %v3851_v27 = vld [vmem:[#allocation2 + $0x254] ss:$56 sps:$4 sm:$0xff]   ;;  %v3846_v29 = vld [vmem:[#allocation5 + $0x590] ss:$8 sps:$4 sm:$0xff]  }
  0xb4   :  { %2536 = vmatprep.mubr.bf16.mxu0 %v3764_v31  ;;  %v3856_v30 = vld [vmem:[#allocation5 + $0x2a4] ss:$8 sps:$4 sm:$0xff]  }
  0xb5   :  { %2196 = vmatpush1.bf16.msra.mxu1 %v3753_v32  ;;  %v3860_v31 = vld [vmem:[#allocation5 + $0x5a4] ss:$8 sps:$4 sm:$0xff]   ;;  %v3853_v32 = vld [vmem:[#allocation2 + $0x238] ss:$56 sps:$4 sm:$0xff]  }
  0xb6   :  { %2535 = vmatpush1.bf16.msra.mxu0 %v3756_v33  ;;  %2278 = vmatprep.subr.bf16.mxu1 %v3767_v34  ;;  %v3854_v33 = vld [vmem:[#allocation5 + $0x2a0] ss:$8 sps:$4 sm:$0xff]  }
  0xb7   :  { %2617 = vmatprep.subr.bf16.mxu0 %v3770_v35  ;;  %v3857_v34 = vld [vmem:[#allocation2 + $0x250] ss:$56 sps:$4 sm:$0xff]  }
  0xb8   :  { %2198 = vmatmul.mubr.bf16.vlgmr.msra.gmra.mrb[0].mxu1 %v3759_v36  ;;  %v3858_v35 = vld [vmem:[#allocation5 + $0x5a0] ss:$8 sps:$4 sm:$0xff]   ;;  %v3863_v36 = vld [vmem:[#allocation5 + $0x2b4] ss:$8 sps:$4 sm:$0xff]  }
  0xb9   :  { %2537 = vmatmul.mubr.bf16.vlgmr.msra.gmra.mrb[0].mxu0 %v3762_v37  ;;  %2279 = vmatpush1.bf16.msra.mxu1 %v3765_v38  ;;  %v3866_v37 = vld [vmem:[#allocation5 + $0x5b4] ss:$8 sps:$4 sm:$0xff]   ;;  %v3867_v38 = vld [vmem:[#allocation2 + $0x2ac] ss:$56 sps:$4 sm:$0xff]  }
  0xba   :  { %2618 = vmatpush1.bf16.msra.mxu0 %v3768_v39  ;;  %2280 = vmatprep.subr.bf16.mxu1 %v3773_v40  ;;  %v3869_v39 = vld [vmem:[#allocation2 + $0x2c4] ss:$56 sps:$4 sm:$0xff]   ;;  %v3861_v40 = vld [vmem:[#allocation5 + $0x2b0] ss:$8 sps:$4 sm:$0xff]  }
  0xbb   :  { %2619 = vmatprep.subr.bf16.mxu0 %v3776_v41  ;;  %2207 = vmatprep.mubr.bf16.mxu1 %v3777_v42  ;;  %v3864_v41 = vld [vmem:[#allocation5 + $0x5b0] ss:$8 sps:$4 sm:$0xff]   ;;  %v3874_v42 = vld [vmem:[#allocation5 + $0x2c4] ss:$8 sps:$4 sm:$0xff]  }
  0xbc   :  { %2546 = vmatprep.mubr.bf16.mxu0 %v3779_v43  ;;  %v3878_v43 = vld [vmem:[#allocation5 + $0x5c4] ss:$8 sps:$4 sm:$0xff]  }
  0xbd   :  { %2281 = vmatpush1.bf16.msra.mxu1 %v3771_v44  ;;  %v3871_v44 = vld [vmem:[#allocation2 + $0x2a8] ss:$56 sps:$4 sm:$0xff]  }
  0xbe   :  { %2620 = vmatpush1.bf16.msra.mxu0 %v3774_v45  ;;  %2282 = vmatprep.subr.bf16.mxu1 %v3784_v46  ;;  %v3872_v45 = vld [vmem:[#allocation5 + $0x2c0] ss:$8 sps:$4 sm:$0xff]  }
  0xbf   :  { %2621 = vmatprep.subr.bf16.mxu0 %v3788_v47  ;;  %v3875_v46 = vld [vmem:[#allocation2 + $0x2c0] ss:$56 sps:$4 sm:$0xff]  }
  0xc0   :  { %2208 = vmatmul.mubr.bf16.gmra.mrb[4].mxu1 %v3781_v48  ;;  %v3876_v47 = vld [vmem:[#allocation5 + $0x5c0] ss:$8 sps:$4 sm:$0xff]   ;;  %v3881_v48 = vld [vmem:[#allocation5 + $0x2d4] ss:$8 sps:$4 sm:$0xff]  }
  0xc1   :  { %2547 = vmatmul.mubr.bf16.gmra.mrb[4].mxu0 %v3785_v50  ;;  %2283 = vmatpush1.bf16.msra.mxu1 %v3782_v49  ;;  %v3884_v49 = vld [vmem:[#allocation5 + $0x5d4] ss:$8 sps:$4 sm:$0xff]  }
  0xc2   :  { %2622 = vmatpush1.bf16.msra.mxu0 %v3786_v51  ;;  %2284 = vmatprep.subr.bf16.mxu1 %v3791_v52  ;;  %v3885_v50 = vld [vmem:[#allocation2 + $0x31c] ss:$56 sps:$4 sm:$0xff]   ;;  %v3879_v52 = vld [vmem:[#allocation5 + $0x2d0] ss:$8 sps:$4 sm:$0xff]  }
  0xc3   :  { %2623 = vmatprep.subr.bf16.mxu0 %v3794_v53  ;;  %2217 = vmatprep.mubr.bf16.mxu1 %v3795_v54  ;;  %v3887_v51 = vld [vmem:[#allocation2 + $0x334] ss:$56 sps:$4 sm:$0xff]   ;;  %v3882_v53 = vld [vmem:[#allocation5 + $0x5d0] ss:$8 sps:$4 sm:$0xff]  }
  0xc4   :  { %2556 = vmatprep.mubr.bf16.mxu0 %v3797_v55  ;;  %v3892_v54 = vld [vmem:[#allocation5 + $0x2e4] ss:$8 sps:$4 sm:$0xff]   ;;  %v3889_v55 = vld [vmem:[#allocation2 + $0x318] ss:$56 sps:$4 sm:$0xff]  }
  0xc5   :  { %2285 = vmatpush1.bf16.msra.mxu1 %v3789_v56  ;;  %v3896_v56 = vld [vmem:[#allocation5 + $0x5e4] ss:$8 sps:$4 sm:$0xff]  }
  0xc6   :  { %2624 = vmatpush1.bf16.msra.mxu0 %v3792_v57  ;;  %2286 = vmatprep.subr.bf16.mxu1 %v3802_v58  ;;  %v3890_v57 = vld [vmem:[#allocation5 + $0x2e0] ss:$8 sps:$4 sm:$0xff]  }
  0xc7   :  { %2625 = vmatprep.subr.bf16.mxu0 %v3806_v59  ;;  %v3893_v58 = vld [vmem:[#allocation2 + $0x330] ss:$56 sps:$4 sm:$0xff]  }
  0xc8   :  { %2218 = vmatmul.mubr.bf16.gmra.mrb[8].mxu1 %v3799_v60  ;;  %v3894_v59 = vld [vmem:[#allocation5 + $0x5e0] ss:$8 sps:$4 sm:$0xff]   ;;  %v3899_v60 = vld [vmem:[#allocation5 + $0x2f4] ss:$8 sps:$4 sm:$0xff]  }
  0xc9   :  { %2557 = vmatmul.mubr.bf16.gmra.mrb[8].mxu0 %v3803_v62  ;;  %2287 = vmatpush1.bf16.msra.mxu1 %v3800_v61  ;;  %v3902_v61 = vld [vmem:[#allocation5 + $0x5f4] ss:$8 sps:$4 sm:$0xff]  }
  0xca   :  { %2626 = vmatpush1.bf16.msra.mxu0 %v3804_v63  ;;  %2288 = vmatprep.subr.bf16.mxu1 %v3809_v0  ;;  %v3905_v62 = vld [vmem:[#allocation2 + $0x14] ss:$56 sps:$4 sm:$0xff]   ;;  %v3897_v0 = vld [vmem:[#allocation5 + $0x2f0] ss:$8 sps:$4 sm:$0xff]  }
  0xcb   :  { %2627 = vmatprep.subr.bf16.mxu0 %v3812_v1  ;;  %2227 = vmatprep.mubr.bf16.mxu1 %v3813_v2  ;;  %v3908_v63 = vld [vmem:[#allocation2 + $0x2c] ss:$56 sps:$4 sm:$0xff]   ;;  %v3900_v1 = vld [vmem:[#allocation5 + $0x5f0] ss:$8 sps:$4 sm:$0xff]  }
  0xcc   :  { %2566 = vmatprep.mubr.bf16.mxu0 %v3815_v3  ;;  %v3911_v2 = vld [vmem:[#allocation5 + $0x604] ss:$8 sps:$4 sm:$0xff]   ;;  %v3903_v3 = vld [vmem:[#allocation2 + $0x10] ss:$56 sps:$4 sm:$0xff]  }
  0xcd   :  { %2289 = vmatpush1.bf16.msra.mxu1 %v3807_v4  ;;  %v3906_v4 = vld [vmem:[#allocation2 + $0x28] ss:$56 sps:$4 sm:$0xff]  }
  0xce   :  { %2628 = vmatpush1.bf16.msra.mxu0 %v3810_v5  ;;  %2290 = vmatprep.subr.bf16.mxu1 %v3820_v6  ;;  %v3909_v5 = vld [vmem:[#allocation5 + $0x600] ss:$8 sps:$4 sm:$0xff]   ;;  %v3914_v6 = vld [vmem:[#allocation5 + $0x614] ss:$8 sps:$4 sm:$0xff]  }
  0xcf   :  { %2629 = vmatprep.subr.bf16.mxu0 %v3824_v7  ;;  %v3915_v7 = vld [vmem:[#allocation2 + $0x84] ss:$56 sps:$4 sm:$0xff]  }
  0xd0   :  { %2228 = vmatmul.mubr.bf16.gmra.mrb[12].mxu1 %v3817_v8  ;;  %v3917_v8 = vld [vmem:[#allocation2 + $0x9c] ss:$56 sps:$4 sm:$0xff]  }
  0xd1   :  { %2567 = vmatmul.mubr.bf16.gmra.mrb[12].mxu0 %v3821_v10  ;;  %2291 = vmatpush1.bf16.msra.mxu1 %v3818_v9  ;;  %v3912_v9 = vld [vmem:[#allocation5 + $0x610] ss:$8 sps:$4 sm:$0xff]   ;;  %v3923_v10 = vld [vmem:[#allocation5 + $0x624] ss:$8 sps:$4 sm:$0xff]  }
  0xd2   :  { %2630 = vmatpush1.bf16.msra.mxu0 %v3822_v11  ;;  %2292 = vmatprep.subr.bf16.mxu1 %v3827_v12  ;;  %v3919_v11 = vld [vmem:[#allocation2 + $0x80] ss:$56 sps:$4 sm:$0xff]  }
  0xd3   :  { %2631 = vmatprep.subr.bf16.mxu0 %v3830_v13  ;;  %2237 = vmatprep.mubr.bf16.mxu1 %v3831_v14  ;;  %v3920_v12 = vld [vmem:[#allocation2 + $0x98] ss:$56 sps:$4 sm:$0xff]   ;;  %v3921_v13 = vld [vmem:[#allocation5 + $0x620] ss:$8 sps:$4 sm:$0xff]   ;;  %v3924_v14 = vld [vmem:[#allocation2 + $0xf4] ss:$56 sps:$4 sm:$0xff]  }
  0xd4   :  { %2576 = vmatprep.mubr.bf16.mxu0 %v3833_v15  ;;  %v3926_v15 = vld [vmem:[#allocation2 + $0x10c] ss:$56 sps:$4 sm:$0xff]  }
  0xd5   :  { %2293 = vmatpush1.bf16.msra.mxu1 %v3825_v16  ;;  %v3932_v16 = vld [vmem:[#allocation5 + $0x634] ss:$8 sps:$4 sm:$0xff]  }
  0xd6   :  { %2632 = vmatpush1.bf16.msra.mxu0 %v3828_v17  ;;  %2294 = vmatprep.subr.bf16.mxu1 %v3838_v18  ;;  %v3930_v17 = vld [vmem:[#allocation5 + $0x630] ss:$8 sps:$4 sm:$0xff]   ;;  %v3935_v18 = vld [vmem:[#allocation5 + $0x644] ss:$8 sps:$4 sm:$0xff]  }
  0xd7   :  { %2633 = vmatprep.subr.bf16.mxu0 %v3842_v19  ;;  %v3928_v19 = vld [vmem:[#allocation2 + $0xf0] ss:$56 sps:$4 sm:$0xff]  }
  0xd8   :  { %2238 = vmatmul.mubr.bf16.gmra.mrb[16].mxu1 %v3835_v20  ;;  %v3929_v20 = vld [vmem:[#allocation2 + $0x108] ss:$56 sps:$4 sm:$0xff]  }
  0xd9   :  { %2577 = vmatmul.mubr.bf16.gmra.mrb[16].mxu0 %v3839_v22  ;;  %2295 = vmatpush1.bf16.msra.mxu1 %v3836_v21  ;;  %v3936_v21 = vld [vmem:[#allocation2 + $0x164] ss:$56 sps:$4 sm:$0xff]  }
  0xda   :  { %2634 = vmatpush1.bf16.msra.mxu0 %v3840_v23  ;;  %2296 = vmatprep.subr.bf16.mxu1 %v3845_v24  ;;  %v3938_v22 = vld [vmem:[#allocation2 + $0x17c] ss:$56 sps:$4 sm:$0xff]   ;;  %v3933_v23 = vld [vmem:[#allocation5 + $0x640] ss:$8 sps:$4 sm:$0xff]  }
  0xdb   :  { %2635 = vmatprep.subr.bf16.mxu0 %v3848_v25  ;;  %2247 = vmatprep.mubr.bf16.mxu1 %v3849_v26  ;;  %v3944_v24 = vld [vmem:[#allocation5 + $0x654] ss:$8 sps:$4 sm:$0xff]   ;;  %v3942_v25 = vld [vmem:[#allocation5 + $0x650] ss:$8 sps:$4 sm:$0xff]   ;;  %v3953_v26 = vld [vmem:[#allocation5 + $0x664] ss:$8 sps:$4 sm:$0xff]  }
  0xdc   :  { %2586 = vmatprep.mubr.bf16.mxu0 %v3851_v27  ;;  %v3940_v27 = vld [vmem:[#allocation2 + $0x160] ss:$56 sps:$4 sm:$0xff]  }
  0xdd   :  { %2297 = vmatpush1.bf16.msra.mxu1 %v3843_v28  ;;  %v3941_v28 = vld [vmem:[#allocation2 + $0x178] ss:$56 sps:$4 sm:$0xff]  }
  0xde   :  { %2636 = vmatpush1.bf16.msra.mxu0 %v3846_v29  ;;  %2298 = vmatprep.subr.bf16.mxu1 %v3856_v30  ;;  %v3945_v29 = vld [vmem:[#allocation2 + $0x1d4] ss:$56 sps:$4 sm:$0xff]  }
  0xdf   :  { %2637 = vmatprep.subr.bf16.mxu0 %v3860_v31  ;;  %v3947_v30 = vld [vmem:[#allocation2 + $0x1ec] ss:$56 sps:$4 sm:$0xff]   ;;  %v3951_v31 = vld [vmem:[#allocation5 + $0x660] ss:$8 sps:$4 sm:$0xff]  }
  0xe0   :  { %2248 = vmatmul.mubr.bf16.gmra.mrb[20].mxu1 %v3853_v32  ;;  %v3956_v32 = vld [vmem:[#allocation5 + $0x674] ss:$8 sps:$4 sm:$0xff]  }
  0xe1   :  { %2587 = vmatmul.mubr.bf16.gmra.mrb[20].mxu0 %v3857_v34  ;;  %2299 = vmatpush1.bf16.msra.mxu1 %v3854_v33  ;;  %v3954_v33 = vld [vmem:[#allocation5 + $0x670] ss:$8 sps:$4 sm:$0xff]   ;;  %v3965_v34 = vld [vmem:[#allocation5 + $0x684] ss:$8 sps:$4 sm:$0xff]  }
  0xe2   :  { %2638 = vmatpush1.bf16.msra.mxu0 %v3858_v35  ;;  %2300 = vmatprep.subr.bf16.mxu1 %v3863_v36  ;;  %v3949_v35 = vld [vmem:[#allocation2 + $0x1d0] ss:$56 sps:$4 sm:$0xff]  }
  0xe3   :  { %2639 = vmatprep.subr.bf16.mxu0 %v3866_v37  ;;  %2257 = vmatprep.mubr.bf16.mxu1 %v3867_v38  ;;  %v3950_v36 = vld [vmem:[#allocation2 + $0x1e8] ss:$56 sps:$4 sm:$0xff]   ;;  %v3957_v37 = vld [vmem:[#allocation2 + $0x244] ss:$56 sps:$4 sm:$0xff]  }
  0xe4   :  { %2596 = vmatprep.mubr.bf16.mxu0 %v3869_v39  ;;  %v3959_v38 = vld [vmem:[#allocation2 + $0x25c] ss:$56 sps:$4 sm:$0xff]   ;;  %v3963_v39 = vld [vmem:[#allocation5 + $0x680] ss:$8 sps:$4 sm:$0xff]  }
  0xe5   :  { %2301 = vmatpush1.bf16.msra.mxu1 %v3861_v40  ;;  %v3974_v40 = vld [vmem:[#allocation5 + $0x694] ss:$8 sps:$4 sm:$0xff]  }
  0xe6   :  { %2640 = vmatpush1.bf16.msra.mxu0 %v3864_v41  ;;  %2302 = vmatprep.subr.bf16.mxu1 %v3874_v42  ;;  %v3972_v41 = vld [vmem:[#allocation5 + $0x690] ss:$8 sps:$4 sm:$0xff]   ;;  %v3977_v42 = vld [vmem:[#allocation5 + $0x6a4] ss:$8 sps:$4 sm:$0xff]  }
  0xe7   :  { %2641 = vmatprep.subr.bf16.mxu0 %v3878_v43  ;;  %v3961_v43 = vld [vmem:[#allocation2 + $0x240] ss:$56 sps:$4 sm:$0xff]  }
  0xe8   :  { %2258 = vmatmul.mubr.bf16.gmra.mrb[24].mxu1 %v3871_v44  ;;  %v3962_v44 = vld [vmem:[#allocation2 + $0x258] ss:$56 sps:$4 sm:$0xff]  }
  0xe9   :  { %2597 = vmatmul.mubr.bf16.gmra.mrb[24].mxu0 %v3875_v46  ;;  %2303 = vmatpush1.bf16.msra.mxu1 %v3872_v45  ;;  %v3966_v45 = vld [vmem:[#allocation2 + $0x2b4] ss:$56 sps:$4 sm:$0xff]  }
  0xea   :  { %2642 = vmatpush1.bf16.msra.mxu0 %v3876_v47  ;;  %2304 = vmatprep.subr.bf16.mxu1 %v3881_v48  ;;  %v3968_v46 = vld [vmem:[#allocation2 + $0x2cc] ss:$56 sps:$4 sm:$0xff]   ;;  %v3975_v47 = vld [vmem:[#allocation5 + $0x6a0] ss:$8 sps:$4 sm:$0xff]   ;;  %v3986_v48 = vld [vmem:[#allocation5 + $0x6b4] ss:$8 sps:$4 sm:$0xff]  }
  0xeb   :  { %2643 = vmatprep.subr.bf16.mxu0 %v3884_v49  ;;  %2267 = vmatprep.mubr.bf16.mxu1 %v3885_v50  ;;  %v3984_v49 = vld [vmem:[#allocation5 + $0x6b0] ss:$8 sps:$4 sm:$0xff]  }
  0xec   :  { %2606 = vmatprep.mubr.bf16.mxu0 %v3887_v51  ;;  %v3970_v50 = vld [vmem:[#allocation2 + $0x2b0] ss:$56 sps:$4 sm:$0xff]  }
  0xed   :  { %2305 = vmatpush1.bf16.msra.mxu1 %v3879_v52  ;;  %v3971_v51 = vld [vmem:[#allocation2 + $0x2c8] ss:$56 sps:$4 sm:$0xff]   ;;  %v3978_v52 = vld [vmem:[#allocation2 + $0x324] ss:$56 sps:$4 sm:$0xff]  }
  0xee   :  { %2644 = vmatpush1.bf16.msra.mxu0 %v3882_v53  ;;  %2306 = vmatprep.subr.bf16.mxu1 %v3892_v54  ;;  %v3980_v53 = vld [vmem:[#allocation2 + $0x33c] ss:$56 sps:$4 sm:$0xff]   ;;  %v3982_v54 = vld [vmem:[#allocation2 + $0x320] ss:$56 sps:$4 sm:$0xff]  }
  0xef   :  { %2645 = vmatprep.subr.bf16.mxu0 %v3896_v56  ;;  %v3989_v56 = vld [vmem:[#allocation2 + $0x34] ss:$56 sps:$4 sm:$0xff]  }
  0xf0   :  { %2268 = vmatmul.mubr.bf16.gmra.mrb[28].mxu1 %v3889_v55  ;;  %v3983_v55 = vld [vmem:[#allocation2 + $0x338] ss:$56 sps:$4 sm:$0xff]  }
  0xf1   :  { %2607 = vmatmul.mubr.bf16.gmra.mrb[28].mxu0 %v3893_v58  ;;  %2307 = vmatpush1.bf16.msra.mxu1 %v3890_v57  ;;  %v3992_v57 = vld [vmem:[#allocation2 + $0x1f4] ss:$56 sps:$4 sm:$0xff]   ;;  %v3987_v58 = vld [vmem:[#allocation2 + $0x30] ss:$56 sps:$4 sm:$0xff]  }
  0xf2   :  { %2646 = vmatpush1.bf16.msra.mxu0 %v3894_v59  ;;  %2308 = vmatprep.subr.bf16.mxu1 %v3899_v60  ;;  %v3990_v59 = vld [vmem:[#allocation2 + $0x1f0] ss:$56 sps:$4 sm:$0xff]   ;;  %v3993_v60 = vld [vmem:[#allocation2 + $0xa4] ss:$56 sps:$4 sm:$0xff]  }
  0xf3   :  { %2647 = vmatprep.subr.bf16.mxu0 %v3902_v61  ;;  %2310 = vmatprep.mubr.bf16.mxu1 %v3905_v62  ;;  %v3995_v61 = vld [vmem:[#allocation2 + $0x264] ss:$56 sps:$4 sm:$0xff]   ;;  %v3997_v62 = vld [vmem:[#allocation2 + $0xa0] ss:$56 sps:$4 sm:$0xff]  }
  0xf4   :  { %2649 = vmatprep.mubr.bf16.mxu0 %v3908_v63  ;;  %v3998_v63 = vld [vmem:[#allocation2 + $0x260] ss:$56 sps:$4 sm:$0xff]  }
  0xf5   :  { %2309 = vmatpush1.bf16.msra.mxu1 %v3897_v0  ;;  %v3999_v0 = vld [vmem:[#allocation2 + $0x114] ss:$56 sps:$4 sm:$0xff]  }
  0xf6   :  { %2648 = vmatpush1.bf16.msra.mxu0 %v3900_v1  ;;  %3261 = vmatprep.subr.bf16.mxu1 %v3911_v2  ;;  %v4001_v1 = vld [vmem:[#allocation2 + $0x2d4] ss:$56 sps:$4 sm:$0xff]  }
  0xf7   :  { %2730 = vmatprep.subr.bf16.mxu0 %v3911_v2  ;;  %v4003_v2 = vld [vmem:[#allocation2 + $0x110] ss:$56 sps:$4 sm:$0xff]  }
  0xf8   :  { %2311 = vmatmul.mubr.bf16.vlgmr.msra.gmra.mrb[0].mxu1 %v3903_v3  ;;  %v4004_v3 = vld [vmem:[#allocation2 + $0x2d0] ss:$56 sps:$4 sm:$0xff]  }
  0xf9   :  { %2650 = vmatmul.mubr.bf16.vlgmr.msra.gmra.mrb[0].mxu0 %v3906_v4  ;;  %3273 = vmatpush1.bf16.msra.mxu1 %v3909_v5  ;;  %v4005_v4 = vld [vmem:[#allocation2 + $0x184] ss:$56 sps:$4 sm:$0xff]  }
  0xfa   :  { %2731 = vmatpush1.bf16.msra.mxu0 %v3909_v5  ;;  %3262 = vmatprep.subr.bf16.mxu1 %v3914_v6  ;;  %v4007_v5 = vld [vmem:[#allocation2 + $0x344] ss:$56 sps:$4 sm:$0xff]  }
  0xfb   :  { %2732 = vmatprep.subr.bf16.mxu0 %v3914_v6  ;;  %2320 = vmatprep.mubr.bf16.mxu1 %v3915_v7  ;;  %v4009_v6 = vld [vmem:[#allocation2 + $0x180] ss:$56 sps:$4 sm:$0xff]  }
  0xfc   :  { %2659 = vmatprep.mubr.bf16.mxu0 %v3917_v8  ;;  %v4010_v7 = vld [vmem:[#allocation2 + $0x340] ss:$56 sps:$4 sm:$0xff]  }
  0xfd   :  { %3274 = vmatpush1.bf16.msra.mxu1 %v3912_v9 }
  0xfe   :  { %2733 = vmatpush1.bf16.msra.mxu0 %v3912_v9  ;;  %3263 = vmatprep.subr.bf16.mxu1 %v3923_v10 }
  0xff   :  { %2734 = vmatprep.subr.bf16.mxu0 %v3923_v10 }
 0x100   :  { %2321 = vmatmul.mubr.bf16.gmra.mrb[4].mxu1 %v3919_v11 }
 0x101   :  { %2660 = vmatmul.mubr.bf16.gmra.mrb[4].mxu0 %v3920_v12  ;;  %3275 = vmatpush1.bf16.msra.mxu1 %v3921_v13 }
 0x102   :  { %2735 = vmatpush1.bf16.msra.mxu0 %v3921_v13  ;;  %2330 = vmatprep.mubr.bf16.mxu1 %v3924_v14 }
 0x103   :  { %2669 = vmatprep.mubr.bf16.mxu0 %v3926_v15  ;;  %2736 = vmatprep.subr.bf16.mxu0 %v3932_v16 }
 0x104   :  { %3264 = vmatprep.subr.bf16.mxu1 %v3932_v16 }
 0x105   :  { %3276 = vmatpush1.bf16.msra.mxu1 %v3930_v17 }
 0x106   :  { %2737 = vmatpush1.bf16.msra.mxu0 %v3930_v17  ;;  %3265 = vmatprep.subr.bf16.mxu1 %v3935_v18 }
 0x107   :  { %2738 = vmatprep.subr.bf16.mxu0 %v3935_v18 }
 0x108   :  { %2331 = vmatmul.mubr.bf16.gmra.mrb[8].mxu1 %v3928_v19  ;;  %v385_v19 = vlaneseq }
 0x109   :  { %2670 = vmatmul.mubr.bf16.gmra.mrb[8].mxu0 %v3929_v20  ;;  %2340 = vmatprep.mubr.bf16.mxu1 %v3936_v21 }
 0x10a   :  { %2679 = vmatprep.mubr.bf16.mxu0 %v3938_v22  ;;  %2739 = vmatpush1.bf16.msra.mxu0 %v3933_v23  ;;  %v386_v21 = vshrl.u32 %v385_v19, 7 }
 0x10b   :  { %3277 = vmatpush1.bf16.msra.mxu1 %v3933_v23  ;;  %2740 = vmatprep.subr.bf16.mxu0 %v3944_v24 }
 0x10c   :  { %3266 = vmatprep.subr.bf16.mxu1 %v3944_v24 }
 0x10e   :  { %2741 = vmatpush1.bf16.msra.mxu0 %v3942_v25 }
 0x10f   :  { %3278 = vmatpush1.bf16.msra.mxu1 %v3942_v25  ;;  %2742 = vmatprep.subr.bf16.mxu0 %v3953_v26  ;;  %v387_v25 = vsub.s32 0, %v386_v21 }
 0x110   :  { %3267 = vmatprep.subr.bf16.mxu1 %v3953_v26  ;;  %2341 = vmatmul.mubr.bf16.gmra.mrb[12].mxu1 %v3940_v27  ;;  %v383_v27 = vld [vmem:[#allocation7] sm:$0x3] }
 0x111   :  { %2680 = vmatmul.mubr.bf16.gmra.mrb[12].mxu0 %v3941_v28  ;;  %2350 = vmatprep.mubr.bf16.mxu1 %v3945_v29  ;;  %v391_v28 = vsub.s32 1, %v386_v21  ;;  %v4211_v29 = vrot.slane %v383_v27, %v387_v25 }
 0x112   :  { %2689 = vmatprep.mubr.bf16.mxu0 %v3947_v30  ;;  %2743 = vmatpush1.bf16.msra.mxu0 %v3951_v31 }
 0x113   :  { %3279 = vmatpush1.bf16.msra.mxu1 %v3951_v31  ;;  %2744 = vmatprep.subr.bf16.mxu0 %v3956_v32  ;;  %v4213_v30 = vrot.slane %v383_v27, %v391_v28 }
 0x114   :  { %3268 = vmatprep.subr.bf16.mxu1 %v3956_v32 }
 0x116   :  { %2745 = vmatpush1.bf16.msra.mxu0 %v3954_v33 }
 0x117   :  { %3280 = vmatpush1.bf16.msra.mxu1 %v3954_v33  ;;  %2746 = vmatprep.subr.bf16.mxu0 %v3965_v34 }
 0x118   :  { %3269 = vmatprep.subr.bf16.mxu1 %v3965_v34  ;;  %2351 = vmatmul.mubr.bf16.gmra.mrb[16].mxu1 %v3949_v35 }
 0x119   :  { %2690 = vmatmul.mubr.bf16.gmra.mrb[16].mxu0 %v3950_v36  ;;  %2360 = vmatprep.mubr.bf16.mxu1 %v3957_v37 }
 0x11a   :  { %2699 = vmatprep.mubr.bf16.mxu0 %v3959_v38  ;;  %2747 = vmatpush1.bf16.msra.mxu0 %v3963_v39 }
 0x11b   :  { %3281 = vmatpush1.bf16.msra.mxu1 %v3963_v39  ;;  %2748 = vmatprep.subr.bf16.mxu0 %v3974_v40 }
 0x11c   :  { %3270 = vmatprep.subr.bf16.mxu1 %v3974_v40 }
 0x11e   :  { %2749 = vmatpush1.bf16.msra.mxu0 %v3972_v41 }
 0x11f   :  { %3282 = vmatpush1.bf16.msra.mxu1 %v3972_v41  ;;  %2750 = vmatprep.subr.bf16.mxu0 %v3977_v42 }
 0x120   :  { %3271 = vmatprep.subr.bf16.mxu1 %v3977_v42  ;;  %2361 = vmatmul.mubr.bf16.gmra.mrb[20].mxu1 %v3961_v43 }
 0x121   :  { %2700 = vmatmul.mubr.bf16.gmra.mrb[20].mxu0 %v3962_v44  ;;  %2370 = vmatprep.mubr.bf16.mxu1 %v3966_v45 }
 0x122   :  { %2709 = vmatprep.mubr.bf16.mxu0 %v3968_v46  ;;  %2751 = vmatpush1.bf16.msra.mxu0 %v3975_v47 }
 0x123   :  { %3283 = vmatpush1.bf16.msra.mxu1 %v3975_v47  ;;  %2752 = vmatprep.subr.bf16.mxu0 %v3986_v48 }
 0x124   :  { %3272 = vmatprep.subr.bf16.mxu1 %v3986_v48 }
 0x126   :  { %2753 = vmatpush1.bf16.msra.mxu0 %v3984_v49 }
 0x127   :  { %3284 = vmatpush1.bf16.msra.mxu1 %v3984_v49 }
 0x128   :  { %2371 = vmatmul.mubr.bf16.gmra.mrb[24].mxu1 %v3970_v50 }
 0x129   :  { %2710 = vmatmul.mubr.bf16.gmra.mrb[24].mxu0 %v3971_v51  ;;  %2380 = vmatprep.mubr.bf16.mxu1 %v3978_v52 }
 0x12a   :  { %2719 = vmatprep.mubr.bf16.mxu0 %v3980_v53 }
 0x130   :  { %2381 = vmatmul.mubr.bf16.gmra.mrb[28].mxu1 %v3982_v54 }
 0x131   :  { %2720 = vmatmul.mubr.bf16.gmra.mrb[28].mxu0 %v3983_v55  ;;  %3257 = vmatprep.mubr.msk.bf16.mxu1 %vm2027_vm0, %v3992_v57 }
 0x132   :  { %3253 = vmatprep.mubr.msk.bf16.mxu0 %vm2027_vm0, %v3989_v56 }
 0x138   :  { %2803 = vmatmul.mubr.bf16.vlgmr.msra.gmra.mrb[32].mxu1 %v3990_v59 }
 0x139   :  { %2763 = vmatmul.mubr.bf16.vlgmr.msra.gmra.mrb[0].mxu0 %v3987_v58  ;;  %3258 = vmatprep.mubr.msk.bf16.mxu1 %vm2027_vm0, %v3995_v61 }
 0x13a   :  { %3254 = vmatprep.mubr.msk.bf16.mxu0 %vm2027_vm0, %v3993_v60 }
 0x140   :  { %2813 = vmatmul.mubr.bf16.gmra.mrb[36].mxu1 %v3998_v63 }
 0x141   :  { %2773 = vmatmul.mubr.bf16.gmra.mrb[4].mxu0 %v3997_v62  ;;  %3259 = vmatprep.mubr.msk.bf16.mxu1 %vm2027_vm0, %v4001_v1 }
 0x142   :  { %3255 = vmatprep.mubr.msk.bf16.mxu0 %vm2027_vm0, %v3999_v0 }
 0x148   :  { %2823 = vmatmul.mubr.bf16.gmra.mrb[40].mxu1 %v4004_v3 }
 0x149   :  { %2783 = vmatmul.mubr.bf16.gmra.mrb[8].mxu0 %v4003_v2  ;;  %3260 = vmatprep.mubr.msk.bf16.mxu1 %vm2027_vm0, %v4007_v5 }
 0x14a   :  { %3256 = vmatprep.mubr.msk.bf16.mxu0 %vm2027_vm0, %v4005_v4 }
 0x150   :  { %2833 = vmatmul.mubr.bf16.gmra.mrb[44].mxu1 %v4010_v7 }
 0x151   :  { %2793 = vmatmul.mubr.bf16.gmra.mrb[12].mxu0 %v4009_v6 }
 0x1cb   :  { %v4179_v8 = vpop.f32.mrb[0].mxu1 }
 0x1cc   :  { %v4181_v9 = vpop.f32.mrb[1].mxu1 }
 0x1cd   :  { %v4183_v10 = vpop.f32.mrb[2].mxu1 }
 0x1ce   :  { %v4185_v11 = vpop.f32.mrb[3].mxu1 }
 0x1d3   :  { %v4187_v12 = vpop.f32.mrb[4].mxu1 }
 0x1d4   :  { %v4189_v13 = vpop.f32.mrb[5].mxu1 }
 0x1d5   :  { %v4191_v14 = vpop.f32.mrb[6].mxu1 }
 0x1d6   :  { %v4193_v15 = vpop.f32.mrb[7].mxu1 }
 0x1db   :  { %v4195_v16 = vpop.f32.mrb[8].mxu1 }
 0x1dc   :  { %v4197_v17 = vpop.f32.mrb[9].mxu1 }
 0x1dd   :  { %v4199_v18 = vpop.f32.mrb[10].mxu1 }
 0x1de   :  { %v4201_v20 = vpop.f32.mrb[11].mxu1 }
 0x1e3   :  { %v4203_v22 = vpop.f32.mrb[12].mxu1 }
 0x1e4   :  { %v4205_v23 = vpop.f32.mrb[13].mxu1 }
 0x1e5   :  { %v4207_v24 = vpop.f32.mrb[14].mxu1 }
 0x1e6   :  { %v4209_v26 = vpop.f32.mrb[15].mxu1 }
 0x1eb   :  { %v2352_v31 = vpop.f32.mrb[16].mxu1 }
 0x1ec   :  { %v2691_v32 = vpop.f32.mrb[16].mxu0  ;;  %v3317_v33 = vadd.f32 %v2352_v31, %v4211_v29  ;;  %v2354_v34 = vpop.f32.mrb[17].mxu1 }
 0x1ed   :  { %v2693_v35 = vpop.f32.mrb[17].mxu0  ;;  %v3320_v36 = vadd.f32 %v2354_v34, %v4213_v30  ;;  %v2356_v37 = vpop.f32.mrb[18].mxu1 }
 0x1ee   :  { %v2695_v38 = vpop.f32.mrb[18].mxu0  ;;  %v3318_v39 = vadd.f32 %v3317_v33, %v2691_v32  ;;  %v3323_v40 = vadd.f32 %v2356_v37, %v4211_v29  ;;  %v2358_v41 = vpop.f32.mrb[19].mxu1 }
 0x1ef   :  { %v2697_v42 = vpop.f32.mrb[19].mxu0  ;;  %v4218_v43 = vadd.f32 %v3320_v36, %v2693_v35  ;;  %v3326_v44 = vadd.f32 %v2358_v41, %v4213_v30 }
 0x1f0   :  { %v4221_v45 = vadd.f32 %v3323_v40, %v2695_v38 }
 0x1f1   :  { %v4223_v46 = vadd.f32 %v3326_v44, %v2697_v42 }
 0x1f3   :  { %v2362_v47 = vpop.f32.mrb[20].mxu1 }
 0x1f4   :  { %v2701_v48 = vpop.f32.mrb[20].mxu0  ;;  %v3329_v49 = vadd.f32 %v2362_v47, %v4211_v29  ;;  %v2364_v50 = vpop.f32.mrb[21].mxu1 }
 0x1f5   :  { %v2703_v51 = vpop.f32.mrb[21].mxu0  ;;  %v3332_v52 = vadd.f32 %v2364_v50, %v4213_v30  ;;  %v2366_v53 = vpop.f32.mrb[22].mxu1 }
 0x1f6   :  { %v2705_v54 = vpop.f32.mrb[22].mxu0  ;;  %v4227_v55 = vadd.f32 %v3329_v49, %v2701_v48  ;;  %v3335_v56 = vadd.f32 %v2366_v53, %v4211_v29  ;;  %v2368_v57 = vpop.f32.mrb[23].mxu1  ;;  %v3285_v53 = vadd.f32 %v4179_v8, %v4211_v29 }
 0x1f7   :  { %v2707_v58 = vpop.f32.mrb[23].mxu0  ;;  %v4230_v59 = vadd.f32 %v3332_v52, %v2703_v51  ;;  %v3338_v60 = vadd.f32 %v2368_v57, %v4213_v30 }
 0x1f8   :  { %v4233_v61 = vadd.f32 %v3335_v56, %v2705_v54  ;;  %v3287_v54 = vadd.f32 %v4181_v9, %v4213_v30 }
 0x1f9   :  { %v4235_v62 = vadd.f32 %v3338_v60, %v2707_v58  ;;  %v3289_v58 = vadd.f32 %v4183_v10, %v4211_v29 }
 0x1fb   :  { %v2372_v63 = vpop.f32.mrb[24].mxu1 }
 0x1fc   :  { %v2711_v0 = vpop.f32.mrb[24].mxu0  ;;  %v3341_v1 = vadd.f32 %v2372_v63, %v4211_v29  ;;  %v2374_v2 = vpop.f32.mrb[25].mxu1 }
 0x1fd   :  { %v2713_v3 = vpop.f32.mrb[25].mxu0  ;;  %v3344_v4 = vadd.f32 %v2374_v2, %v4213_v30  ;;  %v2376_v5 = vpop.f32.mrb[26].mxu1  ;;  %v3291_v2 = vadd.f32 %v4185_v11, %v4213_v30 }
 0x1fe   :  { %v2715_v6 = vpop.f32.mrb[26].mxu0  ;;  %v4239_v7 = vadd.f32 %v3341_v1, %v2711_v0  ;;  %v3347_v19 = vadd.f32 %v2376_v5, %v4211_v29  ;;  %v2378_v21 = vpop.f32.mrb[27].mxu1 }
 0x1ff   :  { %v2717_v25 = vpop.f32.mrb[27].mxu0  ;;  %v4242_v27 = vadd.f32 %v3344_v4, %v2713_v3  ;;  %v3350_v28 = vadd.f32 %v2378_v21, %v4213_v30 }
 0x200   :  { %v4245_v31 = vadd.f32 %v3347_v19, %v2715_v6 }
 0x201   :  { %v4247_v32 = vadd.f32 %v3350_v28, %v2717_v25 }
 0x203   :  { %v2382_v33 = vpop.f32.mrb[28].mxu1 }
 0x204   :  { %v2721_v34 = vpop.f32.mrb[28].mxu0  ;;  %v3353_v35 = vadd.f32 %v2382_v33, %v4211_v29  ;;  %v2384_v36 = vpop.f32.mrb[29].mxu1 }
 0x205   :  { %v2723_v37 = vpop.f32.mrb[29].mxu0  ;;  %v3356_v38 = vadd.f32 %v2384_v36, %v4213_v30  ;;  %v2386_v40 = vpop.f32.mrb[30].mxu1 }
 0x206   :  { %v2725_v41 = vpop.f32.mrb[30].mxu0  ;;  %v4251_v42 = vadd.f32 %v3353_v35, %v2721_v34  ;;  %v3359_v44 = vadd.f32 %v2386_v40, %v4211_v29  ;;  %v2388_v47 = vpop.f32.mrb[31].mxu1  ;;  %v3297_v40 = vadd.f32 %v4191_v14, %v4211_v29 }
 0x207   :  { %v2727_v48 = vpop.f32.mrb[31].mxu0  ;;  %v4254_v49 = vadd.f32 %v3356_v38, %v2723_v37  ;;  %v3362_v50 = vadd.f32 %v2388_v47, %v4213_v30  ;;  %v3295_v37 = vadd.f32 %v4189_v13, %v4213_v30 }
 0x208   :  { %v4257_v51 = vadd.f32 %v3359_v44, %v2725_v41 }
 0x209   :  { %v4259_v52 = vadd.f32 %v3362_v50, %v2727_v48 }
 0x20b   :  { %v2804_v57 = vpop.f32.mrb[32].mxu1 }
 0x20c   :  { %v2764_v56 = vpop.f32.mrb[0].mxu0  ;;  %v3319_v63 = vadd.f32 %v3318_v39, %v2804_v57  ;;  %v2806_v1 = vpop.f32.mrb[33].mxu1 }
 0x20d   :  { %v3286_v60 = vadd.f32 %v3285_v53, %v2764_v56  ;;  %v2766_v0 = vpop.f32.mrb[1].mxu0  ;;  %v3322_v4 = vadd.f32 %v4218_v43, %v2806_v1  ;;  %v2808_v8 = vpop.f32.mrb[34].mxu1 }
 0x20e   :  { %v3288_v3 = vadd.f32 %v3287_v54, %v2766_v0  ;;  %v2768_v5 = vpop.f32.mrb[2].mxu0  ;;  %v2859_v19 = vmax.f32 %v3319_v63, 0.0  ;;  %v3325_v21 = vadd.f32 %v4221_v45, %v2808_v8  ;;  %v2810_v28 = vpop.f32.mrb[35].mxu1  ;;  %v3293_v45 = vadd.f32 %v4187_v12, %v4211_v29 }
 0x20f   :  { %v2843_v6 = vmax.f32 %v3286_v60, 0.0  ;;  %v3290_v9 = vadd.f32 %v3289_v58, %v2768_v5  ;;  %v2770_v25 = vpop.f32.mrb[3].mxu0  ;;  %v2860_v33 = vmax.f32 %v3322_v4, 0.0  ;;  %v3328_v34 = vadd.f32 %v4223_v46, %v2810_v28 }
 0x210   :  { %v2844_v10 = vmax.f32 %v3288_v3, 0.0  ;;  %v3292_v39 = vadd.f32 %v3291_v2, %v2770_v25  ;;  %2891 = vst [vmem:[#allocation8 + $0x80] sm:$0xff] %v2859_v19  ;;  %v2861_v35 = vmax.f32 %v3325_v21, 0.0  ;;  %v3299_v12 = vadd.f32 %v4193_v15, %v4213_v30 }
 0x211   :  { %2875 = vst [vmem:[#allocation8] sm:$0xff] %v2843_v6  ;;  %v2845_v11 = vmax.f32 %v3290_v9, 0.0  ;;  %2892 = vst.msk [vmem:[#allocation8 + $0x88] sm:$0xff] %vm2027_vm0, %v2860_v33  ;;  %v2862_v36 = vmax.f32 %v3328_v34, 0.0  ;;  %v3303_v5 = vadd.f32 %v4197_v17, %v4213_v30  ;;  %v3305_v6 = vadd.f32 %v4199_v18, %v4211_v29 }
 0x212   :  { %2876 = vst.msk [vmem:[#allocation8 + $0x8] sm:$0xff] %vm2027_vm0, %v2844_v10  ;;  %v2846_v43 = vmax.f32 %v3292_v39, 0.0  ;;  %2893 = vst [vmem:[#allocation8 + $0x90] sm:$0xff] %v2861_v35 }
 0x213   :  { %2877 = vst [vmem:[#allocation8 + $0x10] sm:$0xff] %v2845_v11  ;;  %2894 = vst.msk [vmem:[#allocation8 + $0x98] sm:$0xff] %vm2027_vm0, %v2862_v36  ;;  %v2814_v38 = vpop.f32.mrb[36].mxu1 }
 0x214   :  { %2878 = vst.msk [vmem:[#allocation8 + $0x18] sm:$0xff] %vm2027_vm0, %v2846_v43  ;;  %v2774_v46 = vpop.f32.mrb[4].mxu0  ;;  %v3331_v44 = vadd.f32 %v4227_v55, %v2814_v38  ;;  %v2816_v48 = vpop.f32.mrb[37].mxu1 }
 0x215   :  { %v3294_v41 = vadd.f32 %v3293_v45, %v2774_v46  ;;  %v2776_v47 = vpop.f32.mrb[5].mxu0  ;;  %v3334_v13 = vadd.f32 %v4230_v59, %v2816_v48  ;;  %v2818_v54 = vpop.f32.mrb[38].mxu1 }
 0x216   :  { %v3296_v50 = vadd.f32 %v3295_v37, %v2776_v47  ;;  %v2778_v53 = vpop.f32.mrb[6].mxu0  ;;  %v2863_v57 = vmax.f32 %v3331_v44, 0.0  ;;  %v3337_v60 = vadd.f32 %v4233_v61, %v2818_v54  ;;  %v2820_v14 = vpop.f32.mrb[39].mxu1  ;;  %v3301_v61 = vadd.f32 %v4195_v16, %v4211_v29 }
 0x217   :  { %v2847_v56 = vmax.f32 %v3294_v41, 0.0  ;;  %v3298_v58 = vadd.f32 %v3297_v40, %v2778_v53  ;;  %v2780_v63 = vpop.f32.mrb[7].mxu0  ;;  %v2864_v1 = vmax.f32 %v3334_v13, 0.0  ;;  %v3340_v2 = vadd.f32 %v4235_v62, %v2820_v14 }
 0x218   :  { %v2848_v0 = vmax.f32 %v3296_v50, 0.0  ;;  %v3300_v55 = vadd.f32 %v3299_v12, %v2780_v63  ;;  %2895 = vst [vmem:[#allocation8 + $0xa0] sm:$0xff] %v2863_v57  ;;  %v2865_v3 = vmax.f32 %v3337_v60, 0.0  ;;  %v3307_v16 = vadd.f32 %v4201_v20, %v4213_v30 }
 0x219   :  { %2879 = vst [vmem:[#allocation8 + $0x20] sm:$0xff] %v2847_v56  ;;  %v2849_v15 = vmax.f32 %v3298_v58, 0.0  ;;  %2896 = vst.msk [vmem:[#allocation8 + $0xa8] sm:$0xff] %vm2027_vm0, %v2864_v1  ;;  %v2866_v4 = vmax.f32 %v3340_v2, 0.0  ;;  %v3311_v40 = vadd.f32 %v4205_v23, %v4213_v30  ;;  %v3313_v44 = vadd.f32 %v4207_v24, %v4211_v29 }
 0x21a   :  { %2880 = vst.msk [vmem:[#allocation8 + $0x28] sm:$0xff] %vm2027_vm0, %v2848_v0  ;;  %v2850_v59 = vmax.f32 %v3300_v55, 0.0  ;;  %2897 = vst [vmem:[#allocation8 + $0xb0] sm:$0xff] %v2865_v3 }
 0x21b   :  { %2881 = vst [vmem:[#allocation8 + $0x30] sm:$0xff] %v2849_v15  ;;  %2898 = vst.msk [vmem:[#allocation8 + $0xb8] sm:$0xff] %vm2027_vm0, %v2866_v4  ;;  %v2824_v8 = vpop.f32.mrb[40].mxu1 }
 0x21c   :  { %2882 = vst.msk [vmem:[#allocation8 + $0x38] sm:$0xff] %vm2027_vm0, %v2850_v59  ;;  %v2784_v62 = vpop.f32.mrb[8].mxu0  ;;  %v3343_v9 = vadd.f32 %v4239_v7, %v2824_v8  ;;  %v2826_v25 = vpop.f32.mrb[41].mxu1 }
 0x21d   :  { %v3302_v19 = vadd.f32 %v3301_v61, %v2784_v62  ;;  %v2786_v21 = vpop.f32.mrb[9].mxu0  ;;  %v3346_v17 = vadd.f32 %v4242_v27, %v2826_v25  ;;  %v2828_v33 = vpop.f32.mrb[42].mxu1 }
 0x21e   :  { %v3304_v28 = vadd.f32 %v3303_v5, %v2786_v21  ;;  %v2788_v10 = vpop.f32.mrb[10].mxu0  ;;  %v2867_v34 = vmax.f32 %v3343_v9, 0.0  ;;  %v3349_v35 = vadd.f32 %v4245_v31, %v2828_v33  ;;  %v2830_v18 = vpop.f32.mrb[43].mxu1  ;;  %v3309_v31 = vadd.f32 %v4203_v22, %v4211_v29 }
 0x21f   :  { %v2851_v39 = vmax.f32 %v3302_v19, 0.0  ;;  %v3306_v11 = vadd.f32 %v3305_v6, %v2788_v10  ;;  %v2790_v43 = vpop.f32.mrb[11].mxu0  ;;  %v2868_v45 = vmax.f32 %v3346_v17, 0.0  ;;  %v3352_v37 = vadd.f32 %v4247_v32, %v2830_v18 }
 0x220   :  { %v2852_v36 = vmax.f32 %v3304_v28, 0.0  ;;  %v3308_v7 = vadd.f32 %v3307_v16, %v2790_v43  ;;  %2899 = vst [vmem:[#allocation8 + $0xc0] sm:$0xff] %v2867_v34  ;;  %v2869_v46 = vmax.f32 %v3349_v35, 0.0  ;;  %v3315_v22 = vadd.f32 %v4209_v26, %v4213_v30 }
 0x221   :  { %2883 = vst [vmem:[#allocation8 + $0x40] sm:$0xff] %v2851_v39  ;;  %v2853_v20 = vmax.f32 %v3306_v11, 0.0  ;;  %2900 = vst.msk [vmem:[#allocation8 + $0xc8] sm:$0xff] %vm2027_vm0, %v2868_v45  ;;  %v2870_v38 = vmax.f32 %v3352_v37, 0.0 }
 0x222   :  { %2884 = vst.msk [vmem:[#allocation8 + $0x48] sm:$0xff] %vm2027_vm0, %v2852_v36  ;;  %v2854_v27 = vmax.f32 %v3308_v7, 0.0  ;;  %2901 = vst [vmem:[#allocation8 + $0xd0] sm:$0xff] %v2869_v46 }
 0x223   :  { %2885 = vst [vmem:[#allocation8 + $0x50] sm:$0xff] %v2853_v20  ;;  %2902 = vst.msk [vmem:[#allocation8 + $0xd8] sm:$0xff] %vm2027_vm0, %v2870_v38  ;;  %v2834_v41 = vpop.f32.mrb[44].mxu1 }
 0x224   :  { %2886 = vst.msk [vmem:[#allocation8 + $0x58] sm:$0xff] %vm2027_vm0, %v2854_v27  ;;  %v2794_v32 = vpop.f32.mrb[12].mxu0  ;;  %v3355_v48 = vadd.f32 %v4251_v42, %v2834_v41  ;;  %v2836_v50 = vpop.f32.mrb[45].mxu1 }
 0x225   :  { %v3310_v47 = vadd.f32 %v3309_v31, %v2794_v32  ;;  %v2796_v12 = vpop.f32.mrb[13].mxu0  ;;  %v3358_v23 = vadd.f32 %v4254_v49, %v2836_v50  ;;  %v2838_v54 = vpop.f32.mrb[46].mxu1 }
 0x226   :  { %v3312_v13 = vadd.f32 %v3311_v40, %v2796_v12  ;;  %v2798_v53 = vpop.f32.mrb[14].mxu0  ;;  %v2871_v57 = vmax.f32 %v3355_v48, 0.0  ;;  %v3361_v24 = vadd.f32 %v4257_v51, %v2838_v54  ;;  %v2840_v60 = vpop.f32.mrb[47].mxu1 }
 0x227   :  { %v2855_v56 = vmax.f32 %v3310_v47, 0.0  ;;  %v3314_v58 = vadd.f32 %v3313_v44, %v2798_v53  ;;  %v2800_v29 = vpop.f32.mrb[15].mxu0  ;;  %v2872_v63 = vmax.f32 %v3358_v23, 0.0  ;;  %v3364_v0 = vadd.f32 %v4259_v52, %v2840_v60 }
 0x228   :  { %v2856_v42 = vmax.f32 %v3312_v13, 0.0  ;;  %v3316_v14 = vadd.f32 %v3315_v22, %v2800_v29  ;;  %2903 = vst [vmem:[#allocation8 + $0xe0] sm:$0xff] %v2871_v57  ;;  %v2873_v30 = vmax.f32 %v3361_v24, 0.0 }
 0x229   :  { %2887 = vst [vmem:[#allocation8 + $0x60] sm:$0xff] %v2855_v56  ;;  %v2857_v26 = vmax.f32 %v3314_v58, 0.0  ;;  %2904 = vst.msk [vmem:[#allocation8 + $0xe8] sm:$0xff] %vm2027_vm0, %v2872_v63  ;;  %v2874_v1 = vmax.f32 %v3364_v0, 0.0 }
 0x22a   :  { %2888 = vst.msk [vmem:[#allocation8 + $0x68] sm:$0xff] %vm2027_vm0, %v2856_v42  ;;  %v2858_v49 = vmax.f32 %v3316_v14, 0.0  ;;  %2905 = vst [vmem:[#allocation8 + $0xf0] sm:$0xff] %v2873_v30 }
 0x22b   :  { %2889 = vst [vmem:[#allocation8 + $0x70] sm:$0xff] %v2857_v26  ;;  %2906 = vst.msk [vmem:[#allocation8 + $0xf8] sm:$0xff] %vm2027_vm0, %v2874_v1 }
 0x22c   :  { %2890 = vst.msk [vmem:[#allocation8 + $0x78] sm:$0xff] %vm2027_vm0, %v2858_v49 }
 0x22d   :  { %4088 = shalt.err (!%p4085_p0)
}
 0x22e   :  { %s4089_s27 = scalar_lea.hbm %s4339_s3, 4096 }
 0x22f   :  { %p4090_p1 = scmp.ne.s32.totalorder %s4339_s3, %s4089_s27  ;;  %p4093_p2 = scmp.lt.u32.totalorder %s4089_s27, %s4339_s3 }
 0x231   :  { %p4095_p3 = pnand %p4093_p2, %p4090_p1 }
 0x233   :  { %4098 = shalt.err (!%p4095_p3)
}
 0x234   :  { %s4113_s5 = smov 256   ;;  %s4114_s6 = smov 16  }
 0x235   :  { %2918 = dma.vmem_to_hbm [thread:$0]  %s2913_s23, 4096, %s4339_s3, [#allocation4], %s4113_s5, %s4113_s5, %s4114_s6  }
 0x236   :  { %4103 = dma.done.wait [#allocation4], 4096  }
 0x237   :  { %4104 = vsyncadd [#allocation4], 4294963200 }
 0x238   :  { %2922 = vsyncpa [#allocation3], 1 }
 0x239   :  { %2923 = vsyncpa [#allocation6], 1 }
 0x23a   :  { %2924 = vsyncpa [#allocation4], 1 }

// kernel: inception_d.7
= control target key start
LH: loop header
LB: loop body
LE: loop exit
PB: predicated region body
PF: predicated region fallthrough
CT: control target
= control target key end

     0   :  { %8 = vsyncpa [#allocation3], 0  ;;  %s7136_s0 = inlined_call_operand.hbm [shape: bf16[128,1728], index: 0, kind: input, shape index: {}]   ;;  %s7137_s1 = inlined_call_operand.hbm [shape: bf16[1728,320], index: 1, kind: input, shape index: {}]   ;;  %s7138_s2 = inlined_call_operand.hbm [shape: f32[1,320], index: 2, kind: input, shape index: {}]   ;;  %s7139_s3 = inlined_call_operand.hbm [shape: f32[128,320], index: 3, kind: output, shape index: {}]  }
   0x1   :  { %9 = vsyncpa [#allocation6], 0 }
   0x2   :  { %10 = vsyncpa [#allocation4], 0  ;;  %s6271_s12 = smov [#allocation5]   ;;  %s6177_s16 = scalar_lea.hbm %s7137_s1, 41472 }
   0x3   :  { %s28_s13 = sshll.u32 %s6271_s12, 4  ;;  %p6178_p0 = scmp.ne.s32.totalorder %s7137_s1, %s6177_s16  ;;  %s29_s13 = int_to_ptr.vmem [resolvable:$true] %s28_s13 }
   0x4   :  { %p6181_p1 = scmp.lt.u32.totalorder %s6177_s16, %s7137_s1 }
   0x6   :  { %p6183_p2 = pnand %p6181_p1, %p6178_p0 }
   0x8   :  { %6186 = shalt.err (!%p6183_p2)
}
   0x9   :  { %s6187_s21 = scalar_lea.vmem %s29_s13, 41472  ;;  %p6192_p4 = scmp.lt.s32.totalorder %s29_s13, %s29_s13 }
   0xa   :  { %p6188_p3 = scmp.ne.s32.totalorder %s29_s13, %s6187_s21  ;;  %p6193_p5 = scmp.lt.s32.totalorder %s6187_s21, %s6187_s21 }
   0xc   :  { %p6194_p6 = por %p6193_p5, %p6192_p4 }
   0xe   :  { %p6195_p7 = pnand %p6194_p6, %p6188_p3 }
  0x10   :  { %6198 = shalt.err (!%p6195_p7)
}
  0x11   :  { %s6272_s22 = smov 192   ;;  %s6273_s23 = smov 12  }
  0x12   :  { %34 = dma.hbm_to_vmem [thread:$0]  %s7137_s1, 41472, %s29_s13, [#allocation6], %s6272_s22, %s6272_s22, %s6273_s23  }
  0x13   :  { %s6274_s26 = smov [#allocation2]   ;;  %s6199_s30 = scalar_lea.hbm %s7136_s0, 14336 }
  0x14   :  { %s16_s27 = sshll.u32 %s6274_s26, 4  ;;  %p6200_p8 = scmp.ne.s32.totalorder %s7136_s0, %s6199_s30  ;;  %s17_s27 = int_to_ptr.vmem [resolvable:$true] %s16_s27 }
  0x15   :  { %p6203_p9 = scmp.lt.u32.totalorder %s6199_s30, %s7136_s0 }
  0x17   :  { %p6205_p10 = pnand %p6203_p9, %p6200_p8 }
  0x19   :  { %6208 = shalt.err (!%p6205_p10)
}
  0x1a   :  { %s6209_s8 = scalar_lea.vmem %s17_s27, 14336  ;;  %p6214_p12 = scmp.lt.s32.totalorder %s17_s27, %s17_s27 }
  0x1b   :  { %p6210_p11 = scmp.ne.s32.totalorder %s17_s27, %s6209_s8  ;;  %p6215_p13 = scmp.lt.s32.totalorder %s6209_s8, %s6209_s8 }
  0x1d   :  { %p6216_p0 = por %p6215_p13, %p6214_p12 }
  0x1f   :  { %p6217_p1 = pnand %p6216_p0, %p6210_p11 }
  0x21   :  { %6220 = shalt.err (!%p6217_p1)
}
  0x22   :  { %s6275_s1 = smov 896   ;;  %s6276_s9 = smov 56  }
  0x23   :  { %22 = dma.hbm_to_vmem [thread:$0]  %s7136_s0, 14336, %s17_s27, [#allocation3], %s6275_s1, %s6275_s1, %s6276_s9  }
  0x24   :  { %s6277_s12 = smov [#allocation7]   ;;  %s6221_s16 = scalar_lea.hbm %s7138_s2, 48 }
  0x25   :  { %s41_s13 = sshll.u32 %s6277_s12, 4  ;;  %p6222_p2 = scmp.ne.s32.totalorder %s7138_s2, %s6221_s16  ;;  %s42_s13 = int_to_ptr.vmem [resolvable:$true] %s41_s13 }
  0x26   :  { %p6225_p3 = scmp.lt.u32.totalorder %s6221_s16, %s7138_s2 }
  0x28   :  { %p6227_p4 = pnand %p6225_p3, %p6222_p2 }
  0x2a   :  { %6230 = shalt.err (!%p6227_p4)
}
  0x2b   :  { %s6231_s21 = scalar_lea.vmem %s42_s13, 48  ;;  %s6235_s0 = scalar_lea.vmem %s42_s13, 64 }
  0x2c   :  { %p6232_p5 = scmp.ne.s32.totalorder %s42_s13, %s6231_s21  ;;  %p6236_p6 = scmp.lt.s32.totalorder %s42_s13, %s42_s13 }
  0x2d   :  { %p6237_p7 = scmp.lt.s32.totalorder %s6235_s0, %s6231_s21 }
  0x2f   :  { %p6238_p8 = por %p6237_p7, %p6236_p6 }
  0x31   :  { %p6239_p9 = pnand %p6238_p8, %p6232_p5 }
  0x33   :  { %6242 = shalt.err (!%p6239_p9)
}
  0x34   :  { %44 = dma.hbm_to_vmem [thread:$0]  %s7138_s2, 48, %s42_s13, [#allocation6]  }
  0x35   :  { %6265 = dma.done.wait [#allocation3], 14336  }
  0x36   :  { %6266 = vsyncadd [#allocation3], 4294952960 }
  0x37   :  { %6267 = dma.done.wait [#allocation6], 41520  }
  0x38   :  { %6268 = vsyncadd [#allocation6], 4294925776  ;;  %v5576_v0 = vld [vmem:[#allocation5 + $0x4] ss:$12 sps:$4 sm:$0xff]   ;;  %v5578_v1 = vld [vmem:[#allocation5 + $0xc8] ss:$12 sps:$4 sm:$0xff]  }
  0x39   :  { %2921 = vmatprep.subr.bf16.mxu0 %v5576_v0  ;;  %v5579_v2 = vld [vmem:[#allocation5] ss:$12 sps:$4 sm:$0xff]   ;;  %4957 = vmatprep.subr.bf16.mxu1 %v5578_v1  ;;  %v5580_v3 = vld [vmem:[#allocation5 + $0x8] ss:$12 sps:$4 sm:$0xff]   ;;  %v5584_v6 = vld [vmem:[#allocation5 + $0x18] ss:$12 sps:$4 sm:$0xff]  }
  0x3a   :  { %2922 = vmatpush1.bf16.msra.mxu0 %v5579_v2  ;;  %v5581_v4 = vld [vmem:[#allocation5 + $0x1c] ss:$12 sps:$4 sm:$0xff]   ;;  %4958 = vmatpush3.bf16.msra.mxu1 %v5580_v3  ;;  %v5583_v5 = vld [vmem:[#allocation5 + $0xe0] ss:$12 sps:$4 sm:$0xff]   ;;  %v5588_v9 = vld [vmem:[#allocation5 + $0xf8] ss:$12 sps:$4 sm:$0xff]  }
  0x3b   :  { %2923 = vmatprep.subr.bf16.mxu0 %v5581_v4  ;;  %v5585_v7 = vld [vmem:[#allocation5 + $0x20] ss:$12 sps:$4 sm:$0xff]   ;;  %4959 = vmatprep.subr.bf16.mxu1 %v5583_v5  ;;  %v5589_v10 = vld [vmem:[#allocation5 + $0x30] ss:$12 sps:$4 sm:$0xff]   ;;  %v5590_v11 = vld [vmem:[#allocation5 + $0x38] ss:$12 sps:$4 sm:$0xff]  }
  0x3c   :  { %v5586_v8 = vld [vmem:[#allocation5 + $0x34] ss:$12 sps:$4 sm:$0xff]   ;;  %v5591_v12 = vld [vmem:[#allocation5 + $0x4c] ss:$12 sps:$4 sm:$0xff]   ;;  %v5593_v13 = vld [vmem:[#allocation5 + $0x110] ss:$12 sps:$4 sm:$0xff]  }
  0x3d   :  { %v5594_v14 = vld [vmem:[#allocation5 + $0x48] ss:$12 sps:$4 sm:$0xff]   ;;  %v5595_v15 = vld [vmem:[#allocation5 + $0x50] ss:$12 sps:$4 sm:$0xff]   ;;  %v5599_v18 = vld [vmem:[#allocation5 + $0x60] ss:$12 sps:$4 sm:$0xff]  }
  0x3e   :  { %2924 = vmatpush1.bf16.msra.mxu0 %v5584_v6  ;;  %4960 = vmatpush3.bf16.msra.mxu1 %v5585_v7  ;;  %v5596_v16 = vld [vmem:[#allocation5 + $0x64] ss:$12 sps:$4 sm:$0xff]   ;;  %v5598_v17 = vld [vmem:[#allocation5 + $0x128] ss:$12 sps:$4 sm:$0xff]   ;;  %v5603_v21 = vld [vmem:[#allocation5 + $0x140] ss:$12 sps:$4 sm:$0xff]  }
  0x3f   :  { %2925 = vmatprep.subr.bf16.mxu0 %v5586_v8  ;;  %4961 = vmatprep.subr.bf16.mxu1 %v5588_v9  ;;  %v5600_v19 = vld [vmem:[#allocation5 + $0x68] ss:$12 sps:$4 sm:$0xff]   ;;  %v5604_v22 = vld [vmem:[#allocation5 + $0x78] ss:$12 sps:$4 sm:$0xff]   ;;  %v5605_v23 = vld [vmem:[#allocation5 + $0x80] ss:$12 sps:$4 sm:$0xff]  }
  0x40   :  { %v5601_v20 = vld [vmem:[#allocation5 + $0x7c] ss:$12 sps:$4 sm:$0xff]   ;;  %v5606_v24 = vld [vmem:[#allocation5 + $0x94] ss:$12 sps:$4 sm:$0xff]   ;;  %v5608_v25 = vld [vmem:[#allocation5 + $0x158] ss:$12 sps:$4 sm:$0xff]  }
  0x41   :  { %v5609_v26 = vld [vmem:[#allocation5 + $0x90] ss:$12 sps:$4 sm:$0xff]   ;;  %v5610_v27 = vld [vmem:[#allocation5 + $0x98] ss:$12 sps:$4 sm:$0xff]   ;;  %v5614_v30 = vld [vmem:[#allocation5 + $0xa8] ss:$12 sps:$4 sm:$0xff]  }
  0x42   :  { %2926 = vmatpush1.bf16.msra.mxu0 %v5589_v10  ;;  %4962 = vmatpush3.bf16.msra.mxu1 %v5590_v11  ;;  %v5611_v28 = vld [vmem:[#allocation5 + $0xac] ss:$12 sps:$4 sm:$0xff]   ;;  %v5613_v29 = vld [vmem:[#allocation5 + $0x170] ss:$12 sps:$4 sm:$0xff]   ;;  %v5627_v39 = vld [vmem:[#allocation5 + $0xf4] ss:$12 sps:$4 sm:$0xff]  }
  0x43   :  { %2927 = vmatprep.subr.bf16.mxu0 %v5591_v12  ;;  %4963 = vmatprep.subr.bf16.mxu1 %v5593_v13  ;;  %v5618_v31 = vld [vmem:[#allocation2 + $0x4] ss:$56 sps:$4 sm:$0xff]   ;;  %v6338_v34 = vld [vmem:[#allocation2] ss:$56 sps:$4 sm:$0xff]   ;;  %v6340_v37 = vld [vmem:[#allocation2 + $0x74] ss:$56 sps:$4 sm:$0xff]  }
  0x44   :  { %v5615_v32 = vld [vmem:[#allocation5 + $0xb0] ss:$12 sps:$4 sm:$0xff]   ;;  %3744 = vmatprep.mubr.bf16.mxu1 %v5618_v31  ;;  %2953 = vmatprep.mubr.bf16.mxu0 %v5618_v31  ;;  %v5621_v35 = vld [vmem:[#allocation5 + $0xc0] ss:$12 sps:$4 sm:$0xff]   ;;  %v5624_v38 = vld [vmem:[#allocation5 + $0xd8] ss:$12 sps:$4 sm:$0xff]  }
  0x45   :  { %v5619_v33 = vld [vmem:[#allocation5 + $0xc4] ss:$12 sps:$4 sm:$0xff]   ;;  %v5622_v36 = vld [vmem:[#allocation5 + $0xdc] ss:$12 sps:$4 sm:$0xff]   ;;  %v5631_v42 = vld [vmem:[#allocation5 + $0x10c] ss:$12 sps:$4 sm:$0xff]  }
  0x46   :  { %2928 = vmatpush1.bf16.msra.mxu0 %v5594_v14  ;;  %4964 = vmatpush3.bf16.msra.mxu1 %v5595_v15  ;;  %v6344_v40 = vld [vmem:[#allocation2 + $0x70] ss:$56 sps:$4 sm:$0xff]   ;;  %v6346_v43 = vld [vmem:[#allocation2 + $0xe4] ss:$56 sps:$4 sm:$0xff]   ;;  %v6350_v46 = vld [vmem:[#allocation2 + $0xe0] ss:$56 sps:$4 sm:$0xff]  }
  0x47   :  { %2929 = vmatprep.subr.bf16.mxu0 %v5596_v16  ;;  %4965 = vmatprep.subr.bf16.mxu1 %v5598_v17  ;;  %v5630_v41 = vld [vmem:[#allocation5 + $0xf0] ss:$12 sps:$4 sm:$0xff]   ;;  %v5633_v44 = vld [vmem:[#allocation5 + $0x108] ss:$12 sps:$4 sm:$0xff]   ;;  %v5639_v47 = vld [vmem:[#allocation5 + $0x120] ss:$12 sps:$4 sm:$0xff]  }
  0x48   :  { %v5636_v45 = vld [vmem:[#allocation5 + $0x124] ss:$12 sps:$4 sm:$0xff]   ;;  %v5658_v48 = vld [vmem:[#allocation5 + $0x248] ss:$12 sps:$4 sm:$0xff]   ;;  %v5663_v52 = vld [vmem:[#allocation5 + $0x260] ss:$12 sps:$4 sm:$0xff]  }
  0x49   :  { %v5659_v49 = vld [vmem:[#allocation5 + $0x188] ss:$12 sps:$4 sm:$0xff]   ;;  %v5664_v53 = vld [vmem:[#allocation5 + $0x1a0] ss:$12 sps:$4 sm:$0xff]   ;;  %v5642_v54 = vld [vmem:[#allocation5 + $0x138] ss:$12 sps:$4 sm:$0xff]  }
  0x4a   :  { %2930 = vmatpush1.bf16.msra.mxu0 %v5599_v18  ;;  %4966 = vmatpush3.bf16.msra.mxu1 %v5600_v19  ;;  %v5640_v50 = vld [vmem:[#allocation5 + $0x13c] ss:$12 sps:$4 sm:$0xff]   ;;  %v6352_v51 = vld [vmem:[#allocation2 + $0x154] ss:$56 sps:$4 sm:$0xff]   ;;  %v5671_v58 = vld [vmem:[#allocation5 + $0x278] ss:$12 sps:$4 sm:$0xff]  }
  0x4b   :  { %2931 = vmatprep.subr.bf16.mxu0 %v5601_v20  ;;  %4967 = vmatprep.subr.bf16.mxu1 %v5603_v21  ;;  %v5645_v55 = vld [vmem:[#allocation5 + $0x154] ss:$12 sps:$4 sm:$0xff]   ;;  %v6356_v56 = vld [vmem:[#allocation2 + $0x150] ss:$56 sps:$4 sm:$0xff]   ;;  %v5672_v59 = vld [vmem:[#allocation5 + $0x1b8] ss:$12 sps:$4 sm:$0xff]  }
  0x4c   :  { %v5648_v57 = vld [vmem:[#allocation5 + $0x150] ss:$12 sps:$4 sm:$0xff]   ;;  %v5649_v60 = vld [vmem:[#allocation5 + $0x16c] ss:$12 sps:$4 sm:$0xff]   ;;  %v5651_v0 = vld [vmem:[#allocation5 + $0x168] ss:$12 sps:$4 sm:$0xff]  }
  0x4d   :  { %v6358_v61 = vld [vmem:[#allocation2 + $0x1c4] ss:$56 sps:$4 sm:$0xff]   ;;  %v5654_v2 = vld [vmem:[#allocation5 + $0x180] ss:$12 sps:$4 sm:$0xff]   ;;  %v5684_v4 = vld [vmem:[#allocation5 + $0x2a8] ss:$12 sps:$4 sm:$0xff]  }
  0x4e   :  { %2932 = vmatpush1.bf16.msra.mxu0 %v5604_v22  ;;  %4968 = vmatpush3.bf16.msra.mxu1 %v5605_v23  ;;  %v5676_v62 = vld [vmem:[#allocation5 + $0x290] ss:$12 sps:$4 sm:$0xff]   ;;  %v6362_v3 = vld [vmem:[#allocation2 + $0x1c0] ss:$56 sps:$4 sm:$0xff]   ;;  %v5685_v5 = vld [vmem:[#allocation5 + $0x1e8] ss:$12 sps:$4 sm:$0xff]  }
  0x4f   :  { %2933 = vmatprep.subr.bf16.mxu0 %v5606_v24  ;;  %4969 = vmatprep.subr.bf16.mxu1 %v5608_v25  ;;  %v5677_v63 = vld [vmem:[#allocation5 + $0x1d0] ss:$12 sps:$4 sm:$0xff]   ;;  %v6364_v7 = vld [vmem:[#allocation2 + $0x234] ss:$56 sps:$4 sm:$0xff]   ;;  %v5660_v10 = vld [vmem:[#allocation5 + $0x198] ss:$12 sps:$4 sm:$0xff]  }
  0x50   :  { %v5656_v1 = vld [vmem:[#allocation5 + $0x184] ss:$12 sps:$4 sm:$0xff]   ;;  %v5662_v6 = vld [vmem:[#allocation5 + $0x19c] ss:$12 sps:$4 sm:$0xff]   ;;  %v5689_v8 = vld [vmem:[#allocation5 + $0x2c0] ss:$12 sps:$4 sm:$0xff]  }
  0x51   :  { %v5690_v9 = vld [vmem:[#allocation5 + $0x200] ss:$12 sps:$4 sm:$0xff]   ;;  %v5667_v12 = vld [vmem:[#allocation5 + $0x1b0] ss:$12 sps:$4 sm:$0xff]   ;;  %v5697_v14 = vld [vmem:[#allocation5 + $0x2d8] ss:$12 sps:$4 sm:$0xff]  }
  0x52   :  { %2934 = vmatpush1.bf16.msra.mxu0 %v5609_v26  ;;  %4970 = vmatpush3.bf16.msra.mxu1 %v5610_v27  ;;  %v5669_v11 = vld [vmem:[#allocation5 + $0x1b4] ss:$12 sps:$4 sm:$0xff]   ;;  %v6370_v13 = vld [vmem:[#allocation2 + $0x230] ss:$56 sps:$4 sm:$0xff]   ;;  %v5698_v15 = vld [vmem:[#allocation5 + $0x218] ss:$12 sps:$4 sm:$0xff]  }
  0x53   :  { %2935 = vmatprep.subr.bf16.mxu0 %v5611_v28  ;;  %4971 = vmatprep.subr.bf16.mxu1 %v5613_v29  ;;  %v5675_v16 = vld [vmem:[#allocation5 + $0x1cc] ss:$12 sps:$4 sm:$0xff]   ;;  %v6372_v17 = vld [vmem:[#allocation2 + $0x2a4] ss:$56 sps:$4 sm:$0xff]   ;;  %v5673_v20 = vld [vmem:[#allocation5 + $0x1c8] ss:$12 sps:$4 sm:$0xff]  }
  0x54   :  { %v5702_v18 = vld [vmem:[#allocation5 + $0x2f0] ss:$12 sps:$4 sm:$0xff]   ;;  %v5680_v22 = vld [vmem:[#allocation5 + $0x1e0] ss:$12 sps:$4 sm:$0xff]   ;;  %v5686_v26 = vld [vmem:[#allocation5 + $0x1f8] ss:$12 sps:$4 sm:$0xff]  }
  0x55   :  { %v5703_v19 = vld [vmem:[#allocation5 + $0x230] ss:$12 sps:$4 sm:$0xff]   ;;  %v6378_v23 = vld [vmem:[#allocation2 + $0x2a0] ss:$56 sps:$4 sm:$0xff]   ;;  %v6380_v25 = vld [vmem:[#allocation2 + $0x314] ss:$56 sps:$4 sm:$0xff]  }
  0x56   :  { %2936 = vmatpush1.bf16.msra.mxu0 %v5614_v30  ;;  %4972 = vmatpush3.bf16.msra.mxu1 %v5615_v32  ;;  %v5682_v21 = vld [vmem:[#allocation5 + $0x1e4] ss:$12 sps:$4 sm:$0xff]   ;;  %v5688_v24 = vld [vmem:[#allocation5 + $0x1fc] ss:$12 sps:$4 sm:$0xff]   ;;  %v5695_v27 = vld [vmem:[#allocation5 + $0x214] ss:$12 sps:$4 sm:$0xff]  }
  0x57   :  { %2937 = vmatprep.subr.bf16.mxu0 %v5619_v33  ;;  %5021 = vmatprep.subr.bf16.mxu1 %v5658_v48  ;;  %v5693_v28 = vld [vmem:[#allocation5 + $0x210] ss:$12 sps:$4 sm:$0xff]   ;;  %v5701_v30 = vld [vmem:[#allocation5 + $0x22c] ss:$12 sps:$4 sm:$0xff]   ;;  %v5699_v32 = vld [vmem:[#allocation5 + $0x228] ss:$12 sps:$4 sm:$0xff]  }
  0x58   :  { %v6386_v29 = vld [vmem:[#allocation2 + $0x310] ss:$56 sps:$4 sm:$0xff]   ;;  %v6388_v31 = vld [vmem:[#allocation2 + $0xc] ss:$56 sps:$4 sm:$0xff]   ;;  %vm2896_vm0 = vcmask 523264   ;;  %s6279_s2 = smov [#allocation8]  }
  0x59   :  { %3745 = vmatmul.mubr.bf16.vlgmr.msra.gmra.mrb[0].mxu1 %v6338_v34  ;;  %v5709_v33 = vld [vmem:[#allocation5 + $0x244] ss:$12 sps:$4 sm:$0xff]   ;;  %s4492_s24 = sshll.u32 %s6279_s2, 4  ;;  %s4493_s24 = int_to_ptr.vmem [resolvable:$true] %s4492_s24 }
  0x5a   :  { %2938 = vmatpush1.bf16.msra.mxu0 %v5621_v35  ;;  %3752 = vmatprep.mubr.bf16.mxu1 %v6340_v37  ;;  %v6394_v35 = vld [vmem:[#allocation2 + $0x8] ss:$56 sps:$4 sm:$0xff]   ;;  %v6404_v48 = vld [vmem:[#allocation2 + $0xec] ss:$56 sps:$4 sm:$0xff]   ;;  %s6243_s25 = scalar_lea.vmem %s4493_s24, 6144  ;;  %p6248_p11 = scmp.lt.s32.totalorder %s4493_s24, %s4493_s24 }
  0x5b   :  { %2939 = vmatprep.subr.bf16.mxu0 %v5622_v36  ;;  %5022 = vmatpush3.bf16.msra.mxu1 %v5659_v49  ;;  %v5707_v36 = vld [vmem:[#allocation5 + $0x240] ss:$12 sps:$4 sm:$0xff]   ;;  %v5760_v49 = vld [vmem:[#allocation5 + $0x338] ss:$12 sps:$4 sm:$0xff]   ;;  %p6244_p10 = scmp.ne.s32.totalorder %s4493_s24, %s6243_s25  ;;  %p6249_p12 = scmp.lt.s32.totalorder %s6243_s25, %s6243_s25 }
  0x5c   :  { %5023 = vmatprep.subr.bf16.mxu1 %v5663_v52  ;;  %v5726_v52 = vld [vmem:[#allocation5 + $0x2a4] ss:$12 sps:$4 sm:$0xff]  }
  0x5d   :  { %p6250_p13 = por %p6249_p12, %p6248_p11 }
  0x5e   :  { %2940 = vmatpush1.bf16.msra.mxu0 %v5624_v38  ;;  %v6396_v38 = vld [vmem:[#allocation2 + $0x7c] ss:$56 sps:$4 sm:$0xff]  }
  0x5f   :  { %2941 = vmatprep.subr.bf16.mxu0 %v5627_v39  ;;  %5024 = vmatpush3.bf16.msra.mxu1 %v5664_v53  ;;  %v5747_v39 = vld [vmem:[#allocation5 + $0x308] ss:$12 sps:$4 sm:$0xff]   ;;  %v5724_v53 = vld [vmem:[#allocation5 + $0x2a0] ss:$12 sps:$4 sm:$0xff]   ;;  %p6251_p0 = pnand %p6250_p13, %p6244_p10 }
  0x60   :  { %5025 = vmatprep.subr.bf16.mxu1 %v5671_v58  ;;  %v6412_v58 = vld [vmem:[#allocation2 + $0x15c] ss:$56 sps:$4 sm:$0xff]  }
  0x61   :  { %3753 = vmatmul.mubr.bf16.gmra.mrb[4].mxu1 %v6344_v40 }
  0x62   :  { %2942 = vmatpush1.bf16.msra.mxu0 %v5630_v41  ;;  %3760 = vmatprep.mubr.bf16.mxu1 %v6346_v43  ;;  %v5710_v41 = vld [vmem:[#allocation5 + $0x258] ss:$12 sps:$4 sm:$0xff]  }
  0x63   :  { %2943 = vmatprep.subr.bf16.mxu0 %v5631_v42  ;;  %5026 = vmatpush3.bf16.msra.mxu1 %v5672_v59  ;;  %v5717_v42 = vld [vmem:[#allocation5 + $0x274] ss:$12 sps:$4 sm:$0xff]  }
  0x64   :  { %5027 = vmatprep.subr.bf16.mxu1 %v5676_v62  ;;  %v5773_v59 = vld [vmem:[#allocation5 + $0x368] ss:$12 sps:$4 sm:$0xff]  }
  0x65   :  { %v5735_v62 = vld [vmem:[#allocation5 + $0x2d4] ss:$12 sps:$4 sm:$0xff]  }
  0x66   :  { %2944 = vmatpush1.bf16.msra.mxu0 %v5633_v44  ;;  %v5752_v44 = vld [vmem:[#allocation5 + $0x320] ss:$12 sps:$4 sm:$0xff]  }
  0x67   :  { %2945 = vmatprep.subr.bf16.mxu0 %v5636_v45  ;;  %5028 = vmatpush3.bf16.msra.mxu1 %v5677_v63  ;;  %v5759_v45 = vld [vmem:[#allocation5 + $0x3f8] ss:$12 sps:$4 sm:$0xff]   ;;  %v5733_v63 = vld [vmem:[#allocation5 + $0x2d0] ss:$12 sps:$4 sm:$0xff]  }
  0x68   :  { %5029 = vmatprep.subr.bf16.mxu1 %v5684_v4  ;;  %v6420_v4 = vld [vmem:[#allocation2 + $0x1cc] ss:$56 sps:$4 sm:$0xff]  }
  0x69   :  { %3761 = vmatmul.mubr.bf16.gmra.mrb[8].mxu1 %v6350_v46 }
  0x6a   :  { %2946 = vmatpush1.bf16.msra.mxu0 %v5639_v47  ;;  %3768 = vmatprep.mubr.bf16.mxu1 %v6352_v51  ;;  %v5721_v47 = vld [vmem:[#allocation5 + $0x28c] ss:$12 sps:$4 sm:$0xff]  }
  0x6b   :  { %2947 = vmatprep.subr.bf16.mxu0 %v5640_v50  ;;  %5030 = vmatpush3.bf16.msra.mxu1 %v5685_v5  ;;  %v5764_v50 = vld [vmem:[#allocation5 + $0x410] ss:$12 sps:$4 sm:$0xff]   ;;  %v5786_v5 = vld [vmem:[#allocation5 + $0x398] ss:$12 sps:$4 sm:$0xff]  }
  0x6c   :  { %5031 = vmatprep.subr.bf16.mxu1 %v5689_v8  ;;  %v5744_v8 = vld [vmem:[#allocation5 + $0x304] ss:$12 sps:$4 sm:$0xff]  }
  0x6e   :  { %2948 = vmatpush1.bf16.msra.mxu0 %v5642_v54  ;;  %v5765_v54 = vld [vmem:[#allocation5 + $0x350] ss:$12 sps:$4 sm:$0xff]  }
  0x6f   :  { %2949 = vmatprep.subr.bf16.mxu0 %v5645_v55  ;;  %5032 = vmatpush3.bf16.msra.mxu1 %v5690_v9  ;;  %v5772_v55 = vld [vmem:[#allocation5 + $0x428] ss:$12 sps:$4 sm:$0xff]   ;;  %v5791_v9 = vld [vmem:[#allocation5 + $0x3b0] ss:$12 sps:$4 sm:$0xff]  }
  0x70   :  { %5033 = vmatprep.subr.bf16.mxu1 %v5697_v14  ;;  %v5748_v14 = vld [vmem:[#allocation5 + $0x318] ss:$12 sps:$4 sm:$0xff]  }
  0x71   :  { %3769 = vmatmul.mubr.bf16.gmra.mrb[12].mxu1 %v6356_v56 }
  0x72   :  { %2950 = vmatpush1.bf16.msra.mxu0 %v5648_v57  ;;  %3776 = vmatprep.mubr.bf16.mxu1 %v6358_v61  ;;  %v5730_v57 = vld [vmem:[#allocation5 + $0x2bc] ss:$12 sps:$4 sm:$0xff]  }
  0x73   :  { %2951 = vmatprep.subr.bf16.mxu0 %v5649_v60  ;;  %5034 = vmatpush3.bf16.msra.mxu1 %v5698_v15  ;;  %v5777_v60 = vld [vmem:[#allocation5 + $0x440] ss:$12 sps:$4 sm:$0xff]  }
  0x74   :  { %5035 = vmatprep.subr.bf16.mxu1 %v5702_v18  ;;  %v5757_v15 = vld [vmem:[#allocation5 + $0x334] ss:$12 sps:$4 sm:$0xff]   ;;  %v5763_v18 = vld [vmem:[#allocation5 + $0x34c] ss:$12 sps:$4 sm:$0xff]  }
  0x76   :  { %2952 = vmatpush1.bf16.msra.mxu0 %v5651_v0  ;;  %v5778_v0 = vld [vmem:[#allocation5 + $0x380] ss:$12 sps:$4 sm:$0xff]  }
  0x77   :  { %3034 = vmatprep.subr.bf16.mxu0 %v5656_v1  ;;  %5036 = vmatpush3.bf16.msra.mxu1 %v5703_v19  ;;  %v5785_v1 = vld [vmem:[#allocation5 + $0x458] ss:$12 sps:$4 sm:$0xff]  }
  0x78   :  { %v6436_v19 = vld [vmem:[#allocation2 + $0x2ac] ss:$56 sps:$4 sm:$0xff]  }
  0x79   :  { %2954 = vmatmul.mubr.bf16.vlgmr.msra.gmra.mrb[0].mxu0 %v6338_v34  ;;  %3777 = vmatmul.mubr.bf16.gmra.mrb[16].mxu1 %v6362_v3  ;;  %v5746_v34 = vld [vmem:[#allocation5 + $0x3c8] ss:$12 sps:$4 sm:$0xff]  }
  0x7a   :  { %3035 = vmatpush1.bf16.msra.mxu0 %v5654_v2  ;;  %2963 = vmatprep.mubr.bf16.mxu0 %v6340_v37  ;;  %v5712_v37 = vld [vmem:[#allocation5 + $0x25c] ss:$12 sps:$4 sm:$0xff]   ;;  %v6418_v2 = vld [vmem:[#allocation2 + $0x158] ss:$56 sps:$4 sm:$0xff]  }
  0x7b   :  { %3036 = vmatprep.subr.bf16.mxu0 %v5662_v6  ;;  %3784 = vmatprep.mubr.bf16.mxu1 %v6364_v7  ;;  %v5790_v6 = vld [vmem:[#allocation5 + $0x470] ss:$12 sps:$4 sm:$0xff]  }
  0x7c   :  { %5085 = vmatprep.subr.bf16.mxu1 %v5746_v34  ;;  %v5797_v34 = vld [vmem:[#allocation5 + $0x3c4] ss:$12 sps:$4 sm:$0xff]  }
  0x7e   :  { %3037 = vmatpush1.bf16.msra.mxu0 %v5660_v10  ;;  %v5742_v10 = vld [vmem:[#allocation5 + $0x300] ss:$12 sps:$4 sm:$0xff]  }
  0x7f   :  { %3038 = vmatprep.subr.bf16.mxu0 %v5669_v11  ;;  %v6426_v11 = vld [vmem:[#allocation2 + $0x1c8] ss:$56 sps:$4 sm:$0xff]  }
  0x81   :  { %2964 = vmatmul.mubr.bf16.gmra.mrb[4].mxu0 %v6344_v40  ;;  %3785 = vmatmul.mubr.bf16.gmra.mrb[20].mxu1 %v6370_v13  ;;  %v5751_v40 = vld [vmem:[#allocation5 + $0x3e0] ss:$12 sps:$4 sm:$0xff]  }
  0x82   :  { %3039 = vmatpush1.bf16.msra.mxu0 %v5667_v12  ;;  %2973 = vmatprep.mubr.bf16.mxu0 %v6346_v43  ;;  %v5715_v43 = vld [vmem:[#allocation5 + $0x270] ss:$12 sps:$4 sm:$0xff]  }
  0x83   :  { %3040 = vmatprep.subr.bf16.mxu0 %v5675_v16  ;;  %3792 = vmatprep.mubr.bf16.mxu1 %v6372_v17  ;;  %v5750_v12 = vld [vmem:[#allocation5 + $0x31c] ss:$12 sps:$4 sm:$0xff]  }
  0x84   :  { %v5755_v16 = vld [vmem:[#allocation5 + $0x330] ss:$12 sps:$4 sm:$0xff]  }
  0x86   :  { %3041 = vmatpush1.bf16.msra.mxu0 %v5673_v20  ;;  %v5761_v20 = vld [vmem:[#allocation5 + $0x348] ss:$12 sps:$4 sm:$0xff]  }
  0x87   :  { %3042 = vmatprep.subr.bf16.mxu0 %v5682_v21  ;;  %v5770_v21 = vld [vmem:[#allocation5 + $0x364] ss:$12 sps:$4 sm:$0xff]  }
  0x89   :  { %2974 = vmatmul.mubr.bf16.gmra.mrb[8].mxu0 %v6350_v46  ;;  %3793 = vmatmul.mubr.bf16.gmra.mrb[24].mxu1 %v6378_v23  ;;  %v6402_v46 = vld [vmem:[#allocation2 + $0x78] ss:$56 sps:$4 sm:$0xff]  }
  0x8a   :  { %3043 = vmatpush1.bf16.msra.mxu0 %v5680_v22  ;;  %2983 = vmatprep.mubr.bf16.mxu0 %v6352_v51  ;;  %v5719_v51 = vld [vmem:[#allocation5 + $0x288] ss:$12 sps:$4 sm:$0xff]  }
  0x8b   :  { %3044 = vmatprep.subr.bf16.mxu0 %v5688_v24  ;;  %3800 = vmatprep.mubr.bf16.mxu1 %v6380_v25  ;;  %v5834_v22 = vld [vmem:[#allocation5 + $0x548] ss:$12 sps:$4 sm:$0xff]  }
  0x8c   :  { %v6442_v24 = vld [vmem:[#allocation2 + $0x2a8] ss:$56 sps:$4 sm:$0xff]  }
  0x8e   :  { %3045 = vmatpush1.bf16.msra.mxu0 %v5686_v26  ;;  %v6444_v26 = vld [vmem:[#allocation2 + $0x31c] ss:$56 sps:$4 sm:$0xff]  }
  0x8f   :  { %3046 = vmatprep.subr.bf16.mxu0 %v5695_v27  ;;  %v5774_v27 = vld [vmem:[#allocation5 + $0x378] ss:$12 sps:$4 sm:$0xff]  }
  0x91   :  { %2984 = vmatmul.mubr.bf16.gmra.mrb[12].mxu0 %v6356_v56  ;;  %3801 = vmatmul.mubr.bf16.gmra.mrb[28].mxu1 %v6386_v29  ;;  %v6410_v56 = vld [vmem:[#allocation2 + $0xe8] ss:$56 sps:$4 sm:$0xff]  }
  0x92   :  { %3047 = vmatpush1.bf16.msra.mxu0 %v5693_v28  ;;  %2993 = vmatprep.mubr.bf16.mxu0 %v6358_v61  ;;  %v5728_v61 = vld [vmem:[#allocation5 + $0x2b8] ss:$12 sps:$4 sm:$0xff]   ;;  %v5783_v28 = vld [vmem:[#allocation5 + $0x394] ss:$12 sps:$4 sm:$0xff]  }
  0x93   :  { %3048 = vmatprep.subr.bf16.mxu0 %v5701_v30  ;;  %3841 = vmatprep.mubr.bf16.mxu1 %v6388_v31  ;;  %v6450_v30 = vld [vmem:[#allocation2 + $0x318] ss:$56 sps:$4 sm:$0xff]  }
  0x96   :  { %3049 = vmatpush1.bf16.msra.mxu0 %v5699_v32  ;;  %v6452_v32 = vld [vmem:[#allocation2 + $0x14] ss:$56 sps:$4 sm:$0xff]  }
  0x97   :  { %3050 = vmatprep.subr.bf16.mxu0 %v5709_v33  ;;  %v5787_v33 = vld [vmem:[#allocation5 + $0x3a8] ss:$12 sps:$4 sm:$0xff]  }
  0x99   :  { %2994 = vmatmul.mubr.bf16.gmra.mrb[16].mxu0 %v6362_v3  ;;  %3842 = vmatmul.mubr.bf16.vlgmr.msra.gmra.mrb[32].mxu1 %v6394_v35  ;;  %v5739_v3 = vld [vmem:[#allocation5 + $0x2ec] ss:$12 sps:$4 sm:$0xff]  }
  0x9a   :  { %3051 = vmatpush1.bf16.msra.mxu0 %v5707_v36  ;;  %3003 = vmatprep.mubr.bf16.mxu0 %v6364_v7  ;;  %v5737_v7 = vld [vmem:[#allocation5 + $0x2e8] ss:$12 sps:$4 sm:$0xff]   ;;  %v5795_v36 = vld [vmem:[#allocation5 + $0x3c0] ss:$12 sps:$4 sm:$0xff]  }
  0x9b   :  { %3052 = vmatprep.subr.bf16.mxu0 %v5712_v37  ;;  %3849 = vmatprep.mubr.bf16.mxu1 %v6396_v38  ;;  %v5800_v37 = vld [vmem:[#allocation5 + $0x3dc] ss:$12 sps:$4 sm:$0xff]  }
  0x9c   :  { %5086 = vmatpush3.bf16.msra.mxu1 %v5747_v39  ;;  %v5835_v39 = vld [vmem:[#allocation5 + $0x488] ss:$12 sps:$4 sm:$0xff]  }
  0x9d   :  { %5087 = vmatprep.subr.bf16.mxu1 %v5751_v40  ;;  %v5839_v40 = vld [vmem:[#allocation5 + $0x560] ss:$12 sps:$4 sm:$0xff]  }
  0x9e   :  { %3053 = vmatpush1.bf16.msra.mxu0 %v5710_v41  ;;  %v5798_v41 = vld [vmem:[#allocation5 + $0x3d8] ss:$12 sps:$4 sm:$0xff]  }
  0x9f   :  { %3054 = vmatprep.subr.bf16.mxu0 %v5717_v42  ;;  %v5805_v42 = vld [vmem:[#allocation5 + $0x3f4] ss:$12 sps:$4 sm:$0xff]  }
  0xa0   :  { %5088 = vmatpush3.bf16.msra.mxu1 %v5752_v44  ;;  %v5840_v44 = vld [vmem:[#allocation5 + $0x4a0] ss:$12 sps:$4 sm:$0xff]  }
  0xa1   :  { %3004 = vmatmul.mubr.bf16.gmra.mrb[20].mxu0 %v6370_v13  ;;  %5089 = vmatprep.subr.bf16.mxu1 %v5759_v45  ;;  %v6428_v13 = vld [vmem:[#allocation2 + $0x23c] ss:$56 sps:$4 sm:$0xff]   ;;  %v5847_v45 = vld [vmem:[#allocation5 + $0x578] ss:$12 sps:$4 sm:$0xff]  }
  0xa2   :  { %3850 = vmatmul.mubr.bf16.gmra.mrb[36].mxu1 %v6402_v46  ;;  %3055 = vmatpush1.bf16.msra.mxu0 %v5715_v43  ;;  %v5803_v43 = vld [vmem:[#allocation5 + $0x3f0] ss:$12 sps:$4 sm:$0xff]  }
  0xa3   :  { %3056 = vmatprep.subr.bf16.mxu0 %v5721_v47  ;;  %3013 = vmatprep.mubr.bf16.mxu0 %v6372_v17  ;;  %v6434_v17 = vld [vmem:[#allocation2 + $0x238] ss:$56 sps:$4 sm:$0xff]  }
  0xa4   :  { %3857 = vmatprep.mubr.bf16.mxu1 %v6404_v48  ;;  %5090 = vmatpush3.bf16.msra.mxu1 %v5760_v49  ;;  %v5809_v47 = vld [vmem:[#allocation5 + $0x40c] ss:$12 sps:$4 sm:$0xff]  }
  0xa5   :  { %5091 = vmatprep.subr.bf16.mxu1 %v5764_v50  ;;  %v5848_v49 = vld [vmem:[#allocation5 + $0x4b8] ss:$12 sps:$4 sm:$0xff]   ;;  %v5852_v50 = vld [vmem:[#allocation5 + $0x590] ss:$12 sps:$4 sm:$0xff]  }
  0xa6   :  { %3057 = vmatpush1.bf16.msra.mxu0 %v5719_v51  ;;  %v5807_v51 = vld [vmem:[#allocation5 + $0x408] ss:$12 sps:$4 sm:$0xff]  }
  0xa7   :  { %3058 = vmatprep.subr.bf16.mxu0 %v5726_v52  ;;  %v5814_v52 = vld [vmem:[#allocation5 + $0x424] ss:$12 sps:$4 sm:$0xff]  }
  0xa8   :  { %5092 = vmatpush3.bf16.msra.mxu1 %v5765_v54  ;;  %v5860_v54 = vld [vmem:[#allocation5 + $0x5a8] ss:$12 sps:$4 sm:$0xff]  }
  0xa9   :  { %3014 = vmatmul.mubr.bf16.gmra.mrb[24].mxu0 %v6378_v23  ;;  %5093 = vmatprep.subr.bf16.mxu1 %v5772_v55  ;;  %v5768_v23 = vld [vmem:[#allocation5 + $0x360] ss:$12 sps:$4 sm:$0xff]  }
  0xaa   :  { %3858 = vmatmul.mubr.bf16.gmra.mrb[40].mxu1 %v6410_v56  ;;  %3059 = vmatpush1.bf16.msra.mxu0 %v5724_v53  ;;  %v5853_v53 = vld [vmem:[#allocation5 + $0x4d0] ss:$12 sps:$4 sm:$0xff]   ;;  %v5812_v55 = vld [vmem:[#allocation5 + $0x420] ss:$12 sps:$4 sm:$0xff]  }
  0xab   :  { %3060 = vmatprep.subr.bf16.mxu0 %v5730_v57  ;;  %3023 = vmatprep.mubr.bf16.mxu0 %v6380_v25  ;;  %v5776_v25 = vld [vmem:[#allocation5 + $0x37c] ss:$12 sps:$4 sm:$0xff]  }
  0xac   :  { %3865 = vmatprep.mubr.bf16.mxu1 %v6412_v58  ;;  %5094 = vmatpush3.bf16.msra.mxu1 %v5773_v59  ;;  %v5818_v57 = vld [vmem:[#allocation5 + $0x43c] ss:$12 sps:$4 sm:$0xff]  }
  0xad   :  { %5095 = vmatprep.subr.bf16.mxu1 %v5777_v60  ;;  %v5861_v59 = vld [vmem:[#allocation5 + $0x4e8] ss:$12 sps:$4 sm:$0xff]   ;;  %v5865_v60 = vld [vmem:[#allocation5 + $0x5c0] ss:$12 sps:$4 sm:$0xff]  }
  0xae   :  { %3061 = vmatpush1.bf16.msra.mxu0 %v5728_v61  ;;  %v5816_v61 = vld [vmem:[#allocation5 + $0x438] ss:$12 sps:$4 sm:$0xff]  }
  0xaf   :  { %3062 = vmatprep.subr.bf16.mxu0 %v5735_v62  ;;  %v5823_v62 = vld [vmem:[#allocation5 + $0x454] ss:$12 sps:$4 sm:$0xff]  }
  0xb0   :  { %5096 = vmatpush3.bf16.msra.mxu1 %v5778_v0  ;;  %v5873_v0 = vld [vmem:[#allocation5 + $0x5d8] ss:$12 sps:$4 sm:$0xff]  }
  0xb1   :  { %3024 = vmatmul.mubr.bf16.gmra.mrb[28].mxu0 %v6386_v29  ;;  %5097 = vmatprep.subr.bf16.mxu1 %v5785_v1  ;;  %v5781_v29 = vld [vmem:[#allocation5 + $0x390] ss:$12 sps:$4 sm:$0xff]  }
  0xb2   :  { %3866 = vmatmul.mubr.bf16.gmra.mrb[44].mxu1 %v6418_v2  ;;  %3063 = vmatpush1.bf16.msra.mxu0 %v5733_v63  ;;  %v5866_v63 = vld [vmem:[#allocation5 + $0x500] ss:$12 sps:$4 sm:$0xff]   ;;  %v5821_v1 = vld [vmem:[#allocation5 + $0x450] ss:$12 sps:$4 sm:$0xff]  }
  0xb3   :  { %3064 = vmatprep.subr.bf16.mxu0 %v5739_v3  ;;  %3066 = vmatprep.mubr.bf16.mxu0 %v6388_v31  ;;  %v5789_v31 = vld [vmem:[#allocation5 + $0x3ac] ss:$12 sps:$4 sm:$0xff]  }
  0xb4   :  { %3873 = vmatprep.mubr.bf16.mxu1 %v6420_v4  ;;  %5098 = vmatpush3.bf16.msra.mxu1 %v5786_v5  ;;  %v5827_v3 = vld [vmem:[#allocation5 + $0x46c] ss:$12 sps:$4 sm:$0xff]  }
  0xb5   :  { %5099 = vmatprep.subr.bf16.mxu1 %v5790_v6  ;;  %v5874_v5 = vld [vmem:[#allocation5 + $0x518] ss:$12 sps:$4 sm:$0xff]   ;;  %v5878_v6 = vld [vmem:[#allocation5 + $0x5f0] ss:$12 sps:$4 sm:$0xff]  }
  0xb6   :  { %3065 = vmatpush1.bf16.msra.mxu0 %v5737_v7  ;;  %v5825_v7 = vld [vmem:[#allocation5 + $0x468] ss:$12 sps:$4 sm:$0xff]  }
  0xb7   :  { %3147 = vmatprep.subr.bf16.mxu0 %v5744_v8  ;;  %v5832_v8 = vld [vmem:[#allocation5 + $0x484] ss:$12 sps:$4 sm:$0xff]  }
  0xb8   :  { %5100 = vmatpush3.bf16.msra.mxu1 %v5791_v9  ;;  %v5879_v9 = vld [vmem:[#allocation5 + $0x530] ss:$12 sps:$4 sm:$0xff]  }
  0xb9   :  { %3067 = vmatmul.mubr.bf16.vlgmr.msra.gmra.mrb[0].mxu0 %v6394_v35  ;;  %5149 = vmatprep.subr.bf16.mxu1 %v5834_v22  ;;  %v6458_v35 = vld [vmem:[#allocation2 + $0x10] ss:$56 sps:$4 sm:$0xff]  }
  0xba   :  { %3874 = vmatmul.mubr.bf16.gmra.mrb[48].mxu1 %v6426_v11  ;;  %3148 = vmatpush1.bf16.msra.mxu0 %v5742_v10  ;;  %v5922_v10 = vld [vmem:[#allocation5 + $0x6c8] ss:$12 sps:$4 sm:$0xff]   ;;  %v5858_v22 = vld [vmem:[#allocation5 + $0x4e4] ss:$12 sps:$4 sm:$0xff]  }
  0xbb   :  { %3149 = vmatprep.subr.bf16.mxu0 %v5750_v12  ;;  %3076 = vmatprep.mubr.bf16.mxu0 %v6396_v38  ;;  %v6460_v38 = vld [vmem:[#allocation2 + $0x84] ss:$56 sps:$4 sm:$0xff]   ;;  %v5833_v12 = vld [vmem:[#allocation2 + $0x1d0] ss:$56 sps:$4 sm:$0xff]  }
  0xbc   :  { %3881 = vmatprep.mubr.bf16.mxu1 %v6428_v13 }
  0xbe   :  { %3150 = vmatpush1.bf16.msra.mxu0 %v5748_v14  ;;  %v6490_v14 = vld [vmem:[#allocation2 + $0x244] ss:$56 sps:$4 sm:$0xff]  }
  0xbf   :  { %3151 = vmatprep.subr.bf16.mxu0 %v5757_v15  ;;  %v5836_v15 = vld [vmem:[#allocation5 + $0x498] ss:$12 sps:$4 sm:$0xff]  }
  0xc1   :  { %3077 = vmatmul.mubr.bf16.gmra.mrb[4].mxu0 %v6402_v46  ;;  %v6466_v46 = vld [vmem:[#allocation2 + $0x80] ss:$56 sps:$4 sm:$0xff]  }
  0xc2   :  { %3882 = vmatmul.mubr.bf16.gmra.mrb[52].mxu1 %v6434_v17  ;;  %3152 = vmatpush1.bf16.msra.mxu0 %v5755_v16  ;;  %v5845_v16 = vld [vmem:[#allocation5 + $0x4b4] ss:$12 sps:$4 sm:$0xff]  }
  0xc3   :  { %3153 = vmatprep.subr.bf16.mxu0 %v5763_v18  ;;  %3086 = vmatprep.mubr.bf16.mxu0 %v6404_v48  ;;  %v6468_v48 = vld [vmem:[#allocation2 + $0xf4] ss:$56 sps:$4 sm:$0xff]   ;;  %v6495_v18 = vld [vmem:[#allocation2 + $0x240] ss:$56 sps:$4 sm:$0xff]  }
  0xc4   :  { %3889 = vmatprep.mubr.bf16.mxu1 %v6436_v19 }
  0xc6   :  { %3154 = vmatpush1.bf16.msra.mxu0 %v5761_v20  ;;  %v6497_v20 = vld [vmem:[#allocation2 + $0x2b4] ss:$56 sps:$4 sm:$0xff]  }
  0xc7   :  { %3155 = vmatprep.subr.bf16.mxu0 %v5770_v21  ;;  %v5849_v21 = vld [vmem:[#allocation5 + $0x4c8] ss:$12 sps:$4 sm:$0xff]  }
  0xc9   :  { %3087 = vmatmul.mubr.bf16.gmra.mrb[8].mxu0 %v6410_v56  ;;  %v6474_v56 = vld [vmem:[#allocation2 + $0xf0] ss:$56 sps:$4 sm:$0xff]  }
  0xca   :  { %3890 = vmatmul.mubr.bf16.gmra.mrb[56].mxu1 %v6442_v24  ;;  %3156 = vmatpush1.bf16.msra.mxu0 %v5768_v23  ;;  %v5856_v23 = vld [vmem:[#allocation5 + $0x4e0] ss:$12 sps:$4 sm:$0xff]  }
  0xcb   :  { %3157 = vmatprep.subr.bf16.mxu0 %v5776_v25  ;;  %3096 = vmatprep.mubr.bf16.mxu0 %v6412_v58  ;;  %v6476_v58 = vld [vmem:[#allocation2 + $0x164] ss:$56 sps:$4 sm:$0xff]  }
  0xcc   :  { %3897 = vmatprep.mubr.bf16.mxu1 %v6444_v26  ;;  %v5864_v25 = vld [vmem:[#allocation5 + $0x4fc] ss:$12 sps:$4 sm:$0xff]  }
  0xce   :  { %3158 = vmatpush1.bf16.msra.mxu0 %v5774_v27  ;;  %v5862_v27 = vld [vmem:[#allocation5 + $0x4f8] ss:$12 sps:$4 sm:$0xff]  }
  0xcf   :  { %3159 = vmatprep.subr.bf16.mxu0 %v5783_v28  ;;  %v5871_v28 = vld [vmem:[#allocation5 + $0x514] ss:$12 sps:$4 sm:$0xff]  }
  0xd1   :  { %3097 = vmatmul.mubr.bf16.gmra.mrb[12].mxu0 %v6418_v2  ;;  %v6482_v2 = vld [vmem:[#allocation2 + $0x160] ss:$56 sps:$4 sm:$0xff]  }
  0xd2   :  { %3898 = vmatmul.mubr.bf16.gmra.mrb[60].mxu1 %v6450_v30  ;;  %3160 = vmatpush1.bf16.msra.mxu0 %v5781_v29  ;;  %v5869_v29 = vld [vmem:[#allocation5 + $0x510] ss:$12 sps:$4 sm:$0xff]  }
  0xd3   :  { %3161 = vmatprep.subr.bf16.mxu0 %v5789_v31  ;;  %3106 = vmatprep.mubr.bf16.mxu0 %v6420_v4  ;;  %v6484_v4 = vld [vmem:[#allocation2 + $0x1d4] ss:$56 sps:$4 sm:$0xff]  }
  0xd4   :  { %3938 = vmatprep.mubr.bf16.mxu1 %v6452_v32  ;;  %v5877_v31 = vld [vmem:[#allocation5 + $0x52c] ss:$12 sps:$4 sm:$0xff]  }
  0xd6   :  { %3162 = vmatpush1.bf16.msra.mxu0 %v5787_v33  ;;  %v5875_v33 = vld [vmem:[#allocation5 + $0x528] ss:$12 sps:$4 sm:$0xff]  }
  0xd7   :  { %3163 = vmatprep.subr.bf16.mxu0 %v5797_v34  ;;  %v5885_v34 = vld [vmem:[#allocation5 + $0x544] ss:$12 sps:$4 sm:$0xff]  }
  0xd9   :  { %3107 = vmatmul.mubr.bf16.gmra.mrb[16].mxu0 %v6426_v11  ;;  %v5830_v11 = vld [vmem:[#allocation5 + $0x480] ss:$12 sps:$4 sm:$0xff]  }
  0xda   :  { %3939 = vmatmul.mubr.bf16.vlgmr.msra.gmra.mrb[64].mxu1 %v6458_v35  ;;  %3164 = vmatpush1.bf16.msra.mxu0 %v5795_v36  ;;  %v5883_v36 = vld [vmem:[#allocation5 + $0x540] ss:$12 sps:$4 sm:$0xff]  }
  0xdb   :  { %3165 = vmatprep.subr.bf16.mxu0 %v5800_v37  ;;  %3116 = vmatprep.mubr.bf16.mxu0 %v6428_v13  ;;  %v5838_v13 = vld [vmem:[#allocation5 + $0x49c] ss:$12 sps:$4 sm:$0xff]  }
  0xdc   :  { %3946 = vmatprep.mubr.bf16.mxu1 %v6460_v38  ;;  %5150 = vmatpush3.bf16.msra.mxu1 %v5835_v39  ;;  %v5888_v37 = vld [vmem:[#allocation5 + $0x55c] ss:$12 sps:$4 sm:$0xff]  }
  0xdd   :  { %5151 = vmatprep.subr.bf16.mxu1 %v5839_v40  ;;  %v5923_v39 = vld [vmem:[#allocation5 + $0x608] ss:$12 sps:$4 sm:$0xff]   ;;  %v5927_v40 = vld [vmem:[#allocation5 + $0x6e0] ss:$12 sps:$4 sm:$0xff]  }
  0xde   :  { %3166 = vmatpush1.bf16.msra.mxu0 %v5798_v41  ;;  %v5886_v41 = vld [vmem:[#allocation5 + $0x558] ss:$12 sps:$4 sm:$0xff]  }
  0xdf   :  { %3167 = vmatprep.subr.bf16.mxu0 %v5805_v42  ;;  %v5893_v42 = vld [vmem:[#allocation5 + $0x574] ss:$12 sps:$4 sm:$0xff]  }
  0xe0   :  { %5152 = vmatpush3.bf16.msra.mxu1 %v5840_v44  ;;  %v5928_v44 = vld [vmem:[#allocation5 + $0x620] ss:$12 sps:$4 sm:$0xff]  }
  0xe1   :  { %3117 = vmatmul.mubr.bf16.gmra.mrb[20].mxu0 %v6434_v17  ;;  %5153 = vmatprep.subr.bf16.mxu1 %v5847_v45  ;;  %v5843_v17 = vld [vmem:[#allocation5 + $0x4b0] ss:$12 sps:$4 sm:$0xff]   ;;  %v5935_v45 = vld [vmem:[#allocation5 + $0x6f8] ss:$12 sps:$4 sm:$0xff]  }
  0xe2   :  { %3947 = vmatmul.mubr.bf16.gmra.mrb[68].mxu1 %v6466_v46  ;;  %3168 = vmatpush1.bf16.msra.mxu0 %v5803_v43  ;;  %v5891_v43 = vld [vmem:[#allocation5 + $0x570] ss:$12 sps:$4 sm:$0xff]  }
  0xe3   :  { %3169 = vmatprep.subr.bf16.mxu0 %v5809_v47  ;;  %3126 = vmatprep.mubr.bf16.mxu0 %v6436_v19  ;;  %v5851_v19 = vld [vmem:[#allocation5 + $0x4cc] ss:$12 sps:$4 sm:$0xff]  }
  0xe4   :  { %3954 = vmatprep.mubr.bf16.mxu1 %v6468_v48  ;;  %5154 = vmatpush3.bf16.msra.mxu1 %v5848_v49  ;;  %v5897_v47 = vld [vmem:[#allocation5 + $0x58c] ss:$12 sps:$4 sm:$0xff]  }
  0xe5   :  { %5155 = vmatprep.subr.bf16.mxu1 %v5852_v50  ;;  %v5936_v49 = vld [vmem:[#allocation5 + $0x638] ss:$12 sps:$4 sm:$0xff]   ;;  %v5940_v50 = vld [vmem:[#allocation5 + $0x710] ss:$12 sps:$4 sm:$0xff]  }
  0xe6   :  { %3170 = vmatpush1.bf16.msra.mxu0 %v5807_v51  ;;  %v5895_v51 = vld [vmem:[#allocation5 + $0x588] ss:$12 sps:$4 sm:$0xff]  }
  0xe7   :  { %3171 = vmatprep.subr.bf16.mxu0 %v5814_v52  ;;  %v5902_v52 = vld [vmem:[#allocation5 + $0x5a4] ss:$12 sps:$4 sm:$0xff]  }
  0xe8   :  { %5156 = vmatpush3.bf16.msra.mxu1 %v5853_v53  ;;  %v5900_v53 = vld [vmem:[#allocation5 + $0x5a0] ss:$12 sps:$4 sm:$0xff]  }
  0xe9   :  { %3127 = vmatmul.mubr.bf16.gmra.mrb[24].mxu0 %v6442_v24  ;;  %5157 = vmatprep.subr.bf16.mxu1 %v5860_v54  ;;  %v6503_v24 = vld [vmem:[#allocation2 + $0x2b0] ss:$56 sps:$4 sm:$0xff]  }
  0xea   :  { %3955 = vmatmul.mubr.bf16.gmra.mrb[72].mxu1 %v6474_v56  ;;  %3172 = vmatpush1.bf16.msra.mxu0 %v5812_v55  ;;  %v5941_v54 = vld [vmem:[#allocation5 + $0x650] ss:$12 sps:$4 sm:$0xff]   ;;  %v5948_v55 = vld [vmem:[#allocation5 + $0x728] ss:$12 sps:$4 sm:$0xff]  }
  0xeb   :  { %3173 = vmatprep.subr.bf16.mxu0 %v5818_v57  ;;  %3136 = vmatprep.mubr.bf16.mxu0 %v6444_v26  ;;  %v6505_v26 = vld [vmem:[#allocation2 + $0x324] ss:$56 sps:$4 sm:$0xff]  }
  0xec   :  { %3962 = vmatprep.mubr.bf16.mxu1 %v6476_v58  ;;  %5158 = vmatpush3.bf16.msra.mxu1 %v5861_v59  ;;  %v5906_v57 = vld [vmem:[#allocation5 + $0x5bc] ss:$12 sps:$4 sm:$0xff]  }
  0xed   :  { %5159 = vmatprep.subr.bf16.mxu1 %v5865_v60  ;;  %v5949_v59 = vld [vmem:[#allocation5 + $0x668] ss:$12 sps:$4 sm:$0xff]   ;;  %v5953_v60 = vld [vmem:[#allocation5 + $0x740] ss:$12 sps:$4 sm:$0xff]  }
  0xee   :  { %3174 = vmatpush1.bf16.msra.mxu0 %v5816_v61  ;;  %v5904_v61 = vld [vmem:[#allocation5 + $0x5b8] ss:$12 sps:$4 sm:$0xff]  }
  0xef   :  { %3175 = vmatprep.subr.bf16.mxu0 %v5823_v62  ;;  %v5911_v62 = vld [vmem:[#allocation5 + $0x5d4] ss:$12 sps:$4 sm:$0xff]  }
  0xf0   :  { %5160 = vmatpush3.bf16.msra.mxu1 %v5866_v63  ;;  %v5909_v63 = vld [vmem:[#allocation5 + $0x5d0] ss:$12 sps:$4 sm:$0xff]  }
  0xf1   :  { %3137 = vmatmul.mubr.bf16.gmra.mrb[28].mxu0 %v6450_v30  ;;  %5161 = vmatprep.subr.bf16.mxu1 %v5873_v0  ;;  %v6511_v30 = vld [vmem:[#allocation2 + $0x320] ss:$56 sps:$4 sm:$0xff]  }
  0xf2   :  { %3963 = vmatmul.mubr.bf16.gmra.mrb[76].mxu1 %v6482_v2  ;;  %3176 = vmatpush1.bf16.msra.mxu0 %v5821_v1  ;;  %v6542_v0 = vld [vmem:[#allocation2 + $0x168] ss:$56 sps:$4 sm:$0xff]  }
  0xf3   :  { %3177 = vmatprep.subr.bf16.mxu0 %v5827_v3  ;;  %3179 = vmatprep.mubr.bf16.mxu0 %v6452_v32  ;;  %v6513_v32 = vld [vmem:[#allocation2 + $0x1c] ss:$56 sps:$4 sm:$0xff]   ;;  %v5954_v1 = vld [vmem:[#allocation5 + $0x680] ss:$12 sps:$4 sm:$0xff]   ;;  %v5961_v3 = vld [vmem:[#allocation5 + $0x758] ss:$12 sps:$4 sm:$0xff]  }
  0xf4   :  { %3970 = vmatprep.mubr.bf16.mxu1 %v6484_v4  ;;  %5162 = vmatpush3.bf16.msra.mxu1 %v5874_v5  ;;  %v6544_v5 = vld [vmem:[#allocation2 + $0x1dc] ss:$56 sps:$4 sm:$0xff]  }
  0xf5   :  { %5163 = vmatprep.subr.bf16.mxu1 %v5878_v6 }
  0xf6   :  { %3178 = vmatpush1.bf16.msra.mxu0 %v5825_v7 }
  0xf7   :  { %3260 = vmatprep.subr.bf16.mxu0 %v5832_v8 }
  0xf8   :  { %5164 = vmatpush3.bf16.msra.mxu1 %v5879_v9 }
  0xf9   :  { %3180 = vmatmul.mubr.bf16.vlgmr.msra.gmra.mrb[0].mxu0 %v6458_v35  ;;  %5213 = vmatprep.subr.bf16.mxu1 %v5922_v10  ;;  %v6519_v35 = vld [vmem:[#allocation2 + $0x18] ss:$56 sps:$4 sm:$0xff]  }
  0xfa   :  { %3971 = vmatmul.mubr.bf16.gmra.mrb[80].mxu1 %v5833_v12  ;;  %3261 = vmatpush1.bf16.msra.mxu0 %v5830_v11  ;;  %v5962_v10 = vld [vmem:[#allocation5 + $0x698] ss:$12 sps:$4 sm:$0xff]  }
  0xfb   :  { %3262 = vmatprep.subr.bf16.mxu0 %v5838_v13  ;;  %3189 = vmatprep.mubr.bf16.mxu0 %v6460_v38  ;;  %v6521_v38 = vld [vmem:[#allocation2 + $0x8c] ss:$56 sps:$4 sm:$0xff]   ;;  %v5913_v13 = vld [vmem:[#allocation5 + $0x5e8] ss:$12 sps:$4 sm:$0xff]  }
  0xfc   :  { %3978 = vmatprep.mubr.bf16.mxu1 %v6490_v14 }
  0xfe   :  { %3263 = vmatpush1.bf16.msra.mxu0 %v5836_v15  ;;  %v5918_v15 = vld [vmem:[#allocation5 + $0x600] ss:$12 sps:$4 sm:$0xff]  }
  0xff   :  { %3264 = vmatprep.subr.bf16.mxu0 %v5845_v16  ;;  %v5967_v16 = vld [vmem:[#allocation5 + $0x6b0] ss:$12 sps:$4 sm:$0xff]  }
 0x101   :  { %3190 = vmatmul.mubr.bf16.gmra.mrb[4].mxu0 %v6466_v46  ;;  %v6526_v46 = vld [vmem:[#allocation2 + $0x88] ss:$56 sps:$4 sm:$0xff]  }
 0x102   :  { %3979 = vmatmul.mubr.bf16.gmra.mrb[84].mxu1 %v6495_v18  ;;  %3265 = vmatpush1.bf16.msra.mxu0 %v5843_v17 }
 0x103   :  { %3266 = vmatprep.subr.bf16.mxu0 %v5851_v19  ;;  %3199 = vmatprep.mubr.bf16.mxu0 %v6468_v48  ;;  %v6528_v48 = vld [vmem:[#allocation2 + $0xfc] ss:$56 sps:$4 sm:$0xff]   ;;  %v6554_v19 = vld [vmem:[#allocation2 + $0x1d8] ss:$56 sps:$4 sm:$0xff]  }
 0x104   :  { %3986 = vmatprep.mubr.bf16.mxu1 %v6497_v20 }
 0x106   :  { %3267 = vmatpush1.bf16.msra.mxu0 %v5849_v21 }
 0x107   :  { %3268 = vmatprep.subr.bf16.mxu0 %v5858_v22 }
 0x109   :  { %3200 = vmatmul.mubr.bf16.gmra.mrb[8].mxu0 %v6474_v56  ;;  %v6534_v56 = vld [vmem:[#allocation2 + $0xf8] ss:$56 sps:$4 sm:$0xff]  }
 0x10a   :  { %3987 = vmatmul.mubr.bf16.gmra.mrb[88].mxu1 %v6503_v24  ;;  %3269 = vmatpush1.bf16.msra.mxu0 %v5856_v23 }
 0x10b   :  { %3270 = vmatprep.subr.bf16.mxu0 %v5864_v25  ;;  %3209 = vmatprep.mubr.bf16.mxu0 %v6476_v58  ;;  %v6536_v58 = vld [vmem:[#allocation2 + $0x16c] ss:$56 sps:$4 sm:$0xff]  }
 0x10c   :  { %3994 = vmatprep.mubr.bf16.mxu1 %v6505_v26 }
 0x10e   :  { %3271 = vmatpush1.bf16.msra.mxu0 %v5862_v27  ;;  %v5924_v27 = vld [vmem:[#allocation5 + $0x618] ss:$12 sps:$4 sm:$0xff]  }
 0x10f   :  { %3272 = vmatprep.subr.bf16.mxu0 %v5871_v28  ;;  %v5933_v28 = vld [vmem:[#allocation5 + $0x634] ss:$12 sps:$4 sm:$0xff]  }
 0x111   :  { %3210 = vmatmul.mubr.bf16.gmra.mrb[12].mxu0 %v6482_v2 }
 0x112   :  { %3995 = vmatmul.mubr.bf16.gmra.mrb[92].mxu1 %v6511_v30  ;;  %3273 = vmatpush1.bf16.msra.mxu0 %v5869_v29  ;;  %v5931_v29 = vld [vmem:[#allocation5 + $0x630] ss:$12 sps:$4 sm:$0xff]  }
 0x113   :  { %3274 = vmatprep.subr.bf16.mxu0 %v5877_v31  ;;  %3219 = vmatprep.mubr.bf16.mxu0 %v6484_v4  ;;  %v5915_v4 = vld [vmem:[#allocation5 + $0x5ec] ss:$12 sps:$4 sm:$0xff]   ;;  %v6566_v31 = vld [vmem:[#allocation2 + $0x248] ss:$56 sps:$4 sm:$0xff]  }
 0x114   :  { %4035 = vmatprep.mubr.bf16.mxu1 %v6513_v32 }
 0x116   :  { %3275 = vmatpush1.bf16.msra.mxu0 %v5875_v33 }
 0x117   :  { %3276 = vmatprep.subr.bf16.mxu0 %v5885_v34 }
 0x119   :  { %3220 = vmatmul.mubr.bf16.gmra.mrb[16].mxu0 %v5833_v12  ;;  %v5966_v12 = vld [vmem:[#allocation5 + $0x770] ss:$12 sps:$4 sm:$0xff]  }
 0x11a   :  { %4036 = vmatmul.mubr.bf16.vlgmr.msra.gmra.mrb[96].mxu1 %v6519_v35  ;;  %3277 = vmatpush1.bf16.msra.mxu0 %v5883_v36  ;;  %v6570_v36 = vld [vmem:[#allocation2 + $0x2bc] ss:$56 sps:$4 sm:$0xff]  }
 0x11b   :  { %3278 = vmatprep.subr.bf16.mxu0 %v5888_v37  ;;  %3229 = vmatprep.mubr.bf16.mxu0 %v6490_v14  ;;  %v5920_v14 = vld [vmem:[#allocation5 + $0x604] ss:$12 sps:$4 sm:$0xff]  }
 0x11c   :  { %4043 = vmatprep.mubr.bf16.mxu1 %v6521_v38  ;;  %5214 = vmatpush3.bf16.msra.mxu1 %v5923_v39  ;;  %v5937_v39 = vld [vmem:[#allocation5 + $0x648] ss:$12 sps:$4 sm:$0xff]  }
 0x11d   :  { %5215 = vmatprep.subr.bf16.mxu1 %v5927_v40  ;;  %v5946_v40 = vld [vmem:[#allocation5 + $0x664] ss:$12 sps:$4 sm:$0xff]  }
 0x11e   :  { %3279 = vmatpush1.bf16.msra.mxu0 %v5886_v41  ;;  %v5944_v41 = vld [vmem:[#allocation5 + $0x660] ss:$12 sps:$4 sm:$0xff]  }
 0x11f   :  { %3280 = vmatprep.subr.bf16.mxu0 %v5893_v42 }
 0x120   :  { %5216 = vmatpush3.bf16.msra.mxu1 %v5928_v44 }
 0x121   :  { %3230 = vmatmul.mubr.bf16.gmra.mrb[20].mxu0 %v6495_v18  ;;  %5217 = vmatprep.subr.bf16.mxu1 %v5935_v45  ;;  %v6010_v18 = vld [vmem:[#allocation5 + $0x848] ss:$12 sps:$4 sm:$0xff]  }
 0x122   :  { %4044 = vmatmul.mubr.bf16.gmra.mrb[100].mxu1 %v6526_v46  ;;  %3281 = vmatpush1.bf16.msra.mxu0 %v5891_v43  ;;  %v6578_v43 = vld [vmem:[#allocation2 + $0x2b8] ss:$56 sps:$4 sm:$0xff]   ;;  %v5952_v45 = vld [vmem:[#allocation5 + $0x67c] ss:$12 sps:$4 sm:$0xff]  }
 0x123   :  { %3282 = vmatprep.subr.bf16.mxu0 %v5897_v47  ;;  %3239 = vmatprep.mubr.bf16.mxu0 %v6497_v20  ;;  %v5926_v20 = vld [vmem:[#allocation5 + $0x61c] ss:$12 sps:$4 sm:$0xff]  }
 0x124   :  { %4051 = vmatprep.mubr.bf16.mxu1 %v6528_v48  ;;  %5218 = vmatpush3.bf16.msra.mxu1 %v5936_v49  ;;  %v6582_v49 = vld [vmem:[#allocation2 + $0x32c] ss:$56 sps:$4 sm:$0xff]  }
 0x125   :  { %5219 = vmatprep.subr.bf16.mxu1 %v5940_v50 }
 0x126   :  { %3283 = vmatpush1.bf16.msra.mxu0 %v5895_v51  ;;  %v5950_v51 = vld [vmem:[#allocation5 + $0x678] ss:$12 sps:$4 sm:$0xff]  }
 0x127   :  { %3284 = vmatprep.subr.bf16.mxu0 %v5902_v52  ;;  %v5959_v52 = vld [vmem:[#allocation5 + $0x694] ss:$12 sps:$4 sm:$0xff]  }
 0x128   :  { %5220 = vmatpush3.bf16.msra.mxu1 %v5941_v54  ;;  %v6590_v54 = vld [vmem:[#allocation2 + $0x328] ss:$56 sps:$4 sm:$0xff]  }
 0x129   :  { %3240 = vmatmul.mubr.bf16.gmra.mrb[24].mxu0 %v6503_v24  ;;  %5221 = vmatprep.subr.bf16.mxu1 %v5948_v55  ;;  %v6558_v24 = vld [vmem:[#allocation2 + $0x24c] ss:$56 sps:$4 sm:$0xff]  }
 0x12a   :  { %4052 = vmatmul.mubr.bf16.gmra.mrb[104].mxu1 %v6534_v56  ;;  %3285 = vmatpush1.bf16.msra.mxu0 %v5900_v53  ;;  %v5957_v53 = vld [vmem:[#allocation5 + $0x690] ss:$12 sps:$4 sm:$0xff]  }
 0x12b   :  { %3286 = vmatprep.subr.bf16.mxu0 %v5906_v57  ;;  %3249 = vmatprep.mubr.bf16.mxu0 %v6505_v26 }
 0x12c   :  { %4059 = vmatprep.mubr.bf16.mxu1 %v6536_v58  ;;  %5222 = vmatpush3.bf16.msra.mxu1 %v5949_v59  ;;  %v4973_v2 = vpop.f32.mrb[0].mxu1 }
 0x12d   :  { %5223 = vmatprep.subr.bf16.mxu1 %v5953_v60  ;;  %v4974_v6 = vpop.f32.mrb[1].mxu1 }
 0x12e   :  { %3287 = vmatpush1.bf16.msra.mxu0 %v5904_v61  ;;  %v6546_v7 = vadd.f32 %v4974_v6, %v4973_v2  ;;  %v4976_v8 = vpop.f32.mrb[2].mxu1  ;;  %v6594_v61 = vld [vmem:[#allocation2 + $0x24] ss:$56 sps:$4 sm:$0xff]   ;;  %v6601_v2 = vld [vmem:[#allocation2 + $0x20] ss:$56 sps:$4 sm:$0xff]  }
 0x12f   :  { %3288 = vmatprep.subr.bf16.mxu0 %v5911_v62  ;;  %v4977_v9 = vpop.f32.mrb[3].mxu1  ;;  %v5976_v6 = vld [vmem:[#allocation5 + $0x6dc] ss:$12 sps:$4 sm:$0xff]  }
 0x130   :  { %5224 = vmatpush3.bf16.msra.mxu1 %v5954_v1  ;;  %v6549_v11 = vadd.f32 %v4977_v9, %v4976_v8  ;;  %v5973_v1 = vld [vmem:[#allocation5 + $0x6c4] ss:$12 sps:$4 sm:$0xff]  }
 0x131   :  { %3250 = vmatmul.mubr.bf16.gmra.mrb[28].mxu0 %v6511_v30  ;;  %5225 = vmatprep.subr.bf16.mxu1 %v5961_v3  ;;  %v5971_v3 = vld [vmem:[#allocation5 + $0x6c0] ss:$12 sps:$4 sm:$0xff]  }
 0x132   :  { %4060 = vmatmul.mubr.bf16.gmra.mrb[108].mxu1 %v6542_v0  ;;  %3289 = vmatpush1.bf16.msra.mxu0 %v5909_v63  ;;  %v5963_v63 = vld [vmem:[#allocation5 + $0x6a8] ss:$12 sps:$4 sm:$0xff]  }
 0x133   :  { %3290 = vmatprep.subr.bf16.mxu0 %v5915_v4  ;;  %3292 = vmatprep.mubr.bf16.mxu0 %v6513_v32  ;;  %v5939_v32 = vld [vmem:[#allocation5 + $0x64c] ss:$12 sps:$4 sm:$0xff]  }
 0x134   :  { %4067 = vmatprep.mubr.bf16.mxu1 %v6544_v5  ;;  %5226 = vmatpush3.bf16.msra.mxu1 %v5962_v10  ;;  %v4979_v17 = vpop.f32.mrb[4].mxu1 }
 0x135   :  { %5227 = vmatprep.subr.bf16.mxu1 %v5966_v12  ;;  %v4980_v21 = vpop.f32.mrb[5].mxu1  ;;  %v6011_v12 = vld [vmem:[#allocation5 + $0x788] ss:$12 sps:$4 sm:$0xff]  }
 0x136   :  { %3291 = vmatpush1.bf16.msra.mxu0 %v5913_v13  ;;  %v6556_v22 = vadd.f32 %v4980_v21, %v4979_v17  ;;  %v4982_v23 = vpop.f32.mrb[6].mxu1  ;;  %v5981_v17 = vld [vmem:[#allocation5 + $0x6f4] ss:$12 sps:$4 sm:$0xff]  }
 0x137   :  { %3373 = vmatprep.subr.bf16.mxu0 %v5920_v14  ;;  %v4983_v25 = vpop.f32.mrb[7].mxu1  ;;  %v601_v14 = vlaneseq }
 0x138   :  { %5228 = vmatpush3.bf16.msra.mxu1 %v5967_v16  ;;  %v6561_v26 = vadd.f32 %v4983_v25, %v4982_v23  ;;  %v5974_v16 = vld [vmem:[#allocation5 + $0x6d8] ss:$12 sps:$4 sm:$0xff]   ;;  %v6616_v25 = vld [vmem:[#allocation2 + $0x90] ss:$56 sps:$4 sm:$0xff]  }
 0x139   :  { %3293 = vmatmul.mubr.bf16.vlgmr.msra.gmra.mrb[0].mxu0 %v6519_v35  ;;  %5277 = vmatprep.subr.bf16.mxu1 %v6010_v18  ;;  %v5979_v18 = vld [vmem:[#allocation5 + $0x6f0] ss:$12 sps:$4 sm:$0xff]   ;;  %v6614_v21 = vshrl.u32 %v601_v14, 7 }
 0x13a   :  { %4068 = vmatmul.mubr.bf16.gmra.mrb[112].mxu1 %v6554_v19  ;;  %3374 = vmatpush1.bf16.msra.mxu0 %v5918_v15  ;;  %v6015_v15 = vld [vmem:[#allocation5 + $0x860] ss:$12 sps:$4 sm:$0xff]  }
 0x13b   :  { %3375 = vmatprep.subr.bf16.mxu0 %v5926_v20  ;;  %3302 = vmatprep.mubr.bf16.mxu0 %v6521_v38  ;;  %v6016_v20 = vld [vmem:[#allocation5 + $0x7a0] ss:$12 sps:$4 sm:$0xff]  }
 0x13c   :  { %4075 = vmatprep.mubr.bf16.mxu1 %v6558_v24  ;;  %v4985_v30 = vpop.f32.mrb[8].mxu1 }
 0x13d   :  { %v4986_v33 = vpop.f32.mrb[9].mxu1 }
 0x13e   :  { %3376 = vmatpush1.bf16.msra.mxu0 %v5924_v27  ;;  %v6568_v34 = vadd.f32 %v4986_v33, %v4985_v30  ;;  %v4988_v35 = vpop.f32.mrb[10].mxu1  ;;  %v5985_v27 = vld [vmem:[#allocation5 + $0x70c] ss:$12 sps:$4 sm:$0xff]  }
 0x13f   :  { %3377 = vmatprep.subr.bf16.mxu0 %v5933_v28  ;;  %v4989_v37 = vpop.f32.mrb[11].mxu1  ;;  %v6024_v33 = vld [vmem:[#allocation5 + $0x7b8] ss:$12 sps:$4 sm:$0xff]  }
 0x140   :  { %v6573_v38 = vadd.f32 %v4989_v37, %v4988_v35  ;;  %v6028_v37 = vld [vmem:[#allocation5 + $0x890] ss:$12 sps:$4 sm:$0xff]  }
 0x141   :  { %3303 = vmatmul.mubr.bf16.gmra.mrb[4].mxu0 %v6526_v46 }
 0x142   :  { %4076 = vmatmul.mubr.bf16.gmra.mrb[116].mxu1 %v6566_v31  ;;  %3378 = vmatpush1.bf16.msra.mxu0 %v5931_v29 }
 0x143   :  { %3379 = vmatprep.subr.bf16.mxu0 %v5939_v32  ;;  %3312 = vmatprep.mubr.bf16.mxu0 %v6528_v48  ;;  %v6620_v32 = vld [vmem:[#allocation2 + $0x104] ss:$56 sps:$4 sm:$0xff]  }
 0x144   :  { %4083 = vmatprep.mubr.bf16.mxu1 %v6570_v36  ;;  %v4991_v42 = vpop.f32.mrb[12].mxu1 }
 0x145   :  { %v4992_v44 = vpop.f32.mrb[13].mxu1 }
 0x146   :  { %3380 = vmatpush1.bf16.msra.mxu0 %v5937_v39  ;;  %v6580_v46 = vadd.f32 %v4992_v44, %v4991_v42  ;;  %v4994_v47 = vpop.f32.mrb[14].mxu1  ;;  %v5983_v39 = vld [vmem:[#allocation5 + $0x708] ss:$12 sps:$4 sm:$0xff]   ;;  %v6029_v42 = vld [vmem:[#allocation5 + $0x7d0] ss:$12 sps:$4 sm:$0xff]  }
 0x147   :  { %3381 = vmatprep.subr.bf16.mxu0 %v5946_v40  ;;  %v4995_v50 = vpop.f32.mrb[15].mxu1  ;;  %v5990_v40 = vld [vmem:[#allocation5 + $0x724] ss:$12 sps:$4 sm:$0xff]  }
 0x148   :  { %v6585_v48 = vadd.f32 %v4995_v50, %v4994_v47  ;;  %v599_v47 = vld [vmem:[#allocation7] sm:$0x7] }
 0x149   :  { %3313 = vmatmul.mubr.bf16.gmra.mrb[8].mxu0 %v6534_v56  ;;  %v5965_v56 = vld [vmem:[#allocation5 + $0x6ac] ss:$12 sps:$4 sm:$0xff]  }
 0x14a   :  { %4084 = vmatmul.mubr.bf16.gmra.mrb[120].mxu1 %v6578_v43  ;;  %3382 = vmatpush1.bf16.msra.mxu0 %v5944_v41  ;;  %v611_v41 = vsub.s32 2, %v6614_v21 }
 0x14b   :  { %3383 = vmatprep.subr.bf16.mxu0 %v5952_v45  ;;  %3322 = vmatprep.mubr.bf16.mxu0 %v6536_v58  ;;  %v6036_v45 = vld [vmem:[#allocation5 + $0x8a8] ss:$12 sps:$4 sm:$0xff]  }
 0x14c   :  { %4091 = vmatprep.mubr.bf16.mxu1 %v6582_v49  ;;  %v4997_v55 = vpop.f32.mrb[16].mxu1 }
 0x14d   :  { %v4998_v57 = vpop.f32.mrb[17].mxu1 }
 0x14e   :  { %3384 = vmatpush1.bf16.msra.mxu0 %v5950_v51  ;;  %v6592_v59 = vadd.f32 %v4998_v57, %v4997_v55  ;;  %v5000_v60 = vpop.f32.mrb[18].mxu1  ;;  %v6629_v51 = vld [vmem:[#allocation2 + $0x100] ss:$56 sps:$4 sm:$0xff]   ;;  %v6633_v57 = vld [vmem:[#allocation2 + $0x174] ss:$56 sps:$4 sm:$0xff]  }
 0x14f   :  { %3385 = vmatprep.subr.bf16.mxu0 %v5959_v52  ;;  %v5001_v62 = vpop.f32.mrb[19].mxu1  ;;  %v5994_v52 = vld [vmem:[#allocation5 + $0x73c] ss:$12 sps:$4 sm:$0xff]  }
 0x150   :  { %v6597_v58 = vadd.f32 %v5001_v62, %v5000_v60  ;;  %v6041_v62 = vld [vmem:[#allocation5 + $0x8c0] ss:$12 sps:$4 sm:$0xff]  }
 0x151   :  { %3323 = vmatmul.mubr.bf16.gmra.mrb[12].mxu0 %v6542_v0  ;;  %v6604_v0 = vld [vmem:[#allocation2 + $0x94] ss:$56 sps:$4 sm:$0xff]  }
 0x152   :  { %4092 = vmatmul.mubr.bf16.gmra.mrb[124].mxu1 %v6590_v54  ;;  %3386 = vmatpush1.bf16.msra.mxu0 %v5957_v53 }
 0x153   :  { %3387 = vmatprep.subr.bf16.mxu0 %v5965_v56  ;;  %3332 = vmatprep.mubr.bf16.mxu0 %v6544_v5  ;;  %v6037_v56 = vld [vmem:[#allocation5 + $0x7e8] ss:$12 sps:$4 sm:$0xff]  }
 0x154   :  { %4132 = vmatprep.mubr.bf16.mxu1 %v6594_v61  ;;  %v5003_v4 = vpop.f32.mrb[20].mxu1 }
 0x155   :  { %v5004_v8 = vpop.f32.mrb[21].mxu1 }
 0x156   :  { %3388 = vmatpush1.bf16.msra.mxu0 %v5963_v63  ;;  %v6606_v9 = vadd.f32 %v5004_v8, %v5003_v4  ;;  %v5006_v10 = vpop.f32.mrb[22].mxu1  ;;  %v5992_v63 = vld [vmem:[#allocation5 + $0x738] ss:$12 sps:$4 sm:$0xff]   ;;  %v5997_v4 = vld [vmem:[#allocation5 + $0x750] ss:$12 sps:$4 sm:$0xff]  }
 0x157   :  { %3389 = vmatprep.subr.bf16.mxu0 %v5973_v1  ;;  %v5007_v13 = vpop.f32.mrb[23].mxu1  ;;  %v6639_v1 = vrot.slane %v599_v47, %v611_v41  ;;  %v6049_v8 = vld [vmem:[#allocation5 + $0x8d8] ss:$12 sps:$4 sm:$0xff]  }
 0x158   :  { %v6609_v5 = vadd.f32 %v5007_v13, %v5006_v10 }
 0x159   :  { %3333 = vmatmul.mubr.bf16.gmra.mrb[16].mxu0 %v6554_v19  ;;  %v6023_v19 = vld [vmem:[#allocation5 + $0x878] ss:$12 sps:$4 sm:$0xff]   ;;  %v3747_v13 = vadd.f32 %v6546_v7, %v6639_v1  ;;  %v6001_v7 = vld [vmem:[#allocation5 + $0x768] ss:$12 sps:$4 sm:$0xff]  }
 0x15a   :  { %4133 = vmatmul.mubr.bf16.vlgmr.msra.gmra.mrb[128].mxu1 %v6601_v2  ;;  %3390 = vmatpush1.bf16.msra.mxu0 %v5971_v3  ;;  %v5999_v3 = vld [vmem:[#allocation5 + $0x754] ss:$12 sps:$4 sm:$0xff]  }
 0x15b   :  { %3391 = vmatprep.subr.bf16.mxu0 %v5976_v6  ;;  %3342 = vmatprep.mubr.bf16.mxu0 %v6558_v24  ;;  %v6042_v6 = vld [vmem:[#allocation5 + $0x800] ss:$12 sps:$4 sm:$0xff]  }
 0x15c   :  { %4140 = vmatprep.mubr.bf16.mxu1 %v6604_v0  ;;  %5278 = vmatpush3.bf16.msra.mxu1 %v6011_v12  ;;  %v5009_v23 = vpop.f32.mrb[24].mxu1  ;;  %v6643_v12 = vld [vmem:[#allocation2 + $0x170] ss:$56 sps:$4 sm:$0xff]  }
 0x15d   :  { %5279 = vmatprep.subr.bf16.mxu1 %v6015_v15  ;;  %v5010_v28 = vpop.f32.mrb[25].mxu1 }
 0x15e   :  { %3392 = vmatpush1.bf16.msra.mxu0 %v5974_v16  ;;  %v6618_v29 = vadd.f32 %v5010_v28, %v5009_v23  ;;  %v5012_v24 = vpop.f32.mrb[26].mxu1 }
 0x15f   :  { %3393 = vmatprep.subr.bf16.mxu0 %v5981_v17  ;;  %v5013_v30 = vpop.f32.mrb[27].mxu1  ;;  %v6647_v17 = vld [vmem:[#allocation2 + $0x1e4] ss:$56 sps:$4 sm:$0xff]  }
 0x160   :  { %5280 = vmatpush3.bf16.msra.mxu1 %v6016_v20  ;;  %v6623_v35 = vadd.f32 %v5013_v30, %v5012_v24  ;;  %v3750_v20 = vadd.f32 %v6549_v11, %v6639_v1  ;;  %v6008_v24 = vld [vmem:[#allocation5 + $0x784] ss:$12 sps:$4 sm:$0xff]  }
 0x161   :  { %3343 = vmatmul.mubr.bf16.gmra.mrb[20].mxu0 %v6566_v31  ;;  %5281 = vmatprep.subr.bf16.mxu1 %v6023_v19  ;;  %v5988_v31 = vld [vmem:[#allocation5 + $0x720] ss:$12 sps:$4 sm:$0xff]   ;;  %v6055_v11 = vld [vmem:[#allocation5 + $0x830] ss:$12 sps:$4 sm:$0xff]  }
 0x162   :  { %4141 = vmatmul.mubr.bf16.gmra.mrb[132].mxu1 %v6616_v25  ;;  %3394 = vmatpush1.bf16.msra.mxu0 %v5979_v18  ;;  %v6050_v18 = vld [vmem:[#allocation5 + $0x818] ss:$12 sps:$4 sm:$0xff]  }
 0x163   :  { %3395 = vmatprep.subr.bf16.mxu0 %v5985_v27  ;;  %3352 = vmatprep.mubr.bf16.mxu0 %v6570_v36  ;;  %v6054_v27 = vld [vmem:[#allocation5 + $0x8f0] ss:$12 sps:$4 sm:$0xff]  }
 0x164   :  { %4148 = vmatprep.mubr.bf16.mxu1 %v6620_v32  ;;  %5282 = vmatpush3.bf16.msra.mxu1 %v6024_v33  ;;  %v5015_v44 = vpop.f32.mrb[28].mxu1  ;;  %v6006_v33 = vld [vmem:[#allocation5 + $0x780] ss:$12 sps:$4 sm:$0xff]  }
 0x165   :  { %5283 = vmatprep.subr.bf16.mxu1 %v6028_v37  ;;  %v5016_v50 = vpop.f32.mrb[29].mxu1  ;;  %v6659_v37 = vld [vmem:[#allocation2 + $0x1e0] ss:$56 sps:$4 sm:$0xff]  }
 0x166   :  { %3396 = vmatpush1.bf16.msra.mxu0 %v5983_v39  ;;  %v6631_v53 = vadd.f32 %v5016_v50, %v5015_v44  ;;  %v5018_v36 = vpop.f32.mrb[30].mxu1  ;;  %v3755_v39 = vadd.f32 %v6556_v22, %v6639_v1  ;;  %v6012_v44 = vld [vmem:[#allocation5 + $0x798] ss:$12 sps:$4 sm:$0xff]  }
 0x167   :  { %3397 = vmatprep.subr.bf16.mxu0 %v5990_v40  ;;  %v5019_v55 = vpop.f32.mrb[31].mxu1 }
 0x168   :  { %5284 = vmatpush3.bf16.msra.mxu1 %v6029_v42  ;;  %v6636_v60 = vadd.f32 %v5019_v55, %v5018_v36  ;;  %v6014_v42 = vld [vmem:[#allocation5 + $0x79c] ss:$12 sps:$4 sm:$0xff]   ;;  %v6021_v36 = vld [vmem:[#allocation5 + $0x7b4] ss:$12 sps:$4 sm:$0xff]  }
 0x169   :  { %3353 = vmatmul.mubr.bf16.gmra.mrb[24].mxu0 %v6578_v43  ;;  %5285 = vmatprep.subr.bf16.mxu1 %v6036_v45  ;;  %v3758_v45 = vadd.f32 %v6561_v26, %v6639_v1 }
 0x16a   :  { %4149 = vmatmul.mubr.bf16.gmra.mrb[136].mxu1 %v6629_v51  ;;  %3398 = vmatpush1.bf16.msra.mxu0 %v5988_v31  ;;  %v6663_v31 = vld [vmem:[#allocation2 + $0x254] ss:$56 sps:$4 sm:$0xff]  }
 0x16b   :  { %3399 = vmatprep.subr.bf16.mxu0 %v5994_v52  ;;  %3362 = vmatprep.mubr.bf16.mxu0 %v6582_v49  ;;  %v6003_v49 = vld [vmem:[#allocation5 + $0x76c] ss:$12 sps:$4 sm:$0xff]   ;;  %v6278_v52 = vmov 0  }
 0x16c   :  { %4156 = vmatprep.mubr.bf16.mxu1 %v6633_v57  ;;  %5286 = vmatpush3.bf16.msra.mxu1 %v6037_v56  ;;  %v5037_v43 = vpop.f32.mrb[32].mxu1  ;;  %v6019_v56 = vld [vmem:[#allocation5 + $0x7b0] ss:$12 sps:$4 sm:$0xff]  }
 0x16d   :  { %5287 = vmatprep.subr.bf16.mxu1 %v6041_v62  ;;  %v5038_v10 = vpop.f32.mrb[33].mxu1  ;;  %v6676_v62 = vld [vmem:[#allocation2 + $0x250] ss:$56 sps:$4 sm:$0xff]  }
 0x16e   :  { %3400 = vmatpush1.bf16.msra.mxu0 %v5992_v63  ;;  %v5039_v14 = vadd.f32 %v5038_v10, %v5037_v43  ;;  %v5040_v15 = vpop.f32.mrb[34].mxu1  ;;  %v6680_v43 = vld [vmem:[#allocation2 + $0x2c4] ss:$56 sps:$4 sm:$0xff]  }
 0x16f   :  { %3401 = vmatprep.subr.bf16.mxu0 %v5999_v3  ;;  %v5041_v16 = vpop.f32.mrb[35].mxu1 }
 0x170   :  { %5288 = vmatpush3.bf16.msra.mxu1 %v6042_v6  ;;  %v6651_v23 = vadd.f32 %v5039_v14, %v3747_v13  ;;  %v5042_v19 = vadd.f32 %v5041_v16, %v5040_v15  ;;  %v6025_v13 = vld [vmem:[#allocation5 + $0x7c8] ss:$12 sps:$4 sm:$0xff]   ;;  %v6034_v14 = vld [vmem:[#allocation5 + $0x7e4] ss:$12 sps:$4 sm:$0xff]   ;;  %v6692_v16 = vld [vmem:[#allocation2 + $0x2c0] ss:$56 sps:$4 sm:$0xff]  }
 0x171   :  { %3363 = vmatmul.mubr.bf16.gmra.mrb[28].mxu0 %v6590_v54  ;;  %5289 = vmatprep.subr.bf16.mxu1 %v6049_v8 }
 0x172   :  { %4157 = vmatmul.mubr.bf16.gmra.mrb[140].mxu1 %v6643_v12  ;;  %3402 = vmatpush1.bf16.msra.mxu0 %v5997_v4  ;;  %v6655_v28 = vadd.f32 %v5042_v19, %v3750_v20  ;;  %v6027_v4 = vld [vmem:[#allocation5 + $0x7cc] ss:$12 sps:$4 sm:$0xff]   ;;  %v6040_v19 = vld [vmem:[#allocation5 + $0x7fc] ss:$12 sps:$4 sm:$0xff]  }
 0x173   :  { %3403 = vmatprep.subr.bf16.mxu0 %v6003_v49  ;;  %3405 = vmatprep.mubr.bf16.mxu0 %v6594_v61 }
 0x174   :  { %4164 = vmatprep.mubr.bf16.mxu1 %v6647_v17  ;;  %5290 = vmatpush3.bf16.msra.mxu1 %v6050_v18 }
 0x175   :  { %v5043_v30 = vpop.f32.mrb[36].mxu1  ;;  %5291 = vmatprep.subr.bf16.mxu1 %v6054_v27 }
 0x176   :  { %v5044_v54 = vpop.f32.mrb[37].mxu1  ;;  %3404 = vmatpush1.bf16.msra.mxu0 %v6001_v7  ;;  %v6696_v7 = vld [vmem:[#allocation2 + $0x334] ss:$56 sps:$4 sm:$0xff]  }
 0x177   :  { %v5045_v40 = vadd.f32 %v5044_v54, %v5043_v30  ;;  %v5046_v41 = vpop.f32.mrb[38].mxu1  ;;  %3486 = vmatprep.subr.bf16.mxu0 %v6008_v24  ;;  %v6038_v30 = vld [vmem:[#allocation5 + $0x7f8] ss:$12 sps:$4 sm:$0xff]  }
 0x178   :  { %v5047_v61 = vpop.f32.mrb[39].mxu1  ;;  %5292 = vmatpush3.bf16.msra.mxu1 %v6055_v11 }
 0x179   :  { %v6667_v47 = vadd.f32 %v5045_v40, %v3755_v39  ;;  %v5048_v50 = vadd.f32 %v5047_v61, %v5046_v41  ;;  %3406 = vmatmul.mubr.bf16.vlgmr.msra.gmra.mrb[0].mxu0 %v6601_v2  ;;  %4294 = vmatprep.subr.bf16.mxu1 %v6278_v52  ;;  %v3763_v2 = vadd.f32 %v6568_v34, %v6639_v1  ;;  %v6708_v40 = vld [vmem:[#allocation2 + $0x330] ss:$56 sps:$4 sm:$0xff]   ;;  %v6053_v61 = vld [vmem:[#allocation5 + $0x82c] ss:$12 sps:$4 sm:$0xff]  }
 0x17a   :  { %4165 = vmatmul.mubr.bf16.gmra.mrb[144].mxu1 %v6659_v37  ;;  %3487 = vmatpush1.bf16.msra.mxu0 %v6006_v33  ;;  %v6047_v33 = vld [vmem:[#allocation5 + $0x814] ss:$12 sps:$4 sm:$0xff]  }
 0x17b   :  { %v6672_v22 = vadd.f32 %v5048_v50, %v3758_v45  ;;  %3488 = vmatprep.subr.bf16.mxu0 %v6014_v42  ;;  %3415 = vmatprep.mubr.bf16.mxu0 %v6604_v0  ;;  %v3766_v0 = vadd.f32 %v6573_v38, %v6639_v1  ;;  %v6032_v38 = vld [vmem:[#allocation5 + $0x7e0] ss:$12 sps:$4 sm:$0xff]  }
 0x17c   :  { %4172 = vmatprep.mubr.bf16.mxu1 %v6663_v31  ;;  %v6712_v45 = vld [vmem:[#allocation2 + $0x2c] ss:$56 sps:$4 sm:$0xff]  }
 0x17d   :  { %v5049_v26 = vpop.f32.mrb[40].mxu1 }
 0x17e   :  { %v5050_v55 = vpop.f32.mrb[41].mxu1  ;;  %3489 = vmatpush1.bf16.msra.mxu0 %v6012_v44 }
 0x17f   :  { %v5051_v63 = vadd.f32 %v5050_v55, %v5049_v26  ;;  %v5052_v3 = vpop.f32.mrb[42].mxu1  ;;  %3490 = vmatprep.subr.bf16.mxu0 %v6021_v36  ;;  %v6051_v26 = vld [vmem:[#allocation5 + $0x828] ss:$12 sps:$4 sm:$0xff]   ;;  %v6061_v55 = vld [vmem:[#allocation5 + $0x844] ss:$12 sps:$4 sm:$0xff]  }
 0x180   :  { %v5053_v6 = vpop.f32.mrb[43].mxu1 }
 0x181   :  { %v6684_v8 = vadd.f32 %v5051_v63, %v3763_v2  ;;  %v5054_v10 = vadd.f32 %v5053_v6, %v5052_v3  ;;  %3416 = vmatmul.mubr.bf16.gmra.mrb[4].mxu0 %v6616_v25  ;;  %v3771_v25 = vadd.f32 %v6580_v46, %v6639_v1  ;;  %v6059_v63 = vld [vmem:[#allocation5 + $0x840] ss:$12 sps:$4 sm:$0xff]   ;;  %v6064_v6 = vld [vmem:[#allocation5 + $0x85c] ss:$12 sps:$4 sm:$0xff]  }
 0x182   :  { %4173 = vmatmul.mubr.bf16.gmra.mrb[148].mxu1 %v6676_v62  ;;  %3491 = vmatpush1.bf16.msra.mxu0 %v6019_v56 }
 0x183   :  { %v6688_v34 = vadd.f32 %v5054_v10, %v3766_v0  ;;  %3492 = vmatprep.subr.bf16.mxu0 %v6027_v4  ;;  %3425 = vmatprep.mubr.bf16.mxu0 %v6620_v32  ;;  %v3774_v32 = vadd.f32 %v6585_v48, %v6639_v1  ;;  %v6045_v48 = vld [vmem:[#allocation5 + $0x810] ss:$12 sps:$4 sm:$0xff]  }
 0x184   :  { %4180 = vmatprep.mubr.bf16.mxu1 %v6680_v43  ;;  %v6728_v10 = vld [vmem:[#allocation2 + $0x9c] ss:$56 sps:$4 sm:$0xff]  }
 0x185   :  { %v5055_v15 = vpop.f32.mrb[44].mxu1 }
 0x186   :  { %v5056_v49 = vpop.f32.mrb[45].mxu1  ;;  %3493 = vmatpush1.bf16.msra.mxu0 %v6025_v13  ;;  %v3790_v13 = vadd.f32 %v6609_v5, %v6639_v1 }
 0x187   :  { %v5057_v18 = vadd.f32 %v5056_v49, %v5055_v15  ;;  %v5058_v20 = vpop.f32.mrb[46].mxu1  ;;  %3494 = vmatprep.subr.bf16.mxu0 %v6034_v14 }
 0x188   :  { %v5059_v27 = vpop.f32.mrb[47].mxu1 }
 0x189   :  { %v6700_v24 = vadd.f32 %v5057_v18, %v3771_v25  ;;  %v5060_v11 = vadd.f32 %v5059_v27, %v5058_v20  ;;  %3426 = vmatmul.mubr.bf16.gmra.mrb[8].mxu0 %v6629_v51  ;;  %v3779_v51 = vadd.f32 %v6592_v59, %v6639_v1  ;;  %v6084_v25 = vld [vmem:[#allocation5 + $0x920] ss:$12 sps:$4 sm:$0xff]   ;;  %v6741_v20 = vld [vmem:[#allocation2 + $0x98] ss:$56 sps:$4 sm:$0xff]  }
 0x18a   :  { %4181 = vmatmul.mubr.bf16.gmra.mrb[152].mxu1 %v6692_v16  ;;  %3495 = vmatpush1.bf16.msra.mxu0 %v6032_v38  ;;  %v6069_v38 = vld [vmem:[#allocation5 + $0x874] ss:$12 sps:$4 sm:$0xff]  }
 0x18b   :  { %v6704_v46 = vadd.f32 %v5060_v11, %v3774_v32  ;;  %3496 = vmatprep.subr.bf16.mxu0 %v6040_v19  ;;  %3435 = vmatprep.mubr.bf16.mxu0 %v6633_v57  ;;  %v3782_v57 = vadd.f32 %v6597_v58, %v6639_v1  ;;  %v6724_v58 = vld [vmem:[#allocation2 + $0x28] ss:$56 sps:$4 sm:$0xff]   ;;  %v3795_v19 = vadd.f32 %v6618_v29, %v6639_v1 }
 0x18c   :  { %4188 = vmatprep.mubr.bf16.mxu1 %v6696_v7  ;;  %v6071_v29 = vld [vmem:[#allocation5 + $0x888] ss:$12 sps:$4 sm:$0xff]  }
 0x18d   :  { %v5061_v54 = vpop.f32.mrb[48].mxu1 }
 0x18e   :  { %v5062_v39 = vpop.f32.mrb[49].mxu1  ;;  %3497 = vmatpush1.bf16.msra.mxu0 %v6038_v30  ;;  %v6745_v30 = vld [vmem:[#allocation2 + $0x10c] ss:$56 sps:$4 sm:$0xff]  }
 0x18f   :  { %v5063_v41 = vadd.f32 %v5062_v39, %v5061_v54  ;;  %v5064_v42 = vpop.f32.mrb[50].mxu1  ;;  %3498 = vmatprep.subr.bf16.mxu0 %v6047_v33  ;;  %v6091_v33 = vld [vmem:[#allocation5 + $0x938] ss:$12 sps:$4 sm:$0xff]   ;;  %v3798_v54 = vadd.f32 %v6623_v35, %v6639_v1  ;;  %v6095_v35 = vld [vmem:[#allocation5 + $0x950] ss:$12 sps:$4 sm:$0xff]  }
 0x190   :  { %v5065_v44 = vpop.f32.mrb[51].mxu1 }
 0x191   :  { %v6716_v50 = vadd.f32 %v5063_v41, %v3779_v51  ;;  %v5066_v36 = vadd.f32 %v5065_v44, %v5064_v42  ;;  %3436 = vmatmul.mubr.bf16.gmra.mrb[12].mxu0 %v6643_v12  ;;  %v3787_v12 = vadd.f32 %v6606_v9, %v6639_v1  ;;  %v6062_v9 = vld [vmem:[#allocation5 + $0x858] ss:$12 sps:$4 sm:$0xff]   ;;  %v6759_v44 = vld [vmem:[#allocation2 + $0x108] ss:$56 sps:$4 sm:$0xff]  }
 0x192   :  { %4189 = vmatmul.mubr.bf16.gmra.mrb[156].mxu1 %v6708_v40  ;;  %3499 = vmatpush1.bf16.msra.mxu0 %v6045_v48  ;;  %v6078_v41 = vld [vmem:[#allocation5 + $0x8a4] ss:$12 sps:$4 sm:$0xff]  }
 0x193   :  { %v6720_v59 = vadd.f32 %v5066_v36, %v3782_v57  ;;  %3500 = vmatprep.subr.bf16.mxu0 %v6053_v61  ;;  %3445 = vmatprep.mubr.bf16.mxu0 %v6647_v17  ;;  %v6080_v17 = vld [vmem:[#allocation5 + $0x908] ss:$12 sps:$4 sm:$0xff]   ;;  %v6076_v61 = vld [vmem:[#allocation5 + $0x8a0] ss:$12 sps:$4 sm:$0xff]   ;;  %v3803_v57 = vadd.f32 %v6631_v53, %v6639_v1  ;;  %v6081_v53 = vld [vmem:[#allocation5 + $0x8b8] ss:$12 sps:$4 sm:$0xff]  }
 0x194   :  { %4229 = vmatprep.mubr.bf16.mxu1 %v6712_v45 }
 0x195   :  { %v5067_v56 = vpop.f32.mrb[52].mxu1 }
 0x196   :  { %v5068_v2 = vpop.f32.mrb[53].mxu1  ;;  %3501 = vmatpush1.bf16.msra.mxu0 %v6051_v26 }
 0x197   :  { %v5069_v3 = vadd.f32 %v5068_v2, %v5067_v56  ;;  %v5070_v4 = vpop.f32.mrb[54].mxu1  ;;  %3502 = vmatprep.subr.bf16.mxu0 %v6061_v55  ;;  %v6763_v56 = vld [vmem:[#allocation2 + $0x17c] ss:$56 sps:$4 sm:$0xff]  }
 0x198   :  { %v5071_v0 = vpop.f32.mrb[55].mxu1  ;;  %v6102_v2 = vld [vmem:[#allocation5 + $0x968] ss:$12 sps:$4 sm:$0xff]  }
 0x199   :  { %v6732_v14 = vadd.f32 %v5069_v3, %v3787_v12  ;;  %v5072_v15 = vadd.f32 %v5071_v0, %v5070_v4  ;;  %3446 = vmatmul.mubr.bf16.gmra.mrb[16].mxu0 %v6659_v37  ;;  %v6067_v37 = vld [vmem:[#allocation5 + $0x870] ss:$12 sps:$4 sm:$0xff]  }
 0x19a   :  { %4230 = vmatmul.mubr.bf16.vlgmr.msra.gmra.mrb[160].mxu1 %v6724_v58  ;;  %3503 = vmatpush1.bf16.msra.mxu0 %v6059_v63  ;;  %v3806_v63 = vadd.f32 %v6636_v60, %v6639_v1  ;;  %v6103_v60 = vld [vmem:[#allocation5 + $0x980] ss:$12 sps:$4 sm:$0xff]   ;;  %v6087_v0 = vld [vmem:[#allocation5 + $0x8d0] ss:$12 sps:$4 sm:$0xff]  }
 0x19b   :  { %v6736_v49 = vadd.f32 %v5072_v15, %v3790_v13  ;;  %3504 = vmatprep.subr.bf16.mxu0 %v6064_v6  ;;  %3455 = vmatprep.mubr.bf16.mxu0 %v6663_v31  ;;  %v6073_v31 = vld [vmem:[#allocation5 + $0x88c] ss:$12 sps:$4 sm:$0xff]   ;;  %v6089_v6 = vld [vmem:[#allocation5 + $0x8d4] ss:$12 sps:$4 sm:$0xff]  }
 0x19c   :  { %4237 = vmatprep.mubr.bf16.mxu1 %v6728_v10  ;;  %4295 = vmatpush1.bf16.msra.mxu1 %v6080_v17  ;;  %v6777_v17 = vld [vmem:[#allocation2 + $0x178] ss:$56 sps:$4 sm:$0xff]  }
 0x19d   :  { %v5073_v5 = vpop.f32.mrb[56].mxu1  ;;  %4296 = vmatprep.subr.bf16.mxu1 %v6278_v52 }
 0x19e   :  { %v5074_v18 = vpop.f32.mrb[57].mxu1  ;;  %3505 = vmatpush1.bf16.msra.mxu0 %v6062_v9  ;;  %v6094_v9 = vld [vmem:[#allocation5 + $0x8ec] ss:$12 sps:$4 sm:$0xff]  }
 0x19f   :  { %v5075_v27 = vadd.f32 %v5074_v18, %v5073_v5  ;;  %v5076_v32 = vpop.f32.mrb[58].mxu1  ;;  %3506 = vmatprep.subr.bf16.mxu0 %v6069_v38 }
 0x1a0   :  { %v5077_v11 = vpop.f32.mrb[59].mxu1  ;;  %4297 = vmatpush1.bf16.msra.mxu1 %v6084_v25  ;;  %v6779_v25 = vld [vmem:[#allocation2 + $0x1ec] ss:$56 sps:$4 sm:$0xff]  }
 0x1a1   :  { %v6749_v39 = vadd.f32 %v5075_v27, %v3795_v19  ;;  %v5078_v48 = vadd.f32 %v5077_v11, %v5076_v32  ;;  %3456 = vmatmul.mubr.bf16.gmra.mrb[20].mxu0 %v6676_v62  ;;  %4298 = vmatprep.subr.bf16.mxu1 %v6278_v52  ;;  %v6100_v27 = vld [vmem:[#allocation5 + $0x904] ss:$12 sps:$4 sm:$0xff]   ;;  %v6793_v11 = vld [vmem:[#allocation2 + $0x1e8] ss:$56 sps:$4 sm:$0xff]  }
 0x1a2   :  { %4238 = vmatmul.mubr.bf16.gmra.mrb[164].mxu1 %v6741_v20  ;;  %3507 = vmatpush1.bf16.msra.mxu0 %v6067_v37  ;;  %v6092_v37 = vld [vmem:[#allocation5 + $0x8e8] ss:$12 sps:$4 sm:$0xff]  }
 0x1a3   :  { %v6754_v51 = vadd.f32 %v5078_v48, %v3798_v54  ;;  %3508 = vmatprep.subr.bf16.mxu0 %v6073_v31  ;;  %3465 = vmatprep.mubr.bf16.mxu0 %v6680_v43  ;;  %v6083_v43 = vld [vmem:[#allocation5 + $0x8bc] ss:$12 sps:$4 sm:$0xff]   ;;  %v6098_v31 = vld [vmem:[#allocation5 + $0x900] ss:$12 sps:$4 sm:$0xff]  }
 0x1a4   :  { %4245 = vmatprep.mubr.bf16.mxu1 %v6745_v30  ;;  %4299 = vmatpush1.bf16.msra.mxu1 %v6091_v33 }
 0x1a5   :  { %v5079_v42 = vpop.f32.mrb[60].mxu1  ;;  %4300 = vmatprep.subr.bf16.mxu1 %v6278_v52 }
 0x1a6   :  { %v5080_v62 = vpop.f32.mrb[61].mxu1  ;;  %3509 = vmatpush1.bf16.msra.mxu0 %v6071_v29  ;;  %v6795_v29 = vld [vmem:[#allocation2 + $0x25c] ss:$56 sps:$4 sm:$0xff]  }
 0x1a7   :  { %v5081_v36 = vadd.f32 %v5080_v62, %v5079_v42  ;;  %v5082_v26 = vpop.f32.mrb[62].mxu1  ;;  %3510 = vmatprep.subr.bf16.mxu0 %v6078_v41  ;;  %v6104_v42 = vld [vmem:[#allocation5 + $0x918] ss:$12 sps:$4 sm:$0xff]  }
 0x1a8   :  { %v5083_v55 = vpop.f32.mrb[63].mxu1  ;;  %4301 = vmatpush1.bf16.msra.mxu1 %v6095_v35 }
 0x1a9   :  { %v6767_v12 = vadd.f32 %v5081_v36, %v3803_v57  ;;  %v5084_v3 = vadd.f32 %v5083_v55, %v5082_v26  ;;  %3466 = vmatmul.mubr.bf16.gmra.mrb[24].mxu0 %v6692_v16  ;;  %4302 = vmatprep.subr.bf16.mxu1 %v6278_v52  ;;  %v6809_v36 = vld [vmem:[#allocation2 + $0x258] ss:$56 sps:$4 sm:$0xff]  }
 0x1aa   :  { %4246 = vmatmul.mubr.bf16.gmra.mrb[168].mxu1 %v6759_v44  ;;  %3511 = vmatpush1.bf16.msra.mxu0 %v6076_v61  ;;  %v6113_v61 = vld [vmem:[#allocation5 + $0x934] ss:$12 sps:$4 sm:$0xff]   ;;  %v6111_v26 = vld [vmem:[#allocation5 + $0x930] ss:$12 sps:$4 sm:$0xff]  }
 0x1ab   :  { %v6772_v4 = vadd.f32 %v5084_v3, %v3806_v63  ;;  %3512 = vmatprep.subr.bf16.mxu0 %v6083_v43  ;;  %3475 = vmatprep.mubr.bf16.mxu0 %v6696_v7  ;;  %v6110_v7 = vld [vmem:[#allocation5 + $0x998] ss:$12 sps:$4 sm:$0xff]  }
 0x1ac   :  { %4253 = vmatprep.mubr.bf16.mxu1 %v6763_v56  ;;  %4303 = vmatpush1.bf16.msra.mxu1 %v6102_v2  ;;  %v6129_v63 = vld [vmem:[#allocation5 + $0x9f8] ss:$12 sps:$4 sm:$0xff]  }
 0x1ad   :  { %v5101_v1 = vpop.f32.mrb[64].mxu1  ;;  %4304 = vmatprep.subr.bf16.mxu1 %v6278_v52 }
 0x1ae   :  { %v5102_v16 = vpop.f32.mrb[65].mxu1  ;;  %3513 = vmatpush1.bf16.msra.mxu0 %v6081_v53 }
 0x1af   :  { %v5103_v13 = vadd.f32 %v5102_v16, %v5101_v1  ;;  %v5104_v15 = vpop.f32.mrb[66].mxu1  ;;  %3514 = vmatprep.subr.bf16.mxu0 %v6089_v6  ;;  %v6117_v6 = vld [vmem:[#allocation5 + $0x948] ss:$12 sps:$4 sm:$0xff]   ;;  %v6125_v1 = vld [vmem:[#allocation5 + $0x964] ss:$12 sps:$4 sm:$0xff]  }
 0x1b0   :  { %v5105_v38 = vpop.f32.mrb[67].mxu1  ;;  %4305 = vmatpush1.bf16.msra.mxu1 %v6103_v60 }
 0x1b1   :  { %v6782_v5 = vadd.f32 %v5103_v13, %v6651_v23  ;;  %v5106_v18 = vadd.f32 %v5105_v38, %v5104_v15  ;;  %3476 = vmatmul.mubr.bf16.gmra.mrb[28].mxu0 %v6708_v40  ;;  %4306 = vmatprep.subr.bf16.mxu1 %v6278_v52  ;;  %v6114_v23 = vld [vmem:[#allocation5 + $0x9b0] ss:$12 sps:$4 sm:$0xff]  }
 0x1b2   :  { %4254 = vmatmul.mubr.bf16.gmra.mrb[172].mxu1 %v6777_v17  ;;  %3515 = vmatpush1.bf16.msra.mxu0 %v6087_v0  ;;  %v6825_v0 = vld [vmem:[#allocation2 + $0x2c8] ss:$56 sps:$4 sm:$0xff]  }
 0x1b3   :  { %v6788_v19 = vadd.f32 %v5106_v18, %v6655_v28  ;;  %3516 = vmatprep.subr.bf16.mxu0 %v6094_v9  ;;  %3518 = vmatprep.mubr.bf16.mxu0 %v6712_v45  ;;  %v6106_v28 = vld [vmem:[#allocation5 + $0x91c] ss:$12 sps:$4 sm:$0xff]   ;;  %v6123_v9 = vld [vmem:[#allocation5 + $0x960] ss:$12 sps:$4 sm:$0xff]  }
 0x1b4   :  { %4261 = vmatprep.mubr.bf16.mxu1 %v6779_v25  ;;  %4307 = vmatpush1.bf16.msra.mxu1 %v6110_v7  ;;  %v6121_v45 = vld [vmem:[#allocation5 + $0x9c8] ss:$12 sps:$4 sm:$0xff]  }
 0x1b5   :  { %v5107_v32 = vpop.f32.mrb[68].mxu1  ;;  %4308 = vmatprep.subr.bf16.mxu1 %v6278_v52  ;;  %v6132_v38 = vld [vmem:[#allocation5 + $0x97c] ss:$12 sps:$4 sm:$0xff]  }
 0x1b6   :  { %v5108_v40 = vpop.f32.mrb[69].mxu1  ;;  %3517 = vmatpush1.bf16.msra.mxu0 %v6092_v37  ;;  %v6130_v37 = vld [vmem:[#allocation5 + $0x978] ss:$12 sps:$4 sm:$0xff]  }
 0x1b7   :  { %v5109_v33 = vadd.f32 %v5108_v40, %v5107_v32  ;;  %v5110_v54 = vpop.f32.mrb[70].mxu1  ;;  %3599 = vmatprep.subr.bf16.mxu0 %v6100_v27  ;;  %v6139_v27 = vld [vmem:[#allocation5 + $0x994] ss:$12 sps:$4 sm:$0xff]  }
 0x1b8   :  { %v5111_v48 = vpop.f32.mrb[71].mxu1  ;;  %4309 = vmatpush1.bf16.msra.mxu1 %v6114_v23 }
 0x1b9   :  { %v6798_v41 = vadd.f32 %v5109_v33, %v6667_v47  ;;  %v5112_v35 = vadd.f32 %v5111_v48, %v5110_v54  ;;  %3519 = vmatmul.mubr.bf16.vlgmr.msra.gmra.mrb[0].mxu0 %v6724_v58  ;;  %4310 = vmatprep.subr.bf16.mxu1 %v6278_v52  ;;  %v6122_v47 = vld [vmem:[#allocation5 + $0x9e0] ss:$12 sps:$4 sm:$0xff]   ;;  %v6137_v33 = vld [vmem:[#allocation5 + $0x990] ss:$12 sps:$4 sm:$0xff]  }
 0x1ba   :  { %4262 = vmatmul.mubr.bf16.gmra.mrb[176].mxu1 %v6793_v11  ;;  %3600 = vmatpush1.bf16.msra.mxu0 %v6098_v31 }
 0x1bb   :  { %v6804_v62 = vadd.f32 %v5112_v35, %v6672_v22  ;;  %3601 = vmatprep.subr.bf16.mxu0 %v6106_v28  ;;  %3528 = vmatprep.mubr.bf16.mxu0 %v6728_v10  ;;  %v6811_v22 = vld [vmem:[#allocation2 + $0x2cc] ss:$56 sps:$4 sm:$0xff]  }
 0x1bc   :  { %4269 = vmatprep.mubr.bf16.mxu1 %v6795_v29  ;;  %4311 = vmatpush1.bf16.msra.mxu1 %v6121_v45  ;;  %v6119_v10 = vld [vmem:[#allocation5 + $0x94c] ss:$12 sps:$4 sm:$0xff]   ;;  %v6140_v45 = vld [vmem:[#allocation5 + $0x9a8] ss:$12 sps:$4 sm:$0xff]   ;;  %v6148_v35 = vld [vmem:[#allocation5 + $0x9c4] ss:$12 sps:$4 sm:$0xff]  }
 0x1bd   :  { %v5113_v57 = vpop.f32.mrb[72].mxu1  ;;  %4312 = vmatprep.subr.bf16.mxu1 %v6278_v52 }
 0x1be   :  { %v5114_v58 = vpop.f32.mrb[73].mxu1  ;;  %3602 = vmatpush1.bf16.msra.mxu0 %v6104_v42 }
 0x1bf   :  { %v5115_v43 = vadd.f32 %v5114_v58, %v5113_v57  ;;  %v5116_v55 = vpop.f32.mrb[74].mxu1  ;;  %3603 = vmatprep.subr.bf16.mxu0 %v6113_v61  ;;  %v6854_v61 = vld [vmem:[#allocation2 + $0x30] ss:$56 sps:$4 sm:$0xff]   ;;  %v6856_v57 = vld [vmem:[#allocation2 + $0xa4] ss:$56 sps:$4 sm:$0xff]  }
 0x1c0   :  { %v5117_v2 = vpop.f32.mrb[75].mxu1  ;;  %4313 = vmatpush1.bf16.msra.mxu1 %v6122_v47 }
 0x1c1   :  { %v6814_v3 = vadd.f32 %v5115_v43, %v6684_v8  ;;  %v5118_v53 = vadd.f32 %v5117_v2, %v5116_v55  ;;  %3529 = vmatmul.mubr.bf16.gmra.mrb[4].mxu0 %v6741_v20  ;;  %4314 = vmatprep.subr.bf16.mxu1 %v6278_v52  ;;  %v6133_v8 = vld [vmem:[#allocation5 + $0xa10] ss:$12 sps:$4 sm:$0xff]   ;;  %v6151_v2 = vld [vmem:[#allocation5 + $0x9d8] ss:$12 sps:$4 sm:$0xff]  }
 0x1c2   :  { %4270 = vmatmul.mubr.bf16.gmra.mrb[180].mxu1 %v6809_v36  ;;  %3604 = vmatpush1.bf16.msra.mxu0 %v6111_v26 }
 0x1c3   :  { %v6820_v60 = vadd.f32 %v5118_v53, %v6688_v34  ;;  %3538 = vmatprep.mubr.bf16.mxu0 %v6745_v30  ;;  %4277 = vmatprep.mubr.bf16.mxu1 %v6811_v22  ;;  %v6827_v34 = vld [vmem:[#allocation2 + $0x33c] ss:$56 sps:$4 sm:$0xff]   ;;  %v6869_v53 = vld [vmem:[#allocation2 + $0xa0] ss:$56 sps:$4 sm:$0xff]  }
 0x1c4   :  { %3605 = vmatprep.subr.bf16.mxu0 %v6119_v10  ;;  %4315 = vmatpush1.bf16.msra.mxu1 %v6129_v63  ;;  %v6157_v10 = vld [vmem:[#allocation5 + $0x9f4] ss:$12 sps:$4 sm:$0xff]  }
 0x1c5   :  { %v5119_v16 = vpop.f32.mrb[76].mxu1  ;;  %4316 = vmatprep.subr.bf16.mxu1 %v6278_v52 }
 0x1c6   :  { %v5120_v20 = vpop.f32.mrb[77].mxu1  ;;  %3606 = vmatpush1.bf16.msra.mxu0 %v6117_v6 }
 0x1c7   :  { %v5121_v13 = vadd.f32 %v5120_v20, %v5119_v16  ;;  %v5122_v15 = vpop.f32.mrb[78].mxu1  ;;  %3607 = vmatprep.subr.bf16.mxu0 %v6125_v1  ;;  %v6871_v1 = vld [vmem:[#allocation2 + $0x114] ss:$56 sps:$4 sm:$0xff]  }
 0x1c8   :  { %v5123_v30 = vpop.f32.mrb[79].mxu1  ;;  %4317 = vmatpush1.bf16.msra.mxu1 %v6133_v8 }
 0x1c9   :  { %v6830_v7 = vadd.f32 %v5121_v13, %v6700_v24  ;;  %v5124_v18 = vadd.f32 %v5123_v30, %v5122_v15  ;;  %3539 = vmatmul.mubr.bf16.gmra.mrb[8].mxu0 %v6759_v44  ;;  %v6839_v24 = vld [vmem:[#allocation2 + $0x338] ss:$56 sps:$4 sm:$0xff]   ;;  %v6841_v44 = vld [vmem:[#allocation2 + $0x34] ss:$56 sps:$4 sm:$0xff]  }
 0x1ca   :  { %4278 = vmatmul.mubr.bf16.gmra.mrb[184].mxu1 %v6825_v0  ;;  %3548 = vmatprep.mubr.bf16.mxu0 %v6763_v56  ;;  %v6161_v15 = vld [vmem:[#allocation5 + $0xa08] ss:$12 sps:$4 sm:$0xff]  }
 0x1cb   :  { %v6836_v52 = vadd.f32 %v5124_v18, %v6704_v46  ;;  %3608 = vmatpush1.bf16.msra.mxu0 %v6123_v9  ;;  %4285 = vmatprep.mubr.bf16.mxu1 %v6827_v34  ;;  %v6142_v46 = vld [vmem:[#allocation5 + $0x9ac] ss:$12 sps:$4 sm:$0xff]  }
 0x1cc   :  { %3609 = vmatprep.subr.bf16.mxu0 %v6132_v38 }
 0x1cd   :  { %v5125_v23 = vpop.f32.mrb[80].mxu1 }
 0x1ce   :  { %v5126_v32 = vpop.f32.mrb[81].mxu1 }
 0x1cf   :  { %v5127_v40 = vadd.f32 %v5126_v32, %v5125_v23  ;;  %v5128_v31 = vpop.f32.mrb[82].mxu1  ;;  %3610 = vmatpush1.bf16.msra.mxu0 %v6130_v37 }
 0x1d0   :  { %v5129_v56 = vpop.f32.mrb[83].mxu1  ;;  %3611 = vmatprep.subr.bf16.mxu0 %v6139_v27 }
 0x1d1   :  { %v6844_v54 = vadd.f32 %v5127_v40, %v6716_v50  ;;  %v5130_v28 = vadd.f32 %v5129_v56, %v5128_v31  ;;  %3549 = vmatmul.mubr.bf16.gmra.mrb[12].mxu0 %v6777_v17  ;;  %v6160_v40 = vld [vmem:[#allocation2 + $0x180] ss:$56 sps:$4 sm:$0xff]  }
 0x1d2   :  { %4286 = vmatmul.mubr.bf16.gmra.mrb[188].mxu1 %v6839_v24  ;;  %3558 = vmatprep.mubr.bf16.mxu0 %v6779_v25  ;;  %v6146_v25 = vld [vmem:[#allocation5 + $0x9c0] ss:$12 sps:$4 sm:$0xff]  }
 0x1d3   :  { %v6850_v48 = vadd.f32 %v5130_v28, %v6720_v59  ;;  %4949 = vmatprep.mubr.msk.bf16.mxu1 %vm2896_vm0, %v6841_v44  ;;  %3612 = vmatpush1.bf16.msra.mxu0 %v6137_v33  ;;  %v6153_v59 = vld [vmem:[#allocation5 + $0x9dc] ss:$12 sps:$4 sm:$0xff]  }
 0x1d4   :  { %3613 = vmatprep.subr.bf16.mxu0 %v6142_v46 }
 0x1d5   :  { %v5131_v42 = vpop.f32.mrb[84].mxu1 }
 0x1d6   :  { %v5132_v50 = vpop.f32.mrb[85].mxu1 }
 0x1d7   :  { %v5133_v47 = vadd.f32 %v5132_v50, %v5131_v42  ;;  %v5134_v17 = vpop.f32.mrb[86].mxu1  ;;  %3614 = vmatpush1.bf16.msra.mxu0 %v6140_v45  ;;  %v6166_v45 = vld [vmem:[#allocation2 + $0x1f0] ss:$56 sps:$4 sm:$0xff]   ;;  %v6167_v50 = vld [vmem:[#allocation2 + $0x264] ss:$56 sps:$4 sm:$0xff]  }
 0x1d8   :  { %v5135_v58 = vpop.f32.mrb[87].mxu1  ;;  %3615 = vmatprep.subr.bf16.mxu0 %v6148_v35 }
 0x1d9   :  { %v6859_v26 = vadd.f32 %v5133_v47, %v6732_v14  ;;  %v5136_v43 = vadd.f32 %v5135_v58, %v5134_v17  ;;  %3559 = vmatmul.mubr.bf16.gmra.mrb[16].mxu0 %v6793_v11 }
 0x1da   :  { %4327 = vmatmul.mubr.bf16.vlgmr.msra.gmra.mrb[192].mxu1 %v6854_v61  ;;  %3568 = vmatprep.mubr.bf16.mxu0 %v6795_v29  ;;  %v6155_v29 = vld [vmem:[#allocation5 + $0x9f0] ss:$12 sps:$4 sm:$0xff]  }
 0x1db   :  { %v6865_v55 = vadd.f32 %v5136_v43, %v6736_v49  ;;  %4950 = vmatprep.mubr.msk.bf16.mxu1 %vm2896_vm0, %v6856_v57  ;;  %3616 = vmatpush1.bf16.msra.mxu0 %v6146_v25  ;;  %v6163_v49 = vld [vmem:[#allocation5 + $0xa0c] ss:$12 sps:$4 sm:$0xff]  }
 0x1dc   :  { %3617 = vmatprep.subr.bf16.mxu0 %v6153_v59  ;;  %v6169_v25 = vld [vmem:[#allocation2 + $0x260] ss:$56 sps:$4 sm:$0xff]   ;;  %v6170_v43 = vld [vmem:[#allocation2 + $0x2d4] ss:$56 sps:$4 sm:$0xff]  }
 0x1dd   :  { %v5137_v63 = vpop.f32.mrb[88].mxu1 }
 0x1de   :  { %v5138_v14 = vpop.f32.mrb[89].mxu1 }
 0x1df   :  { %v5139_v6 = vadd.f32 %v5138_v14, %v5137_v63  ;;  %v5140_v11 = vpop.f32.mrb[90].mxu1  ;;  %3618 = vmatpush1.bf16.msra.mxu0 %v6151_v2  ;;  %v6172_v63 = vld [vmem:[#allocation2 + $0x2d0] ss:$56 sps:$4 sm:$0xff]  }
 0x1e0   :  { %v5141_v8 = vpop.f32.mrb[91].mxu1  ;;  %3619 = vmatprep.subr.bf16.mxu0 %v6157_v10 }
 0x1e1   :  { %v6874_v16 = vadd.f32 %v5139_v6, %v6749_v39  ;;  %v5142_v20 = vadd.f32 %v5141_v8, %v5140_v11  ;;  %3569 = vmatmul.mubr.bf16.gmra.mrb[20].mxu0 %v6809_v36  ;;  %v6884_v39 = vld [vmem:[#allocation2 + $0x110] ss:$56 sps:$4 sm:$0xff]   ;;  %v6886_v36 = vld [vmem:[#allocation2 + $0x184] ss:$56 sps:$4 sm:$0xff]  }
 0x1e2   :  { %4335 = vmatmul.mubr.bf16.gmra.mrb[196].mxu1 %v6869_v53  ;;  %3578 = vmatprep.mubr.bf16.mxu0 %v6811_v22  ;;  %v6173_v11 = vld [vmem:[#allocation2 + $0x344] ss:$56 sps:$4 sm:$0xff]  }
 0x1e3   :  { %v6880_v13 = vadd.f32 %v5142_v20, %v6754_v51  ;;  %4951 = vmatprep.mubr.msk.bf16.mxu1 %vm2896_vm0, %v6871_v1  ;;  %3620 = vmatpush1.bf16.msra.mxu0 %v6155_v29 }
 0x1e4   :  { %3621 = vmatprep.subr.bf16.mxu0 %v6163_v49  ;;  %v6175_v49 = vld [vmem:[#allocation2 + $0x340] ss:$56 sps:$4 sm:$0xff]  }
 0x1e5   :  { %v5143_v9 = vpop.f32.mrb[92].mxu1 }
 0x1e6   :  { %v5144_v30 = vpop.f32.mrb[93].mxu1 }
 0x1e7   :  { %v5145_v38 = vadd.f32 %v5144_v30, %v5143_v9  ;;  %v5146_v18 = vpop.f32.mrb[94].mxu1  ;;  %3622 = vmatpush1.bf16.msra.mxu0 %v6161_v15 }
 0x1e8   :  { %v5147_v37 = vpop.f32.mrb[95].mxu1 }
 0x1e9   :  { %v6889_v22 = vadd.f32 %v5145_v38, %v6767_v12  ;;  %v5148_v51 = vadd.f32 %v5147_v37, %v5146_v18  ;;  %3579 = vmatmul.mubr.bf16.gmra.mrb[24].mxu0 %v6825_v0  ;;  %v6164_v12 = vld [vmem:[#allocation2 + $0x1f4] ss:$56 sps:$4 sm:$0xff]  }
 0x1ea   :  { %4343 = vmatmul.mubr.bf16.gmra.mrb[200].mxu1 %v6884_v39  ;;  %3588 = vmatprep.mubr.bf16.mxu0 %v6827_v34 }
 0x1eb   :  { %v6895_v27 = vadd.f32 %v5148_v51, %v6772_v4  ;;  %4952 = vmatprep.mubr.msk.bf16.mxu1 %vm2896_vm0, %v6886_v36 }
 0x1ed   :  { %v5165_v23 = vpop.f32.mrb[96].mxu1 }
 0x1ee   :  { %v5166_v32 = vpop.f32.mrb[97].mxu1 }
 0x1ef   :  { %v5167_v31 = vadd.f32 %v5166_v32, %v5165_v23  ;;  %v5168_v33 = vpop.f32.mrb[98].mxu1 }
 0x1f0   :  { %v5169_v56 = vpop.f32.mrb[99].mxu1 }
 0x1f1   :  { %v6900_v46 = vadd.f32 %v5167_v31, %v6782_v5  ;;  %v5170_v0 = vadd.f32 %v5169_v56, %v5168_v33  ;;  %3589 = vmatmul.mubr.bf16.gmra.mrb[28].mxu0 %v6839_v24 }
 0x1f2   :  { %4351 = vmatmul.mubr.bf16.gmra.mrb[204].mxu1 %v6160_v40  ;;  %4941 = vmatprep.mubr.msk.bf16.mxu0 %vm2896_vm0, %v6841_v44 }
 0x1f3   :  { %v6906_v4 = vadd.f32 %v5170_v0, %v6788_v19  ;;  %4953 = vmatprep.mubr.msk.bf16.mxu1 %vm2896_vm0, %v6164_v12 }
 0x1f5   :  { %v5171_v34 = vpop.f32.mrb[100].mxu1 }
 0x1f6   :  { %v5172_v28 = vpop.f32.mrb[101].mxu1 }
 0x1f7   :  { %v5173_v35 = vadd.f32 %v5172_v28, %v5171_v34  ;;  %v5174_v42 = vpop.f32.mrb[102].mxu1 }
 0x1f8   :  { %v5175_v5 = vpop.f32.mrb[103].mxu1 }
 0x1f9   :  { %v6910_v47 = vadd.f32 %v5173_v35, %v6798_v41  ;;  %v5176_v24 = vadd.f32 %v5175_v5, %v5174_v42  ;;  %3632 = vmatmul.mubr.bf16.vlgmr.msra.gmra.mrb[0].mxu0 %v6854_v61 }
 0x1fa   :  { %4359 = vmatmul.mubr.bf16.gmra.mrb[208].mxu1 %v6166_v45  ;;  %4942 = vmatprep.mubr.msk.bf16.mxu0 %vm2896_vm0, %v6856_v57 }
 0x1fb   :  { %v6916_v19 = vadd.f32 %v5176_v24, %v6804_v62  ;;  %4954 = vmatprep.mubr.msk.bf16.mxu1 %vm2896_vm0, %v6167_v50 }
 0x1fd   :  { %v5177_v44 = vpop.f32.mrb[104].mxu1 }
 0x1fe   :  { %v5178_v17 = vpop.f32.mrb[105].mxu1 }
 0x1ff   :  { %v5179_v58 = vadd.f32 %v5178_v17, %v5177_v44  ;;  %v5180_v59 = vpop.f32.mrb[106].mxu1 }
 0x200   :  { %v5181_v41 = vpop.f32.mrb[107].mxu1 }
 0x201   :  { %v6920_v2 = vadd.f32 %v5179_v58, %v6814_v3  ;;  %v5182_v61 = vadd.f32 %v5181_v41, %v5180_v59  ;;  %3642 = vmatmul.mubr.bf16.gmra.mrb[4].mxu0 %v6869_v53 }
 0x202   :  { %4367 = vmatmul.mubr.bf16.gmra.mrb[212].mxu1 %v6169_v25  ;;  %4943 = vmatprep.mubr.msk.bf16.mxu0 %vm2896_vm0, %v6871_v1 }
 0x203   :  { %v6926_v62 = vadd.f32 %v5182_v61, %v6820_v60  ;;  %4955 = vmatprep.mubr.msk.bf16.mxu1 %vm2896_vm0, %v6170_v43 }
 0x205   :  { %v5183_v57 = vpop.f32.mrb[108].mxu1 }
 0x206   :  { %v5184_v10 = vpop.f32.mrb[109].mxu1 }
 0x207   :  { %v5185_v14 = vadd.f32 %v5184_v10, %v5183_v57  ;;  %v5186_v6 = vpop.f32.mrb[110].mxu1 }
 0x208   :  { %v5187_v3 = vpop.f32.mrb[111].mxu1 }
 0x209   :  { %v6930_v29 = vadd.f32 %v5185_v14, %v6830_v7  ;;  %v5188_v53 = vadd.f32 %v5187_v3, %v5186_v6  ;;  %3652 = vmatmul.mubr.bf16.gmra.mrb[8].mxu0 %v6884_v39 }
 0x20a   :  { %4375 = vmatmul.mubr.bf16.gmra.mrb[216].mxu1 %v6172_v63  ;;  %4944 = vmatprep.mubr.msk.bf16.mxu0 %vm2896_vm0, %v6886_v36 }
 0x20b   :  { %v6936_v60 = vadd.f32 %v5188_v53, %v6836_v52  ;;  %4956 = vmatprep.mubr.msk.bf16.mxu1 %vm2896_vm0, %v6173_v11 }
 0x20d   :  { %v5189_v1 = vpop.f32.mrb[112].mxu1 }
 0x20e   :  { %v5190_v8 = vpop.f32.mrb[113].mxu1 }
 0x20f   :  { %v5191_v20 = vadd.f32 %v5190_v8, %v5189_v1  ;;  %v5192_v15 = vpop.f32.mrb[114].mxu1 }
 0x210   :  { %v5193_v9 = vpop.f32.mrb[115].mxu1 }
 0x211   :  { %v6940_v7 = vadd.f32 %v5191_v20, %v6844_v54  ;;  %v5194_v30 = vadd.f32 %v5193_v9, %v5192_v15  ;;  %3662 = vmatmul.mubr.bf16.gmra.mrb[12].mxu0 %v6160_v40 }
 0x212   :  { %4383 = vmatmul.mubr.bf16.gmra.mrb[220].mxu1 %v6175_v49  ;;  %4945 = vmatprep.mubr.msk.bf16.mxu0 %vm2896_vm0, %v6164_v12 }
 0x213   :  { %v6944_v39 = vadd.f32 %v5194_v30, %v6850_v48 }
 0x215   :  { %v5195_v52 = vpop.f32.mrb[116].mxu1 }
 0x216   :  { %v5196_v38 = vpop.f32.mrb[117].mxu1 }
 0x217   :  { %v5197_v18 = vadd.f32 %v5196_v38, %v5195_v52  ;;  %v5198_v36 = vpop.f32.mrb[118].mxu1 }
 0x218   :  { %v5199_v37 = vpop.f32.mrb[119].mxu1 }
 0x219   :  { %v6947_v51 = vadd.f32 %v5197_v18, %v6859_v26  ;;  %v5200_v23 = vadd.f32 %v5199_v37, %v5198_v36  ;;  %3672 = vmatmul.mubr.bf16.gmra.mrb[16].mxu0 %v6166_v45 }
 0x21a   :  { %4946 = vmatprep.mubr.msk.bf16.mxu0 %vm2896_vm0, %v6167_v50 }
 0x21b   :  { %v6951_v54 = vadd.f32 %v5200_v23, %v6865_v55 }
 0x21d   :  { %v5201_v32 = vpop.f32.mrb[120].mxu1 }
 0x21e   :  { %v5202_v40 = vpop.f32.mrb[121].mxu1 }
 0x21f   :  { %v5203_v31 = vadd.f32 %v5202_v40, %v5201_v32  ;;  %v5204_v48 = vpop.f32.mrb[122].mxu1 }
 0x220   :  { %v5205_v33 = vpop.f32.mrb[123].mxu1 }
 0x221   :  { %v6954_v12 = vadd.f32 %v5203_v31, %v6874_v16  ;;  %v5206_v56 = vadd.f32 %v5205_v33, %v5204_v48  ;;  %3682 = vmatmul.mubr.bf16.gmra.mrb[20].mxu0 %v6169_v25 }
 0x222   :  { %4947 = vmatprep.mubr.msk.bf16.mxu0 %vm2896_vm0, %v6170_v43 }
 0x223   :  { %v6958_v26 = vadd.f32 %v5206_v56, %v6880_v13 }
 0x225   :  { %v5207_v0 = vpop.f32.mrb[124].mxu1 }
 0x226   :  { %v5208_v34 = vpop.f32.mrb[125].mxu1 }
 0x227   :  { %v5209_v28 = vadd.f32 %v5208_v34, %v5207_v0  ;;  %v5210_v55 = vpop.f32.mrb[126].mxu1 }
 0x228   :  { %v5211_v45 = vpop.f32.mrb[127].mxu1 }
 0x229   :  { %v6961_v35 = vadd.f32 %v5209_v28, %v6889_v22  ;;  %v5212_v42 = vadd.f32 %v5211_v45, %v5210_v55  ;;  %3692 = vmatmul.mubr.bf16.gmra.mrb[24].mxu0 %v6172_v63 }
 0x22a   :  { %4948 = vmatprep.mubr.msk.bf16.mxu0 %vm2896_vm0, %v6173_v11 }
 0x22b   :  { %v6965_v16 = vadd.f32 %v5212_v42, %v6895_v27 }
 0x22d   :  { %v5229_v50 = vpop.f32.mrb[128].mxu1 }
 0x22e   :  { %v5230_v5 = vpop.f32.mrb[129].mxu1 }
 0x22f   :  { %v5231_v24 = vadd.f32 %v5230_v5, %v5229_v50  ;;  %v5232_v13 = vpop.f32.mrb[130].mxu1 }
 0x230   :  { %v5233_v44 = vpop.f32.mrb[131].mxu1 }
 0x231   :  { %v6968_v17 = vadd.f32 %v5231_v24, %v6900_v46  ;;  %v5234_v25 = vadd.f32 %v5233_v44, %v5232_v13  ;;  %3702 = vmatmul.mubr.bf16.gmra.mrb[28].mxu0 %v6175_v49 }
 0x233   :  { %v6971_v22 = vadd.f32 %v5234_v25, %v6906_v4 }
 0x235   :  { %v5235_v58 = vpop.f32.mrb[132].mxu1 }
 0x236   :  { %v5236_v59 = vpop.f32.mrb[133].mxu1 }
 0x237   :  { %v5237_v43 = vadd.f32 %v5236_v59, %v5235_v58  ;;  %v5238_v41 = vpop.f32.mrb[134].mxu1 }
 0x238   :  { %v5239_v61 = vpop.f32.mrb[135].mxu1 }
 0x239   :  { %v6974_v27 = vadd.f32 %v5237_v43, %v6910_v47  ;;  %v5240_v57 = vadd.f32 %v5239_v61, %v5238_v41 }
 0x23b   :  { %v6977_v10 = vadd.f32 %v5240_v57, %v6916_v19 }
 0x23d   :  { %v5241_v63 = vpop.f32.mrb[136].mxu1 }
 0x23e   :  { %v5242_v46 = vpop.f32.mrb[137].mxu1 }
 0x23f   :  { %v5243_v14 = vadd.f32 %v5242_v46, %v5241_v63  ;;  %v5244_v6 = vpop.f32.mrb[138].mxu1 }
 0x240   :  { %v5245_v11 = vpop.f32.mrb[139].mxu1 }
 0x241   :  { %v6980_v4 = vadd.f32 %v5243_v14, %v6920_v2  ;;  %v5246_v3 = vadd.f32 %v5245_v11, %v5244_v6 }
 0x243   :  { %v6983_v53 = vadd.f32 %v5246_v3, %v6926_v62 }
 0x245   :  { %v5247_v1 = vpop.f32.mrb[140].mxu1 }
 0x246   :  { %v5248_v8 = vpop.f32.mrb[141].mxu1 }
 0x247   :  { %v5249_v47 = vadd.f32 %v5248_v8, %v5247_v1  ;;  %v5250_v49 = vpop.f32.mrb[142].mxu1 }
 0x248   :  { %v5251_v20 = vpop.f32.mrb[143].mxu1 }
 0x249   :  { %v6986_v19 = vadd.f32 %v5249_v47, %v6930_v29  ;;  %v5252_v15 = vadd.f32 %v5251_v20, %v5250_v49 }
 0x24b   :  { %v6989_v9 = vadd.f32 %v5252_v15, %v6936_v60 }
 0x24d   :  { %v5253_v30 = vpop.f32.mrb[144].mxu1 }
 0x24e   :  { %v5254_v52 = vpop.f32.mrb[145].mxu1 }
 0x24f   :  { %v5255_v2 = vadd.f32 %v5254_v52, %v5253_v30  ;;  %v5256_v38 = vpop.f32.mrb[146].mxu1 }
 0x250   :  { %v5257_v18 = vpop.f32.mrb[147].mxu1 }
 0x251   :  { %v6992_v62 = vadd.f32 %v5255_v2, %v6940_v7  ;;  %v5258_v36 = vadd.f32 %v5257_v18, %v5256_v38 }
 0x253   :  { %v6995_v37 = vadd.f32 %v5258_v36, %v6944_v39 }
 0x255   :  { %v5259_v23 = vpop.f32.mrb[148].mxu1 }
 0x256   :  { %v5260_v32 = vpop.f32.mrb[149].mxu1 }
 0x257   :  { %v5261_v29 = vadd.f32 %v5260_v32, %v5259_v23  ;;  %v5262_v40 = vpop.f32.mrb[150].mxu1 }
 0x258   :  { %v5263_v31 = vpop.f32.mrb[151].mxu1 }
 0x259   :  { %v6998_v60 = vadd.f32 %v5261_v29, %v6947_v51  ;;  %v5264_v48 = vadd.f32 %v5263_v31, %v5262_v40 }
 0x25b   :  { %v7001_v33 = vadd.f32 %v5264_v48, %v6951_v54 }
 0x25d   :  { %v5265_v56 = vpop.f32.mrb[152].mxu1 }
 0x25e   :  { %v5266_v0 = vpop.f32.mrb[153].mxu1 }
 0x25f   :  { %v5267_v7 = vadd.f32 %v5266_v0, %v5265_v56  ;;  %v5268_v34 = vpop.f32.mrb[154].mxu1 }
 0x260   :  { %v5269_v28 = vpop.f32.mrb[155].mxu1 }
 0x261   :  { %v7004_v39 = vadd.f32 %v5267_v7, %v6954_v12  ;;  %v5270_v55 = vadd.f32 %v5269_v28, %v5268_v34 }
 0x263   :  { %v7007_v45 = vadd.f32 %v5270_v55, %v6958_v26 }
 0x265   :  { %v5271_v42 = vpop.f32.mrb[156].mxu1 }
 0x266   :  { %v5272_v50 = vpop.f32.mrb[157].mxu1 }
 0x267   :  { %v5273_v51 = vadd.f32 %v5272_v50, %v5271_v42  ;;  %v5274_v5 = vpop.f32.mrb[158].mxu1 }
 0x268   :  { %v5275_v24 = vpop.f32.mrb[159].mxu1 }
 0x269   :  { %v7010_v54 = vadd.f32 %v5273_v51, %v6961_v35  ;;  %v5276_v13 = vadd.f32 %v5275_v24, %v5274_v5 }
 0x26b   :  { %v7013_v44 = vadd.f32 %v5276_v13, %v6965_v16 }
 0x26d   :  { %v5293_v25 = vpop.f32.mrb[160].mxu1 }
 0x26e   :  { %v5294_v58 = vpop.f32.mrb[161].mxu1 }
 0x26f   :  { %v5295_v12 = vadd.f32 %v5294_v58, %v5293_v25  ;;  %v5296_v59 = vpop.f32.mrb[162].mxu1 }
 0x270   :  { %v5297_v43 = vpop.f32.mrb[163].mxu1 }
 0x271   :  { %v5298_v41 = vadd.f32 %v5297_v43, %v5296_v59  ;;  %v4232_v26 = vadd.f32 %v5295_v12, %v6968_v17 }
 0x273   :  { %v4235_v61 = vadd.f32 %v5298_v41, %v6971_v22 }
 0x275   :  { %v5299_v57 = vpop.f32.mrb[164].mxu1 }
 0x276   :  { %v5300_v63 = vpop.f32.mrb[165].mxu1 }
 0x277   :  { %v5301_v46 = vadd.f32 %v5300_v63, %v5299_v57  ;;  %v5302_v14 = vpop.f32.mrb[166].mxu1 }
 0x278   :  { %v5303_v35 = vpop.f32.mrb[167].mxu1 }
 0x279   :  { %v5304_v6 = vadd.f32 %v5303_v35, %v5302_v14  ;;  %v4240_v11 = vadd.f32 %v5301_v46, %v6974_v27 }
 0x27b   :  { %v7019_v16 = vadd.f32 %v5304_v6, %v6977_v10 }
 0x27d   :  { %v5305_v3 = vpop.f32.mrb[168].mxu1 }
 0x27e   :  { %v5306_v1 = vpop.f32.mrb[169].mxu1 }
 0x27f   :  { %v5307_v8 = vadd.f32 %v5306_v1, %v5305_v3  ;;  %v5308_v47 = vpop.f32.mrb[170].mxu1 }
 0x280   :  { %v5309_v49 = vpop.f32.mrb[171].mxu1 }
 0x281   :  { %v5310_v20 = vadd.f32 %v5309_v49, %v5308_v47  ;;  %v7022_v17 = vadd.f32 %v5307_v8, %v6980_v4 }
 0x283   :  { %v7025_v22 = vadd.f32 %v5310_v20, %v6983_v53 }
 0x285   :  { %v5311_v15 = vpop.f32.mrb[172].mxu1 }
 0x286   :  { %v5312_v30 = vpop.f32.mrb[173].mxu1 }
 0x287   :  { %v5313_v52 = vadd.f32 %v5312_v30, %v5311_v15  ;;  %v5314_v2 = vpop.f32.mrb[174].mxu1 }
 0x288   :  { %v5315_v27 = vpop.f32.mrb[175].mxu1 }
 0x289   :  { %v5316_v38 = vadd.f32 %v5315_v27, %v5314_v2  ;;  %v7028_v10 = vadd.f32 %v5313_v52, %v6986_v19  ;;  %v603_v27 = vsub.s32 0, %v6614_v21 }
 0x28b   :  { %v7031_v18 = vadd.f32 %v5316_v38, %v6989_v9 }
 0x28d   :  { %v5317_v36 = vpop.f32.mrb[176].mxu1 }
 0x28e   :  { %v5318_v23 = vpop.f32.mrb[177].mxu1 }
 0x28f   :  { %v5319_v32 = vadd.f32 %v5318_v23, %v5317_v36  ;;  %v5320_v4 = vpop.f32.mrb[178].mxu1  ;;  %v607_v23 = vsub.s32 1, %v6614_v21 }
 0x290   :  { %v5321_v29 = vpop.f32.mrb[179].mxu1 }
 0x291   :  { %v5322_v40 = vadd.f32 %v5321_v29, %v5320_v4  ;;  %v7034_v53 = vadd.f32 %v5319_v32, %v6992_v62 }
 0x293   :  { %v7037_v31 = vadd.f32 %v5322_v40, %v6995_v37 }
 0x295   :  { %v5323_v48 = vpop.f32.mrb[180].mxu1 }
 0x296   :  { %v5324_v56 = vpop.f32.mrb[181].mxu1 }
 0x297   :  { %v5325_v0 = vadd.f32 %v5324_v56, %v5323_v48  ;;  %v5326_v19 = vpop.f32.mrb[182].mxu1 }
 0x298   :  { %v5327_v7 = vpop.f32.mrb[183].mxu1 }
 0x299   :  { %v5328_v34 = vadd.f32 %v5327_v7, %v5326_v19  ;;  %v7040_v9 = vadd.f32 %v5325_v0, %v6998_v60 }
 0x29b   :  { %v7043_v28 = vadd.f32 %v5328_v34, %v7001_v33 }
 0x29d   :  { %v5329_v55 = vpop.f32.mrb[184].mxu1 }
 0x29e   :  { %v5330_v42 = vpop.f32.mrb[185].mxu1 }
 0x29f   :  { %v5331_v50 = vadd.f32 %v5330_v42, %v5329_v55  ;;  %v5332_v62 = vpop.f32.mrb[186].mxu1 }
 0x2a0   :  { %v5333_v51 = vpop.f32.mrb[187].mxu1 }
 0x2a1   :  { %v5334_v5 = vadd.f32 %v5333_v51, %v5332_v62  ;;  %v7046_v37 = vadd.f32 %v5331_v50, %v7004_v39 }
 0x2a3   :  { %v7049_v24 = vadd.f32 %v5334_v5, %v7007_v45 }
 0x2a5   :  { %v5335_v13 = vpop.f32.mrb[188].mxu1 }
 0x2a6   :  { %v5336_v25 = vpop.f32.mrb[189].mxu1 }
 0x2a7   :  { %v5337_v58 = vadd.f32 %v5336_v25, %v5335_v13  ;;  %v5338_v60 = vpop.f32.mrb[190].mxu1 }
 0x2a8   :  { %v5339_v12 = vpop.f32.mrb[191].mxu1 }
 0x2a9   :  { %v5340_v59 = vadd.f32 %v5339_v12, %v5338_v60  ;;  %v7052_v33 = vadd.f32 %v5337_v58, %v7010_v54 }
 0x2ab   :  { %v7055_v43 = vadd.f32 %v5340_v59, %v7013_v44 }
 0x2ad   :  { %v4328_v41 = vpop.f32.mrb[192].mxu1 }
 0x2ae   :  { %v4329_v57 = vadd.f32 %v4328_v41, %v4232_v26  ;;  %v4330_v63 = vpop.f32.mrb[193].mxu1 }
 0x2af   :  { %v4331_v39 = vpop.f32.mrb[194].mxu1 }
 0x2b0   :  { %v4393_v46 = vmax.f32 %v4329_v57, 0.0  ;;  %v4332_v14 = vadd.f32 %v4331_v39, %v4235_v61  ;;  %v4333_v45 = vpop.f32.mrb[195].mxu1 }
 0x2b2   :  { %4441 = vst.msk [vmem:[#allocation8 + $0x10] sm:$0xff] %vm2896_vm0, %v4393_v46  ;;  %v4396_v35 = vmax.f32 %v4332_v14, 0.0 }
 0x2b4   :  { %4444 = vst.msk [vmem:[#allocation8 + $0x28] sm:$0xff] %vm2896_vm0, %v4396_v35 }
 0x2b5   :  { %v4336_v6 = vpop.f32.mrb[196].mxu1 }
 0x2b6   :  { %v4337_v3 = vadd.f32 %v4336_v6, %v4240_v11  ;;  %v4338_v1 = vpop.f32.mrb[197].mxu1 }
 0x2b7   :  { %v4339_v54 = vpop.f32.mrb[198].mxu1 }
 0x2b8   :  { %v4399_v8 = vmax.f32 %v4337_v3, 0.0  ;;  %v4340_v44 = vadd.f32 %v4339_v54, %v7019_v16  ;;  %v4341_v47 = vpop.f32.mrb[199].mxu1 }
 0x2ba   :  { %4447 = vst.msk [vmem:[#allocation8 + $0x40] sm:$0xff] %vm2896_vm0, %v4399_v8  ;;  %v4402_v26 = vmax.f32 %v4340_v44, 0.0 }
 0x2bc   :  { %4450 = vst.msk [vmem:[#allocation8 + $0x58] sm:$0xff] %vm2896_vm0, %v4402_v26 }
 0x2bd   :  { %v4344_v61 = vpop.f32.mrb[200].mxu1 }
 0x2be   :  { %v4345_v49 = vadd.f32 %v4344_v61, %v7022_v17  ;;  %v4346_v20 = vpop.f32.mrb[201].mxu1 }
 0x2bf   :  { %v4347_v15 = vpop.f32.mrb[202].mxu1 }
 0x2c0   :  { %v4405_v30 = vmax.f32 %v4345_v49, 0.0  ;;  %v4348_v52 = vadd.f32 %v4347_v15, %v7025_v22  ;;  %v4349_v11 = vpop.f32.mrb[203].mxu1  ;;  %v6176_v22 = vld [vmem:[#allocation7] sm:$0x7] }
 0x2c1   :  { %v7070_v40 = vrot.slane %v6176_v22, %v603_v27  ;;  %v7073_v56 = vrot.slane %v6176_v22, %v607_v23 }
 0x2c2   :  { %4453 = vst.msk [vmem:[#allocation8 + $0x70] sm:$0xff] %vm2896_vm0, %v4405_v30  ;;  %v4408_v2 = vmax.f32 %v4348_v52, 0.0 }
 0x2c4   :  { %4456 = vst.msk [vmem:[#allocation8 + $0x88] sm:$0xff] %vm2896_vm0, %v4408_v2 }
 0x2c5   :  { %v4352_v16 = vpop.f32.mrb[204].mxu1 }
 0x2c6   :  { %v4353_v38 = vadd.f32 %v4352_v16, %v7028_v10  ;;  %v4354_v36 = vpop.f32.mrb[205].mxu1 }
 0x2c7   :  { %v4355_v17 = vpop.f32.mrb[206].mxu1 }
 0x2c8   :  { %v4411_v32 = vmax.f32 %v4353_v38, 0.0  ;;  %v4356_v4 = vadd.f32 %v4355_v17, %v7031_v18  ;;  %v4357_v29 = vpop.f32.mrb[207].mxu1 }
 0x2ca   :  { %4459 = vst.msk [vmem:[#allocation8 + $0xa0] sm:$0xff] %vm2896_vm0, %v4411_v32  ;;  %v4414_v48 = vmax.f32 %v4356_v4, 0.0 }
 0x2cc   :  { %4462 = vst.msk [vmem:[#allocation8 + $0xb8] sm:$0xff] %vm2896_vm0, %v4414_v48  ;;  %v3633_v0 = vpop.f32.mrb[0].mxu0 }
 0x2cd   :  { %v5341_v10 = vadd.f32 %v3633_v0, %v7070_v40  ;;  %v4360_v19 = vpop.f32.mrb[208].mxu1  ;;  %v3635_v21 = vpop.f32.mrb[1].mxu0 }
 0x2ce   :  { %v4361_v7 = vadd.f32 %v4360_v19, %v7034_v53  ;;  %v5342_v18 = vadd.f32 %v3635_v21, %v7073_v56  ;;  %v4362_v34 = vpop.f32.mrb[209].mxu1  ;;  %v3637_v55 = vpop.f32.mrb[2].mxu0 }
 0x2cf   :  { %v4391_v42 = vmax.f32 %v5341_v10, 0.0  ;;  %v5343_v50 = vadd.f32 %v3637_v55, %v7070_v40  ;;  %v4363_v62 = vpop.f32.mrb[210].mxu1  ;;  %v3639_v51 = vpop.f32.mrb[3].mxu0 }
 0x2d0   :  { %v4417_v5 = vmax.f32 %v4361_v7, 0.0  ;;  %v4392_v13 = vmax.f32 %v5342_v18, 0.0  ;;  %v4364_v25 = vadd.f32 %v4363_v62, %v7037_v31  ;;  %v5344_v58 = vadd.f32 %v3639_v51, %v7073_v56  ;;  %v4365_v60 = vpop.f32.mrb[211].mxu1 }
 0x2d1   :  { %4439 = vst [vmem:[#allocation8] sm:$0xff] %v4391_v42  ;;  %v4394_v12 = vmax.f32 %v5343_v50, 0.0 }
 0x2d2   :  { %4465 = vst.msk [vmem:[#allocation8 + $0xd0] sm:$0xff] %vm2896_vm0, %v4417_v5  ;;  %4440 = vst [vmem:[#allocation8 + $0x8] sm:$0xff] %v4392_v13  ;;  %v4420_v53 = vmax.f32 %v4364_v25, 0.0  ;;  %v4395_v59 = vmax.f32 %v5344_v58, 0.0 }
 0x2d3   :  { %4442 = vst [vmem:[#allocation8 + $0x18] sm:$0xff] %v4394_v12 }
 0x2d4   :  { %4468 = vst.msk [vmem:[#allocation8 + $0xe8] sm:$0xff] %vm2896_vm0, %v4420_v53  ;;  %4443 = vst [vmem:[#allocation8 + $0x20] sm:$0xff] %v4395_v59  ;;  %v3643_v41 = vpop.f32.mrb[4].mxu0 }
 0x2d5   :  { %v5345_v57 = vadd.f32 %v3643_v41, %v7070_v40  ;;  %v4368_v63 = vpop.f32.mrb[212].mxu1  ;;  %v3645_v39 = vpop.f32.mrb[5].mxu0 }
 0x2d6   :  { %v4369_v31 = vadd.f32 %v4368_v63, %v7040_v9  ;;  %v5346_v46 = vadd.f32 %v3645_v39, %v7073_v56  ;;  %v4370_v14 = vpop.f32.mrb[213].mxu1  ;;  %v3647_v45 = vpop.f32.mrb[6].mxu0 }
 0x2d7   :  { %v4397_v35 = vmax.f32 %v5345_v57, 0.0  ;;  %v5347_v6 = vadd.f32 %v3647_v45, %v7070_v40  ;;  %v4371_v3 = vpop.f32.mrb[214].mxu1  ;;  %v3649_v1 = vpop.f32.mrb[7].mxu0 }
 0x2d8   :  { %v4423_v54 = vmax.f32 %v4369_v31, 0.0  ;;  %v4398_v8 = vmax.f32 %v5346_v46, 0.0  ;;  %v4372_v44 = vadd.f32 %v4371_v3, %v7043_v28  ;;  %v5348_v47 = vadd.f32 %v3649_v1, %v7073_v56  ;;  %v4373_v26 = vpop.f32.mrb[215].mxu1 }
 0x2d9   :  { %4445 = vst [vmem:[#allocation8 + $0x30] sm:$0xff] %v4397_v35  ;;  %v4400_v61 = vmax.f32 %v5347_v6, 0.0 }
 0x2da   :  { %4471 = vst.msk [vmem:[#allocation8 + $0x100] sm:$0xff] %vm2896_vm0, %v4423_v54  ;;  %4446 = vst [vmem:[#allocation8 + $0x38] sm:$0xff] %v4398_v8  ;;  %v4426_v9 = vmax.f32 %v4372_v44, 0.0  ;;  %v4401_v49 = vmax.f32 %v5348_v47, 0.0 }
 0x2db   :  { %4448 = vst [vmem:[#allocation8 + $0x48] sm:$0xff] %v4400_v61 }
 0x2dc   :  { %4474 = vst.msk [vmem:[#allocation8 + $0x118] sm:$0xff] %vm2896_vm0, %v4426_v9  ;;  %4449 = vst [vmem:[#allocation8 + $0x50] sm:$0xff] %v4401_v49  ;;  %v3653_v20 = vpop.f32.mrb[8].mxu0 }
 0x2dd   :  { %v5349_v15 = vadd.f32 %v3653_v20, %v7070_v40  ;;  %v4376_v30 = vpop.f32.mrb[216].mxu1  ;;  %v3655_v52 = vpop.f32.mrb[9].mxu0 }
 0x2de   :  { %v4377_v28 = vadd.f32 %v4376_v30, %v7046_v37  ;;  %v5350_v11 = vadd.f32 %v3655_v52, %v7073_v56  ;;  %v4378_v2 = vpop.f32.mrb[217].mxu1  ;;  %v3657_v16 = vpop.f32.mrb[10].mxu0 }
 0x2df   :  { %v4403_v27 = vmax.f32 %v5349_v15, 0.0  ;;  %v5351_v38 = vadd.f32 %v3657_v16, %v7070_v40  ;;  %v4379_v36 = vpop.f32.mrb[218].mxu1  ;;  %v3659_v23 = vpop.f32.mrb[11].mxu0 }
 0x2e0   :  { %v4429_v17 = vmax.f32 %v4377_v28, 0.0  ;;  %v4404_v32 = vmax.f32 %v5350_v11, 0.0  ;;  %v4380_v4 = vadd.f32 %v4379_v36, %v7049_v24  ;;  %v5352_v29 = vadd.f32 %v3659_v23, %v7073_v56  ;;  %v4381_v22 = vpop.f32.mrb[219].mxu1 }
 0x2e1   :  { %4451 = vst [vmem:[#allocation8 + $0x60] sm:$0xff] %v4403_v27  ;;  %v4406_v48 = vmax.f32 %v5351_v38, 0.0 }
 0x2e2   :  { %4477 = vst.msk [vmem:[#allocation8 + $0x130] sm:$0xff] %vm2896_vm0, %v4429_v17  ;;  %4452 = vst [vmem:[#allocation8 + $0x68] sm:$0xff] %v4404_v32  ;;  %v4432_v37 = vmax.f32 %v4380_v4, 0.0  ;;  %v4407_v0 = vmax.f32 %v5352_v29, 0.0 }
 0x2e3   :  { %4454 = vst [vmem:[#allocation8 + $0x78] sm:$0xff] %v4406_v48 }
 0x2e4   :  { %4480 = vst.msk [vmem:[#allocation8 + $0x148] sm:$0xff] %vm2896_vm0, %v4432_v37  ;;  %4455 = vst [vmem:[#allocation8 + $0x80] sm:$0xff] %v4407_v0  ;;  %v3663_v10 = vpop.f32.mrb[12].mxu0 }
 0x2e5   :  { %v5353_v19 = vadd.f32 %v3663_v10, %v7070_v40  ;;  %v4384_v21 = vpop.f32.mrb[220].mxu1  ;;  %v3665_v7 = vpop.f32.mrb[13].mxu0 }
 0x2e6   :  { %v4385_v24 = vadd.f32 %v4384_v21, %v7052_v33  ;;  %v5354_v18 = vadd.f32 %v3665_v7, %v7073_v56  ;;  %v4386_v34 = vpop.f32.mrb[221].mxu1  ;;  %v3667_v55 = vpop.f32.mrb[14].mxu0 }
 0x2e7   :  { %v4409_v42 = vmax.f32 %v5353_v19, 0.0  ;;  %v5355_v50 = vadd.f32 %v3667_v55, %v7070_v40  ;;  %v4387_v62 = vpop.f32.mrb[222].mxu1  ;;  %v3669_v51 = vpop.f32.mrb[15].mxu0 }
 0x2e8   :  { %v4435_v5 = vmax.f32 %v4385_v24, 0.0  ;;  %v4410_v13 = vmax.f32 %v5354_v18, 0.0  ;;  %v4388_v25 = vadd.f32 %v4387_v62, %v7055_v43  ;;  %v5356_v58 = vadd.f32 %v3669_v51, %v7073_v56  ;;  %v4389_v60 = vpop.f32.mrb[223].mxu1 }
 0x2e9   :  { %4457 = vst [vmem:[#allocation8 + $0x90] sm:$0xff] %v4409_v42  ;;  %v4412_v12 = vmax.f32 %v5355_v50, 0.0 }
 0x2ea   :  { %4483 = vst.msk [vmem:[#allocation8 + $0x160] sm:$0xff] %vm2896_vm0, %v4435_v5  ;;  %4458 = vst [vmem:[#allocation8 + $0x98] sm:$0xff] %v4410_v13  ;;  %v4438_v33 = vmax.f32 %v4388_v25, 0.0  ;;  %v4413_v53 = vmax.f32 %v5356_v58, 0.0 }
 0x2eb   :  { %4460 = vst [vmem:[#allocation8 + $0xa8] sm:$0xff] %v4412_v12 }
 0x2ec   :  { %4486 = vst.msk [vmem:[#allocation8 + $0x178] sm:$0xff] %vm2896_vm0, %v4438_v33  ;;  %4461 = vst [vmem:[#allocation8 + $0xb0] sm:$0xff] %v4413_v53  ;;  %v3673_v59 = vpop.f32.mrb[16].mxu0 }
 0x2ed   :  { %v5357_v41 = vadd.f32 %v3673_v59, %v7070_v40  ;;  %v3675_v57 = vpop.f32.mrb[17].mxu0 }
 0x2ee   :  { %v5358_v43 = vadd.f32 %v3675_v57, %v7073_v56  ;;  %v3677_v63 = vpop.f32.mrb[18].mxu0 }
 0x2ef   :  { %v4415_v39 = vmax.f32 %v5357_v41, 0.0  ;;  %v5359_v31 = vadd.f32 %v3677_v63, %v7070_v40  ;;  %v3679_v46 = vpop.f32.mrb[19].mxu0 }
 0x2f0   :  { %v4416_v14 = vmax.f32 %v5358_v43, 0.0  ;;  %v5360_v45 = vadd.f32 %v3679_v46, %v7073_v56 }
 0x2f1   :  { %4463 = vst [vmem:[#allocation8 + $0xc0] sm:$0xff] %v4415_v39  ;;  %v4418_v35 = vmax.f32 %v5359_v31, 0.0 }
 0x2f2   :  { %4464 = vst [vmem:[#allocation8 + $0xc8] sm:$0xff] %v4416_v14  ;;  %v4419_v6 = vmax.f32 %v5360_v45, 0.0 }
 0x2f3   :  { %4466 = vst [vmem:[#allocation8 + $0xd8] sm:$0xff] %v4418_v35 }
 0x2f4   :  { %4467 = vst [vmem:[#allocation8 + $0xe0] sm:$0xff] %v4419_v6  ;;  %v3683_v3 = vpop.f32.mrb[20].mxu0 }
 0x2f5   :  { %v5361_v1 = vadd.f32 %v3683_v3, %v7070_v40  ;;  %v3685_v54 = vpop.f32.mrb[21].mxu0 }
 0x2f6   :  { %v5362_v8 = vadd.f32 %v3685_v54, %v7073_v56  ;;  %v3687_v44 = vpop.f32.mrb[22].mxu0 }
 0x2f7   :  { %v4421_v47 = vmax.f32 %v5361_v1, 0.0  ;;  %v5363_v26 = vadd.f32 %v3687_v44, %v7070_v40  ;;  %v3689_v61 = vpop.f32.mrb[23].mxu0 }
 0x2f8   :  { %v4422_v9 = vmax.f32 %v5362_v8, 0.0  ;;  %v5364_v49 = vadd.f32 %v3689_v61, %v7073_v56 }
 0x2f9   :  { %4469 = vst [vmem:[#allocation8 + $0xf0] sm:$0xff] %v4421_v47  ;;  %v4424_v20 = vmax.f32 %v5363_v26, 0.0 }
 0x2fa   :  { %4470 = vst [vmem:[#allocation8 + $0xf8] sm:$0xff] %v4422_v9  ;;  %v4425_v15 = vmax.f32 %v5364_v49, 0.0 }
 0x2fb   :  { %4472 = vst [vmem:[#allocation8 + $0x108] sm:$0xff] %v4424_v20 }
 0x2fc   :  { %4473 = vst [vmem:[#allocation8 + $0x110] sm:$0xff] %v4425_v15  ;;  %v3693_v30 = vpop.f32.mrb[24].mxu0 }
 0x2fd   :  { %v5365_v52 = vadd.f32 %v3693_v30, %v7070_v40  ;;  %v3695_v28 = vpop.f32.mrb[25].mxu0 }
 0x2fe   :  { %v5366_v11 = vadd.f32 %v3695_v28, %v7073_v56  ;;  %v3697_v2 = vpop.f32.mrb[26].mxu0 }
 0x2ff   :  { %v4427_v16 = vmax.f32 %v5365_v52, 0.0  ;;  %v5367_v27 = vadd.f32 %v3697_v2, %v7070_v40  ;;  %v3699_v38 = vpop.f32.mrb[27].mxu0 }
 0x300   :  { %v4428_v36 = vmax.f32 %v5366_v11, 0.0  ;;  %v5368_v23 = vadd.f32 %v3699_v38, %v7073_v56 }
 0x301   :  { %4475 = vst [vmem:[#allocation8 + $0x120] sm:$0xff] %v4427_v16  ;;  %v4430_v17 = vmax.f32 %v5367_v27, 0.0 }
 0x302   :  { %4476 = vst [vmem:[#allocation8 + $0x128] sm:$0xff] %v4428_v36  ;;  %v4431_v32 = vmax.f32 %v5368_v23, 0.0 }
 0x303   :  { %4478 = vst [vmem:[#allocation8 + $0x138] sm:$0xff] %v4430_v17 }
 0x304   :  { %4479 = vst [vmem:[#allocation8 + $0x140] sm:$0xff] %v4431_v32  ;;  %v3703_v4 = vpop.f32.mrb[28].mxu0 }
 0x305   :  { %v5369_v29 = vadd.f32 %v3703_v4, %v7070_v40  ;;  %v3705_v22 = vpop.f32.mrb[29].mxu0 }
 0x306   :  { %v5370_v48 = vadd.f32 %v3705_v22, %v7073_v56  ;;  %v3707_v37 = vpop.f32.mrb[30].mxu0 }
 0x307   :  { %v4433_v0 = vmax.f32 %v5369_v29, 0.0  ;;  %v5371_v10 = vadd.f32 %v3707_v37, %v7070_v40  ;;  %v3709_v19 = vpop.f32.mrb[31].mxu0 }
 0x308   :  { %v4434_v21 = vmax.f32 %v5370_v48, 0.0  ;;  %v5372_v7 = vadd.f32 %v3709_v19, %v7073_v56 }
 0x309   :  { %4481 = vst [vmem:[#allocation8 + $0x150] sm:$0xff] %v4433_v0  ;;  %v4436_v24 = vmax.f32 %v5371_v10, 0.0 }
 0x30a   :  { %4482 = vst [vmem:[#allocation8 + $0x158] sm:$0xff] %v4434_v21  ;;  %v4437_v18 = vmax.f32 %v5372_v7, 0.0 }
 0x30b   :  { %4484 = vst [vmem:[#allocation8 + $0x168] sm:$0xff] %v4436_v24 }
 0x30c   :  { %4485 = vst [vmem:[#allocation8 + $0x170] sm:$0xff] %v4437_v18 }
 0x30d   :  { %6254 = shalt.err (!%p6251_p0)
}
 0x30e   :  { %s6255_s28 = scalar_lea.hbm %s7139_s3, 6144 }
 0x30f   :  { %p6256_p1 = scmp.ne.s32.totalorder %s7139_s3, %s6255_s28  ;;  %p6259_p2 = scmp.lt.u32.totalorder %s6255_s28, %s7139_s3 }
 0x311   :  { %p6261_p3 = pnand %p6259_p2, %p6256_p1 }
 0x313   :  { %6264 = shalt.err (!%p6261_p3)
}
 0x314   :  { %s6280_s6 = smov 384   ;;  %s6281_s7 = smov 24  }
 0x315   :  { %4498 = dma.vmem_to_hbm [thread:$0]  %s4493_s24, 6144, %s7139_s3, [#allocation4], %s6280_s6, %s6280_s6, %s6281_s7  }
 0x316   :  { %6269 = dma.done.wait [#allocation4], 6144  }
 0x317   :  { %6270 = vsyncadd [#allocation4], 4294961152 }
 0x318   :  { %4502 = vsyncpa [#allocation3], 1 }
 0x319   :  { %4503 = vsyncpa [#allocation6], 1 }
 0x31a   :  { %4504 = vsyncpa [#allocation4], 1 }

</bundles_post_ra>
